<compile_context>
chip_gen: v5e
topology: v5e:2x2
jax: 0.10.0
libtpu: 0.0.40
codegen_flags: <defaults>
</compile_context>

<pallas_src>
import math

import jax
import jax.numpy as jnp
from jax import lax
from jax.experimental import pallas as pl
from jax.experimental.pallas import tpu as pltpu

NEG = -1e30                      # stand-in for -inf for ceil-mode pool padding
IN_ROWS = 48 * 48 + 8            # flat input rows per image (+8 tap-overrun pad)

# VMEM scratch sizes (rows x 128 lanes), f32
CS1_ROWS = 2264   # conv1 out: 46*48 computed + 56 NEG pad rows (ceil pool row)
PS1_ROWS = 560    # pool1 out: 23*24 + 8 zero pad rows
CS2_ROWS = 504    # conv2 out: 21*24
PS2_ROWS = 112    # pool2 out: 10*10 + 12 zero pad rows
CS3_ROWS = 80     # conv3 out: 8*10
PS3_ROWS = 24     # pool3 out: 4*4 + 8 zero pad rows


def _make_onet_kernel(block_n):
    """Build the fused ONet kernel for a batch block of `block_n` images."""

    def kernel(x_ref,
               w1, b1, a1, w2, b2, a2, w3, b3, a3, w4, b4, a4,
               w5, b5, a5, w6, b6,
               bb_ref, cls_ref, lm_ref,
               cs1, ps1, cs2, ps2, cs3, ps3, fs):

        # ---------------- generic conv (+bias +PReLU +col mask) -------------
        def conv_stage(read_patch, w_ref, bias_ref, alpha_ref, out_ref,
                       Lc, TM, k, sW, vW_out, mask_cols):
            nblk = Lc // TM

            def block(bi, carry):
                r0 = bi * TM
                acc = jnp.zeros((TM, 128), jnp.float32)
                for dy in range(k):
                    for dx in range(k):
                        patch = read_patch(r0 + dy * sW + dx, TM)
                        acc = acc + jnp.dot(patch, w_ref[dy * k + dx],
                                            preferred_element_type=jnp.float32)
                acc = acc + bias_ref[...]
                acc = jnp.where(acc >= 0, acc, alpha_ref[...] * acc)   # PReLU
                if mask_cols:
                    # garbage columns (flat-row trick) -> NEG so pooling ignores
                    col = (r0 + lax.broadcasted_iota(jnp.int32, (TM, 1), 0)) % sW
                    acc = jnp.where(col >= vW_out, NEG, acc)
                out_ref[pl.ds(r0, TM), :] = acc
                return carry

            lax.fori_loop(0, nblk, block, 0)

        # ---------------- generic max-pool (kernel kp, stride 2) ------------
        def pool_stage(cs_ref, ps_ref, kp, sW, Hp, Wp):
            hm_rows = sW - kp + 1
            # exact 0/1 selection matrix implementing the stride-2 down-select
            r_i = lax.broadcasted_iota(jnp.int32, (Wp, hm_rows), 0)
            c_i = lax.broadcasted_iota(jnp.int32, (Wp, hm_rows), 1)
            sel = jnp.where(c_i == 2 * r_i, 1.0, 0.0).astype(jnp.float32)

            def row(i, carry):
                vm = cs_ref[pl.ds(2 * i * sW, sW), :]            # vertical max
                for dy in range(1, kp):
                    vm = jnp.maximum(vm, cs_ref[pl.ds((2 * i + dy) * sW, sW), :])
                hm = vm[0:hm_rows, :]                            # horizontal max
                for dx in range(1, kp):
                    hm = jnp.maximum(hm, vm[dx:hm_rows + dx, :])
                ps_ref[pl.ds(i * Wp, Wp), :] = jnp.dot(
                    sel, hm, preferred_element_type=jnp.float32)
                return carry

            lax.fori_loop(0, Hp, row, 0)

        # ---- constant pad regions (ceil-mode -inf row / tap-overrun zeros) --
        cs1[pl.ds(2208, 56), :] = jnp.full((56, 128), NEG, jnp.float32)
        ps1[pl.ds(552, 8), :] = jnp.zeros((8, 128), jnp.float32)
        ps2[pl.ds(100, 12), :] = jnp.zeros((12, 128), jnp.float32)
        ps3[pl.ds(16, 8), :] = jnp.zeros((8, 128), jnp.float32)

        # ---------------- per-image conv/pool pipeline ----------------------
        def image(b, carry):
            # stage 1: 48x48x3 -> conv3x3 -> 46x46 -> pool3/2 -> 23x23
            conv_stage(lambda s, n: x_ref[b, pl.ds(s, n), :],
                       w1, b1, a1, cs1,
                       Lc=2208, TM=96, k=3, sW=48, vW_out=46, mask_cols=True)
            pool_stage(cs1, ps1, kp=3, sW=48, Hp=23, Wp=24)

            # stage 2: 23x23 -> conv3x3 -> 21x21 -> pool3/2 -> 10x10
            conv_stage(lambda s, n: ps1[pl.ds(s, n), :],
                       w2, b2, a2, cs2,
                       Lc=504, TM=72, k=3, sW=24, vW_out=21, mask_cols=True)
            pool_stage(cs2, ps2, kp=3, sW=24, Hp=10, Wp=10)

            # stage 3: 10x10 -> conv3x3 -> 8x8 -> pool2/2 -> 4x4
            conv_stage(lambda s, n: ps2[pl.ds(s, n), :],
                       w3, b3, a3, cs3,
                       Lc=80, TM=80, k=3, sW=10, vW_out=8, mask_cols=True)
            pool_stage(cs3, ps3, kp=2, sW=10, Hp=4, Wp=4)

            # stage 4: 4x4 -> conv2x2 (64->128), computed in registers
            acc = jnp.zeros((12, 128), jnp.float32)
            for dy in range(2):
                for dx in range(2):
                    patch = ps3[pl.ds(dy * 4 + dx, 12), :]
                    acc = acc + jnp.dot(patch, w4[dy * 2 + dx],
                                        preferred_element_type=jnp.float32)
            acc = acc + b4[...]
            acc = jnp.where(acc >= 0, acc, a4[...] * acc)

            # flatten in PyTorch permute(0,3,2,1).view order: (w, h, c)
            pieces = [acc[h * 4 + w:h * 4 + w + 1, :]
                      for w in range(3) for h in range(3)]
            fs[pl.ds(b, 1), :] = jnp.concatenate(pieces, axis=1)    # (1, 1152)
            return carry

        lax.fori_loop(0, block_n, image, 0)

        # ---------------- fused dense head over the image block -------------
        hid = jnp.dot(fs[...], w5[...], preferred_element_type=jnp.float32)
        hid = hid + b5[...]
        hid = jnp.where(hid >= 0, hid, a5[...] * hid)               # prelu5

        logits = jnp.dot(hid, w6[...],
                         preferred_element_type=jnp.float32) + b6[...]   # (BN,16)
        cls_logits = logits[:, 0:2]
        m = jnp.max(cls_logits, axis=1, keepdims=True)
        e = jnp.exp(cls_logits - m)
        cls_ref[0] = e / jnp.sum(e, axis=1, keepdims=True)          # softmax
        bb_ref[0] = logits[:, 2:6]
        lm_ref[0] = logits[:, 6:16]

    return kernel


# ----------------------------------------------------------------------------
# Wrapper
# ----------------------------------------------------------------------------

def _pick_block_n(n):
    # at most 8 images per grid step, and >= 2 grid steps whenever n >= 2
    return max(1, min(8, -(-n // 2)))


def onet_forward(x_nchw, params):
    """Full ONet forward.  x_nchw: (N, 3, 48, 48) float32 (PyTorch layout)."""
    N = x_nchw.shape[0]
    BN = _pick_block_n(N)
    G = -(-N // BN)
    Np = G * BN

    # layout glue (plain JAX): NCHW -> flat NHWC rows, pad batch + tap overrun
    x = jnp.transpose(x_nchw.astype(jnp.float32), (0, 2, 3, 1))
    x = x.reshape(N, 48 * 48, 3)
    x = jnp.pad(x, ((0, Np - N), (0, IN_ROWS - 48 * 48), (0, 0)))   # (Np,2312,3)

    c1, c2, c3, c4 = (params["conv1"], params["conv2"],
                      params["conv3"], params["conv4"])
    hd = params["head"]

    def rep(shape):
        n = len(shape)
        return pl.BlockSpec(shape, lambda g, n=n: (0,) * n)

    args = [x]
    in_specs = [pl.BlockSpec((BN, IN_ROWS, 3), lambda g: (g, 0, 0))]
    for p in (c1, c2, c3, c4):
        for kname in ("w", "b", "a"):
            args.append(p[kname])
            in_specs.append(rep(p[kname].shape))
    for kname in ("w5", "b5", "a5", "w6", "b6"):
        args.append(hd[kname])
        in_specs.append(rep(hd[kname].shape))

    out_shapes = (
        jax.ShapeDtypeStruct((G, BN, 4), jnp.float32),
        jax.ShapeDtypeStruct((G, BN, 2), jnp.float32),
        jax.ShapeDtypeStruct((G, BN, 10), jnp.float32),
    )
    out_specs = (
        pl.BlockSpec((1, BN, 4), lambda g: (g, 0, 0)),
        pl.BlockSpec((1, BN, 2), lambda g: (g, 0, 0)),
        pl.BlockSpec((1, BN, 10), lambda g: (g, 0, 0)),
    )
    scratch = [
        pltpu.VMEM((CS1_ROWS, 128), jnp.float32),   # conv1 out (+ NEG pad row)
        pltpu.VMEM((PS1_ROWS, 128), jnp.float32),   # pool1 out
        pltpu.VMEM((CS2_ROWS, 128), jnp.float32),   # conv2 out
        pltpu.VMEM((PS2_ROWS, 128), jnp.float32),   # pool2 out
        pltpu.VMEM((CS3_ROWS, 128), jnp.float32),   # conv3 out
        pltpu.VMEM((PS3_ROWS, 128), jnp.float32),   # pool3 out
        pltpu.VMEM((BN, 1152), jnp.float32),        # flattened conv4 features
    ]

    bb, cls, lm = pl.pallas_call(
        _make_onet_kernel(BN),
        out_shape=out_shapes,
        grid=(G,),
        in_specs=in_specs,
        out_specs=out_specs,
        scratch_shapes=scratch,
        compiler_params=pltpu.CompilerParams(
            dimension_semantics=("parallel",),
            vmem_limit_bytes=32 * 1024 * 1024),
    )(*args)

    bb = bb.reshape(Np, 4)[:N]
    cls = cls.reshape(Np, 2)[:N]
    lm = lm.reshape(Np, 10)[:N]
    return bb, cls, lm


# ----------------------------------------------------------------------------
# Deterministic parameter init (xavier_uniform weights, bias 0.1, PReLU 0.25),
# produced directly in kernel layout (taps-major, channel-padded to 128 lanes).
# ----------------------------------------------------------------------------

def _xavier(key, shape, fan_in, fan_out):
    limit = math.sqrt(6.0 / (fan_in + fan_out))
    return jax.random.uniform(key, shape, jnp.float32, -limit, limit)


def _conv_param(key, cin, cout, k, cin_pad, cout_pad):
    fan_in, fan_out = cin * k * k, cout * k * k
    w_t = _xavier(key, (cout, cin, k, k), fan_in, fan_out)       # PyTorch layout
    w = jnp.transpose(w_t, (2, 3, 1, 0)).reshape(k * k, cin, cout)
    w = jnp.pad(w, ((0, 0), (0, cin_pad - cin), (0, cout_pad - cout)))
    b = jnp.pad(jnp.full((1, cout), 0.1, jnp.float32),
                ((0, 0), (0, cout_pad - cout)))
    a = jnp.pad(jnp.full((1, cout), 0.25, jnp.float32),
                ((0, 0), (0, cout_pad - cout)))
    return {"w": w, "b": b, "a": a}


def _linear_param(key, fin, fout):
    w_t = _xavier(key, (fout, fin), fin, fout)                   # PyTorch layout
    return jnp.transpose(w_t), jnp.full((1, fout), 0.1, jnp.float32)


def init_params(key):
    ks = jax.random.split(key, 8)
    w5, b5 = _linear_param(ks[4], 1152, 256)
    w61, b61 = _linear_param(ks[5], 256, 2)      # face classification
    w62, b62 = _linear_param(ks[6], 256, 4)      # bbox regression
    w63, b63 = _linear_param(ks[7], 256, 10)     # landmarks
    return {
        "conv1": _conv_param(ks[0], 3, 32, 3, cin_pad=3, cout_pad=128),
        "conv2": _conv_param(ks[1], 32, 64, 3, cin_pad=128, cout_pad=128),
        "conv3": _conv_param(ks[2], 64, 64, 3, cin_pad=128, cout_pad=128),
        "conv4": _conv_param(ks[3], 64, 128, 2, cin_pad=128, cout_pad=128),
        "head": {
            "w5": w5, "b5": b5,
            "a5": jnp.full((1, 256), 0.25, jnp.float32),
            # merged head: [face-classify(2) | bbox(4) | landmarks(10)]
            "w6": jnp.concatenate([w61, w62, w63], axis=1),
            "b6": jnp.concatenate([b61, b62, b63], axis=1),
        },
    }


# ----------------------------------------------------------------------------

if __name__ == "__main__":
    key = jax.random.PRNGKey(0)
    pkey, xkey = jax.random.split(key)
    params = init_params(pkey)

    # ONet requires 48x48 input for the 1152-dim flatten; batch kept small.
    x = jax.random.normal(xkey, (2, 3, 48, 48), jnp.float32)

    fwd = jax.jit(onet_forward)
    bb_regress, face_classify, landmarks = fwd(x, params)
    jax.block_until_ready((bb_regress, face_classify, landmarks))

    assert bb_regress.shape == (2, 4)
    assert face_classify.shape == (2, 2)
    assert landmarks.shape == (2, 10)
    assert bool(jnp.all(jnp.isfinite(bb_regress)))
    assert bool(jnp.all(jnp.isfinite(landmarks)))
    assert bool(jnp.all(jnp.isfinite(face_classify)))
    assert bool(jnp.allclose(jnp.sum(face_classify, axis=1), 1.0, atol=1e-5))

    print("KERNEL_OK")
</pallas_src>

<mosaic_0001>
module attributes {stable_mosaic.version = 11 : i64} {
  func.func @kernel(%arg0: i32, %arg1: memref<1x2312x3xf32, #tpu.memory_space<vmem>>, %arg2: memref<9x3x128xf32, #tpu.memory_space<vmem>>, %arg3: memref<1x128xf32, #tpu.memory_space<vmem>>, %arg4: memref<1x128xf32, #tpu.memory_space<vmem>>, %arg5: memref<9x128x128xf32, #tpu.memory_space<vmem>>, %arg6: memref<1x128xf32, #tpu.memory_space<vmem>>, %arg7: memref<1x128xf32, #tpu.memory_space<vmem>>, %arg8: memref<9x128x128xf32, #tpu.memory_space<vmem>>, %arg9: memref<1x128xf32, #tpu.memory_space<vmem>>, %arg10: memref<1x128xf32, #tpu.memory_space<vmem>>, %arg11: memref<4x128x128xf32, #tpu.memory_space<vmem>>, %arg12: memref<1x128xf32, #tpu.memory_space<vmem>>, %arg13: memref<1x128xf32, #tpu.memory_space<vmem>>, %arg14: memref<1152x256xf32, #tpu.memory_space<vmem>>, %arg15: memref<1x256xf32, #tpu.memory_space<vmem>>, %arg16: memref<1x256xf32, #tpu.memory_space<vmem>>, %arg17: memref<256x16xf32, #tpu.memory_space<vmem>>, %arg18: memref<1x16xf32, #tpu.memory_space<vmem>>, %arg19: memref<1x1x4xf32, #tpu.memory_space<vmem>>, %arg20: memref<1x1x2xf32, #tpu.memory_space<vmem>>, %arg21: memref<1x1x10xf32, #tpu.memory_space<vmem>>, %arg22: memref<2264x128xf32, #tpu.memory_space<vmem>>, %arg23: memref<560x128xf32, #tpu.memory_space<vmem>>, %arg24: memref<504x128xf32, #tpu.memory_space<vmem>>, %arg25: memref<112x128xf32, #tpu.memory_space<vmem>>, %arg26: memref<80x128xf32, #tpu.memory_space<vmem>>, %arg27: memref<24x128xf32, #tpu.memory_space<vmem>>, %arg28: memref<1x1152xf32, #tpu.memory_space<vmem>>) attributes {dimension_semantics = [#tpu.dimension_semantics<parallel>], iteration_bounds = array<i64: 2>, scalar_prefetch = 0 : i64, scratch_operands = 7 : i64, tpu.core_type = #tpu.core_type<tc>, window_params = [{transform_indices = @transform_0, window_bounds = array<i64: 1, 2312, 3>}, {pipeline_mode = #tpu.pipeline_mode<synchronous>, transform_indices = @transform_1, window_bounds = array<i64: 9, 3, 128>}, {pipeline_mode = #tpu.pipeline_mode<synchronous>, transform_indices = @transform_2, window_bounds = array<i64: 1, 128>}, {pipeline_mode = #tpu.pipeline_mode<synchronous>, transform_indices = @transform_3, window_bounds = array<i64: 1, 128>}, {pipeline_mode = #tpu.pipeline_mode<synchronous>, transform_indices = @transform_4, window_bounds = array<i64: 9, 128, 128>}, {pipeline_mode = #tpu.pipeline_mode<synchronous>, transform_indices = @transform_5, window_bounds = array<i64: 1, 128>}, {pipeline_mode = #tpu.pipeline_mode<synchronous>, transform_indices = @transform_6, window_bounds = array<i64: 1, 128>}, {pipeline_mode = #tpu.pipeline_mode<synchronous>, transform_indices = @transform_7, window_bounds = array<i64: 9, 128, 128>}, {pipeline_mode = #tpu.pipeline_mode<synchronous>, transform_indices = @transform_8, window_bounds = array<i64: 1, 128>}, {pipeline_mode = #tpu.pipeline_mode<synchronous>, transform_indices = @transform_9, window_bounds = array<i64: 1, 128>}, {pipeline_mode = #tpu.pipeline_mode<synchronous>, transform_indices = @transform_10, window_bounds = array<i64: 4, 128, 128>}, {pipeline_mode = #tpu.pipeline_mode<synchronous>, transform_indices = @transform_11, window_bounds = array<i64: 1, 128>}, {pipeline_mode = #tpu.pipeline_mode<synchronous>, transform_indices = @transform_12, window_bounds = array<i64: 1, 128>}, {pipeline_mode = #tpu.pipeline_mode<synchronous>, transform_indices = @transform_13, window_bounds = array<i64: 1152, 256>}, {pipeline_mode = #tpu.pipeline_mode<synchronous>, transform_indices = @transform_14, window_bounds = array<i64: 1, 256>}, {pipeline_mode = #tpu.pipeline_mode<synchronous>, transform_indices = @transform_15, window_bounds = array<i64: 1, 256>}, {pipeline_mode = #tpu.pipeline_mode<synchronous>, transform_indices = @transform_16, window_bounds = array<i64: 256, 16>}, {pipeline_mode = #tpu.pipeline_mode<synchronous>, transform_indices = @transform_17, window_bounds = array<i64: 1, 16>}, {transform_indices = @transform_18, window_bounds = array<i64: 1, 1, 4>}, {transform_indices = @transform_19, window_bounds = array<i64: 1, 1, 2>}, {transform_indices = @transform_20, window_bounds = array<i64: 1, 1, 10>}]} {
    %cst = arith.constant -1.000000e+30 : f32
    %0 = vector.broadcast %cst : f32 to vector<56x128xf32>
    %c2208 = arith.constant 2208 : index
    %c0 = arith.constant 0 : index
    %1 = vector.load %arg22[%c2208, %c0] : memref<2264x128xf32, #tpu.memory_space<vmem>>, vector<56x128xf32>
    tpu.vector_store %arg22[%c2208, %c0], %0 {strides = array<i32>} : memref<2264x128xf32, #tpu.memory_space<vmem>>, vector<56x128xf32>,
    %cst_0 = arith.constant 0.000000e+00 : f32
    %2 = vector.broadcast %cst_0 : f32 to vector<8x128xf32>
    %c552 = arith.constant 552 : index
    %c0_1 = arith.constant 0 : index
    %3 = vector.load %arg23[%c552, %c0_1] : memref<560x128xf32, #tpu.memory_space<vmem>>, vector<8x128xf32>
    tpu.vector_store %arg23[%c552, %c0_1], %2 {strides = array<i32>} : memref<560x128xf32, #tpu.memory_space<vmem>>, vector<8x128xf32>,
    %cst_2 = arith.constant 0.000000e+00 : f32
    %4 = vector.broadcast %cst_2 : f32 to vector<12x128xf32>
    %c100 = arith.constant 100 : index
    %c0_3 = arith.constant 0 : index
    %5 = vector.load %arg25[%c100, %c0_3] : memref<112x128xf32, #tpu.memory_space<vmem>>, vector<12x128xf32>
    tpu.vector_store %arg25[%c100, %c0_3], %4 {strides = array<i32>} : memref<112x128xf32, #tpu.memory_space<vmem>>, vector<12x128xf32>,
    %cst_4 = arith.constant 0.000000e+00 : f32
    %6 = vector.broadcast %cst_4 : f32 to vector<8x128xf32>
    %c16 = arith.constant 16 : index
    %c0_5 = arith.constant 0 : index
    %7 = vector.load %arg27[%c16, %c0_5] : memref<24x128xf32, #tpu.memory_space<vmem>>, vector<8x128xf32>
    tpu.vector_store %arg27[%c16, %c0_5], %6 {strides = array<i32>} : memref<24x128xf32, #tpu.memory_space<vmem>>, vector<8x128xf32>,
    %c0_i32 = arith.constant 0 : i32
    %c0_i32_6 = arith.constant 0 : i32
    %c23_i32 = arith.constant 23 : i32
    %8 = arith.addi %c0_i32_6, %c23_i32 : i32
    %c1_i32 = arith.constant 1 : i32
    scf.for %arg29 = %c0_i32_6 to %8 step %c1_i32  : i32 {
      %c96_i32 = arith.constant 96 : i32
      %224 = arith.muli %arg29, %c96_i32 : i32
      %cst_157 = arith.constant 0.000000e+00 : f32
      %225 = vector.broadcast %cst_157 : f32 to vector<96x128xf32>
      %c0_i32_158 = arith.constant 0 : i32
      %226 = arith.addi %224, %c0_i32_158 : i32
      %c0_i32_159 = arith.constant 0 : i32
      %227 = arith.addi %226, %c0_i32_159 : i32
      %228 = arith.index_cast %c0_i32 : i32 to index
      %229 = arith.index_cast %227 : i32 to index
      %c0_160 = arith.constant 0 : index
      %230 = vector.load %arg1[%228, %229, %c0_160] : memref<1x2312x3xf32, #tpu.memory_space<vmem>>, vector<1x96x3xf32>
      %231 = vector.shape_cast %230 : vector<1x96x3xf32> to vector<96x3xf32>
      %c0_161 = arith.constant 0 : index
      %c0_162 = arith.constant 0 : index
      %c0_163 = arith.constant 0 : index
      %232 = vector.load %arg2[%c0_161, %c0_162, %c0_163] : memref<9x3x128xf32, #tpu.memory_space<vmem>>, vector<1x3x128xf32>
      %233 = vector.shape_cast %232 : vector<1x3x128xf32> to vector<3x128xf32>
      %cst_164 = arith.constant dense<0.000000e+00> : vector<96x128xf32>
      %234 = tpu.matmul %231, %233, %cst_164 {dimension_numbers = #tpu.dot_dimension_numbers<[1], [0], [0], [1], [0, 0, 1, 1], [], []>} : vector<96x3xf32>, vector<3x128xf32>, vector<96x128xf32> -> vector<96x128xf32>
      %235 = arith.addf %225, %234 : vector<96x128xf32>
      %c0_i32_165 = arith.constant 0 : i32
      %236 = arith.addi %224, %c0_i32_165 : i32
      %c1_i32_166 = arith.constant 1 : i32
      %237 = arith.addi %236, %c1_i32_166 : i32
      %238 = arith.index_cast %c0_i32 : i32 to index
      %239 = arith.index_cast %237 : i32 to index
      %c0_167 = arith.constant 0 : index
      %240 = vector.load %arg1[%238, %239, %c0_167] : memref<1x2312x3xf32, #tpu.memory_space<vmem>>, vector<1x96x3xf32>
      %241 = vector.shape_cast %240 : vector<1x96x3xf32> to vector<96x3xf32>
      %c1_168 = arith.constant 1 : index
      %c0_169 = arith.constant 0 : index
      %c0_170 = arith.constant 0 : index
      %242 = vector.load %arg2[%c1_168, %c0_169, %c0_170] : memref<9x3x128xf32, #tpu.memory_space<vmem>>, vector<1x3x128xf32>
      %243 = vector.shape_cast %242 : vector<1x3x128xf32> to vector<3x128xf32>
      %cst_171 = arith.constant dense<0.000000e+00> : vector<96x128xf32>
      %244 = tpu.matmul %241, %243, %cst_171 {dimension_numbers = #tpu.dot_dimension_numbers<[1], [0], [0], [1], [0, 0, 1, 1], [], []>} : vector<96x3xf32>, vector<3x128xf32>, vector<96x128xf32> -> vector<96x128xf32>
      %245 = arith.addf %235, %244 : vector<96x128xf32>
      %c0_i32_172 = arith.constant 0 : i32
      %246 = arith.addi %224, %c0_i32_172 : i32
      %c2_i32_173 = arith.constant 2 : i32
      %247 = arith.addi %246, %c2_i32_173 : i32
      %248 = arith.index_cast %c0_i32 : i32 to index
      %249 = arith.index_cast %247 : i32 to index
      %c0_174 = arith.constant 0 : index
      %250 = vector.load %arg1[%248, %249, %c0_174] : memref<1x2312x3xf32, #tpu.memory_space<vmem>>, vector<1x96x3xf32>
      %251 = vector.shape_cast %250 : vector<1x96x3xf32> to vector<96x3xf32>
      %c2_175 = arith.constant 2 : index
      %c0_176 = arith.constant 0 : index
      %c0_177 = arith.constant 0 : index
      %252 = vector.load %arg2[%c2_175, %c0_176, %c0_177] : memref<9x3x128xf32, #tpu.memory_space<vmem>>, vector<1x3x128xf32>
      %253 = vector.shape_cast %252 : vector<1x3x128xf32> to vector<3x128xf32>
      %cst_178 = arith.constant dense<0.000000e+00> : vector<96x128xf32>
      %254 = tpu.matmul %251, %253, %cst_178 {dimension_numbers = #tpu.dot_dimension_numbers<[1], [0], [0], [1], [0, 0, 1, 1], [], []>} : vector<96x3xf32>, vector<3x128xf32>, vector<96x128xf32> -> vector<96x128xf32>
      %255 = arith.addf %245, %254 : vector<96x128xf32>
      %c48_i32 = arith.constant 48 : i32
      %256 = arith.addi %224, %c48_i32 : i32
      %c0_i32_179 = arith.constant 0 : i32
      %257 = arith.addi %256, %c0_i32_179 : i32
      %258 = arith.index_cast %c0_i32 : i32 to index
      %259 = arith.index_cast %257 : i32 to index
      %c0_180 = arith.constant 0 : index
      %260 = vector.load %arg1[%258, %259, %c0_180] : memref<1x2312x3xf32, #tpu.memory_space<vmem>>, vector<1x96x3xf32>
      %261 = vector.shape_cast %260 : vector<1x96x3xf32> to vector<96x3xf32>
      %c3_181 = arith.constant 3 : index
      %c0_182 = arith.constant 0 : index
      %c0_183 = arith.constant 0 : index
      %262 = vector.load %arg2[%c3_181, %c0_182, %c0_183] : memref<9x3x128xf32, #tpu.memory_space<vmem>>, vector<1x3x128xf32>
      %263 = vector.shape_cast %262 : vector<1x3x128xf32> to vector<3x128xf32>
      %cst_184 = arith.constant dense<0.000000e+00> : vector<96x128xf32>
      %264 = tpu.matmul %261, %263, %cst_184 {dimension_numbers = #tpu.dot_dimension_numbers<[1], [0], [0], [1], [0, 0, 1, 1], [], []>} : vector<96x3xf32>, vector<3x128xf32>, vector<96x128xf32> -> vector<96x128xf32>
      %265 = arith.addf %255, %264 : vector<96x128xf32>
      %c48_i32_185 = arith.constant 48 : i32
      %266 = arith.addi %224, %c48_i32_185 : i32
      %c1_i32_186 = arith.constant 1 : i32
      %267 = arith.addi %266, %c1_i32_186 : i32
      %268 = arith.index_cast %c0_i32 : i32 to index
      %269 = arith.index_cast %267 : i32 to index
      %c0_187 = arith.constant 0 : index
      %270 = vector.load %arg1[%268, %269, %c0_187] : memref<1x2312x3xf32, #tpu.memory_space<vmem>>, vector<1x96x3xf32>
      %271 = vector.shape_cast %270 : vector<1x96x3xf32> to vector<96x3xf32>
      %c4_188 = arith.constant 4 : index
      %c0_189 = arith.constant 0 : index
      %c0_190 = arith.constant 0 : index
      %272 = vector.load %arg2[%c4_188, %c0_189, %c0_190] : memref<9x3x128xf32, #tpu.memory_space<vmem>>, vector<1x3x128xf32>
      %273 = vector.shape_cast %272 : vector<1x3x128xf32> to vector<3x128xf32>
      %cst_191 = arith.constant dense<0.000000e+00> : vector<96x128xf32>
      %274 = tpu.matmul %271, %273, %cst_191 {dimension_numbers = #tpu.dot_dimension_numbers<[1], [0], [0], [1], [0, 0, 1, 1], [], []>} : vector<96x3xf32>, vector<3x128xf32>, vector<96x128xf32> -> vector<96x128xf32>
      %275 = arith.addf %265, %274 : vector<96x128xf32>
      %c48_i32_192 = arith.constant 48 : i32
      %276 = arith.addi %224, %c48_i32_192 : i32
      %c2_i32_193 = arith.constant 2 : i32
      %277 = arith.addi %276, %c2_i32_193 : i32
      %278 = arith.index_cast %c0_i32 : i32 to index
      %279 = arith.index_cast %277 : i32 to index
      %c0_194 = arith.constant 0 : index
      %280 = vector.load %arg1[%278, %279, %c0_194] : memref<1x2312x3xf32, #tpu.memory_space<vmem>>, vector<1x96x3xf32>
      %281 = vector.shape_cast %280 : vector<1x96x3xf32> to vector<96x3xf32>
      %c5_195 = arith.constant 5 : index
      %c0_196 = arith.constant 0 : index
      %c0_197 = arith.constant 0 : index
      %282 = vector.load %arg2[%c5_195, %c0_196, %c0_197] : memref<9x3x128xf32, #tpu.memory_space<vmem>>, vector<1x3x128xf32>
      %283 = vector.shape_cast %282 : vector<1x3x128xf32> to vector<3x128xf32>
      %cst_198 = arith.constant dense<0.000000e+00> : vector<96x128xf32>
      %284 = tpu.matmul %281, %283, %cst_198 {dimension_numbers = #tpu.dot_dimension_numbers<[1], [0], [0], [1], [0, 0, 1, 1], [], []>} : vector<96x3xf32>, vector<3x128xf32>, vector<96x128xf32> -> vector<96x128xf32>
      %285 = arith.addf %275, %284 : vector<96x128xf32>
      %c96_i32_199 = arith.constant 96 : i32
      %286 = arith.addi %224, %c96_i32_199 : i32
      %c0_i32_200 = arith.constant 0 : i32
      %287 = arith.addi %286, %c0_i32_200 : i32
      %288 = arith.index_cast %c0_i32 : i32 to index
      %289 = arith.index_cast %287 : i32 to index
      %c0_201 = arith.constant 0 : index
      %290 = vector.load %arg1[%288, %289, %c0_201] : memref<1x2312x3xf32, #tpu.memory_space<vmem>>, vector<1x96x3xf32>
      %291 = vector.shape_cast %290 : vector<1x96x3xf32> to vector<96x3xf32>
      %c6_202 = arith.constant 6 : index
      %c0_203 = arith.constant 0 : index
      %c0_204 = arith.constant 0 : index
      %292 = vector.load %arg2[%c6_202, %c0_203, %c0_204] : memref<9x3x128xf32, #tpu.memory_space<vmem>>, vector<1x3x128xf32>
      %293 = vector.shape_cast %292 : vector<1x3x128xf32> to vector<3x128xf32>
      %cst_205 = arith.constant dense<0.000000e+00> : vector<96x128xf32>
      %294 = tpu.matmul %291, %293, %cst_205 {dimension_numbers = #tpu.dot_dimension_numbers<[1], [0], [0], [1], [0, 0, 1, 1], [], []>} : vector<96x3xf32>, vector<3x128xf32>, vector<96x128xf32> -> vector<96x128xf32>
      %295 = arith.addf %285, %294 : vector<96x128xf32>
      %c96_i32_206 = arith.constant 96 : i32
      %296 = arith.addi %224, %c96_i32_206 : i32
      %c1_i32_207 = arith.constant 1 : i32
      %297 = arith.addi %296, %c1_i32_207 : i32
      %298 = arith.index_cast %c0_i32 : i32 to index
      %299 = arith.index_cast %297 : i32 to index
      %c0_208 = arith.constant 0 : index
      %300 = vector.load %arg1[%298, %299, %c0_208] : memref<1x2312x3xf32, #tpu.memory_space<vmem>>, vector<1x96x3xf32>
      %301 = vector.shape_cast %300 : vector<1x96x3xf32> to vector<96x3xf32>
      %c7_209 = arith.constant 7 : index
      %c0_210 = arith.constant 0 : index
      %c0_211 = arith.constant 0 : index
      %302 = vector.load %arg2[%c7_209, %c0_210, %c0_211] : memref<9x3x128xf32, #tpu.memory_space<vmem>>, vector<1x3x128xf32>
      %303 = vector.shape_cast %302 : vector<1x3x128xf32> to vector<3x128xf32>
      %cst_212 = arith.constant dense<0.000000e+00> : vector<96x128xf32>
      %304 = tpu.matmul %301, %303, %cst_212 {dimension_numbers = #tpu.dot_dimension_numbers<[1], [0], [0], [1], [0, 0, 1, 1], [], []>} : vector<96x3xf32>, vector<3x128xf32>, vector<96x128xf32> -> vector<96x128xf32>
      %305 = arith.addf %295, %304 : vector<96x128xf32>
      %c96_i32_213 = arith.constant 96 : i32
      %306 = arith.addi %224, %c96_i32_213 : i32
      %c2_i32_214 = arith.constant 2 : i32
      %307 = arith.addi %306, %c2_i32_214 : i32
      %308 = arith.index_cast %c0_i32 : i32 to index
      %309 = arith.index_cast %307 : i32 to index
      %c0_215 = arith.constant 0 : index
      %310 = vector.load %arg1[%308, %309, %c0_215] : memref<1x2312x3xf32, #tpu.memory_space<vmem>>, vector<1x96x3xf32>
      %311 = vector.shape_cast %310 : vector<1x96x3xf32> to vector<96x3xf32>
      %c8_216 = arith.constant 8 : index
      %c0_217 = arith.constant 0 : index
      %c0_218 = arith.constant 0 : index
      %312 = vector.load %arg2[%c8_216, %c0_217, %c0_218] : memref<9x3x128xf32, #tpu.memory_space<vmem>>, vector<1x3x128xf32>
      %313 = vector.shape_cast %312 : vector<1x3x128xf32> to vector<3x128xf32>
      %cst_219 = arith.constant dense<0.000000e+00> : vector<96x128xf32>
      %314 = tpu.matmul %311, %313, %cst_219 {dimension_numbers = #tpu.dot_dimension_numbers<[1], [0], [0], [1], [0, 0, 1, 1], [], []>} : vector<96x3xf32>, vector<3x128xf32>, vector<96x128xf32> -> vector<96x128xf32>
      %315 = arith.addf %305, %314 : vector<96x128xf32>
      %c0_220 = arith.constant 0 : index
      %c0_221 = arith.constant 0 : index
      %316 = vector.load %arg3[%c0_220, %c0_221] : memref<1x128xf32, #tpu.memory_space<vmem>>, vector<1x128xf32>
      %317 = vector.broadcast %316 : vector<1x128xf32> to vector<96x128xf32>
      %318 = arith.addf %315, %317 : vector<96x128xf32>
      %cst_222 = arith.constant 0.000000e+00 : f32
      %319 = vector.broadcast %cst_222 : f32 to vector<96x128xf32>
      %320 = arith.cmpf oge, %318, %319 : vector<96x128xf32>
      %c0_223 = arith.constant 0 : index
      %c0_224 = arith.constant 0 : index
      %321 = vector.load %arg4[%c0_223, %c0_224] : memref<1x128xf32, #tpu.memory_space<vmem>>, vector<1x128xf32>
      %322 = vector.broadcast %321 : vector<1x128xf32> to vector<96x128xf32>
      %323 = arith.mulf %322, %318 : vector<96x128xf32>
      %324 = arith.select %320, %318, %323 : vector<96x128xi1>, vector<96x128xf32>
      %325 = tpu.iota {dimensions = array<i32: 0>} : vector<96x1xi32>
      %326 = vector.broadcast %224 : i32 to vector<96x1xi32>
      %327 = arith.addi %326, %325 : vector<96x1xi32>
      %c48_i32_225 = arith.constant 48 : i32
      %c0_i32_226 = arith.constant 0 : i32
      %328 = arith.cmpi eq, %c48_i32_225, %c0_i32_226 : i32
      %c1_i32_227 = arith.constant 1 : i32
      %329 = arith.select %328, %c1_i32_227, %c48_i32_225 : i32
      %330 = vector.broadcast %329 : i32 to vector<96x1xi32>
      %331 = arith.remsi %327, %330 : vector<96x1xi32>
      %c0_i32_228 = arith.constant 0 : i32
      %332 = vector.broadcast %c0_i32_228 : i32 to vector<96x1xi32>
      %333 = arith.cmpi ne, %331, %332 : vector<96x1xi32>
      %c0_i32_229 = arith.constant 0 : i32
      %334 = vector.broadcast %c0_i32_229 : i32 to vector<96x1xi32>
      %335 = arith.cmpi slt, %331, %334 : vector<96x1xi32>
      %c0_i32_230 = arith.constant 0 : i32
      %336 = arith.cmpi slt, %329, %c0_i32_230 : i32
      %337 = vector.broadcast %336 : i1 to vector<96x1xi1>
      %338 = vector.broadcast %337 : vector<96x1xi1> to vector<96x1xi1>
      %339 = arith.xori %335, %338 : vector<96x1xi1>
      %340 = arith.andi %339, %333 : vector<96x1xi1>
      %341 = vector.broadcast %329 : i32 to vector<96x1xi32>
      %342 = arith.addi %331, %341 : vector<96x1xi32>
      %343 = arith.select %340, %342, %331 : vector<96x1xi1>, vector<96x1xi32>
      %c46_i32 = arith.constant 46 : i32
      %344 = vector.broadcast %c46_i32 : i32 to vector<96x1xi32>
      %345 = arith.cmpi sge, %343, %344 : vector<96x1xi32>
      %cst_231 = arith.constant -1.000000e+30 : f32
      %346 = vector.shape_cast %345 : vector<96x1xi1> to vector<96x1xi1>
      %347 = vector.broadcast %346 : vector<96x1xi1> to vector<96x128xi1>
      %348 = vector.broadcast %cst_231 : f32 to vector<96x128xf32>
      %349 = arith.select %347, %348, %324 : vector<96x128xi1>, vector<96x128xf32>
      %350 = arith.index_cast %224 : i32 to index
      %c0_232 = arith.constant 0 : index
      %351 = vector.load %arg22[%350, %c0_232] : memref<2264x128xf32, #tpu.memory_space<vmem>>, vector<96x128xf32>
      tpu.vector_store %arg22[%350, %c0_232], %349 {strides = array<i32>} : memref<2264x128xf32, #tpu.memory_space<vmem>>, vector<96x128xf32>,
    }
    %c23_i32_7 = arith.constant 23 : i32
    %9 = tpu.iota {dimensions = array<i32: 0>} : vector<24x46xi32>
    %10 = tpu.iota {dimensions = array<i32: 1>} : vector<24x46xi32>
    %c2_i32 = arith.constant 2 : i32
    %11 = vector.broadcast %c2_i32 : i32 to vector<24x46xi32>
    %12 = arith.muli %11, %9 : vector<24x46xi32>
    %13 = arith.cmpi eq, %10, %12 : vector<24x46xi32>
    %cst_8 = arith.constant 1.000000e+00 : f32
    %cst_9 = arith.constant 0.000000e+00 : f32
    %14 = vector.broadcast %cst_8 : f32 to vector<24x46xf32>
    %15 = vector.broadcast %cst_9 : f32 to vector<24x46xf32>
    %16 = arith.select %13, %14, %15 : vector<24x46xi1>, vector<24x46xf32>
    %c0_i32_10 = arith.constant 0 : i32
    %c23_i32_11 = arith.constant 23 : i32
    %17 = arith.addi %c0_i32_10, %c23_i32_11 : i32
    %c1_i32_12 = arith.constant 1 : i32
    scf.for %arg29 = %c0_i32_10 to %17 step %c1_i32_12  : i32 {
      %c2_i32_157 = arith.constant 2 : i32
      %224 = arith.muli %c2_i32_157, %arg29 : i32
      %c48_i32 = arith.constant 48 : i32
      %225 = arith.muli %224, %c48_i32 : i32
      %226 = arith.index_cast %225 : i32 to index
      %c0_158 = arith.constant 0 : index
      %227 = vector.load %arg22[%226, %c0_158] : memref<2264x128xf32, #tpu.memory_space<vmem>>, vector<48x128xf32>
      %c2_i32_159 = arith.constant 2 : i32
      %228 = arith.muli %c2_i32_159, %arg29 : i32
      %c1_i32_160 = arith.constant 1 : i32
      %229 = arith.addi %228, %c1_i32_160 : i32
      %c48_i32_161 = arith.constant 48 : i32
      %230 = arith.muli %229, %c48_i32_161 : i32
      %231 = arith.index_cast %230 : i32 to index
      %c0_162 = arith.constant 0 : index
      %232 = vector.load %arg22[%231, %c0_162] : memref<2264x128xf32, #tpu.memory_space<vmem>>, vector<48x128xf32>
      %233 = arith.maximumf %227, %232 : vector<48x128xf32>
      %c2_i32_163 = arith.constant 2 : i32
      %234 = arith.muli %c2_i32_163, %arg29 : i32
      %c2_i32_164 = arith.constant 2 : i32
      %235 = arith.addi %234, %c2_i32_164 : i32
      %c48_i32_165 = arith.constant 48 : i32
      %236 = arith.muli %235, %c48_i32_165 : i32
      %237 = arith.index_cast %236 : i32 to index
      %c0_166 = arith.constant 0 : index
      %238 = vector.load %arg22[%237, %c0_166] : memref<2264x128xf32, #tpu.memory_space<vmem>>, vector<48x128xf32>
      %239 = arith.maximumf %233, %238 : vector<48x128xf32>
      %240 = vector.extract_strided_slice %239 {offsets = [0, 0], sizes = [46, 128], strides = [1, 1]} : vector<48x128xf32> to vector<46x128xf32>
      %241 = vector.extract_strided_slice %239 {offsets = [1, 0], sizes = [46, 128], strides = [1, 1]} : vector<48x128xf32> to vector<46x128xf32>
      %242 = arith.maximumf %240, %241 : vector<46x128xf32>
      %243 = vector.extract_strided_slice %239 {offsets = [2, 0], sizes = [46, 128], strides = [1, 1]} : vector<48x128xf32> to vector<46x128xf32>
      %244 = arith.maximumf %242, %243 : vector<46x128xf32>
      %cst_167 = arith.constant dense<0.000000e+00> : vector<24x128xf32>
      %245 = tpu.matmul %16, %244, %cst_167 {dimension_numbers = #tpu.dot_dimension_numbers<[1], [0], [0], [1], [0, 0, 1, 1], [], []>} : vector<24x46xf32>, vector<46x128xf32>, vector<24x128xf32> -> vector<24x128xf32>
      %c24_i32 = arith.constant 24 : i32
      %246 = arith.muli %arg29, %c24_i32 : i32
      %247 = arith.index_cast %246 : i32 to index
      %c0_168 = arith.constant 0 : index
      %248 = vector.load %arg23[%247, %c0_168] : memref<560x128xf32, #tpu.memory_space<vmem>>, vector<24x128xf32>
      tpu.vector_store %arg23[%247, %c0_168], %245 {strides = array<i32>} : memref<560x128xf32, #tpu.memory_space<vmem>>, vector<24x128xf32>,
    }
    %c23_i32_13 = arith.constant 23 : i32
    %c0_i32_14 = arith.constant 0 : i32
    %c7_i32 = arith.constant 7 : i32
    %18 = arith.addi %c0_i32_14, %c7_i32 : i32
    %c1_i32_15 = arith.constant 1 : i32
    scf.for %arg29 = %c0_i32_14 to %18 step %c1_i32_15  : i32 {
      %c72_i32 = arith.constant 72 : i32
      %224 = arith.muli %arg29, %c72_i32 : i32
      %cst_157 = arith.constant 0.000000e+00 : f32
      %225 = vector.broadcast %cst_157 : f32 to vector<72x128xf32>
      %c0_i32_158 = arith.constant 0 : i32
      %226 = arith.addi %224, %c0_i32_158 : i32
      %c0_i32_159 = arith.constant 0 : i32
      %227 = arith.addi %226, %c0_i32_159 : i32
      %228 = arith.index_cast %227 : i32 to index
      %c0_160 = arith.constant 0 : index
      %229 = vector.load %arg23[%228, %c0_160] : memref<560x128xf32, #tpu.memory_space<vmem>>, vector<72x128xf32>
      %c0_161 = arith.constant 0 : index
      %c0_162 = arith.constant 0 : index
      %c0_163 = arith.constant 0 : index
      %230 = vector.load %arg5[%c0_161, %c0_162, %c0_163] : memref<9x128x128xf32, #tpu.memory_space<vmem>>, vector<1x128x128xf32>
      %231 = vector.shape_cast %230 : vector<1x128x128xf32> to vector<128x128xf32>
      %cst_164 = arith.constant dense<0.000000e+00> : vector<72x128xf32>
      %232 = tpu.matmul %229, %231, %cst_164 {dimension_numbers = #tpu.dot_dimension_numbers<[1], [0], [0], [1], [0, 0, 1, 1], [], []>} : vector<72x128xf32>, vector<128x128xf32>, vector<72x128xf32> -> vector<72x128xf32>
      %233 = arith.addf %225, %232 : vector<72x128xf32>
      %c0_i32_165 = arith.constant 0 : i32
      %234 = arith.addi %224, %c0_i32_165 : i32
      %c1_i32_166 = arith.constant 1 : i32
      %235 = arith.addi %234, %c1_i32_166 : i32
      %236 = arith.index_cast %235 : i32 to index
      %c0_167 = arith.constant 0 : index
      %237 = vector.load %arg23[%236, %c0_167] : memref<560x128xf32, #tpu.memory_space<vmem>>, vector<72x128xf32>
      %c1_168 = arith.constant 1 : index
      %c0_169 = arith.constant 0 : index
      %c0_170 = arith.constant 0 : index
      %238 = vector.load %arg5[%c1_168, %c0_169, %c0_170] : memref<9x128x128xf32, #tpu.memory_space<vmem>>, vector<1x128x128xf32>
      %239 = vector.shape_cast %238 : vector<1x128x128xf32> to vector<128x128xf32>
      %cst_171 = arith.constant dense<0.000000e+00> : vector<72x128xf32>
      %240 = tpu.matmul %237, %239, %cst_171 {dimension_numbers = #tpu.dot_dimension_numbers<[1], [0], [0], [1], [0, 0, 1, 1], [], []>} : vector<72x128xf32>, vector<128x128xf32>, vector<72x128xf32> -> vector<72x128xf32>
      %241 = arith.addf %233, %240 : vector<72x128xf32>
      %c0_i32_172 = arith.constant 0 : i32
      %242 = arith.addi %224, %c0_i32_172 : i32
      %c2_i32_173 = arith.constant 2 : i32
      %243 = arith.addi %242, %c2_i32_173 : i32
      %244 = arith.index_cast %243 : i32 to index
      %c0_174 = arith.constant 0 : index
      %245 = vector.load %arg23[%244, %c0_174] : memref<560x128xf32, #tpu.memory_space<vmem>>, vector<72x128xf32>
      %c2_175 = arith.constant 2 : index
      %c0_176 = arith.constant 0 : index
      %c0_177 = arith.constant 0 : index
      %246 = vector.load %arg5[%c2_175, %c0_176, %c0_177] : memref<9x128x128xf32, #tpu.memory_space<vmem>>, vector<1x128x128xf32>
      %247 = vector.shape_cast %246 : vector<1x128x128xf32> to vector<128x128xf32>
      %cst_178 = arith.constant dense<0.000000e+00> : vector<72x128xf32>
      %248 = tpu.matmul %245, %247, %cst_178 {dimension_numbers = #tpu.dot_dimension_numbers<[1], [0], [0], [1], [0, 0, 1, 1], [], []>} : vector<72x128xf32>, vector<128x128xf32>, vector<72x128xf32> -> vector<72x128xf32>
      %249 = arith.addf %241, %248 : vector<72x128xf32>
      %c24_i32 = arith.constant 24 : i32
      %250 = arith.addi %224, %c24_i32 : i32
      %c0_i32_179 = arith.constant 0 : i32
      %251 = arith.addi %250, %c0_i32_179 : i32
      %252 = arith.index_cast %251 : i32 to index
      %c0_180 = arith.constant 0 : index
      %253 = vector.load %arg23[%252, %c0_180] : memref<560x128xf32, #tpu.memory_space<vmem>>, vector<72x128xf32>
      %c3_181 = arith.constant 3 : index
      %c0_182 = arith.constant 0 : index
      %c0_183 = arith.constant 0 : index
      %254 = vector.load %arg5[%c3_181, %c0_182, %c0_183] : memref<9x128x128xf32, #tpu.memory_space<vmem>>, vector<1x128x128xf32>
      %255 = vector.shape_cast %254 : vector<1x128x128xf32> to vector<128x128xf32>
      %cst_184 = arith.constant dense<0.000000e+00> : vector<72x128xf32>
      %256 = tpu.matmul %253, %255, %cst_184 {dimension_numbers = #tpu.dot_dimension_numbers<[1], [0], [0], [1], [0, 0, 1, 1], [], []>} : vector<72x128xf32>, vector<128x128xf32>, vector<72x128xf32> -> vector<72x128xf32>
      %257 = arith.addf %249, %256 : vector<72x128xf32>
      %c24_i32_185 = arith.constant 24 : i32
      %258 = arith.addi %224, %c24_i32_185 : i32
      %c1_i32_186 = arith.constant 1 : i32
      %259 = arith.addi %258, %c1_i32_186 : i32
      %260 = arith.index_cast %259 : i32 to index
      %c0_187 = arith.constant 0 : index
      %261 = vector.load %arg23[%260, %c0_187] : memref<560x128xf32, #tpu.memory_space<vmem>>, vector<72x128xf32>
      %c4_188 = arith.constant 4 : index
      %c0_189 = arith.constant 0 : index
      %c0_190 = arith.constant 0 : index
      %262 = vector.load %arg5[%c4_188, %c0_189, %c0_190] : memref<9x128x128xf32, #tpu.memory_space<vmem>>, vector<1x128x128xf32>
      %263 = vector.shape_cast %262 : vector<1x128x128xf32> to vector<128x128xf32>
      %cst_191 = arith.constant dense<0.000000e+00> : vector<72x128xf32>
      %264 = tpu.matmul %261, %263, %cst_191 {dimension_numbers = #tpu.dot_dimension_numbers<[1], [0], [0], [1], [0, 0, 1, 1], [], []>} : vector<72x128xf32>, vector<128x128xf32>, vector<72x128xf32> -> vector<72x128xf32>
      %265 = arith.addf %257, %264 : vector<72x128xf32>
      %c24_i32_192 = arith.constant 24 : i32
      %266 = arith.addi %224, %c24_i32_192 : i32
      %c2_i32_193 = arith.constant 2 : i32
      %267 = arith.addi %266, %c2_i32_193 : i32
      %268 = arith.index_cast %267 : i32 to index
      %c0_194 = arith.constant 0 : index
      %269 = vector.load %arg23[%268, %c0_194] : memref<560x128xf32, #tpu.memory_space<vmem>>, vector<72x128xf32>
      %c5_195 = arith.constant 5 : index
      %c0_196 = arith.constant 0 : index
      %c0_197 = arith.constant 0 : index
      %270 = vector.load %arg5[%c5_195, %c0_196, %c0_197] : memref<9x128x128xf32, #tpu.memory_space<vmem>>, vector<1x128x128xf32>
      %271 = vector.shape_cast %270 : vector<1x128x128xf32> to vector<128x128xf32>
      %cst_198 = arith.constant dense<0.000000e+00> : vector<72x128xf32>
      %272 = tpu.matmul %269, %271, %cst_198 {dimension_numbers = #tpu.dot_dimension_numbers<[1], [0], [0], [1], [0, 0, 1, 1], [], []>} : vector<72x128xf32>, vector<128x128xf32>, vector<72x128xf32> -> vector<72x128xf32>
      %273 = arith.addf %265, %272 : vector<72x128xf32>
      %c48_i32 = arith.constant 48 : i32
      %274 = arith.addi %224, %c48_i32 : i32
      %c0_i32_199 = arith.constant 0 : i32
      %275 = arith.addi %274, %c0_i32_199 : i32
      %276 = arith.index_cast %275 : i32 to index
      %c0_200 = arith.constant 0 : index
      %277 = vector.load %arg23[%276, %c0_200] : memref<560x128xf32, #tpu.memory_space<vmem>>, vector<72x128xf32>
      %c6_201 = arith.constant 6 : index
      %c0_202 = arith.constant 0 : index
      %c0_203 = arith.constant 0 : index
      %278 = vector.load %arg5[%c6_201, %c0_202, %c0_203] : memref<9x128x128xf32, #tpu.memory_space<vmem>>, vector<1x128x128xf32>
      %279 = vector.shape_cast %278 : vector<1x128x128xf32> to vector<128x128xf32>
      %cst_204 = arith.constant dense<0.000000e+00> : vector<72x128xf32>
      %280 = tpu.matmul %277, %279, %cst_204 {dimension_numbers = #tpu.dot_dimension_numbers<[1], [0], [0], [1], [0, 0, 1, 1], [], []>} : vector<72x128xf32>, vector<128x128xf32>, vector<72x128xf32> -> vector<72x128xf32>
      %281 = arith.addf %273, %280 : vector<72x128xf32>
      %c48_i32_205 = arith.constant 48 : i32
      %282 = arith.addi %224, %c48_i32_205 : i32
      %c1_i32_206 = arith.constant 1 : i32
      %283 = arith.addi %282, %c1_i32_206 : i32
      %284 = arith.index_cast %283 : i32 to index
      %c0_207 = arith.constant 0 : index
      %285 = vector.load %arg23[%284, %c0_207] : memref<560x128xf32, #tpu.memory_space<vmem>>, vector<72x128xf32>
      %c7_208 = arith.constant 7 : index
      %c0_209 = arith.constant 0 : index
      %c0_210 = arith.constant 0 : index
      %286 = vector.load %arg5[%c7_208, %c0_209, %c0_210] : memref<9x128x128xf32, #tpu.memory_space<vmem>>, vector<1x128x128xf32>
      %287 = vector.shape_cast %286 : vector<1x128x128xf32> to vector<128x128xf32>
      %cst_211 = arith.constant dense<0.000000e+00> : vector<72x128xf32>
      %288 = tpu.matmul %285, %287, %cst_211 {dimension_numbers = #tpu.dot_dimension_numbers<[1], [0], [0], [1], [0, 0, 1, 1], [], []>} : vector<72x128xf32>, vector<128x128xf32>, vector<72x128xf32> -> vector<72x128xf32>
      %289 = arith.addf %281, %288 : vector<72x128xf32>
      %c48_i32_212 = arith.constant 48 : i32
      %290 = arith.addi %224, %c48_i32_212 : i32
      %c2_i32_213 = arith.constant 2 : i32
      %291 = arith.addi %290, %c2_i32_213 : i32
      %292 = arith.index_cast %291 : i32 to index
      %c0_214 = arith.constant 0 : index
      %293 = vector.load %arg23[%292, %c0_214] : memref<560x128xf32, #tpu.memory_space<vmem>>, vector<72x128xf32>
      %c8_215 = arith.constant 8 : index
      %c0_216 = arith.constant 0 : index
      %c0_217 = arith.constant 0 : index
      %294 = vector.load %arg5[%c8_215, %c0_216, %c0_217] : memref<9x128x128xf32, #tpu.memory_space<vmem>>, vector<1x128x128xf32>
      %295 = vector.shape_cast %294 : vector<1x128x128xf32> to vector<128x128xf32>
      %cst_218 = arith.constant dense<0.000000e+00> : vector<72x128xf32>
      %296 = tpu.matmul %293, %295, %cst_218 {dimension_numbers = #tpu.dot_dimension_numbers<[1], [0], [0], [1], [0, 0, 1, 1], [], []>} : vector<72x128xf32>, vector<128x128xf32>, vector<72x128xf32> -> vector<72x128xf32>
      %297 = arith.addf %289, %296 : vector<72x128xf32>
      %c0_219 = arith.constant 0 : index
      %c0_220 = arith.constant 0 : index
      %298 = vector.load %arg6[%c0_219, %c0_220] : memref<1x128xf32, #tpu.memory_space<vmem>>, vector<1x128xf32>
      %299 = vector.broadcast %298 : vector<1x128xf32> to vector<72x128xf32>
      %300 = arith.addf %297, %299 : vector<72x128xf32>
      %cst_221 = arith.constant 0.000000e+00 : f32
      %301 = vector.broadcast %cst_221 : f32 to vector<72x128xf32>
      %302 = arith.cmpf oge, %300, %301 : vector<72x128xf32>
      %c0_222 = arith.constant 0 : index
      %c0_223 = arith.constant 0 : index
      %303 = vector.load %arg7[%c0_222, %c0_223] : memref<1x128xf32, #tpu.memory_space<vmem>>, vector<1x128xf32>
      %304 = vector.broadcast %303 : vector<1x128xf32> to vector<72x128xf32>
      %305 = arith.mulf %304, %300 : vector<72x128xf32>
      %306 = arith.select %302, %300, %305 : vector<72x128xi1>, vector<72x128xf32>
      %307 = tpu.iota {dimensions = array<i32: 0>} : vector<72x1xi32>
      %308 = vector.broadcast %224 : i32 to vector<72x1xi32>
      %309 = arith.addi %308, %307 : vector<72x1xi32>
      %c24_i32_224 = arith.constant 24 : i32
      %c0_i32_225 = arith.constant 0 : i32
      %310 = arith.cmpi eq, %c24_i32_224, %c0_i32_225 : i32
      %c1_i32_226 = arith.constant 1 : i32
      %311 = arith.select %310, %c1_i32_226, %c24_i32_224 : i32
      %312 = vector.broadcast %311 : i32 to vector<72x1xi32>
      %313 = arith.remsi %309, %312 : vector<72x1xi32>
      %c0_i32_227 = arith.constant 0 : i32
      %314 = vector.broadcast %c0_i32_227 : i32 to vector<72x1xi32>
      %315 = arith.cmpi ne, %313, %314 : vector<72x1xi32>
      %c0_i32_228 = arith.constant 0 : i32
      %316 = vector.broadcast %c0_i32_228 : i32 to vector<72x1xi32>
      %317 = arith.cmpi slt, %313, %316 : vector<72x1xi32>
      %c0_i32_229 = arith.constant 0 : i32
      %318 = arith.cmpi slt, %311, %c0_i32_229 : i32
      %319 = vector.broadcast %318 : i1 to vector<72x1xi1>
      %320 = vector.broadcast %319 : vector<72x1xi1> to vector<72x1xi1>
      %321 = arith.xori %317, %320 : vector<72x1xi1>
      %322 = arith.andi %321, %315 : vector<72x1xi1>
      %323 = vector.broadcast %311 : i32 to vector<72x1xi32>
      %324 = arith.addi %313, %323 : vector<72x1xi32>
      %325 = arith.select %322, %324, %313 : vector<72x1xi1>, vector<72x1xi32>
      %c21_i32 = arith.constant 21 : i32
      %326 = vector.broadcast %c21_i32 : i32 to vector<72x1xi32>
      %327 = arith.cmpi sge, %325, %326 : vector<72x1xi32>
      %cst_230 = arith.constant -1.000000e+30 : f32
      %328 = vector.shape_cast %327 : vector<72x1xi1> to vector<72x1xi1>
      %329 = vector.broadcast %328 : vector<72x1xi1> to vector<72x128xi1>
      %330 = vector.broadcast %cst_230 : f32 to vector<72x128xf32>
      %331 = arith.select %329, %330, %306 : vector<72x128xi1>, vector<72x128xf32>
      %332 = arith.index_cast %224 : i32 to index
      %c0_231 = arith.constant 0 : index
      %333 = vector.load %arg24[%332, %c0_231] : memref<504x128xf32, #tpu.memory_space<vmem>>, vector<72x128xf32>
      tpu.vector_store %arg24[%332, %c0_231], %331 {strides = array<i32>} : memref<504x128xf32, #tpu.memory_space<vmem>>, vector<72x128xf32>,
    }
    %c7_i32_16 = arith.constant 7 : i32
    %19 = tpu.iota {dimensions = array<i32: 0>} : vector<10x22xi32>
    %20 = tpu.iota {dimensions = array<i32: 1>} : vector<10x22xi32>
    %c2_i32_17 = arith.constant 2 : i32
    %21 = vector.broadcast %c2_i32_17 : i32 to vector<10x22xi32>
    %22 = arith.muli %21, %19 : vector<10x22xi32>
    %23 = arith.cmpi eq, %20, %22 : vector<10x22xi32>
    %cst_18 = arith.constant 1.000000e+00 : f32
    %cst_19 = arith.constant 0.000000e+00 : f32
    %24 = vector.broadcast %cst_18 : f32 to vector<10x22xf32>
    %25 = vector.broadcast %cst_19 : f32 to vector<10x22xf32>
    %26 = arith.select %23, %24, %25 : vector<10x22xi1>, vector<10x22xf32>
    %c0_i32_20 = arith.constant 0 : i32
    %c10_i32 = arith.constant 10 : i32
    %27 = arith.addi %c0_i32_20, %c10_i32 : i32
    %c1_i32_21 = arith.constant 1 : i32
    scf.for %arg29 = %c0_i32_20 to %27 step %c1_i32_21  : i32 {
      %c2_i32_157 = arith.constant 2 : i32
      %224 = arith.muli %c2_i32_157, %arg29 : i32
      %c24_i32 = arith.constant 24 : i32
      %225 = arith.muli %224, %c24_i32 : i32
      %226 = arith.index_cast %225 : i32 to index
      %c0_158 = arith.constant 0 : index
      %227 = vector.load %arg24[%226, %c0_158] : memref<504x128xf32, #tpu.memory_space<vmem>>, vector<24x128xf32>
      %c2_i32_159 = arith.constant 2 : i32
      %228 = arith.muli %c2_i32_159, %arg29 : i32
      %c1_i32_160 = arith.constant 1 : i32
      %229 = arith.addi %228, %c1_i32_160 : i32
      %c24_i32_161 = arith.constant 24 : i32
      %230 = arith.muli %229, %c24_i32_161 : i32
      %231 = arith.index_cast %230 : i32 to index
      %c0_162 = arith.constant 0 : index
      %232 = vector.load %arg24[%231, %c0_162] : memref<504x128xf32, #tpu.memory_space<vmem>>, vector<24x128xf32>
      %233 = arith.maximumf %227, %232 : vector<24x128xf32>
      %c2_i32_163 = arith.constant 2 : i32
      %234 = arith.muli %c2_i32_163, %arg29 : i32
      %c2_i32_164 = arith.constant 2 : i32
      %235 = arith.addi %234, %c2_i32_164 : i32
      %c24_i32_165 = arith.constant 24 : i32
      %236 = arith.muli %235, %c24_i32_165 : i32
      %237 = arith.index_cast %236 : i32 to index
      %c0_166 = arith.constant 0 : index
      %238 = vector.load %arg24[%237, %c0_166] : memref<504x128xf32, #tpu.memory_space<vmem>>, vector<24x128xf32>
      %239 = arith.maximumf %233, %238 : vector<24x128xf32>
      %240 = vector.extract_strided_slice %239 {offsets = [0, 0], sizes = [22, 128], strides = [1, 1]} : vector<24x128xf32> to vector<22x128xf32>
      %241 = vector.extract_strided_slice %239 {offsets = [1, 0], sizes = [22, 128], strides = [1, 1]} : vector<24x128xf32> to vector<22x128xf32>
      %242 = arith.maximumf %240, %241 : vector<22x128xf32>
      %243 = vector.extract_strided_slice %239 {offsets = [2, 0], sizes = [22, 128], strides = [1, 1]} : vector<24x128xf32> to vector<22x128xf32>
      %244 = arith.maximumf %242, %243 : vector<22x128xf32>
      %cst_167 = arith.constant dense<0.000000e+00> : vector<10x128xf32>
      %245 = tpu.matmul %26, %244, %cst_167 {dimension_numbers = #tpu.dot_dimension_numbers<[1], [0], [0], [1], [0, 0, 1, 1], [], []>} : vector<10x22xf32>, vector<22x128xf32>, vector<10x128xf32> -> vector<10x128xf32>
      %c10_i32_168 = arith.constant 10 : i32
      %246 = arith.muli %arg29, %c10_i32_168 : i32
      %247 = arith.index_cast %246 : i32 to index
      %c0_169 = arith.constant 0 : index
      %248 = vector.load %arg25[%247, %c0_169] : memref<112x128xf32, #tpu.memory_space<vmem>>, vector<10x128xf32>
      tpu.vector_store %arg25[%247, %c0_169], %245 {strides = array<i32>} : memref<112x128xf32, #tpu.memory_space<vmem>>, vector<10x128xf32>,
    }
    %c10_i32_22 = arith.constant 10 : i32
    %c0_i32_23 = arith.constant 0 : i32
    %c80_i32 = arith.constant 80 : i32
    %28 = arith.muli %c0_i32_23, %c80_i32 : i32
    %cst_24 = arith.constant 0.000000e+00 : f32
    %29 = vector.broadcast %cst_24 : f32 to vector<80x128xf32>
    %c0_i32_25 = arith.constant 0 : i32
    %30 = arith.addi %28, %c0_i32_25 : i32
    %c0_i32_26 = arith.constant 0 : i32
    %31 = arith.addi %30, %c0_i32_26 : i32
    %32 = arith.index_cast %31 : i32 to index
    %c0_27 = arith.constant 0 : index
    %33 = vector.load %arg25[%32, %c0_27] : memref<112x128xf32, #tpu.memory_space<vmem>>, vector<80x128xf32>
    %c0_28 = arith.constant 0 : index
    %c0_29 = arith.constant 0 : index
    %c0_30 = arith.constant 0 : index
    %34 = vector.load %arg8[%c0_28, %c0_29, %c0_30] : memref<9x128x128xf32, #tpu.memory_space<vmem>>, vector<1x128x128xf32>
    %35 = vector.shape_cast %34 : vector<1x128x128xf32> to vector<128x128xf32>
    %cst_31 = arith.constant dense<0.000000e+00> : vector<80x128xf32>
    %36 = tpu.matmul %33, %35, %cst_31 {dimension_numbers = #tpu.dot_dimension_numbers<[1], [0], [0], [1], [0, 0, 1, 1], [], []>} : vector<80x128xf32>, vector<128x128xf32>, vector<80x128xf32> -> vector<80x128xf32>
    %37 = arith.addf %29, %36 : vector<80x128xf32>
    %c0_i32_32 = arith.constant 0 : i32
    %38 = arith.addi %28, %c0_i32_32 : i32
    %c1_i32_33 = arith.constant 1 : i32
    %39 = arith.addi %38, %c1_i32_33 : i32
    %40 = arith.index_cast %39 : i32 to index
    %c0_34 = arith.constant 0 : index
    %41 = vector.load %arg25[%40, %c0_34] : memref<112x128xf32, #tpu.memory_space<vmem>>, vector<80x128xf32>
    %c1 = arith.constant 1 : index
    %c0_35 = arith.constant 0 : index
    %c0_36 = arith.constant 0 : index
    %42 = vector.load %arg8[%c1, %c0_35, %c0_36] : memref<9x128x128xf32, #tpu.memory_space<vmem>>, vector<1x128x128xf32>
    %43 = vector.shape_cast %42 : vector<1x128x128xf32> to vector<128x128xf32>
    %cst_37 = arith.constant dense<0.000000e+00> : vector<80x128xf32>
    %44 = tpu.matmul %41, %43, %cst_37 {dimension_numbers = #tpu.dot_dimension_numbers<[1], [0], [0], [1], [0, 0, 1, 1], [], []>} : vector<80x128xf32>, vector<128x128xf32>, vector<80x128xf32> -> vector<80x128xf32>
    %45 = arith.addf %37, %44 : vector<80x128xf32>
    %c0_i32_38 = arith.constant 0 : i32
    %46 = arith.addi %28, %c0_i32_38 : i32
    %c2_i32_39 = arith.constant 2 : i32
    %47 = arith.addi %46, %c2_i32_39 : i32
    %48 = arith.index_cast %47 : i32 to index
    %c0_40 = arith.constant 0 : index
    %49 = vector.load %arg25[%48, %c0_40] : memref<112x128xf32, #tpu.memory_space<vmem>>, vector<80x128xf32>
    %c2 = arith.constant 2 : index
    %c0_41 = arith.constant 0 : index
    %c0_42 = arith.constant 0 : index
    %50 = vector.load %arg8[%c2, %c0_41, %c0_42] : memref<9x128x128xf32, #tpu.memory_space<vmem>>, vector<1x128x128xf32>
    %51 = vector.shape_cast %50 : vector<1x128x128xf32> to vector<128x128xf32>
    %cst_43 = arith.constant dense<0.000000e+00> : vector<80x128xf32>
    %52 = tpu.matmul %49, %51, %cst_43 {dimension_numbers = #tpu.dot_dimension_numbers<[1], [0], [0], [1], [0, 0, 1, 1], [], []>} : vector<80x128xf32>, vector<128x128xf32>, vector<80x128xf32> -> vector<80x128xf32>
    %53 = arith.addf %45, %52 : vector<80x128xf32>
    %c10_i32_44 = arith.constant 10 : i32
    %54 = arith.addi %28, %c10_i32_44 : i32
    %c0_i32_45 = arith.constant 0 : i32
    %55 = arith.addi %54, %c0_i32_45 : i32
    %56 = arith.index_cast %55 : i32 to index
    %c0_46 = arith.constant 0 : index
    %57 = vector.load %arg25[%56, %c0_46] : memref<112x128xf32, #tpu.memory_space<vmem>>, vector<80x128xf32>
    %c3 = arith.constant 3 : index
    %c0_47 = arith.constant 0 : index
    %c0_48 = arith.constant 0 : index
    %58 = vector.load %arg8[%c3, %c0_47, %c0_48] : memref<9x128x128xf32, #tpu.memory_space<vmem>>, vector<1x128x128xf32>
    %59 = vector.shape_cast %58 : vector<1x128x128xf32> to vector<128x128xf32>
    %cst_49 = arith.constant dense<0.000000e+00> : vector<80x128xf32>
    %60 = tpu.matmul %57, %59, %cst_49 {dimension_numbers = #tpu.dot_dimension_numbers<[1], [0], [0], [1], [0, 0, 1, 1], [], []>} : vector<80x128xf32>, vector<128x128xf32>, vector<80x128xf32> -> vector<80x128xf32>
    %61 = arith.addf %53, %60 : vector<80x128xf32>
    %c10_i32_50 = arith.constant 10 : i32
    %62 = arith.addi %28, %c10_i32_50 : i32
    %c1_i32_51 = arith.constant 1 : i32
    %63 = arith.addi %62, %c1_i32_51 : i32
    %64 = arith.index_cast %63 : i32 to index
    %c0_52 = arith.constant 0 : index
    %65 = vector.load %arg25[%64, %c0_52] : memref<112x128xf32, #tpu.memory_space<vmem>>, vector<80x128xf32>
    %c4 = arith.constant 4 : index
    %c0_53 = arith.constant 0 : index
    %c0_54 = arith.constant 0 : index
    %66 = vector.load %arg8[%c4, %c0_53, %c0_54] : memref<9x128x128xf32, #tpu.memory_space<vmem>>, vector<1x128x128xf32>
    %67 = vector.shape_cast %66 : vector<1x128x128xf32> to vector<128x128xf32>
    %cst_55 = arith.constant dense<0.000000e+00> : vector<80x128xf32>
    %68 = tpu.matmul %65, %67, %cst_55 {dimension_numbers = #tpu.dot_dimension_numbers<[1], [0], [0], [1], [0, 0, 1, 1], [], []>} : vector<80x128xf32>, vector<128x128xf32>, vector<80x128xf32> -> vector<80x128xf32>
    %69 = arith.addf %61, %68 : vector<80x128xf32>
    %c10_i32_56 = arith.constant 10 : i32
    %70 = arith.addi %28, %c10_i32_56 : i32
    %c2_i32_57 = arith.constant 2 : i32
    %71 = arith.addi %70, %c2_i32_57 : i32
    %72 = arith.index_cast %71 : i32 to index
    %c0_58 = arith.constant 0 : index
    %73 = vector.load %arg25[%72, %c0_58] : memref<112x128xf32, #tpu.memory_space<vmem>>, vector<80x128xf32>
    %c5 = arith.constant 5 : index
    %c0_59 = arith.constant 0 : index
    %c0_60 = arith.constant 0 : index
    %74 = vector.load %arg8[%c5, %c0_59, %c0_60] : memref<9x128x128xf32, #tpu.memory_space<vmem>>, vector<1x128x128xf32>
    %75 = vector.shape_cast %74 : vector<1x128x128xf32> to vector<128x128xf32>
    %cst_61 = arith.constant dense<0.000000e+00> : vector<80x128xf32>
    %76 = tpu.matmul %73, %75, %cst_61 {dimension_numbers = #tpu.dot_dimension_numbers<[1], [0], [0], [1], [0, 0, 1, 1], [], []>} : vector<80x128xf32>, vector<128x128xf32>, vector<80x128xf32> -> vector<80x128xf32>
    %77 = arith.addf %69, %76 : vector<80x128xf32>
    %c20_i32 = arith.constant 20 : i32
    %78 = arith.addi %28, %c20_i32 : i32
    %c0_i32_62 = arith.constant 0 : i32
    %79 = arith.addi %78, %c0_i32_62 : i32
    %80 = arith.index_cast %79 : i32 to index
    %c0_63 = arith.constant 0 : index
    %81 = vector.load %arg25[%80, %c0_63] : memref<112x128xf32, #tpu.memory_space<vmem>>, vector<80x128xf32>
    %c6 = arith.constant 6 : index
    %c0_64 = arith.constant 0 : index
    %c0_65 = arith.constant 0 : index
    %82 = vector.load %arg8[%c6, %c0_64, %c0_65] : memref<9x128x128xf32, #tpu.memory_space<vmem>>, vector<1x128x128xf32>
    %83 = vector.shape_cast %82 : vector<1x128x128xf32> to vector<128x128xf32>
    %cst_66 = arith.constant dense<0.000000e+00> : vector<80x128xf32>
    %84 = tpu.matmul %81, %83, %cst_66 {dimension_numbers = #tpu.dot_dimension_numbers<[1], [0], [0], [1], [0, 0, 1, 1], [], []>} : vector<80x128xf32>, vector<128x128xf32>, vector<80x128xf32> -> vector<80x128xf32>
    %85 = arith.addf %77, %84 : vector<80x128xf32>
    %c20_i32_67 = arith.constant 20 : i32
    %86 = arith.addi %28, %c20_i32_67 : i32
    %c1_i32_68 = arith.constant 1 : i32
    %87 = arith.addi %86, %c1_i32_68 : i32
    %88 = arith.index_cast %87 : i32 to index
    %c0_69 = arith.constant 0 : index
    %89 = vector.load %arg25[%88, %c0_69] : memref<112x128xf32, #tpu.memory_space<vmem>>, vector<80x128xf32>
    %c7 = arith.constant 7 : index
    %c0_70 = arith.constant 0 : index
    %c0_71 = arith.constant 0 : index
    %90 = vector.load %arg8[%c7, %c0_70, %c0_71] : memref<9x128x128xf32, #tpu.memory_space<vmem>>, vector<1x128x128xf32>
    %91 = vector.shape_cast %90 : vector<1x128x128xf32> to vector<128x128xf32>
    %cst_72 = arith.constant dense<0.000000e+00> : vector<80x128xf32>
    %92 = tpu.matmul %89, %91, %cst_72 {dimension_numbers = #tpu.dot_dimension_numbers<[1], [0], [0], [1], [0, 0, 1, 1], [], []>} : vector<80x128xf32>, vector<128x128xf32>, vector<80x128xf32> -> vector<80x128xf32>
    %93 = arith.addf %85, %92 : vector<80x128xf32>
    %c20_i32_73 = arith.constant 20 : i32
    %94 = arith.addi %28, %c20_i32_73 : i32
    %c2_i32_74 = arith.constant 2 : i32
    %95 = arith.addi %94, %c2_i32_74 : i32
    %96 = arith.index_cast %95 : i32 to index
    %c0_75 = arith.constant 0 : index
    %97 = vector.load %arg25[%96, %c0_75] : memref<112x128xf32, #tpu.memory_space<vmem>>, vector<80x128xf32>
    %c8 = arith.constant 8 : index
    %c0_76 = arith.constant 0 : index
    %c0_77 = arith.constant 0 : index
    %98 = vector.load %arg8[%c8, %c0_76, %c0_77] : memref<9x128x128xf32, #tpu.memory_space<vmem>>, vector<1x128x128xf32>
    %99 = vector.shape_cast %98 : vector<1x128x128xf32> to vector<128x128xf32>
    %cst_78 = arith.constant dense<0.000000e+00> : vector<80x128xf32>
    %100 = tpu.matmul %97, %99, %cst_78 {dimension_numbers = #tpu.dot_dimension_numbers<[1], [0], [0], [1], [0, 0, 1, 1], [], []>} : vector<80x128xf32>, vector<128x128xf32>, vector<80x128xf32> -> vector<80x128xf32>
    %101 = arith.addf %93, %100 : vector<80x128xf32>
    %c0_79 = arith.constant 0 : index
    %c0_80 = arith.constant 0 : index
    %102 = vector.load %arg9[%c0_79, %c0_80] : memref<1x128xf32, #tpu.memory_space<vmem>>, vector<1x128xf32>
    %103 = vector.broadcast %102 : vector<1x128xf32> to vector<80x128xf32>
    %104 = arith.addf %101, %103 : vector<80x128xf32>
    %cst_81 = arith.constant 0.000000e+00 : f32
    %105 = vector.broadcast %cst_81 : f32 to vector<80x128xf32>
    %106 = arith.cmpf oge, %104, %105 : vector<80x128xf32>
    %c0_82 = arith.constant 0 : index
    %c0_83 = arith.constant 0 : index
    %107 = vector.load %arg10[%c0_82, %c0_83] : memref<1x128xf32, #tpu.memory_space<vmem>>, vector<1x128xf32>
    %108 = vector.broadcast %107 : vector<1x128xf32> to vector<80x128xf32>
    %109 = arith.mulf %108, %104 : vector<80x128xf32>
    %110 = arith.select %106, %104, %109 : vector<80x128xi1>, vector<80x128xf32>
    %111 = tpu.iota {dimensions = array<i32: 0>} : vector<80x1xi32>
    %112 = vector.broadcast %28 : i32 to vector<80x1xi32>
    %113 = arith.addi %112, %111 : vector<80x1xi32>
    %c10_i32_84 = arith.constant 10 : i32
    %c0_i32_85 = arith.constant 0 : i32
    %114 = arith.cmpi eq, %c10_i32_84, %c0_i32_85 : i32
    %c1_i32_86 = arith.constant 1 : i32
    %115 = arith.select %114, %c1_i32_86, %c10_i32_84 : i32
    %116 = vector.broadcast %115 : i32 to vector<80x1xi32>
    %117 = arith.remsi %113, %116 : vector<80x1xi32>
    %c0_i32_87 = arith.constant 0 : i32
    %118 = vector.broadcast %c0_i32_87 : i32 to vector<80x1xi32>
    %119 = arith.cmpi ne, %117, %118 : vector<80x1xi32>
    %c0_i32_88 = arith.constant 0 : i32
    %120 = vector.broadcast %c0_i32_88 : i32 to vector<80x1xi32>
    %121 = arith.cmpi slt, %117, %120 : vector<80x1xi32>
    %c0_i32_89 = arith.constant 0 : i32
    %122 = arith.cmpi slt, %115, %c0_i32_89 : i32
    %123 = vector.broadcast %122 : i1 to vector<80x1xi1>
    %124 = vector.broadcast %123 : vector<80x1xi1> to vector<80x1xi1>
    %125 = arith.xori %121, %124 : vector<80x1xi1>
    %126 = arith.andi %125, %119 : vector<80x1xi1>
    %127 = vector.broadcast %115 : i32 to vector<80x1xi32>
    %128 = arith.addi %117, %127 : vector<80x1xi32>
    %129 = arith.select %126, %128, %117 : vector<80x1xi1>, vector<80x1xi32>
    %c8_i32 = arith.constant 8 : i32
    %130 = vector.broadcast %c8_i32 : i32 to vector<80x1xi32>
    %131 = arith.cmpi sge, %129, %130 : vector<80x1xi32>
    %cst_90 = arith.constant -1.000000e+30 : f32
    %132 = vector.shape_cast %131 : vector<80x1xi1> to vector<80x1xi1>
    %133 = vector.broadcast %132 : vector<80x1xi1> to vector<80x128xi1>
    %134 = vector.broadcast %cst_90 : f32 to vector<80x128xf32>
    %135 = arith.select %133, %134, %110 : vector<80x128xi1>, vector<80x128xf32>
    %136 = arith.index_cast %28 : i32 to index
    %c0_91 = arith.constant 0 : index
    %137 = vector.load %arg26[%136, %c0_91] : memref<80x128xf32, #tpu.memory_space<vmem>>, vector<80x128xf32>
    tpu.vector_store %arg26[%136, %c0_91], %135 {strides = array<i32>} : memref<80x128xf32, #tpu.memory_space<vmem>>, vector<80x128xf32>,
    %c1_i32_92 = arith.constant 1 : i32
    %138 = tpu.iota {dimensions = array<i32: 0>} : vector<4x9xi32>
    %139 = tpu.iota {dimensions = array<i32: 1>} : vector<4x9xi32>
    %c2_i32_93 = arith.constant 2 : i32
    %140 = vector.broadcast %c2_i32_93 : i32 to vector<4x9xi32>
    %141 = arith.muli %140, %138 : vector<4x9xi32>
    %142 = arith.cmpi eq, %139, %141 : vector<4x9xi32>
    %cst_94 = arith.constant 1.000000e+00 : f32
    %cst_95 = arith.constant 0.000000e+00 : f32
    %143 = vector.broadcast %cst_94 : f32 to vector<4x9xf32>
    %144 = vector.broadcast %cst_95 : f32 to vector<4x9xf32>
    %145 = arith.select %142, %143, %144 : vector<4x9xi1>, vector<4x9xf32>
    %c0_i32_96 = arith.constant 0 : i32
    %c4_i32 = arith.constant 4 : i32
    %146 = arith.addi %c0_i32_96, %c4_i32 : i32
    %c1_i32_97 = arith.constant 1 : i32
    scf.for %arg29 = %c0_i32_96 to %146 step %c1_i32_97  : i32 {
      %c2_i32_157 = arith.constant 2 : i32
      %224 = arith.muli %c2_i32_157, %arg29 : i32
      %c10_i32_158 = arith.constant 10 : i32
      %225 = arith.muli %224, %c10_i32_158 : i32
      %226 = arith.index_cast %225 : i32 to index
      %c0_159 = arith.constant 0 : index
      %227 = vector.load %arg26[%226, %c0_159] : memref<80x128xf32, #tpu.memory_space<vmem>>, vector<10x128xf32>
      %c2_i32_160 = arith.constant 2 : i32
      %228 = arith.muli %c2_i32_160, %arg29 : i32
      %c1_i32_161 = arith.constant 1 : i32
      %229 = arith.addi %228, %c1_i32_161 : i32
      %c10_i32_162 = arith.constant 10 : i32
      %230 = arith.muli %229, %c10_i32_162 : i32
      %231 = arith.index_cast %230 : i32 to index
      %c0_163 = arith.constant 0 : index
      %232 = vector.load %arg26[%231, %c0_163] : memref<80x128xf32, #tpu.memory_space<vmem>>, vector<10x128xf32>
      %233 = arith.maximumf %227, %232 : vector<10x128xf32>
      %234 = vector.extract_strided_slice %233 {offsets = [0, 0], sizes = [9, 128], strides = [1, 1]} : vector<10x128xf32> to vector<9x128xf32>
      %235 = vector.extract_strided_slice %233 {offsets = [1, 0], sizes = [9, 128], strides = [1, 1]} : vector<10x128xf32> to vector<9x128xf32>
      %236 = arith.maximumf %234, %235 : vector<9x128xf32>
      %cst_164 = arith.constant dense<0.000000e+00> : vector<4x128xf32>
      %237 = tpu.matmul %145, %236, %cst_164 {dimension_numbers = #tpu.dot_dimension_numbers<[1], [0], [0], [1], [0, 0, 1, 1], [], []>} : vector<4x9xf32>, vector<9x128xf32>, vector<4x128xf32> -> vector<4x128xf32>
      %c4_i32_165 = arith.constant 4 : i32
      %238 = arith.muli %arg29, %c4_i32_165 : i32
      %239 = arith.index_cast %238 : i32 to index
      %c0_166 = arith.constant 0 : index
      %240 = vector.load %arg27[%239, %c0_166] : memref<24x128xf32, #tpu.memory_space<vmem>>, vector<4x128xf32>
      tpu.vector_store %arg27[%239, %c0_166], %237 {strides = array<i32>} : memref<24x128xf32, #tpu.memory_space<vmem>>, vector<4x128xf32>,
    }
    %c4_i32_98 = arith.constant 4 : i32
    %cst_99 = arith.constant 0.000000e+00 : f32
    %147 = vector.broadcast %cst_99 : f32 to vector<12x128xf32>
    %c0_100 = arith.constant 0 : index
    %c0_101 = arith.constant 0 : index
    %148 = vector.load %arg27[%c0_100, %c0_101] : memref<24x128xf32, #tpu.memory_space<vmem>>, vector<12x128xf32>
    %c0_102 = arith.constant 0 : index
    %c0_103 = arith.constant 0 : index
    %c0_104 = arith.constant 0 : index
    %149 = vector.load %arg11[%c0_102, %c0_103, %c0_104] : memref<4x128x128xf32, #tpu.memory_space<vmem>>, vector<1x128x128xf32>
    %150 = vector.shape_cast %149 : vector<1x128x128xf32> to vector<128x128xf32>
    %cst_105 = arith.constant dense<0.000000e+00> : vector<12x128xf32>
    %151 = tpu.matmul %148, %150, %cst_105 {dimension_numbers = #tpu.dot_dimension_numbers<[1], [0], [0], [1], [0, 0, 1, 1], [], []>} : vector<12x128xf32>, vector<128x128xf32>, vector<12x128xf32> -> vector<12x128xf32>
    %152 = arith.addf %147, %151 : vector<12x128xf32>
    %c1_106 = arith.constant 1 : index
    %c0_107 = arith.constant 0 : index
    %153 = vector.load %arg27[%c1_106, %c0_107] : memref<24x128xf32, #tpu.memory_space<vmem>>, vector<12x128xf32>
    %c1_108 = arith.constant 1 : index
    %c0_109 = arith.constant 0 : index
    %c0_110 = arith.constant 0 : index
    %154 = vector.load %arg11[%c1_108, %c0_109, %c0_110] : memref<4x128x128xf32, #tpu.memory_space<vmem>>, vector<1x128x128xf32>
    %155 = vector.shape_cast %154 : vector<1x128x128xf32> to vector<128x128xf32>
    %cst_111 = arith.constant dense<0.000000e+00> : vector<12x128xf32>
    %156 = tpu.matmul %153, %155, %cst_111 {dimension_numbers = #tpu.dot_dimension_numbers<[1], [0], [0], [1], [0, 0, 1, 1], [], []>} : vector<12x128xf32>, vector<128x128xf32>, vector<12x128xf32> -> vector<12x128xf32>
    %157 = arith.addf %152, %156 : vector<12x128xf32>
    %c4_112 = arith.constant 4 : index
    %c0_113 = arith.constant 0 : index
    %158 = vector.load %arg27[%c4_112, %c0_113] : memref<24x128xf32, #tpu.memory_space<vmem>>, vector<12x128xf32>
    %c2_114 = arith.constant 2 : index
    %c0_115 = arith.constant 0 : index
    %c0_116 = arith.constant 0 : index
    %159 = vector.load %arg11[%c2_114, %c0_115, %c0_116] : memref<4x128x128xf32, #tpu.memory_space<vmem>>, vector<1x128x128xf32>
    %160 = vector.shape_cast %159 : vector<1x128x128xf32> to vector<128x128xf32>
    %cst_117 = arith.constant dense<0.000000e+00> : vector<12x128xf32>
    %161 = tpu.matmul %158, %160, %cst_117 {dimension_numbers = #tpu.dot_dimension_numbers<[1], [0], [0], [1], [0, 0, 1, 1], [], []>} : vector<12x128xf32>, vector<128x128xf32>, vector<12x128xf32> -> vector<12x128xf32>
    %162 = arith.addf %157, %161 : vector<12x128xf32>
    %c5_118 = arith.constant 5 : index
    %c0_119 = arith.constant 0 : index
    %163 = vector.load %arg27[%c5_118, %c0_119] : memref<24x128xf32, #tpu.memory_space<vmem>>, vector<12x128xf32>
    %c3_120 = arith.constant 3 : index
    %c0_121 = arith.constant 0 : index
    %c0_122 = arith.constant 0 : index
    %164 = vector.load %arg11[%c3_120, %c0_121, %c0_122] : memref<4x128x128xf32, #tpu.memory_space<vmem>>, vector<1x128x128xf32>
    %165 = vector.shape_cast %164 : vector<1x128x128xf32> to vector<128x128xf32>
    %cst_123 = arith.constant dense<0.000000e+00> : vector<12x128xf32>
    %166 = tpu.matmul %163, %165, %cst_123 {dimension_numbers = #tpu.dot_dimension_numbers<[1], [0], [0], [1], [0, 0, 1, 1], [], []>} : vector<12x128xf32>, vector<128x128xf32>, vector<12x128xf32> -> vector<12x128xf32>
    %167 = arith.addf %162, %166 : vector<12x128xf32>
    %c0_124 = arith.constant 0 : index
    %c0_125 = arith.constant 0 : index
    %168 = vector.load %arg12[%c0_124, %c0_125] : memref<1x128xf32, #tpu.memory_space<vmem>>, vector<1x128xf32>
    %169 = vector.broadcast %168 : vector<1x128xf32> to vector<12x128xf32>
    %170 = arith.addf %167, %169 : vector<12x128xf32>
    %cst_126 = arith.constant 0.000000e+00 : f32
    %171 = vector.broadcast %cst_126 : f32 to vector<12x128xf32>
    %172 = arith.cmpf oge, %170, %171 : vector<12x128xf32>
    %c0_127 = arith.constant 0 : index
    %c0_128 = arith.constant 0 : index
    %173 = vector.load %arg13[%c0_127, %c0_128] : memref<1x128xf32, #tpu.memory_space<vmem>>, vector<1x128xf32>
    %174 = vector.broadcast %173 : vector<1x128xf32> to vector<12x128xf32>
    %175 = arith.mulf %174, %170 : vector<12x128xf32>
    %176 = arith.select %172, %170, %175 : vector<12x128xi1>, vector<12x128xf32>
    %177 = vector.extract_strided_slice %176 {offsets = [0, 0], sizes = [1, 128], strides = [1, 1]} : vector<12x128xf32> to vector<1x128xf32>
    %178 = vector.extract_strided_slice %176 {offsets = [4, 0], sizes = [1, 128], strides = [1, 1]} : vector<12x128xf32> to vector<1x128xf32>
    %179 = vector.extract_strided_slice %176 {offsets = [8, 0], sizes = [1, 128], strides = [1, 1]} : vector<12x128xf32> to vector<1x128xf32>
    %180 = vector.extract_strided_slice %176 {offsets = [1, 0], sizes = [1, 128], strides = [1, 1]} : vector<12x128xf32> to vector<1x128xf32>
    %181 = vector.extract_strided_slice %176 {offsets = [5, 0], sizes = [1, 128], strides = [1, 1]} : vector<12x128xf32> to vector<1x128xf32>
    %182 = vector.extract_strided_slice %176 {offsets = [9, 0], sizes = [1, 128], strides = [1, 1]} : vector<12x128xf32> to vector<1x128xf32>
    %183 = vector.extract_strided_slice %176 {offsets = [2, 0], sizes = [1, 128], strides = [1, 1]} : vector<12x128xf32> to vector<1x128xf32>
    %184 = vector.extract_strided_slice %176 {offsets = [6, 0], sizes = [1, 128], strides = [1, 1]} : vector<12x128xf32> to vector<1x128xf32>
    %185 = vector.extract_strided_slice %176 {offsets = [10, 0], sizes = [1, 128], strides = [1, 1]} : vector<12x128xf32> to vector<1x128xf32>
    %186 = tpu.concatenate %177, %178, %179, %180, %181, %182, %183, %184, %185 in 1 : vector<1x128xf32>, vector<1x128xf32>, vector<1x128xf32>, vector<1x128xf32>, vector<1x128xf32>, vector<1x128xf32>, vector<1x128xf32>, vector<1x128xf32>, vector<1x128xf32> -> vector<1x1152xf32>
    %187 = arith.index_cast %c0_i32 : i32 to index
    %c0_129 = arith.constant 0 : index
    %188 = vector.load %arg28[%187, %c0_129] : memref<1x1152xf32, #tpu.memory_space<vmem>>, vector<1x1152xf32>
    tpu.vector_store %arg28[%187, %c0_129], %186 {strides = array<i32>} : memref<1x1152xf32, #tpu.memory_space<vmem>>, vector<1x1152xf32>,
    %c1_i32_130 = arith.constant 1 : i32
    %c0_131 = arith.constant 0 : index
    %c0_132 = arith.constant 0 : index
    %189 = vector.load %arg28[%c0_131, %c0_132] : memref<1x1152xf32, #tpu.memory_space<vmem>>, vector<1x1152xf32>
    %c0_133 = arith.constant 0 : index
    %c0_134 = arith.constant 0 : index
    %190 = vector.load %arg14[%c0_133, %c0_134] : memref<1152x256xf32, #tpu.memory_space<vmem>>, vector<1152x256xf32>
    %cst_135 = arith.constant dense<0.000000e+00> : vector<1x256xf32>
    %191 = tpu.matmul %189, %190, %cst_135 {dimension_numbers = #tpu.dot_dimension_numbers<[1], [0], [0], [1], [0, 0, 1, 1], [], []>} : vector<1x1152xf32>, vector<1152x256xf32>, vector<1x256xf32> -> vector<1x256xf32>
    %c0_136 = arith.constant 0 : index
    %c0_137 = arith.constant 0 : index
    %192 = vector.load %arg15[%c0_136, %c0_137] : memref<1x256xf32, #tpu.memory_space<vmem>>, vector<1x256xf32>
    %193 = arith.addf %191, %192 : vector<1x256xf32>
    %cst_138 = arith.constant 0.000000e+00 : f32
    %194 = vector.broadcast %cst_138 : f32 to vector<1x256xf32>
    %195 = arith.cmpf oge, %193, %194 : vector<1x256xf32>
    %c0_139 = arith.constant 0 : index
    %c0_140 = arith.constant 0 : index
    %196 = vector.load %arg16[%c0_139, %c0_140] : memref<1x256xf32, #tpu.memory_space<vmem>>, vector<1x256xf32>
    %197 = arith.mulf %196, %193 : vector<1x256xf32>
    %198 = arith.select %195, %193, %197 : vector<1x256xi1>, vector<1x256xf32>
    %c0_141 = arith.constant 0 : index
    %c0_142 = arith.constant 0 : index
    %199 = vector.load %arg17[%c0_141, %c0_142] : memref<256x16xf32, #tpu.memory_space<vmem>>, vector<256x16xf32>
    %cst_143 = arith.constant dense<0.000000e+00> : vector<1x16xf32>
    %200 = tpu.matmul %198, %199, %cst_143 {dimension_numbers = #tpu.dot_dimension_numbers<[1], [0], [0], [1], [0, 0, 1, 1], [], []>} : vector<1x256xf32>, vector<256x16xf32>, vector<1x16xf32> -> vector<1x16xf32>
    %c0_144 = arith.constant 0 : index
    %c0_145 = arith.constant 0 : index
    %201 = vector.load %arg18[%c0_144, %c0_145] : memref<1x16xf32, #tpu.memory_space<vmem>>, vector<1x16xf32>
    %202 = arith.addf %200, %201 : vector<1x16xf32>
    %203 = vector.extract_strided_slice %202 {offsets = [0, 0], sizes = [1, 2], strides = [1, 1]} : vector<1x16xf32> to vector<1x2xf32>
    %cst_146 = arith.constant dense<0xFF800000> : vector<1xf32>
    %204 = vector.multi_reduction <maximumf>, %203, %cst_146 [1] : vector<1x2xf32> to vector<1xf32>
    %205 = vector.shape_cast %204 : vector<1xf32> to vector<1x1xf32>
    %206 = vector.broadcast %205 : vector<1x1xf32> to vector<1x2xf32>
    %207 = arith.subf %203, %206 : vector<1x2xf32>
    %208 = math.exp %207 : vector<1x2xf32>
    %cst_147 = arith.constant dense<0.000000e+00> : vector<1xf32>
    %209 = vector.multi_reduction <add>, %208, %cst_147 [1] : vector<1x2xf32> to vector<1xf32>
    %210 = vector.shape_cast %209 : vector<1xf32> to vector<1x1xf32>
    %211 = vector.broadcast %210 : vector<1x1xf32> to vector<1x2xf32>
    %212 = arith.divf %208, %211 : vector<1x2xf32>
    %c0_148 = arith.constant 0 : index
    %c0_149 = arith.constant 0 : index
    %c0_150 = arith.constant 0 : index
    %213 = vector.load %arg20[%c0_148, %c0_149, %c0_150] : memref<1x1x2xf32, #tpu.memory_space<vmem>>, vector<1x1x2xf32>
    %214 = vector.shape_cast %213 : vector<1x1x2xf32> to vector<1x2xf32>
    %215 = vector.shape_cast %212 : vector<1x2xf32> to vector<1x1x2xf32>
    tpu.vector_store %arg20[%c0_148, %c0_149, %c0_150], %215 {strides = array<i32>} : memref<1x1x2xf32, #tpu.memory_space<vmem>>, vector<1x1x2xf32>,
    %216 = vector.extract_strided_slice %202 {offsets = [0, 2], sizes = [1, 4], strides = [1, 1]} : vector<1x16xf32> to vector<1x4xf32>
    %c0_151 = arith.constant 0 : index
    %c0_152 = arith.constant 0 : index
    %c0_153 = arith.constant 0 : index
    %217 = vector.load %arg19[%c0_151, %c0_152, %c0_153] : memref<1x1x4xf32, #tpu.memory_space<vmem>>, vector<1x1x4xf32>
    %218 = vector.shape_cast %217 : vector<1x1x4xf32> to vector<1x4xf32>
    %219 = vector.shape_cast %216 : vector<1x4xf32> to vector<1x1x4xf32>
    tpu.vector_store %arg19[%c0_151, %c0_152, %c0_153], %219 {strides = array<i32>} : memref<1x1x4xf32, #tpu.memory_space<vmem>>, vector<1x1x4xf32>,
    %220 = vector.extract_strided_slice %202 {offsets = [0, 6], sizes = [1, 10], strides = [1, 1]} : vector<1x16xf32> to vector<1x10xf32>
    %c0_154 = arith.constant 0 : index
    %c0_155 = arith.constant 0 : index
    %c0_156 = arith.constant 0 : index
    %221 = vector.load %arg21[%c0_154, %c0_155, %c0_156] : memref<1x1x10xf32, #tpu.memory_space<vmem>>, vector<1x1x10xf32>
    %222 = vector.shape_cast %221 : vector<1x1x10xf32> to vector<1x10xf32>
    %223 = vector.shape_cast %220 : vector<1x10xf32> to vector<1x1x10xf32>
    tpu.vector_store %arg21[%c0_154, %c0_155, %c0_156], %223 {strides = array<i32>} : memref<1x1x10xf32, #tpu.memory_space<vmem>>, vector<1x1x10xf32>,
    return
  }
  func.func @transform_0(%arg0: i32) -> (i32, i32, i32) {
    %c0_i32 = arith.constant 0 : i32
    %c0_i32_0 = arith.constant 0 : i32
    %c0_i32_1 = arith.constant 0 : i32
    return %arg0, %c0_i32, %c0_i32_0 : i32, i32, i32
  }
  func.func @transform_1(%arg0: i32) -> (i32, i32, i32) {
    %c0_i32 = arith.constant 0 : i32
    %c0_i32_0 = arith.constant 0 : i32
    %c0_i32_1 = arith.constant 0 : i32
    %c0_i32_2 = arith.constant 0 : i32
    return %c0_i32, %c0_i32_0, %c0_i32_1 : i32, i32, i32
  }
  func.func @transform_2(%arg0: i32) -> (i32, i32) {
    %c0_i32 = arith.constant 0 : i32
    %c0_i32_0 = arith.constant 0 : i32
    %c0_i32_1 = arith.constant 0 : i32
    return %c0_i32, %c0_i32_0 : i32, i32
  }
  func.func @transform_3(%arg0: i32) -> (i32, i32) {
    %c0_i32 = arith.constant 0 : i32
    %c0_i32_0 = arith.constant 0 : i32
    %c0_i32_1 = arith.constant 0 : i32
    return %c0_i32, %c0_i32_0 : i32, i32
  }
  func.func @transform_4(%arg0: i32) -> (i32, i32, i32) {
    %c0_i32 = arith.constant 0 : i32
    %c0_i32_0 = arith.constant 0 : i32
    %c0_i32_1 = arith.constant 0 : i32
    %c0_i32_2 = arith.constant 0 : i32
    return %c0_i32, %c0_i32_0, %c0_i32_1 : i32, i32, i32
  }
  func.func @transform_5(%arg0: i32) -> (i32, i32) {
    %c0_i32 = arith.constant 0 : i32
    %c0_i32_0 = arith.constant 0 : i32
    %c0_i32_1 = arith.constant 0 : i32
    return %c0_i32, %c0_i32_0 : i32, i32
  }
  func.func @transform_6(%arg0: i32) -> (i32, i32) {
    %c0_i32 = arith.constant 0 : i32
    %c0_i32_0 = arith.constant 0 : i32
    %c0_i32_1 = arith.constant 0 : i32
    return %c0_i32, %c0_i32_0 : i32, i32
  }
  func.func @transform_7(%arg0: i32) -> (i32, i32, i32) {
    %c0_i32 = arith.constant 0 : i32
    %c0_i32_0 = arith.constant 0 : i32
    %c0_i32_1 = arith.constant 0 : i32
    %c0_i32_2 = arith.constant 0 : i32
    return %c0_i32, %c0_i32_0, %c0_i32_1 : i32, i32, i32
  }
  func.func @transform_8(%arg0: i32) -> (i32, i32) {
    %c0_i32 = arith.constant 0 : i32
    %c0_i32_0 = arith.constant 0 : i32
    %c0_i32_1 = arith.constant 0 : i32
    return %c0_i32, %c0_i32_0 : i32, i32
  }
  func.func @transform_9(%arg0: i32) -> (i32, i32) {
    %c0_i32 = arith.constant 0 : i32
    %c0_i32_0 = arith.constant 0 : i32
    %c0_i32_1 = arith.constant 0 : i32
    return %c0_i32, %c0_i32_0 : i32, i32
  }
  func.func @transform_10(%arg0: i32) -> (i32, i32, i32) {
    %c0_i32 = arith.constant 0 : i32
    %c0_i32_0 = arith.constant 0 : i32
    %c0_i32_1 = arith.constant 0 : i32
    %c0_i32_2 = arith.constant 0 : i32
    return %c0_i32, %c0_i32_0, %c0_i32_1 : i32, i32, i32
  }
  func.func @transform_11(%arg0: i32) -> (i32, i32) {
    %c0_i32 = arith.constant 0 : i32
    %c0_i32_0 = arith.constant 0 : i32
    %c0_i32_1 = arith.constant 0 : i32
    return %c0_i32, %c0_i32_0 : i32, i32
  }
  func.func @transform_12(%arg0: i32) -> (i32, i32) {
    %c0_i32 = arith.constant 0 : i32
    %c0_i32_0 = arith.constant 0 : i32
    %c0_i32_1 = arith.constant 0 : i32
    return %c0_i32, %c0_i32_0 : i32, i32
  }
  func.func @transform_13(%arg0: i32) -> (i32, i32) {
    %c0_i32 = arith.constant 0 : i32
    %c0_i32_0 = arith.constant 0 : i32
    %c0_i32_1 = arith.constant 0 : i32
    return %c0_i32, %c0_i32_0 : i32, i32
  }
  func.func @transform_14(%arg0: i32) -> (i32, i32) {
    %c0_i32 = arith.constant 0 : i32
    %c0_i32_0 = arith.constant 0 : i32
    %c0_i32_1 = arith.constant 0 : i32
    return %c0_i32, %c0_i32_0 : i32, i32
  }
  func.func @transform_15(%arg0: i32) -> (i32, i32) {
    %c0_i32 = arith.constant 0 : i32
    %c0_i32_0 = arith.constant 0 : i32
    %c0_i32_1 = arith.constant 0 : i32
    return %c0_i32, %c0_i32_0 : i32, i32
  }
  func.func @transform_16(%arg0: i32) -> (i32, i32) {
    %c0_i32 = arith.constant 0 : i32
    %c0_i32_0 = arith.constant 0 : i32
    %c0_i32_1 = arith.constant 0 : i32
    return %c0_i32, %c0_i32_0 : i32, i32
  }
  func.func @transform_17(%arg0: i32) -> (i32, i32) {
    %c0_i32 = arith.constant 0 : i32
    %c0_i32_0 = arith.constant 0 : i32
    %c0_i32_1 = arith.constant 0 : i32
    return %c0_i32, %c0_i32_0 : i32, i32
  }
  func.func @transform_18(%arg0: i32) -> (i32, i32, i32) {
    %c0_i32 = arith.constant 0 : i32
    %c0_i32_0 = arith.constant 0 : i32
    %c0_i32_1 = arith.constant 0 : i32
    return %arg0, %c0_i32, %c0_i32_0 : i32, i32, i32
  }
  func.func @transform_19(%arg0: i32) -> (i32, i32, i32) {
    %c0_i32 = arith.constant 0 : i32
    %c0_i32_0 = arith.constant 0 : i32
    %c0_i32_1 = arith.constant 0 : i32
    return %arg0, %c0_i32, %c0_i32_0 : i32, i32, i32
  }
  func.func @transform_20(%arg0: i32) -> (i32, i32, i32) {
    %c0_i32 = arith.constant 0 : i32
    %c0_i32_0 = arith.constant 0 : i32
    %c0_i32_1 = arith.constant 0 : i32
    return %arg0, %c0_i32, %c0_i32_0 : i32, i32, i32
  }
}

</mosaic_0001>

<bundles_post_ra>
// kernel: onet_forward.1
= control target key start
LH: loop header
LB: loop body
LE: loop exit
PB: predicated region body
PF: predicated region fallthrough
CT: control target
= control target key end

     0   :  { %s11420_s0 = inlined_call_operand.vmem [shape: f32[2,2312,3], index: 0, kind: input, shape index: {}]   ;;  %s11421_s1 = inlined_call_operand.vmem [shape: f32[9,3,128], index: 1, kind: input, shape index: {}]   ;;  %s11422_s2 = inlined_call_operand.vmem [shape: f32[1,128], index: 2, kind: input, shape index: {}]   ;;  %s11423_s3 = inlined_call_operand.vmem [shape: f32[1,128], index: 3, kind: input, shape index: {}]   ;;  %s11424_s4 = inlined_call_operand.vmem [shape: f32[9,128,128], index: 4, kind: input, shape index: {}]   ;;  %s11425_s5 = inlined_call_operand.vmem [shape: f32[1,128], index: 5, kind: input, shape index: {}]   ;;  %s11426_s6 = inlined_call_operand.vmem [shape: f32[1,128], index: 6, kind: input, shape index: {}]   ;;  %s11427_s7 = inlined_call_operand.vmem [shape: f32[9,128,128], index: 7, kind: input, shape index: {}]   ;;  %s11428_s8 = inlined_call_operand.vmem [shape: f32[1,128], index: 8, kind: input, shape index: {}]   ;;  %s11429_s9 = inlined_call_operand.vmem [shape: f32[1,128], index: 9, kind: input, shape index: {}]   ;;  %s11430_s10 = inlined_call_operand.vmem [shape: f32[4,128,128], index: 10, kind: input, shape index: {}]   ;;  %s11431_s11 = inlined_call_operand.vmem [shape: f32[1,128], index: 11, kind: input, shape index: {}]   ;;  %s11432_s12 = inlined_call_operand.vmem [shape: f32[1,128], index: 12, kind: input, shape index: {}]   ;;  %s11433_s13 = inlined_call_operand.vmem [shape: f32[1152,256], index: 13, kind: input, shape index: {}]   ;;  %s11434_s14 = inlined_call_operand.vmem [shape: f32[1,256], index: 14, kind: input, shape index: {}]   ;;  %s11435_s15 = inlined_call_operand.vmem [shape: f32[1,256], index: 15, kind: input, shape index: {}]   ;;  %s11436_s16 = inlined_call_operand.vmem [shape: f32[256,16], index: 16, kind: input, shape index: {}]   ;;  %s11437_s17 = inlined_call_operand.vmem [shape: f32[1,16], index: 17, kind: input, shape index: {}]   ;;  %s11438_s18 = inlined_call_operand.hbm [shape: f32[2,1,4], index: 18, kind: output, shape index: {0}]   ;;  %s11439_s19 = inlined_call_operand.hbm [shape: f32[2,1,2], index: 19, kind: output, shape index: {1}]   ;;  %s11440_s20 = inlined_call_operand.hbm [shape: f32[2,1,10], index: 20, kind: output, shape index: {2}]  }
   0x1   :  { %11455 = sst [smem:[#allocation23_spill]] %s11420_s0 }
   0x2   :  { %11456 = sst [smem:[#allocation24_spill]] %s11421_s1 }
   0x3   :  { %11457 = sst [smem:[#allocation25_spill]] %s11422_s2 }
   0x4   :  { %11458 = sst [smem:[#allocation26_spill]] %s11423_s3 }
   0x5   :  { %11459 = sst [smem:[#allocation27_spill]] %s11424_s4 }
   0x6   :  { %11460 = sst [smem:[#allocation28_spill]] %s11425_s5 }
   0x7   :  { %11461 = sst [smem:[#allocation29_spill]] %s11426_s6 }
   0x8   :  { %11462 = sst [smem:[#allocation30_spill]] %s11439_s19 }
   0x9   :  { %11463 = sst [smem:[#allocation31_spill]] %s11440_s20 }
   0xa   :  { %26 = vsyncpa [#allocation10], 0 }
   0xb   :  { %28 = vsyncpa [#allocation10 + $0x1], 0 }
   0xc   :  { %29 = vsyncpa [#allocation12], 0 }
   0xd   :  { %31 = vsyncpa [#allocation12 + $0x1], 0  ;;  %s7332_s1 = smov 0   ;;  %s7334_s22 = smov 0  }
   0xe   :  { %s7336_s23 = smov 0   ;;  %s7338_s24 = smov 0  }
   0xf LB: > { %11464 = sst [smem:[#allocation16_spill]] %s7186_s1  ;;  %s7353_s2 = sadd.s32 4294967295, %s7198_s24   ;;  %s7198_s24 = sphi %s7338_s24, %s11586_s24   ;;  %s7194_s23 = sphi %s7336_s23, %s11589_s23   ;;  %s7190_s22 = sphi %s7334_s22, %s11588_s22   ;;  %s7186_s1 = sphi %s7332_s1, %s11587_s1  }
  0x10   : > { %11465 = sst [smem:[#allocation17_spill]] %s7190_s22  ;;  %s11443_s25 = sadd.s32 4294967294, %s7198_s24  }
  0x11   : > { %11466 = sst [smem:[#allocation18_spill]] %s7194_s23  ;;  %s7357_s3 = sadd.s32 1, %s7198_s24  }
  0x12   : > { %11467 = sst [smem:[#allocation19_spill]] %s7198_s24  ;;  %s427_s26 = sadd.s32 1, %s7194_s23 }
  0x13   : > { %11468 = sst [smem:[#allocation20_spill]] %s7357_s3  ;;  %s424_s27 = ssub.s32 %s7198_s24, %s7357_s3 }
  0x14   : > { %p437_p0 = scmp.ne.s32.totalorder %s7194_s23, %s7190_s22  ;;  %p425_p1 = scmp.eq.s32.totalorder %s424_s27, 0 }
  0x15   : > { %p438_p2 = scmp.eq.s32.totalorder %s7353_s2, 1  ;;  %p443_p3 = scmp.ne.s32.totalorder %s7190_s22, %s7186_s1 }
  0x16   : > { %p444_p4 = scmp.eq.s32.totalorder %s11443_s25, 1  ;;  %p6185_p7 = scmp.ge.s32.totalorder %s7198_s24, 1 }
  0x17   : > { %s7370_s28 = scalar_select %p425_p1, %s7194_s23, %s427_s26  }
  0x18   : > { %p7372_p5 = por %p438_p2, %p437_p0  ;;  %p7376_p6 = por %p444_p4, %p443_p3 }
  0x19   : > { %11469 = sst [smem:[#allocation21_spill]] %s7370_s28  ;;  %p573_p8 = scmp.lt.s32.totalorder %s7198_s24, 3 }
  0x1a   : > { %s11471_s29 = scalar_select %p7376_p6, 1, 0 }
  0x1b   : > { %p574_p9 = pnand %p6185_p7, %p573_p8 }
  0x1c   : > { %11472 = sst [smem:[#allocation22_spill]] %s11471_s29  ;;  %s7383_s30 = sand.u32 (!%p574_p9), 1, %s7190_s22  }
  0x1d   : > { %577 = sbr.rel (%p574_p9) target bundleno = 2365 (0x93d), region = 92  ;;  %p638_p10 = scmp.lt.s32.totalorder (!%p574_p9), %s7353_s2, 1 }
  0x1e   : > { %s11473_s25 = sld [smem:[#allocation23_spill]] (!%p574_p9)  ;;  %s7398_s29 = smov (!%p574_p9), 0  }
  0x22   : > { %v7220_v0 = vmov -1e+30   ;;  %s639_s0 = scalar_select %p638_p10, %s7353_s2, 1  ;;  %v7221_v1 = vmov 0.0  }
  0x23   : > { %643 = vst [vmem:[#allocation2 + $0x8a0] sm:$0xff] %v7220_v0 }
  0x24   : > { %644 = vst [vmem:[#allocation2 + $0x8a8] sm:$0xff] %v7220_v0  ;;  %s6946_s21 = smul.u32 2312, %s639_s0 }
  0x25   : > { %645 = vst [vmem:[#allocation2 + $0x8b0] sm:$0xff] %v7220_v0 }
  0x26   : > { %646 = vst [vmem:[#allocation2 + $0x8b8] sm:$0xff] %v7220_v0  ;;  %s7390_s28 = scalar_lea.vmem %s11473_s25, %s6946_s21 }
  0x27   : > { %647 = vst [vmem:[#allocation2 + $0x8c0] sm:$0xff] %v7220_v0 }
  0x28   : > { %648 = vst [vmem:[#allocation2 + $0x8c8] sm:$0xff] %v7220_v0 }
  0x29   : > { %649 = vst [vmem:[#allocation2 + $0x8d0] sm:$0xff] %v7220_v0 }
  0x2a   : > { %650 = vst [vmem:[#allocation3 + $0x228] sm:$0xff] %v7221_v1 }
  0x2b   : > { %651 = vst [vmem:[#allocation5 + $0x64] sm:$0xff] %v7221_v1 }
  0x2c   : > { %653 = vst [vmem:[#allocation7 + $0x10] sm:$0xff] %v7221_v1 }
  0x2d LB: >> { %s11474_s21 = sld [smem:[#allocation24_spill]]  ;;  %vm728_vm0 = vcmask 1042432   ;;  %s7418_s25 = smul.u32 96, %s7202_s29  ;;  %vm691_vm1 = vcmask 23552   ;;  %s7202_s29 = sphi %s7398_s29, %s659_s29  }
  0x2e   : >> { %s11479_s27 = sld [smem:[#allocation25_spill]]  ;;  %s659_s29 = sadd.s32 1, %s7202_s29  }
  0x2f   : >> { %s7429_s22 = scalar_lea.vmem %s7390_s28, %s7418_s25  ;;  %s11482_s1 = sld [smem:[#allocation26_spill]] }
  0x30   : >> { %v6190_v9 = vld [vmem:[%s7429_s22 + $0x19] sm:$0xff]  ;;  %v6193_v10 = vld [vmem:[%s7429_s22 + $0x31] sm:$0xff]  ;;  %v6196_v11 = vld [vmem:[%s7429_s22 + $0x49] sm:$0xff]  ;;  %s7925_s23 = scalar_lea.vmem [#allocation2], %s7418_s25  ;;  %p656_p11 = scmp.ge.s32.totalorder %s659_s29, 23  }
  0x31   : >> { %v6187_v12 = vld [vmem:[%s7429_s22 + $0x1] sm:$0xff]  ;;  %v6194_v15 = vld [vmem:[%s7429_s22 + $0x39] sm:$0xff]  ;;  %v6197_v17 = vld [vmem:[%s7429_s22 + $0x51] sm:$0xff]  ;;  %s8223_s28 = smov (%p656_p11), 0  }
  0x32   : >> { %v6191_v14 = vld [vmem:[%s7429_s22 + $0x21] sm:$0xff]  ;;  %v6188_v18 = vld [vmem:[%s7429_s22 + $0x9] sm:$0xff]  ;;  %v6198_v21 = vld [vmem:[%s7429_s22 + $0x59] sm:$0xff] }
  0x33   : >> { %v6199_v2 = vld [vmem:[%s11474_s21 + $0x4] sm:$0x7]  ;;  %v6238_v3 = vld [vmem:[%s11474_s21 + $0x8] sm:$0x7]  ;;  %v6264_v4 = vld [vmem:[%s11474_s21 + $0xc] sm:$0x7] }
  0x34   : >> { %6832 = vmatpush.msk.msra.mxu1 %vm728_vm0, %v6199_v2  ;;  %6833 = vmatpush.msk.msra.mxu2 %vm728_vm0, %v6199_v2  ;;  %v674_v5 = vld [vmem:[%s11474_s21] sm:$0x7]  ;;  %v6290_v6 = vld [vmem:[%s11474_s21 + $0x10] sm:$0x7]  ;;  %v6342_v7 = vld [vmem:[%s11474_s21 + $0x18] sm:$0x7] }
  0x35   : >> { %6834 = vmatpush.msk.msra.mxu3 %vm728_vm0, %v6199_v2  ;;  %6200 = vmatpush.msk.msra.mxu0 %vm728_vm0, %v6199_v2  ;;  %v6368_v8 = vld [vmem:[%s11474_s21 + $0x1c] sm:$0x7]  ;;  %v6316_v13 = vld [vmem:[%s11474_s21 + $0x14] sm:$0x7]  ;;  %v6394_v16 = vld [vmem:[%s11474_s21 + $0x20] sm:$0x7] }
  0x36   : >> { %6239 = vmatpush.msk.msrb.mxu2 %vm728_vm0, %v6238_v3  ;;  %6213 = vmatpush.msk.msrb.mxu1 %vm728_vm0, %v674_v5  ;;  %v6192_v19 = vld [vmem:[%s7429_s22 + $0x29] sm:$0xff]  ;;  %v6195_v20 = vld [vmem:[%s7429_s22 + $0x41] sm:$0xff]  ;;  %v6189_v22 = vld [vmem:[%s7429_s22 + $0x11] sm:$0xff] }
  0x37   : >> { %6265 = vmatpush.msk.msrb.mxu3 %vm728_vm0, %v6264_v4  ;;  %6291 = vmatpush.msk.msrb.mxu0 %vm728_vm0, %v6290_v6  ;;  %v662_v23 = vld [vmem:[%s7429_s22] sm:$0xff]  ;;  %v6252_v25 = vld [vmem:[%s7429_s22 + $0x30] sm:$0xff]  ;;  %v663_v26 = vld [vmem:[%s7429_s22 + $0x8] sm:$0xff] }
  0x38   : >> { %6204 = vmatmul.msk.f32.vlgmr.msra.gmra.mxu1 %vm691_vm1, %v6190_v9  ;;  %6207 = vmatmul.msk.f32.vlgmr.msra.gmra.mxu2 %vm691_vm1, %v6193_v10  ;;  %v6226_v24 = vld [vmem:[%s7429_s22 + $0x2] sm:$0xff]  ;;  %v6227_v27 = vld [vmem:[%s7429_s22 + $0xa] sm:$0xff]  ;;  %v6253_v28 = vld [vmem:[%s7429_s22 + $0x38] sm:$0xff] }
  0x39   : >> { %6210 = vmatmul.msk.f32.vlgmr.msra.gmra.mxu3 %vm691_vm1, %v6196_v11  ;;  %6201 = vmatmul.msk.f32.vlgmr.msra.gmra.mxu0 %vm691_vm1, %v6187_v12  ;;  %v664_v29 = vld [vmem:[%s7429_s22 + $0x10] sm:$0xff]  ;;  %v6254_v31 = vld [vmem:[%s7429_s22 + $0x40] sm:$0xff]  ;;  %v665_v32 = vld [vmem:[%s7429_s22 + $0x18] sm:$0xff] }
  0x3a   : >> { %6343 = vmatpush.msk.msra.mxu2 %vm728_vm0, %v6342_v7  ;;  %6369 = vmatpush.msk.msra.mxu3 %vm728_vm0, %v6368_v8  ;;  %v6228_v30 = vld [vmem:[%s7429_s22 + $0x12] sm:$0xff]  ;;  %v6229_v33 = vld [vmem:[%s7429_s22 + $0x1a] sm:$0xff]  ;;  %v6255_v34 = vld [vmem:[%s7429_s22 + $0x48] sm:$0xff] }
  0x3b   : >> { %6317 = vmatpush.msk.msra.mxu1 %vm728_vm0, %v6316_v13  ;;  %6395 = vmatpush.msk.msra.mxu0 %vm728_vm0, %v6394_v16  ;;  %v666_v35 = vld [vmem:[%s7429_s22 + $0x20] sm:$0xff]  ;;  %v6256_v37 = vld [vmem:[%s7429_s22 + $0x50] sm:$0xff]  ;;  %v667_v38 = vld [vmem:[%s7429_s22 + $0x28] sm:$0xff] }
  0x3c   : >> { %v6230_v36 = vld [vmem:[%s7429_s22 + $0x22] sm:$0xff]  ;;  %v6231_v39 = vld [vmem:[%s7429_s22 + $0x2a] sm:$0xff]  ;;  %v6257_v40 = vld [vmem:[%s7429_s22 + $0x58] sm:$0xff] }
  0x3d   : >> { %v6232_v41 = vld [vmem:[%s7429_s22 + $0x32] sm:$0xff]  ;;  %v6258_v42 = vld [vmem:[%s7429_s22 + $0x60] sm:$0xff]  ;;  %v6259_v45 = vld [vmem:[%s7429_s22 + $0x68] sm:$0xff] }
  0x3e   : >> { %v6284_v43 = vld [vmem:[%s7429_s22 + $0x61] sm:$0xff]  ;;  %v6285_v46 = vld [vmem:[%s7429_s22 + $0x69] sm:$0xff]  ;;  %v6286_v49 = vld [vmem:[%s7429_s22 + $0x71] sm:$0xff] }
  0x3f   : >> { %v6233_v44 = vld [vmem:[%s7429_s22 + $0x3a] sm:$0xff]  ;;  %v6234_v47 = vld [vmem:[%s7429_s22 + $0x42] sm:$0xff]  ;;  %v6260_v48 = vld [vmem:[%s7429_s22 + $0x70] sm:$0xff] }
  0x40   : >> { %6205 = vmatmul.msk.f32.gmra.mxu1 %vm691_vm1, %v6191_v14  ;;  %6208 = vmatmul.msk.f32.gmra.mxu2 %vm691_vm1, %v6194_v15  ;;  %v6235_v50 = vld [vmem:[%s7429_s22 + $0x4a] sm:$0xff]  ;;  %v6261_v51 = vld [vmem:[%s7429_s22 + $0x78] sm:$0xff]  ;;  %v6262_v54 = vld [vmem:[%s7429_s22 + $0x80] sm:$0xff] }
  0x41   : >> { %6211 = vmatmul.msk.f32.gmra.mxu3 %vm691_vm1, %v6197_v17  ;;  %6202 = vmatmul.msk.f32.gmra.mxu0 %vm691_vm1, %v6188_v18  ;;  %v6287_v52 = vld [vmem:[%s7429_s22 + $0x79] sm:$0xff]  ;;  %v6288_v55 = vld [vmem:[%s7429_s22 + $0x81] sm:$0xff]  ;;  %v6289_v58 = vld [vmem:[%s7429_s22 + $0x89] sm:$0xff] }
  0x42   : >> { %v6236_v53 = vld [vmem:[%s7429_s22 + $0x52] sm:$0xff]  ;;  %v6237_v56 = vld [vmem:[%s7429_s22 + $0x5a] sm:$0xff]  ;;  %v6263_v57 = vld [vmem:[%s7429_s22 + $0x88] sm:$0xff] }
  0x43   : >> { %v7558_v59 = vld [vmem:[%s7429_s22 + $0x62] sm:$0xff]  ;;  %v7568_v62 = vld [vmem:[%s7429_s22 + $0x6a] sm:$0xff]  ;;  %v7582_v4 = vld [vmem:[%s7429_s22 + $0x72] sm:$0xff] }
  0x44   : >> { %v7596_v9 = vld [vmem:[%s7429_s22 + $0x7a] sm:$0xff] }
  0x48   : >> { %6206 = vmatmul.msk.f32.gmra.mxu1 %vm691_vm1, %v6192_v19  ;;  %6209 = vmatmul.msk.f32.gmra.mxu2 %vm691_vm1, %v6195_v20 }
  0x49   : >> { %6212 = vmatmul.msk.f32.gmra.mxu3 %vm691_vm1, %v6198_v21  ;;  %6203 = vmatmul.msk.f32.gmra.mxu0 %vm691_vm1, %v6189_v22 }
  0x50   : >> { %6214 = vmatmul.msk.f32.vlgmr.msrb.gmra.mxu1 %vm691_vm1, %v662_v23  ;;  %6240 = vmatmul.msk.f32.vlgmr.msrb.gmra.mxu2 %vm691_vm1, %v6226_v24  ;;  %v7616_v23 = vld [vmem:[%s7429_s22 + $0x8a] sm:$0xff] }
  0x51   : >> { %6266 = vmatmul.msk.f32.vlgmr.msrb.gmra.mxu3 %vm691_vm1, %v6252_v25  ;;  %6292 = vmatmul.msk.f32.vlgmr.msrb.gmra.mxu0 %vm691_vm1, %v6193_v10 }
  0x58   : >> { %6215 = vmatmul.msk.f32.gmra.mxu1 %vm691_vm1, %v663_v26  ;;  %6241 = vmatmul.msk.f32.gmra.mxu2 %vm691_vm1, %v6227_v27 }
  0x59   : >> { %6267 = vmatmul.msk.f32.gmra.mxu3 %vm691_vm1, %v6253_v28  ;;  %6293 = vmatmul.msk.f32.gmra.mxu0 %vm691_vm1, %v6194_v15  ;;  %v7608_v15 = vld [vmem:[%s7429_s22 + $0x82] sm:$0xff] }
  0x60   : >> { %6216 = vmatmul.msk.f32.gmra.mxu1 %vm691_vm1, %v664_v29  ;;  %6242 = vmatmul.msk.f32.gmra.mxu2 %vm691_vm1, %v6228_v30  ;;  %v6336_v29 = vld [vmem:[%s7429_s22 + $0x90] sm:$0xff] }
  0x61   : >> { %6268 = vmatmul.msk.f32.gmra.mxu3 %vm691_vm1, %v6254_v31  ;;  %6294 = vmatmul.msk.f32.gmra.mxu0 %vm691_vm1, %v6195_v20 }
  0x68   : >> { %6217 = vmatmul.msk.f32.gmra.mxu1 %vm691_vm1, %v665_v32  ;;  %6243 = vmatmul.msk.f32.gmra.mxu2 %vm691_vm1, %v6229_v33  ;;  %v6362_v32 = vld [vmem:[%s7429_s22 + $0x91] sm:$0xff] }
  0x69   : >> { %6269 = vmatmul.msk.f32.gmra.mxu3 %vm691_vm1, %v6255_v34  ;;  %6295 = vmatmul.msk.f32.gmra.mxu0 %vm691_vm1, %v6196_v11 }
  0x70   : >> { %6218 = vmatmul.msk.f32.gmra.mxu1 %vm691_vm1, %v666_v35  ;;  %6244 = vmatmul.msk.f32.gmra.mxu2 %vm691_vm1, %v6230_v36 }
  0x71   : >> { %6270 = vmatmul.msk.f32.gmra.mxu3 %vm691_vm1, %v6256_v37  ;;  %6296 = vmatmul.msk.f32.gmra.mxu0 %vm691_vm1, %v6197_v17 }
  0x78   : >> { %6219 = vmatmul.msk.f32.gmra.mxu1 %vm691_vm1, %v667_v38  ;;  %6245 = vmatmul.msk.f32.gmra.mxu2 %vm691_vm1, %v6231_v39 }
  0x79   : >> { %6271 = vmatmul.msk.f32.gmra.mxu3 %vm691_vm1, %v6257_v40  ;;  %6297 = vmatmul.msk.f32.gmra.mxu0 %vm691_vm1, %v6198_v21 }
  0x80   : >> { %6220 = vmatmul.msk.f32.gmra.mxu1 %vm691_vm1, %v6252_v25  ;;  %6246 = vmatmul.msk.f32.gmra.mxu2 %vm691_vm1, %v6232_v41 }
  0x81   : >> { %6272 = vmatmul.msk.f32.gmra.mxu3 %vm691_vm1, %v6258_v42  ;;  %6298 = vmatmul.msk.f32.gmra.mxu0 %vm691_vm1, %v6284_v43 }
  0x88   : >> { %6221 = vmatmul.msk.f32.gmra.mxu1 %vm691_vm1, %v6253_v28  ;;  %6247 = vmatmul.msk.f32.gmra.mxu2 %vm691_vm1, %v6233_v44 }
  0x89   : >> { %6273 = vmatmul.msk.f32.gmra.mxu3 %vm691_vm1, %v6259_v45  ;;  %6299 = vmatmul.msk.f32.gmra.mxu0 %vm691_vm1, %v6285_v46 }
  0x90   : >> { %6222 = vmatmul.msk.f32.gmra.mxu1 %vm691_vm1, %v6254_v31  ;;  %6248 = vmatmul.msk.f32.gmra.mxu2 %vm691_vm1, %v6234_v47 }
  0x91   : >> { %6274 = vmatmul.msk.f32.gmra.mxu3 %vm691_vm1, %v6260_v48  ;;  %6300 = vmatmul.msk.f32.gmra.mxu0 %vm691_vm1, %v6286_v49 }
  0x98   : >> { %6223 = vmatmul.msk.f32.gmra.mxu1 %vm691_vm1, %v6255_v34  ;;  %6249 = vmatmul.msk.f32.gmra.mxu2 %vm691_vm1, %v6235_v50  ;;  %v6388_v34 = vld [vmem:[%s7429_s22 + $0x92] sm:$0xff] }
  0x99   : >> { %6275 = vmatmul.msk.f32.gmra.mxu3 %vm691_vm1, %v6261_v51  ;;  %6301 = vmatmul.msk.f32.gmra.mxu0 %vm691_vm1, %v6287_v52 }
  0xa0   : >> { %6224 = vmatmul.msk.f32.gmra.mxu1 %vm691_vm1, %v6256_v37  ;;  %6250 = vmatmul.msk.f32.gmra.mxu2 %vm691_vm1, %v6236_v53 }
  0xa1   : >> { %6276 = vmatmul.msk.f32.gmra.mxu3 %vm691_vm1, %v6262_v54  ;;  %6302 = vmatmul.msk.f32.gmra.mxu0 %vm691_vm1, %v6288_v55 }
  0xa8   : >> { %6225 = vmatmul.msk.f32.gmra.mxu1 %vm691_vm1, %v6257_v40  ;;  %6251 = vmatmul.msk.f32.gmra.mxu2 %vm691_vm1, %v6237_v56  ;;  %v6337_v40 = vld [vmem:[%s7429_s22 + $0x98] sm:$0xff] }
  0xa9   : >> { %6277 = vmatmul.msk.f32.gmra.mxu3 %vm691_vm1, %v6263_v57  ;;  %6303 = vmatmul.msk.f32.gmra.mxu0 %vm691_vm1, %v6289_v58 }
  0xb0   : >> { %6318 = vmatmul.msk.f32.vlgmr.msra.gmra.mxu1 %vm691_vm1, %v6232_v41  ;;  %6344 = vmatmul.msk.f32.vlgmr.msra.gmra.mxu2 %vm691_vm1, %v6258_v42 }
  0xb1   : >> { %6370 = vmatmul.msk.f32.vlgmr.msra.gmra.mxu3 %vm691_vm1, %v6284_v43  ;;  %6396 = vmatmul.msk.f32.vlgmr.msra.gmra.mxu0 %vm691_vm1, %v7558_v59  ;;  %v6363_v43 = vld [vmem:[%s7429_s22 + $0x99] sm:$0xff] }
  0xb5   : >> { %v7565_v60 = vpop.f32.mrf.mxu1 }
  0xb6   : >> { %v749_v61 = vpop.f32.mrf.mxu0 }
  0xb8   : >> { %6319 = vmatmul.msk.f32.gmra.mxu1 %vm691_vm1, %v6233_v44  ;;  %6345 = vmatmul.msk.f32.gmra.mxu2 %vm691_vm1, %v6259_v45  ;;  %v6389_v45 = vld [vmem:[%s7429_s22 + $0x9a] sm:$0xff] }
  0xb9   : >> { %6371 = vmatmul.msk.f32.gmra.mxu3 %vm691_vm1, %v6285_v46  ;;  %6397 = vmatmul.msk.f32.gmra.mxu0 %vm691_vm1, %v7568_v62 }
  0xbb   : >> { %v7575_v63 = vpop.f32.mrf.mxu2 }
  0xbc   : >> { %v7577_v0 = vpop.f32.mrf.mxu3 }
  0xbd   : >> { %v7579_v2 = vpop.f32.mrf.mxu1 }
  0xbe   : >> { %v752_v3 = vpop.f32.mrf.mxu0 }
  0xc0   : >> { %6320 = vmatmul.msk.f32.gmra.mxu1 %vm691_vm1, %v6234_v47  ;;  %6346 = vmatmul.msk.f32.gmra.mxu2 %vm691_vm1, %v6260_v48 }
  0xc1   : >> { %6372 = vmatmul.msk.f32.gmra.mxu3 %vm691_vm1, %v6286_v49  ;;  %6398 = vmatmul.msk.f32.gmra.mxu0 %vm691_vm1, %v7582_v4 }
  0xc3   : >> { %v7589_v5 = vpop.f32.mrf.mxu2 }
  0xc4   : >> { %v7591_v6 = vpop.f32.mrf.mxu3 }
  0xc5   : >> { %v7593_v7 = vpop.f32.mrf.mxu1 }
  0xc6   : >> { %v755_v8 = vpop.f32.mrf.mxu0 }
  0xc8   : >> { %6321 = vmatmul.msk.f32.gmra.mxu1 %vm691_vm1, %v6235_v50  ;;  %6347 = vmatmul.msk.f32.gmra.mxu2 %vm691_vm1, %v6261_v51  ;;  %v6338_v51 = vld [vmem:[%s7429_s22 + $0xa0] sm:$0xff] }
  0xc9   : >> { %6373 = vmatmul.msk.f32.gmra.mxu3 %vm691_vm1, %v6287_v52  ;;  %6399 = vmatmul.msk.f32.gmra.mxu0 %vm691_vm1, %v7596_v9 }
  0xcb   : >> { %v7603_v10 = vpop.f32.mrf.mxu2 }
  0xcc   : >> { %v7605_v11 = vpop.f32.mrf.mxu3 }
  0xcd   : >> { %v841_v12 = vpop.f32.mrf.mxu1 }
  0xce   : >> { %v842_v13 = vadd.f32 %v841_v12, %v749_v61  ;;  %v1189_v14 = vpop.f32.mrf.mxu0 }
  0xd0   : >> { %6322 = vmatmul.msk.f32.gmra.mxu1 %vm691_vm1, %v6236_v53  ;;  %6348 = vmatmul.msk.f32.gmra.mxu2 %vm691_vm1, %v6262_v54  ;;  %v6364_v54 = vld [vmem:[%s7429_s22 + $0xa1] sm:$0xff] }
  0xd1   : >> { %6374 = vmatmul.msk.f32.gmra.mxu3 %vm691_vm1, %v6288_v55  ;;  %6400 = vmatmul.msk.f32.gmra.mxu0 %vm691_vm1, %v7608_v15 }
  0xd3   : >> { %v949_v16 = vpop.f32.mrf.mxu2 }
  0xd4   : >> { %v985_v17 = vadd.f32 %v949_v16, %v842_v13  ;;  %v1069_v18 = vpop.f32.mrf.mxu3  ;;  %v6391_v13 = vld [vmem:[%s7429_s22 + $0xaa] sm:$0xff] }
  0xd5   : >> { %v844_v19 = vpop.f32.mrf.mxu1 }
  0xd6   : >> { %v845_v20 = vadd.f32 %v844_v19, %v752_v3  ;;  %v1105_v21 = vadd.f32 %v1069_v18, %v985_v17  ;;  %v1192_v22 = vpop.f32.mrf.mxu0  ;;  %v7672_v19 = vstv %s7418_s25 }
  0xd8   : >> { %v7618_v24 = vadd.f32 %v1189_v14, %v1105_v21  ;;  %6323 = vmatmul.msk.f32.gmra.mxu1 %vm691_vm1, %v6237_v56  ;;  %6349 = vmatmul.msk.f32.gmra.mxu2 %vm691_vm1, %v6263_v57  ;;  %v6390_v56 = vld [vmem:[%s7429_s22 + $0xa2] sm:$0xff]  ;;  %v1773_v14 = vlaneseq  ;;  %v6340_v21 = vld [vmem:[%s7429_s22 + $0xb0] sm:$0xff] }
  0xd9   : >> { %6375 = vmatmul.msk.f32.gmra.mxu3 %vm691_vm1, %v6289_v58  ;;  %6401 = vmatmul.msk.f32.gmra.mxu0 %vm691_vm1, %v7616_v23 }
  0xda   : >> { %v7669_v16 = vshrl.u32 %v1773_v14, 7 }
  0xdb   : >> { %v952_v25 = vpop.f32.mrf.mxu2 }
  0xdc   : >> { %v986_v26 = vadd.f32 %v952_v25, %v845_v20  ;;  %v1072_v27 = vpop.f32.mrf.mxu3 }
  0xdd   : >> { %v847_v28 = vpop.f32.mrf.mxu1 }
  0xde   : >> { %v848_v30 = vadd.f32 %v847_v28, %v755_v8  ;;  %v1106_v31 = vadd.f32 %v1072_v27, %v986_v26  ;;  %v1195_v33 = vpop.f32.mrf.mxu0  ;;  %v6365_v8 = vld [vmem:[%s7429_s22 + $0xa9] sm:$0xff]  ;;  %v6366_v26 = vld [vmem:[%s7429_s22 + $0xb1] sm:$0xff] }
  0xdf   : >> { %v6392_v28 = vld [vmem:[%s7429_s22 + $0xb2] sm:$0xff] }
  0xe0   : >> { %v7628_v35 = vadd.f32 %v1192_v22, %v1106_v31  ;;  %6324 = vmatmul.msk.f32.gmra.mxu1 %vm691_vm1, %v7558_v59  ;;  %6350 = vmatmul.msk.f32.gmra.mxu2 %vm691_vm1, %v6336_v29 }
  0xe1   : >> { %6376 = vmatmul.msk.f32.gmra.mxu3 %vm691_vm1, %v6362_v32  ;;  %6402 = vmatmul.msk.f32.gmra.mxu0 %vm691_vm1, %v6388_v34 }
  0xe3   : >> { %v955_v36 = vpop.f32.mrf.mxu2 }
  0xe4   : >> { %v987_v37 = vadd.f32 %v955_v36, %v848_v30  ;;  %v1075_v38 = vpop.f32.mrf.mxu3 }
  0xe5   : >> { %v850_v39 = vpop.f32.mrf.mxu1 }
  0xe6   : >> { %v851_v41 = vadd.f32 %v850_v39, %v7565_v60  ;;  %v1107_v42 = vadd.f32 %v1075_v38, %v987_v37  ;;  %v1198_v44 = vpop.f32.mrf.mxu0  ;;  %v6341_v39 = vld [vmem:[%s7429_s22 + $0xb8] sm:$0xff] }
  0xe8   : >> { %v7639_v46 = vadd.f32 %v1195_v33, %v1107_v42  ;;  %6325 = vmatmul.msk.f32.gmra.mxu1 %vm691_vm1, %v7568_v62  ;;  %6351 = vmatmul.msk.f32.gmra.mxu2 %vm691_vm1, %v6337_v40  ;;  %v6339_v62 = vld [vmem:[%s7429_s22 + $0xa8] sm:$0xff] }
  0xe9   : >> { %6377 = vmatmul.msk.f32.gmra.mxu3 %vm691_vm1, %v6363_v43  ;;  %6403 = vmatmul.msk.f32.gmra.mxu0 %vm691_vm1, %v6389_v45  ;;  %v6367_v43 = vld [vmem:[%s7429_s22 + $0xb9] sm:$0xff] }
  0xea   : >> { %v6393_v45 = vld [vmem:[%s7429_s22 + $0xba] sm:$0xff] }
  0xeb   : >> { %v958_v47 = vpop.f32.mrf.mxu2 }
  0xec   : >> { %v988_v48 = vadd.f32 %v958_v47, %v851_v41  ;;  %v1078_v49 = vpop.f32.mrf.mxu3 }
  0xed   : >> { %v853_v50 = vpop.f32.mrf.mxu1 }
  0xee   : >> { %v854_v52 = vadd.f32 %v853_v50, %v7579_v2  ;;  %v1108_v53 = vadd.f32 %v1078_v49, %v988_v48  ;;  %v1201_v55 = vpop.f32.mrf.mxu0 }
  0xf0   : >> { %v7650_v57 = vadd.f32 %v1198_v44, %v1108_v53  ;;  %6326 = vmatmul.msk.f32.gmra.mxu1 %vm691_vm1, %v7582_v4  ;;  %6352 = vmatmul.msk.f32.gmra.mxu2 %vm691_vm1, %v6338_v51 }
  0xf1   : >> { %6378 = vmatmul.msk.f32.gmra.mxu3 %vm691_vm1, %v6364_v54  ;;  %6404 = vmatmul.msk.f32.gmra.mxu0 %vm691_vm1, %v6390_v56  ;;  %v7222_v54 = vmov 0  }
  0xf3   : >> { %v961_v58 = vpop.f32.mrf.mxu2 }
  0xf4   : >> { %v989_v59 = vadd.f32 %v961_v58, %v854_v52  ;;  %v1081_v60 = vpop.f32.mrf.mxu3 }
  0xf5   : >> { %v856_v61 = vpop.f32.mrf.mxu1 }
  0xf6   : >> { %v857_v2 = vadd.f32 %v856_v61, %v7593_v7  ;;  %v1109_v3 = vadd.f32 %v1081_v60, %v989_v59  ;;  %v1204_v12 = vpop.f32.mrf.mxu0  ;;  %v7726_v60 = vadd.s32 16, %v7669_v16 }
  0xf8   : >> { %v7661_v4 = vadd.f32 %v1201_v55, %v1109_v3  ;;  %6327 = vmatmul.msk.f32.gmra.mxu1 %vm691_vm1, %v7596_v9  ;;  %6353 = vmatmul.msk.f32.gmra.mxu2 %vm691_vm1, %v6339_v62  ;;  %v7677_v9 = vadd.s32 %v7672_v19, %v7669_v16 }
  0xf9   : >> { %6379 = vmatmul.msk.f32.gmra.mxu3 %vm691_vm1, %v6365_v8  ;;  %6405 = vmatmul.msk.f32.gmra.mxu0 %vm691_vm1, %v6391_v13 }
  0xfa   : >> { %v1800_v29 = vsub.s32 0, %v7677_v9  ;;  %vm1799_vm2 = vcmp.lt.s32.totalorder %v7677_v9, 0 }
  0xfb   : >> { %v964_v7 = vpop.f32.mrf.mxu2 }
  0xfc   : >> { %v990_v17 = vadd.f32 %v964_v7, %v857_v2  ;;  %v1084_v18 = vpop.f32.mrf.mxu3 }
  0xfd   : >> { %v859_v20 = vpop.f32.mrf.mxu1 }
  0xfe   : >> { %v860_v22 = vadd.f32 %v859_v20, %v7575_v63  ;;  %v1110_v25 = vadd.f32 %v1084_v18, %v990_v17  ;;  %v1207_v27 = vpop.f32.mrf.mxu0  ;;  %v7694_v63 = vsel %vm1799_vm2, %v1800_v29, %v7677_v9  ;;  %v7732_v17 = vadd.s32 %v7672_v19, %v7726_v60 }
  0xff   : >> { %v1802_v31 = vand.u32 65535, %v7694_v63  ;;  %v1803_v36 = vshrl.u32 %v7694_v63, 16 }
 0x100   : >> { %v7683_v30 = vadd.f32 %v1204_v12, %v1110_v25  ;;  %6328 = vmatmul.msk.f32.gmra.mxu1 %vm691_vm1, %v7608_v15  ;;  %6354 = vmatmul.msk.f32.gmra.mxu2 %vm691_vm1, %v6340_v21  ;;  %v7698_v15 = vadd.s32 8, %v7669_v16  ;;  %v1858_v29 = vsub.s32 0, %v7732_v17  ;;  %vm1857_vm6 = vcmp.lt.s32.totalorder %v7732_v17, 0 }
 0x101   : >> { %6380 = vmatmul.msk.f32.gmra.mxu3 %vm691_vm1, %v6366_v26  ;;  %6406 = vmatmul.msk.f32.gmra.mxu0 %vm691_vm1, %v6392_v28  ;;  %v1806_v37 = vmul.u32 43690, %v1802_v31  ;;  %v1805_v47 = vmul.u32 43691, %v1802_v31  ;;  %v1807_v48 = vmul.u32 43691, %v1803_v36  ;;  %v1808_v52 = vmul.u32 43690, %v1803_v36 }
 0x102   : >> { %v7704_v40 = vadd.s32 %v7672_v19, %v7698_v15 }
 0x103   : >> { %v967_v32 = vpop.f32.mrf.mxu2  ;;  %v1809_v49 = vshll.u32 %v1806_v37, 16  ;;  %v1811_v53 = vshll.u32 %v1807_v48, 16  ;;  %v1810_v2 = vshrl.u32 %v1806_v37, 16  ;;  %v7743_v37 = vsel %vm1857_vm6, %v1858_v29, %v7732_v17 }
 0x104   : >> { %v991_v33 = vadd.f32 %v967_v32, %v860_v22  ;;  %v1087_v34 = vpop.f32.mrf.mxu3  ;;  %v1829_v50 = vsub.s32 0, %v7704_v40  ;;  %vm1828_vm4 = vcmp.lt.s32.totalorder %v7704_v40, 0  ;;  %v1812_v22 = vshrl.u32 %v1807_v48, 16 }
 0x105   : >> { %v862_v38 = vpop.f32.mrf.mxu1  ;;  %vm1813_vm3 = vc.u32 %v1805_v47, %v1809_v49  ;;  %v1861_v48 = vshrl.u32 %v7743_v37, 16 }
 0x106   : >> { %v863_v41 = vadd.f32 %v862_v38, %v7589_v5  ;;  %v1111_v42 = vadd.f32 %v1087_v34, %v991_v33  ;;  %v1210_v44 = vpop.f32.mrf.mxu0  ;;  %v1815_v5 = vadd.s32 %v1809_v49, %v1805_v47  ;;  %v1814_v55 = vsel %vm1813_vm3, 1, %v7222_v54 }
 0x107   : >> { %v7722_v56 = vsel %vm1828_vm4, %v1829_v50, %v7704_v40  ;;  %v1816_v58 = vadd.s32 %v1814_v55, %v1808_v52 }
 0x108   : >> { %v7710_v51 = vadd.f32 %v1207_v27, %v1111_v42  ;;  %6329 = vmatmul.msk.f32.gmra.mxu1 %vm691_vm1, %v7616_v23  ;;  %6355 = vmatmul.msk.f32.gmra.mxu2 %vm691_vm1, %v6341_v39  ;;  %vm1817_vm5 = vc.u32 %v1815_v5, %v1811_v53  ;;  %v1831_v59 = vand.u32 65535, %v7722_v56  ;;  %v1832_v8 = vshrl.u32 %v7722_v56, 16 }
 0x109   : >> { %6381 = vmatmul.msk.f32.gmra.mxu3 %vm691_vm1, %v6367_v43  ;;  %6407 = vmatmul.msk.f32.gmra.mxu0 %vm691_vm1, %v6393_v45  ;;  %v1818_v3 = vsel %vm1817_vm5, 1, %v7222_v54  ;;  %v1860_v42 = vand.u32 65535, %v7743_v37  ;;  %v7749_v5 = vadd.s32 24, %v7669_v16 }
 0x10a   : >> { %v1820_v13 = vadd.s32 %v1818_v3, %v1816_v58  ;;  %v1835_v7 = vmul.u32 43690, %v1831_v59  ;;  %v1834_v25 = vmul.u32 43691, %v1831_v59  ;;  %v1836_v27 = vmul.u32 43691, %v1832_v8 }
 0x10b   : >> { %v970_v23 = vpop.f32.mrf.mxu2  ;;  %v1837_v32 = vmul.u32 43690, %v1832_v8  ;;  %v1864_v53 = vmul.u32 43690, %v1860_v42  ;;  %v1863_v59 = vmul.u32 43691, %v1860_v42 }
 0x10c   : >> { %v992_v61 = vadd.f32 %v970_v23, %v863_v41  ;;  %v1090_v62 = vpop.f32.mrf.mxu3  ;;  %v1821_v26 = vadd.s32 %v1820_v13, %v1810_v2  ;;  %v1838_v28 = vshll.u32 %v1835_v7, 16  ;;  %v1840_v34 = vshll.u32 %v1836_v27, 16 }
 0x10d   : >> { %v865_v12 = vpop.f32.mrf.mxu1  ;;  %v1839_v45 = vshrl.u32 %v1835_v7, 16  ;;  %v1841_v58 = vshrl.u32 %v1836_v27, 16  ;;  %v1865_v2 = vmul.u32 43691, %v1861_v48  ;;  %v1867_v3 = vshll.u32 %v1864_v53, 16 }
 0x10e   : >> { %v866_v18 = vadd.f32 %v865_v12, %v7603_v10  ;;  %v1112_v20 = vadd.f32 %v1090_v62, %v992_v61  ;;  %v1213_v21 = vpop.f32.mrf.mxu0  ;;  %v1822_v33 = vadd.s32 %v1821_v26, %v1812_v22  ;;  %vm1842_vm7 = vc.u32 %v1834_v25, %v1838_v28 }
 0x10f   : >> { %v1844_v36 = vadd.s32 %v1838_v28, %v1834_v25  ;;  %v1843_v10 = vsel %vm1842_vm7, 1, %v7222_v54  ;;  %v1866_v12 = vmul.u32 43690, %v1861_v48  ;;  %v7756_v13 = vadd.s32 %v7672_v19, %v7749_v5 }
 0x110   : >> { %v7736_v31 = vadd.f32 %v1210_v44, %v1112_v20  ;;  %v1823_v39 = vshrl.u32 %v1822_v33, 5  ;;  %v1845_v41 = vadd.s32 %v1843_v10, %v1837_v32  ;;  %v1869_v20 = vshll.u32 %v1865_v2, 16 }
 0x111   : >> { %vm1846_vm8 = vc.u32 %v1844_v36, %v1840_v34  ;;  %vm1871_vm9 = vc.u32 %v1863_v59, %v1867_v3  ;;  %v1873_v25 = vadd.s32 %v1867_v3, %v1863_v59  ;;  %vm1886_vm10 = vcmp.lt.s32.totalorder %v7756_v13, 0 }
 0x112   : >> { %v1847_v47 = vsel %vm1846_vm8, 1, %v7222_v54  ;;  %v1824_v50 = vmul.u32 48, %v1823_v39  ;;  %v1872_v22 = vsel %vm1871_vm9, 1, %v7222_v54  ;;  %v7763_v33 = vadd.s32 32, %v7669_v16 }
 0x113   : >> { %v973_v38 = vpop.f32.mrf.mxu2  ;;  %v1849_v52 = vadd.s32 %v1847_v47, %v1845_v41  ;;  %v1874_v32 = vadd.s32 %v1872_v22, %v1866_v12  ;;  %vm1875_vm11 = vc.u32 %v1873_v25, %v1869_v20  ;;  %v1868_v39 = vshrl.u32 %v1864_v53, 16 }
 0x114   : >> { %v993_v43 = vadd.f32 %v973_v38, %v866_v18  ;;  %v1093_v44 = vpop.f32.mrf.mxu3  ;;  %v1825_v61 = vsub.s32 %v7694_v63, %v1824_v50  ;;  %v1887_v63 = vsub.s32 0, %v7756_v13  ;;  %v1870_v50 = vshrl.u32 %v1865_v2, 16 }
 0x115   : >> { %v868_v49 = vpop.f32.mrf.mxu1  ;;  %v1850_v62 = vadd.s32 %v1849_v52, %v1839_v45  ;;  %v7789_v2 = vadd.s32 40, %v7669_v16 }
 0x116   : >> { %v1113_v55 = vadd.f32 %v1093_v44, %v993_v43  ;;  %v1216_v23 = vpop.f32.mrf.mxu0  ;;  %v869_v7 = vadd.f32 %v868_v49, %v7577_v0  ;;  %v7768_v36 = vsel %vm1886_vm10, %v1887_v63, %v7756_v13  ;;  %v1876_v43 = vsel %vm1875_vm11, 1, %v7222_v54 }
 0x117   : >> { %v1851_v18 = vadd.s32 %v1850_v62, %v1841_v58  ;;  %v1889_v44 = vand.u32 65535, %v7768_v36  ;;  %v1878_v47 = vadd.s32 %v1876_v43, %v1874_v32  ;;  %v1890_v48 = vshrl.u32 %v7768_v36, 16 }
 0x118   : >> { %v7752_v8 = vadd.f32 %v1213_v21, %v1113_v55  ;;  %v1826_v21 = vsub.s32 0, %v1825_v61  ;;  %v7782_v49 = vadd.s32 %v7672_v19, %v7763_v33  ;;  %v7808_v40 = vadd.s32 %v7672_v19, %v7789_v2 }
 0x119   : >> { %v1852_v27 = vshrl.u32 %v1851_v18, 5  ;;  %v1892_v52 = vmul.u32 43691, %v1889_v44  ;;  %v1893_v9 = vmul.u32 43690, %v1889_v44  ;;  %v1894_v58 = vmul.u32 43691, %v1890_v48 }
 0x11a   : >> { %v7772_v41 = vsel %vm1799_vm2, %v1826_v21, %v1825_v61  ;;  %v1895_v3 = vmul.u32 43690, %v1890_v48  ;;  %v1916_v12 = vsub.s32 0, %v7782_v49  ;;  %vm1915_vm15 = vcmp.lt.s32.totalorder %v7782_v49, 0 }
 0x11b   : >> { %v976_v26 = vpop.f32.mrf.mxu2  ;;  %v1853_v34 = vmul.u32 48, %v1852_v27  ;;  %vm2147_vm12 = vcmp.ne.s32.totalorder %v7772_v41, 0  ;;  %vm2159_vm13 = vcmp.lt.s32.totalorder %v7772_v41, 0  ;;  %v2183_v25 = vadd.s32 48, %v7772_v41 }
 0x11c   : >> { %v994_v28 = vadd.f32 %v976_v26, %v869_v7  ;;  %v1096_v29 = vpop.f32.mrf.mxu3  ;;  %v1897_v26 = vshrl.u32 %v1893_v9, 16  ;;  %vm7816_vm1 = vmand %vm2159_vm13, %vm2147_vm12  ;;  %vm1944_vm2 = vcmp.lt.s32.totalorder %v7808_v40, 0  ;;  %v1945_v44 = vsub.s32 0, %v7808_v40 }
 0x11d   : >> { %v871_v0 = vpop.f32.mrf.mxu1  ;;  %v1854_v42 = vsub.s32 %v7722_v56, %v1853_v34  ;;  %v1879_v56 = vadd.s32 %v1878_v47, %v1868_v39  ;;  %v7804_v34 = vsel %vm1915_vm15, %v1916_v12, %v7782_v49 }
 0x11e   : >> { %v1114_v10 = vadd.f32 %v1096_v29, %v994_v28  ;;  %v1219_v38 = vpop.f32.mrf.mxu0  ;;  %v872_v53 = vadd.f32 %v871_v0, %v7591_v6  ;;  %v1898_v6 = vshll.u32 %v1894_v58, 16  ;;  %v1919_v39 = vshrl.u32 %v7804_v34, 16 }
 0x11f   : >> { %v1855_v55 = vsub.s32 0, %v1854_v42  ;;  %v1880_v18 = vadd.s32 %v1879_v56, %v1870_v50 }
 0x120   : >> { %v7777_v45 = vadd.f32 %v1216_v23, %v1114_v10  ;;  %v1896_v23 = vshll.u32 %v1893_v9, 16  ;;  %v1923_v56 = vmul.u32 43691, %v1919_v39  ;;  %v1924_v12 = vmul.u32 43690, %v1919_v39 }
 0x121   : >> { %v7795_v63 = vsel %vm1828_vm4, %v1855_v55, %v1854_v42  ;;  %v1881_v27 = vshrl.u32 %v1880_v18, 5  ;;  %v1899_v42 = vshrl.u32 %v1894_v58, 16  ;;  %v2195_v58 = vsel %vm7816_vm1, %v2183_v25, %v7772_v41 }
 0x122   : >> { %vm1900_vm14 = vc.u32 %v1892_v52, %v1896_v23  ;;  %v1902_v29 = vadd.s32 %v1896_v23, %v1892_v52  ;;  %vm2148_vm3 = vcmp.ne.s32.totalorder %v7795_v63, 0  ;;  %vm2160_vm5 = vcmp.lt.s32.totalorder %v7795_v63, 0 }
 0x123   : >> { %v979_v59 = vpop.f32.mrf.mxu2  ;;  %v1901_v28 = vsel %vm1900_vm14, 1, %v7222_v54  ;;  %v1882_v10 = vmul.u32 48, %v1881_v27  ;;  %v7837_v41 = vadd.s32 48, %v7795_v63  ;;  %vm7848_vm8 = vcmp.ge.s32.totalorder %v2195_v58, 46  ;;  %v7861_v58 = vld [vmem:[%s11479_s27] ss:$0 sm:$0xff] }
 0x124   : >> { %v995_v61 = vadd.f32 %v979_v59, %v872_v53  ;;  %v1099_v62 = vpop.f32.mrf.mxu3  ;;  %v1903_v0 = vadd.s32 %v1901_v28, %v1895_v3  ;;  %vm1904_vm0 = vc.u32 %v1902_v29, %v1898_v6 }
 0x125   : >> { %v874_v7 = vpop.f32.mrf.mxu1  ;;  %v1905_v43 = vsel %vm1904_vm0, 1, %v7222_v54  ;;  %v1883_v48 = vsub.s32 %v7743_v37, %v1882_v10  ;;  %v7831_v37 = vsel %vm1944_vm2, %v1945_v44, %v7808_v40 }
 0x126   : >> { %v1115_v20 = vadd.f32 %v1099_v62, %v995_v61  ;;  %v1222_v22 = vpop.f32.mrf.mxu0  ;;  %v875_v21 = vadd.f32 %v874_v7, %v7605_v11  ;;  %v1918_v11 = vand.u32 65535, %v7804_v34  ;;  %v1907_v50 = vadd.s32 %v1905_v43, %v1903_v0 }
 0x127   : >> { %v1927_v7 = vshll.u32 %v1923_v56, 16  ;;  %v1884_v18 = vsub.s32 0, %v1883_v48  ;;  %v1947_v28 = vand.u32 65535, %v7831_v37 }
 0x128   : >> { %v7799_v32 = vadd.f32 %v1219_v38, %v1115_v20  ;;  %v1921_v52 = vmul.u32 43691, %v1918_v11  ;;  %v1922_v9 = vmul.u32 43690, %v1918_v11  ;;  %v1908_v23 = vadd.s32 %v1907_v50, %v1897_v26 }
 0x129   : >> { %v7846_v39 = vsel %vm1857_vm6, %v1884_v18, %v1883_v48  ;;  %v1951_v43 = vmul.u32 43690, %v1947_v28  ;;  %v7856_v48 = vadd.s32 48, %v7669_v16  ;;  %vm7867_vm6 = vmand %vm2160_vm5, %vm2148_vm3 }
 0x12a   : >> { %v1925_v61 = vshll.u32 %v1922_v9, 16  ;;  %v1909_v6 = vadd.s32 %v1908_v23, %v1899_v42  ;;  %v1926_v25 = vshrl.u32 %v1922_v9, 16  ;;  %v1950_v42 = vmul.u32 43691, %v1947_v28 }
 0x12b   : >> { %v982_v47 = vpop.f32.mrf.mxu2  ;;  %v1954_v17 = vshll.u32 %v1951_v43, 16  ;;  %vm2149_vm9 = vcmp.ne.s32.totalorder %v7846_v39, 0  ;;  %vm2161_vm11 = vcmp.lt.s32.totalorder %v7846_v39, 0  ;;  %v2185_v28 = vadd.s32 48, %v7846_v39 }
 0x12c   : >> { %v996_v53 = vadd.f32 %v982_v47, %v875_v21  ;;  %v1102_v55 = vpop.f32.mrf.mxu3  ;;  %vm1929_vm4 = vc.u32 %v1921_v52, %v1925_v61  ;;  %v1931_v20 = vadd.s32 %v1925_v61, %v1921_v52  ;;  %v1910_v26 = vshrl.u32 %v1909_v6, 5  ;;  %v7877_v6 = vld [vmem:[%s11482_s1] ss:$0 sm:$0xff]  ;;  %vm7896_vm14 = vmand %vm2161_vm11, %vm2149_vm9 }
 0x12d   : >> { %v1309_v59 = vpop.f32.mrf.mxu1  ;;  %v1930_v27 = vsel %vm1929_vm4, 1, %v7222_v54  ;;  %vm1958_vm12 = vc.u32 %v1950_v42, %v1954_v17  ;;  %v2197_v13 = vsel %vm7896_vm14, %v2185_v28, %v7846_v39 }
 0x12e   : >> { %v1116_v62 = vadd.f32 %v1102_v55, %v996_v53  ;;  %v1669_v3 = vpop.f32.mrf.mxu0  ;;  %vm1933_vm7 = vc.u32 %v1931_v20, %v1927_v7  ;;  %v1345_v29 = vadd.f32 %v1309_v59, %v7618_v24  ;;  %v1932_v0 = vadd.s32 %v1930_v27, %v1924_v12 }
 0x12f   : >> { %v1934_v10 = vsel %vm1933_vm7, 1, %v7222_v54  ;;  %v1911_v38 = vmul.u32 48, %v1910_v26  ;;  %v1928_v24 = vshrl.u32 %v1923_v56, 16  ;;  %v1960_v7 = vadd.s32 %v1954_v17, %v1950_v42 }
 0x130   : >> { %v7833_v21 = vadd.f32 %v1222_v22, %v1116_v62  ;;  %v1948_v22 = vshrl.u32 %v7831_v37, 16  ;;  %v1936_v52 = vadd.s32 %v1934_v10, %v1932_v0  ;;  %v1959_v26 = vsel %vm1958_vm12, 1, %v7222_v54 }
 0x131   : >> { %v1912_v55 = vsub.s32 %v7768_v36, %v1911_v38  ;;  %v7882_v27 = vadd.s32 %v7672_v19, %v7856_v48  ;;  %v1955_v10 = vshrl.u32 %v1951_v43, 16  ;;  %vm7951_vm7 = vcmp.ge.s32.totalorder %v2197_v13, 46 }
 0x132   : >> { %v7852_v9 = vmul.u32 43691, %v1948_v22  ;;  %v1953_v59 = vmul.u32 43690, %v1948_v22  ;;  %v1937_v36 = vadd.s32 %v1936_v52, %v1926_v25  ;;  %v2196_v25 = vsel %vm7867_vm6, %v7837_v41, %v7795_v63 }
 0x133   : >> { %v1429_v11 = vpop.f32.mrf.mxu2  ;;  %v1913_v12 = vsub.s32 0, %v1912_v55  ;;  %vm1973_vm0 = vcmp.lt.s32.totalorder %v7882_v27, 0  ;;  %vm7941_vm4 = vcmp.ge.s32.totalorder %v2196_v25, 46 }
 0x134   : >> { %v1465_v44 = vadd.f32 %v1429_v11, %v1345_v29  ;;  %v1549_v47 = vpop.f32.mrf.mxu3  ;;  %v1956_v62 = vshll.u32 %v7852_v9, 16  ;;  %v1938_v20 = vadd.s32 %v1937_v36, %v1928_v24  ;;  %v1957_v22 = vshrl.u32 %v7852_v9, 16 }
 0x135   : >> { %v1312_v53 = vpop.f32.mrf.mxu1 }
 0x136   : >> { %v1585_v23 = vadd.f32 %v1549_v47, %v1465_v44  ;;  %v1672_v61 = vpop.f32.mrf.mxu0  ;;  %vm1962_vm13 = vc.u32 %v1960_v7, %v1956_v62  ;;  %v1346_v29 = vadd.f32 %v1312_v53, %v7628_v35  ;;  %v1939_v63 = vshrl.u32 %v1938_v20, 5 }
 0x137   : >> { %v1963_v41 = vsel %vm1962_vm13, 1, %v7222_v54  ;;  %v1974_v35 = vsub.s32 0, %v7882_v27  ;;  %v7906_v47 = vsel %vm1886_vm10, %v1913_v12, %v1912_v55 }
 0x138   : >> { %v1705_v18 = vadd.f32 %v1669_v3, %v1585_v23  ;;  %v1961_v3 = vadd.s32 %v1959_v26, %v1953_v59  ;;  %v1940_v52 = vmul.u32 48, %v1939_v63  ;;  %v7914_v59 = vadd.s32 56, %v7669_v16 }
 0x139   : >> { %v7911_v53 = vsel %vm1973_vm0, %v1974_v35, %v7882_v27  ;;  %vm2150_vm10 = vcmp.ne.s32.totalorder %v7906_v47, 0  ;;  %vm2162_vm3 = vcmp.lt.s32.totalorder %v7906_v47, 0 }
 0x13a   : >> { %v1721_v0 = vadd.f32 %v7861_v58, %v1705_v18  ;;  %v1965_v9 = vadd.s32 %v1963_v41, %v1961_v3  ;;  %v1976_v55 = vand.u32 65535, %v7911_v53  ;;  %v1941_v62 = vsub.s32 %v7804_v34, %v1940_v52 }
 0x13b   : >> { %v1432_v11 = vpop.f32.mrf.mxu2  ;;  %v1977_v7 = vshrl.u32 %v7911_v53, 16  ;;  %v7935_v34 = vadd.s32 %v7672_v19, %v7914_v59 }
 0x13c   : >> { %vm1733_vm1 = vcmp.ge.f32.partialorder %v1721_v0, 0.0  ;;  %v1749_v42 = vmul.f32 %v7877_v6, %v1721_v0  ;;  %v1466_v43 = vadd.f32 %v1432_v11, %v1346_v29  ;;  %v1552_v44 = vpop.f32.mrf.mxu3  ;;  %v1966_v12 = vadd.s32 %v1965_v9, %v1955_v10 }
 0x13d   : >> { %v1315_v24 = vpop.f32.mrf.mxu1  ;;  %v1979_v20 = vmul.u32 43691, %v1976_v55  ;;  %v7929_v26 = vmul.u32 43690, %v1976_v55  ;;  %v1942_v39 = vsub.s32 0, %v1941_v62  ;;  %v7931_v3 = vmul.u32 43691, %v1977_v7 }
 0x13e   : >> { %v1761_v17 = vsel %vm1733_vm1, %v1721_v0, %v1749_v42  ;;  %v1586_v23 = vadd.f32 %v1552_v44, %v1466_v43  ;;  %v1675_v56 = vpop.f32.mrf.mxu0  ;;  %v1967_v28 = vadd.s32 %v1966_v12, %v1957_v22  ;;  %v1347_v50 = vadd.f32 %v1315_v24, %v7639_v46 }
 0x13f   : >> { %v2243_v36 = vsel %vm7848_vm8, -1e+30, %v1761_v17  ;;  %v2186_v22 = vadd.s32 48, %v7906_v47  ;;  %v7948_v11 = vsel %vm1915_vm15, %v1942_v39, %v1941_v62  ;;  %v1982_v25 = vmul.u32 43690, %v1977_v7  ;;  %vm7957_vm8 = vmand %vm2162_vm3, %vm2150_vm10 }
 0x140   : >> { %2256 = vst [vmem:[%s7925_s23] sm:$0xff] %v2243_v36  ;;  %v1706_v18 = vadd.f32 %v1672_v61, %v1586_v23  ;;  %v1983_v61 = vshll.u32 %v7929_v26, 16  ;;  %v1968_v38 = vshrl.u32 %v1967_v28, 5  ;;  %v1985_v44 = vshll.u32 %v7931_v3, 16 }
 0x141   : >> { %vm2002_vm6 = vcmp.lt.s32.totalorder %v7935_v34, 0  ;;  %vm2151_vm9 = vcmp.ne.s32.totalorder %v7948_v11, 0  ;;  %vm2163_vm11 = vcmp.lt.s32.totalorder %v7948_v11, 0  ;;  %v2198_v62 = vsel %vm7957_vm8, %v2186_v22, %v7906_v47 }
 0x142   : >> { %v1722_v29 = vadd.f32 %v7861_v58, %v1706_v18  ;;  %v1969_v49 = vmul.u32 48, %v1968_v38  ;;  %vm1987_vm15 = vc.u32 %v1979_v20, %v1983_v61  ;;  %v1989_v55 = vadd.s32 %v1983_v61, %v1979_v20  ;;  %vm7980_vm13 = vmand %vm2163_vm11, %vm2151_vm9 }
 0x143   : >> { %v1435_v10 = vpop.f32.mrf.mxu2  ;;  %v1988_v17 = vsel %vm1987_vm15, 1, %v7222_v54  ;;  %v2003_v7 = vsub.s32 0, %v7935_v34  ;;  %v2187_v18 = vadd.s32 48, %v7948_v11  ;;  %v1984_v28 = vshrl.u32 %v7929_v26, 16 }
 0x144   : >> { %vm1734_vm5 = vcmp.ge.f32.partialorder %v1722_v29, 0.0  ;;  %v1750_v46 = vmul.f32 %v7877_v6, %v1722_v29  ;;  %v1467_v63 = vadd.f32 %v1435_v10, %v1347_v50  ;;  %v1555_v41 = vpop.f32.mrf.mxu3  ;;  %v1970_v13 = vsub.s32 %v7831_v37, %v1969_v49 }
 0x145   : >> { %v1318_v42 = vpop.f32.mrf.mxu1  ;;  %v1990_v12 = vadd.s32 %v1988_v17, %v1982_v25  ;;  %vm1991_vm12 = vc.u32 %v1989_v55, %v1985_v44  ;;  %v7988_v20 = vsel %vm2002_vm6, %v2003_v7, %v7935_v34  ;;  %v1986_v26 = vshrl.u32 %v7931_v3, 16 }
 0x146   : >> { %v1762_v24 = vsel %vm1734_vm5, %v1722_v29, %v1750_v46  ;;  %v1587_v52 = vadd.f32 %v1555_v41, %v1467_v63  ;;  %v1678_v9 = vpop.f32.mrf.mxu0  ;;  %v1971_v39 = vsub.s32 0, %v1970_v13  ;;  %v1348_v50 = vadd.f32 %v1318_v42, %v7650_v57 }
 0x147   : >> { %v2244_v23 = vsel %vm7941_vm4, -1e+30, %v1762_v24  ;;  %v1992_v47 = vsel %vm1991_vm12, 1, %v7222_v54  ;;  %v2005_v57 = vand.u32 65535, %v7988_v20  ;;  %v2006_v0 = vshrl.u32 %v7988_v20, 16 }
 0x148   : >> { %2257 = vst [vmem:[%s7925_s23 + $0x8] sm:$0xff] %v2244_v23  ;;  %v1707_v36 = vadd.f32 %v1675_v56, %v1587_v52  ;;  %v1994_v61 = vadd.s32 %v1992_v47, %v1990_v12  ;;  %vm7994_vm1 = vcmp.ge.s32.totalorder %v2198_v62, 46  ;;  %v8000_v63 = vsel %vm1944_vm2, %v1971_v39, %v1970_v13 }
 0x149   : >> { %v2199_v41 = vsel %vm7980_vm13, %v2187_v18, %v7948_v11  ;;  %v8006_v42 = vadd.s32 64, %v7669_v16  ;;  %v8009_v43 = vadd.s32 72, %v7669_v16  ;;  %v2008_v52 = vmul.u32 43691, %v2005_v57 }
 0x14a   : >> { %v1723_v37 = vadd.f32 %v7861_v58, %v1707_v36  ;;  %v1995_v25 = vadd.s32 %v1994_v61, %v1984_v28  ;;  %v2009_v40 = vmul.u32 43690, %v2005_v57  ;;  %vm2152_vm2 = vcmp.ne.s32.totalorder %v8000_v63, 0 }
 0x14b   : >> { %v1438_v29 = vpop.f32.mrf.mxu2  ;;  %v2010_v13 = vmul.u32 43691, %v2006_v0  ;;  %vm2164_vm10 = vcmp.lt.s32.totalorder %v8000_v63, 0  ;;  %v2011_v55 = vmul.u32 43690, %v2006_v0  ;;  %v2188_v12 = vadd.s32 48, %v8000_v63 }
 0x14c   : >> { %vm1735_vm14 = vcmp.ge.f32.partialorder %v1723_v37, 0.0  ;;  %v1751_v10 = vmul.f32 %v7877_v6, %v1723_v37  ;;  %v1468_v22 = vadd.f32 %v1438_v29, %v1348_v50  ;;  %v1558_v38 = vpop.f32.mrf.mxu3  ;;  %v1996_v23 = vadd.s32 %v1995_v25, %v1986_v26 }
 0x14d   : >> { %v1321_v3 = vpop.f32.mrf.mxu1  ;;  %v2012_v36 = vshll.u32 %v2009_v40, 16  ;;  %v2014_v18 = vshll.u32 %v2010_v13, 16  ;;  %v8021_v28 = vadd.s32 %v7672_v19, %v8006_v42  ;;  %v2015_v56 = vshrl.u32 %v2010_v13, 16 }
 0x14e   : >> { %v1763_v49 = vsel %vm1735_vm14, %v1723_v37, %v1751_v10  ;;  %v1588_v44 = vadd.f32 %v1558_v38, %v1468_v22  ;;  %v1681_v24 = vpop.f32.mrf.mxu0  ;;  %v1349_v62 = vadd.f32 %v1321_v3, %v7661_v4  ;;  %v1997_v7 = vshrl.u32 %v1996_v23, 5 }
 0x14f   : >> { %v2245_v17 = vsel %vm7951_vm7, -1e+30, %v1763_v49  ;;  %vm2016_vm3 = vc.u32 %v2008_v52, %v2012_v36  ;;  %v2018_v35 = vadd.s32 %v2012_v36, %v2008_v52  ;;  %v2013_v37 = vshrl.u32 %v2009_v40, 16  ;;  %vm8033_vm7 = vmand %vm2164_vm10, %vm2152_vm2 }
 0x150   : >> { %2258 = vst [vmem:[%s7925_s23 + $0x10] sm:$0xff] %v2245_v17  ;;  %v1708_v11 = vadd.f32 %v1678_v9, %v1588_v44  ;;  %v1998_v9 = vmul.u32 48, %v1997_v7  ;;  %v2017_v47 = vsel %vm2016_vm3, 1, %v7222_v54  ;;  %vm8025_vm5 = vcmp.ge.s32.totalorder %v2199_v41, 46 }
 0x151   : >> { %v2019_v57 = vadd.s32 %v2017_v47, %v2011_v55  ;;  %vm2020_vm8 = vc.u32 %v2018_v35, %v2014_v18  ;;  %vm2031_vm15 = vcmp.lt.s32.totalorder %v8021_v28, 0  ;;  %v2032_v38 = vsub.s32 0, %v8021_v28 }
 0x152   : >> { %v1724_v39 = vadd.f32 %v7861_v58, %v1708_v11  ;;  %v1999_v22 = vsub.s32 %v7911_v53, %v1998_v9  ;;  %v2021_v49 = vsel %vm2020_vm8, 1, %v7222_v54  ;;  %v8043_v44 = vadd.s32 %v7672_v19, %v8009_v43 }
 0x153   : >> { %v1441_v50 = vpop.f32.mrf.mxu2  ;;  %v2023_v17 = vadd.s32 %v2021_v49, %v2019_v57  ;;  %v8050_v53 = vsel %vm2031_vm15, %v2032_v38, %v8021_v28  ;;  %v2200_v13 = vsel %vm8033_vm7, %v2188_v12, %v8000_v63  ;;  %v1784_v7 = vadd.s32 80, %v7669_v16 }
 0x154   : >> { %vm1736_vm4 = vcmp.ge.f32.partialorder %v1724_v39, 0.0  ;;  %v1752_v4 = vmul.f32 %v7877_v6, %v1724_v39  ;;  %v1469_v29 = vadd.f32 %v1441_v50, %v1349_v62  ;;  %v1561_v26 = vpop.f32.mrf.mxu3  ;;  %v2000_v40 = vsub.s32 0, %v1999_v22 }
 0x155   : >> { %v1324_v0 = vpop.f32.mrf.mxu1  ;;  %v2034_v11 = vand.u32 65535, %v8050_v53  ;;  %v2035_v55 = vshrl.u32 %v8050_v53, 16  ;;  %v2024_v62 = vadd.s32 %v2023_v17, %v2013_v37  ;;  %vm8071_vm13 = vcmp.ge.s32.totalorder %v2200_v13, 46 }
 0x156   : >> { %v1764_v3 = vsel %vm1736_vm4, %v1724_v39, %v1752_v4  ;;  %v1589_v41 = vadd.f32 %v1561_v26, %v1469_v29  ;;  %v1684_v25 = vpop.f32.mrf.mxu0  ;;  %v1350_v46 = vadd.f32 %v1324_v0, %v7683_v30  ;;  %v2001_v36 = vsel %vm1973_vm0, %v2000_v40, %v1999_v22 }
 0x157   : >> { %v2246_v52 = vsel %vm7994_vm1, -1e+30, %v1764_v3  ;;  %vm2153_vm9 = vcmp.ne.s32.totalorder %v2001_v36, 0  ;;  %vm2165_vm11 = vcmp.lt.s32.totalorder %v2001_v36, 0  ;;  %v2025_v12 = vadd.s32 %v2024_v62, %v2015_v56 }
 0x158   : >> { %2259 = vst [vmem:[%s7925_s23 + $0x18] sm:$0xff] %v2246_v52  ;;  %v1709_v23 = vadd.f32 %v1681_v24, %v1589_v41  ;;  %v2189_v24 = vadd.s32 48, %v2001_v36  ;;  %vm8063_vm12 = vmand %vm2165_vm11, %vm2153_vm9  ;;  %v2038_v35 = vmul.u32 43690, %v2034_v11  ;;  %v8067_v50 = vmul.u32 43691, %v2035_v55 }
 0x159   : >> { %v2061_v30 = vsub.s32 0, %v8043_v44  ;;  %v2037_v4 = vmul.u32 43691, %v2034_v11  ;;  %v2026_v26 = vshrl.u32 %v2025_v12, 5  ;;  %vm2060_vm14 = vcmp.lt.s32.totalorder %v8043_v44, 0 }
 0x15a   : >> { %v1725_v18 = vadd.f32 %v7861_v58, %v1709_v23  ;;  %v2041_v57 = vshll.u32 %v2038_v35, 16  ;;  %v8077_v56 = vadd.s32 %v7672_v19, %v1784_v7  ;;  %v2201_v38 = vsel %vm8063_vm12, %v2189_v24, %v2001_v36 }
 0x15b   : >> { %v1444_v39 = vpop.f32.mrf.mxu2  ;;  %v2040_v3 = vmul.u32 43690, %v2035_v55  ;;  %v2027_v52 = vmul.u32 48, %v2026_v26  ;;  %v2043_v40 = vshll.u32 %v8067_v50, 16  ;;  %v8089_v13 = vsel %vm2060_vm14, %v2061_v30, %v8043_v44 }
 0x15c   : >> { %vm1737_vm0 = vcmp.ge.f32.partialorder %v1725_v18, 0.0  ;;  %v1753_v27 = vmul.f32 %v7877_v6, %v1725_v18  ;;  %v1470_v9 = vadd.f32 %v1444_v39, %v1350_v46  ;;  %v1564_v37 = vpop.f32.mrf.mxu3  ;;  %vm2045_vm1 = vc.u32 %v2037_v4, %v2041_v57 }
 0x15d   : >> { %v1327_v29 = vpop.f32.mrf.mxu1  ;;  %v2047_v23 = vadd.s32 %v2041_v57, %v2037_v4  ;;  %v2028_v11 = vsub.s32 %v7988_v20, %v2027_v52  ;;  %v2046_v55 = vsel %vm2045_vm1, 1, %v7222_v54  ;;  %v2063_v61 = vand.u32 65535, %v8089_v13 }
 0x15e   : >> { %v1765_v0 = vsel %vm1737_vm0, %v1725_v18, %v1753_v27  ;;  %v1590_v10 = vadd.f32 %v1564_v37, %v1470_v9  ;;  %v1687_v22 = vpop.f32.mrf.mxu0  ;;  %v1351_v49 = vadd.f32 %v1327_v29, %v7710_v51  ;;  %v2064_v51 = vshrl.u32 %v8089_v13, 16 }
 0x15f   : >> { %v2247_v41 = vsel %vm8025_vm5, -1e+30, %v1765_v0  ;;  %v2042_v36 = vshrl.u32 %v2038_v35, 16  ;;  %v2048_v62 = vadd.s32 %v2046_v55, %v2040_v3  ;;  %vm2049_vm2 = vc.u32 %v2047_v23, %v2043_v40 }
 0x160   : >> { %2260 = vst [vmem:[%s7925_s23 + $0x20] sm:$0xff] %v2247_v41  ;;  %v1710_v17 = vadd.f32 %v1684_v25, %v1590_v10  ;;  %v2029_v7 = vsub.s32 0, %v2028_v11  ;;  %v2044_v18 = vshrl.u32 %v8067_v50, 16  ;;  %v2050_v24 = vsel %vm2049_vm2, 1, %v7222_v54 }
 0x161   : >> { %v2067_v39 = vmul.u32 43690, %v2063_v61  ;;  %vm8099_vm3 = vcmp.ge.s32.totalorder %v2201_v38, 46  ;;  %v2052_v35 = vadd.s32 %v2050_v24, %v2048_v62  ;;  %v2066_v37 = vmul.u32 43691, %v2063_v61 }
 0x162   : >> { %v1726_v46 = vadd.f32 %v7861_v58, %v1710_v17  ;;  %v2030_v9 = vsel %vm2002_vm6, %v2029_v7, %v2028_v11  ;;  %v2068_v50 = vmul.u32 43691, %v2064_v51  ;;  %v2069_v0 = vmul.u32 43690, %v2064_v51 }
 0x163   : >> { %v1447_v25 = vpop.f32.mrf.mxu2  ;;  %v2070_v4 = vshll.u32 %v2067_v39, 16  ;;  %vm2089_vm4 = vcmp.lt.s32.totalorder %v8077_v56, 0  ;;  %vm2154_vm5 = vcmp.ne.s32.totalorder %v2030_v9, 0  ;;  %vm2166_vm7 = vcmp.lt.s32.totalorder %v2030_v9, 0 }
 0x164   : >> { %vm1738_vm10 = vcmp.ge.f32.partialorder %v1726_v46, 0.0  ;;  %v1754_v20 = vmul.f32 %v7877_v6, %v1726_v46  ;;  %v1471_v63 = vadd.f32 %v1447_v25, %v1351_v49  ;;  %v1567_v12 = vpop.f32.mrf.mxu3  ;;  %v2053_v38 = vadd.s32 %v2052_v35, %v2042_v36  ;;  %vm8111_vm8 = vmand %vm2166_vm7, %vm2154_vm5 }
 0x165   : >> { %v1330_v27 = vpop.f32.mrf.mxu1  ;;  %v2190_v41 = vadd.s32 48, %v2030_v9  ;;  %v2072_v49 = vshll.u32 %v2068_v50, 16  ;;  %v2071_v40 = vshrl.u32 %v2067_v39, 16  ;;  %vm2074_vm6 = vc.u32 %v2066_v37, %v2070_v4 }
 0x166   : >> { %v1766_v29 = vsel %vm1738_vm10, %v1726_v46, %v1754_v20  ;;  %v1591_v26 = vadd.f32 %v1567_v12, %v1471_v63  ;;  %v1690_v57 = vpop.f32.mrf.mxu0  ;;  %v1352_v3 = vadd.f32 %v1330_v27, %v7736_v31  ;;  %v2054_v52 = vadd.s32 %v2053_v38, %v2044_v18 }
 0x167   : >> { %v2248_v10 = vsel %vm8071_vm13, -1e+30, %v1766_v29  ;;  %v2076_v17 = vadd.s32 %v2070_v4, %v2066_v37  ;;  %v2073_v47 = vshrl.u32 %v2068_v50, 16  ;;  %v2075_v55 = vsel %vm2074_vm6, 1, %v7222_v54 }
 0x168   : >> { %2261 = vst [vmem:[%s7925_s23 + $0x28] sm:$0xff] %v2248_v10  ;;  %v1711_v34 = vadd.f32 %v1687_v22, %v1591_v26  ;;  %v2090_v61 = vsub.s32 0, %v8077_v56  ;;  %v2055_v31 = vshrl.u32 %v2054_v52, 5  ;;  %v2077_v22 = vadd.s32 %v2075_v55, %v2069_v0 }
 0x169   : >> { %vm2078_vm9 = vc.u32 %v2076_v17, %v2072_v49  ;;  %v1785_v46 = vadd.s32 88, %v7669_v16  ;;  %v2202_v24 = vsel %vm8111_vm8, %v2190_v41, %v2030_v9 }
 0x16a   : >> { %v1727_v23 = vadd.f32 %v7861_v58, %v1711_v34  ;;  %v2079_v7 = vsel %vm2078_vm9, 1, %v7222_v54  ;;  %v2056_v39 = vmul.u32 48, %v2055_v31  ;;  %v8125_v63 = vsel %vm2089_vm4, %v2090_v61, %v8077_v56 }
 0x16b   : >> { %v1450_v51 = vpop.f32.mrf.mxu2  ;;  %v2081_v20 = vadd.s32 %v2079_v7, %v2077_v22  ;;  %v2092_v27 = vand.u32 65535, %v8125_v63  ;;  %v8129_v37 = vadd.s32 %v7672_v19, %v1785_v46  ;;  %v2093_v26 = vshrl.u32 %v8125_v63, 16 }
 0x16c   : >> { %vm1739_vm11 = vcmp.ge.f32.partialorder %v1727_v23, 0.0  ;;  %v1755_v36 = vmul.f32 %v7877_v6, %v1727_v23  ;;  %v1472_v62 = vadd.f32 %v1450_v51, %v1352_v3  ;;  %v1570_v25 = vpop.f32.mrf.mxu3  ;;  %v2057_v9 = vsub.s32 %v8050_v53, %v2056_v39 }
 0x16d   : >> { %v1333_v18 = vpop.f32.mrf.mxu1  ;;  %v2082_v29 = vadd.s32 %v2081_v20, %v2071_v40  ;;  %vm8137_vm12 = vcmp.ge.s32.totalorder %v2202_v24, 46  ;;  %v2096_v3 = vmul.u32 43690, %v2092_v27  ;;  %v2095_v41 = vmul.u32 43691, %v2092_v27 }
 0x16e   : >> { %v1767_v12 = vsel %vm1739_vm11, %v1727_v23, %v1755_v36  ;;  %v1592_v35 = vadd.f32 %v1570_v25, %v1472_v62  ;;  %v1693_v4 = vpop.f32.mrf.mxu0  ;;  %v1353_v0 = vadd.f32 %v1333_v18, %v7752_v8  ;;  %v2058_v19 = vsub.s32 0, %v2057_v9 }
 0x16f   : >> { %v2249_v50 = vsel %vm8099_vm3, -1e+30, %v1767_v12  ;;  %v2083_v34 = vadd.s32 %v2082_v29, %v2073_v47  ;;  %v8141_v30 = vmul.u32 43691, %v2093_v26  ;;  %v2098_v53 = vmul.u32 43690, %v2093_v26 }
 0x170   : >> { %2262 = vst [vmem:[%s7925_s23 + $0x30] sm:$0xff] %v2249_v50  ;;  %v1712_v10 = vadd.f32 %v1690_v57, %v1592_v35  ;;  %v2099_v52 = vshll.u32 %v2096_v3, 16  ;;  %vm2118_vm0 = vcmp.lt.s32.totalorder %v8129_v37, 0  ;;  %v2059_v8 = vsel %vm2031_vm15, %v2058_v19, %v2057_v9 }
 0x171   : >> { %v2084_v57 = vshrl.u32 %v2083_v34, 5  ;;  %v2101_v17 = vshll.u32 %v8141_v30, 16  ;;  %v2119_v23 = vsub.s32 0, %v8129_v37  ;;  %vm2155_vm1 = vcmp.ne.s32.totalorder %v2059_v8, 0 }
 0x172   : >> { %v1728_v49 = vadd.f32 %v7861_v58, %v1712_v10  ;;  %vm2167_vm2 = vcmp.lt.s32.totalorder %v2059_v8, 0  ;;  %v2191_v51 = vadd.s32 48, %v2059_v8  ;;  %vm2103_vm10 = vc.u32 %v2095_v41, %v2099_v52 }
 0x173   : >> { %v1453_v40 = vpop.f32.mrf.mxu2  ;;  %v2085_v31 = vmul.u32 48, %v2084_v57  ;;  %vm8150_vm15 = vmand %vm2167_vm2, %vm2155_vm1  ;;  %v2100_v36 = vshrl.u32 %v2096_v3, 16  ;;  %v2104_v62 = vsel %vm2103_vm10, 1, %v7222_v54  ;;  %v2105_v24 = vadd.s32 %v2099_v52, %v2095_v41 }
 0x174   : >> { %vm1740_vm13 = vcmp.ge.f32.partialorder %v1728_v49, 0.0  ;;  %v1756_v11 = vmul.f32 %v7877_v6, %v1728_v49  ;;  %v1473_v47 = vadd.f32 %v1453_v40, %v1353_v0  ;;  %v1573_v55 = vpop.f32.mrf.mxu3  ;;  %v2203_v7 = vsel %vm8150_vm15, %v2191_v51, %v2059_v8 }
 0x175   : >> { %v1336_v61 = vpop.f32.mrf.mxu1  ;;  %v2086_v18 = vsub.s32 %v8089_v13, %v2085_v31  ;;  %v2102_v20 = vshrl.u32 %v8141_v30, 16  ;;  %v2106_v12 = vadd.s32 %v2104_v62, %v2098_v53  ;;  %v8165_v35 = vsel %vm2118_vm0, %v2119_v23, %v8129_v37 }
 0x176   : >> { %v1768_v22 = vsel %vm1740_vm13, %v1728_v49, %v1756_v11  ;;  %v1593_v28 = vadd.f32 %v1573_v55, %v1473_v47  ;;  %v1696_v27 = vpop.f32.mrf.mxu0  ;;  %vm2107_vm3 = vc.u32 %v2105_v24, %v2101_v17  ;;  %v2121_v9 = vand.u32 65535, %v8165_v35 }
 0x177   : >> { %v2250_v25 = vsel %vm8137_vm12, -1e+30, %v1768_v22  ;;  %v2087_v50 = vsub.s32 0, %v2086_v18  ;;  %v2122_v29 = vshrl.u32 %v8165_v35, 16  ;;  %v1354_v13 = vadd.f32 %v1336_v61, %v7777_v45 }
 0x178   : >> { %2263 = vst [vmem:[%s7925_s23 + $0x38] sm:$0xff] %v2250_v25  ;;  %v1713_v39 = vadd.f32 %v1693_v4, %v1593_v28  ;;  %vm8171_vm5 = vcmp.ge.s32.totalorder %v2203_v7, 46  ;;  %v2108_v0 = vsel %vm2107_vm3, 1, %v7222_v54  ;;  %v2124_v19 = vmul.u32 43691, %v2121_v9 }
 0x179   : >> { %v2088_v38 = vsel %vm2060_vm14, %v2087_v50, %v2086_v18  ;;  %v2110_v3 = vadd.s32 %v2108_v0, %v2106_v12  ;;  %v2125_v34 = vmul.u32 43690, %v2121_v9  ;;  %v2126_v40 = vmul.u32 43691, %v2122_v29 }
 0x17a   : >> { %v1729_v26 = vadd.f32 %v7861_v58, %v1713_v39  ;;  %vm2156_vm6 = vcmp.ne.s32.totalorder %v2088_v38, 0  ;;  %vm2168_vm8 = vcmp.lt.s32.totalorder %v2088_v38, 0  ;;  %v2192_v53 = vadd.s32 48, %v2088_v38 }
 0x17b   : >> { %v1456_v10 = vpop.f32.mrf.mxu2  ;;  %v2111_v52 = vadd.s32 %v2110_v3, %v2100_v36  ;;  %vm2180_vm9 = vmand %vm2168_vm8, %vm2156_vm6  ;;  %v2127_v44 = vmul.u32 43690, %v2122_v29  ;;  %v2128_v47 = vshll.u32 %v2125_v34, 16  ;;  %v2130_v61 = vshll.u32 %v2126_v40, 16 }
 0x17c   : >> { %vm1741_vm7 = vcmp.ge.f32.partialorder %v1729_v26, 0.0  ;;  %v1757_v41 = vmul.f32 %v7877_v6, %v1729_v26  ;;  %v1474_v30 = vadd.f32 %v1456_v10, %v1354_v13  ;;  %v1576_v45 = vpop.f32.mrf.mxu3  ;;  %v2204_v23 = vsel %vm2180_vm9, %v2192_v53, %v2088_v38 }
 0x17d   : >> { %v1339_v49 = vpop.f32.mrf.mxu1  ;;  %v2112_v11 = vadd.s32 %v2111_v52, %v2102_v20  ;;  %vm2132_vm14 = vc.u32 %v2124_v19, %v2128_v47  ;;  %v2134_v31 = vadd.s32 %v2128_v47, %v2124_v19  ;;  %vm8184_vm11 = vcmp.ge.s32.totalorder %v2204_v23, 46 }
 0x17e   : >> { %v1769_v8 = vsel %vm1741_vm7, %v1729_v26, %v1757_v41  ;;  %v1594_v57 = vadd.f32 %v1576_v45, %v1474_v30  ;;  %v1355_v22 = vadd.f32 %v1339_v49, %v7799_v32  ;;  %v2133_v36 = vsel %vm2132_vm14, 1, %v7222_v54  ;;  %v1699_v25 = vpop.f32.mrf.mxu0 }
 0x17f   : >> { %v2251_v17 = vsel %vm8171_vm5, -1e+30, %v1769_v8  ;;  %v2113_v51 = vshrl.u32 %v2112_v11, 5  ;;  %v2129_v18 = vshrl.u32 %v2125_v34, 16  ;;  %v2135_v24 = vadd.s32 %v2133_v36, %v2127_v44 }
 0x180   : >> { %2264 = vst [vmem:[%s7925_s23 + $0x40] sm:$0xff] %v2251_v17  ;;  %v1714_v55 = vadd.f32 %v1696_v27, %v1594_v57  ;;  %vm2136_vm12 = vc.u32 %v2134_v31, %v2130_v61  ;;  %v2131_v50 = vshrl.u32 %v2126_v40, 16  ;;  %v2274_v37 = vmul.u32 (%p656_p11), 2, %v7669_v16 }
 0x181   : >> { %v2114_v7 = vmul.u32 48, %v2113_v51  ;;  %v2137_v12 = vsel %vm2136_vm12, 1, %v7222_v54 }
 0x182   : >> { %v1730_v28 = vadd.f32 %v7861_v58, %v1714_v55  ;;  %v2139_v9 = vadd.s32 %v2137_v12, %v2135_v24 }
 0x183   : >> { %v1459_v62 = vpop.f32.mrf.mxu2  ;;  %v2115_v27 = vsub.s32 %v8125_v63, %v2114_v7 }
 0x184   : >> { %vm1742_vm13 = vcmp.ge.f32.partialorder %v1730_v28, 0.0  ;;  %v1758_v39 = vmul.f32 %v7877_v6, %v1730_v28  ;;  %v1475_v20 = vadd.f32 %v1459_v62, %v1355_v22  ;;  %v1579_v32 = vpop.f32.mrf.mxu3  ;;  %v2140_v10 = vadd.s32 %v2139_v9, %v2129_v18 }
 0x185   : >> { %v1342_v13 = vpop.f32.mrf.mxu1  ;;  %v2116_v0 = vsub.s32 0, %v2115_v27  ;;  %v2276_v22 = vmul.u32 (%p656_p11), 2, %v7726_v60 }
 0x186   : >> { %v1770_v29 = vsel %vm1742_vm13, %v1730_v28, %v1758_v39  ;;  %v1595_v26 = vadd.f32 %v1579_v32, %v1475_v20  ;;  %v1356_v3 = vadd.f32 %v1342_v13, %v7833_v21  ;;  %v2141_v54 = vadd.s32 %v2140_v10, %v2131_v50  ;;  %v1702_v21 = vpop.f32.mrf.mxu0 }
 0x187   : >> { %v2252_v4 = vsel %vm8184_vm11, -1e+30, %v1770_v29  ;;  %v2117_v19 = vsel %vm2089_vm4, %v2116_v0, %v2115_v27 }
 0x188   : >> { %2265 = vst [vmem:[%s7925_s23 + $0x48] sm:$0xff] %v2252_v4  ;;  %v1715_v38 = vadd.f32 %v1699_v25, %v1595_v26  ;;  %vm2157_vm1 = vcmp.ne.s32.totalorder %v2117_v19, 0  ;;  %vm2169_vm2 = vcmp.lt.s32.totalorder %v2117_v19, 0  ;;  %v2193_v34 = vadd.s32 48, %v2117_v19 }
 0x189   : >> { %vm2181_vm10 = vmand %vm2169_vm2, %vm2157_vm1  ;;  %v2142_v30 = vshrl.u32 %v2141_v54, 5 }
 0x18a   : >> { %v1731_v63 = vadd.f32 %v7861_v58, %v1715_v38  ;;  %v2205_v49 = vsel %vm2181_vm10, %v2193_v34, %v2117_v19 }
 0x18b   : >> { %v1462_v41 = vpop.f32.mrf.mxu2  ;;  %vm2217_vm3 = vcmp.ge.s32.totalorder %v2205_v49, 46  ;;  %v2143_v56 = vmul.u32 48, %v2142_v30 }
 0x18c   : >> { %vm1743_vm15 = vcmp.ge.f32.partialorder %v1731_v63, 0.0  ;;  %v1759_v45 = vmul.f32 %v7877_v6, %v1731_v63  ;;  %v1476_v53 = vadd.f32 %v1462_v41, %v1356_v3  ;;  %v1582_v52 = vpop.f32.mrf.mxu3 }
 0x18d   : >> { %v2144_v44 = vsub.s32 %v8165_v35, %v2143_v56 }
 0x18e   : >> { %v1771_v40 = vsel %vm1743_vm15, %v1731_v63, %v1759_v45  ;;  %v1596_v8 = vadd.f32 %v1582_v52, %v1476_v53 }
 0x18f   : >> { %v2253_v57 = vsel %vm2217_vm3, -1e+30, %v1771_v40  ;;  %v2145_v23 = vsub.s32 0, %v2144_v44 }
 0x190   : >> { %2266 = vst [vmem:[%s7925_s23 + $0x50] sm:$0xff] %v2253_v57  ;;  %v1716_v17 = vadd.f32 %v1702_v21, %v1596_v8 }
 0x191   : >> { %v2146_v47 = vsel %vm2118_vm0, %v2145_v23, %v2144_v44 }
 0x192   : >> { %v1732_v11 = vadd.f32 %v7861_v58, %v1716_v17  ;;  %vm2158_vm5 = vcmp.ne.s32.totalorder %v2146_v47, 0  ;;  %vm2170_vm7 = vcmp.lt.s32.totalorder %v2146_v47, 0  ;;  %v2194_v61 = vadd.s32 48, %v2146_v47 }
 0x193   : >> { %vm2182_vm6 = vmand %vm2170_vm7, %vm2158_vm5  ;;  %v2273_v58 = vand.u32 (%p656_p11), 127, %v1773_v14 }
 0x194   : >> { %vm1744_vm4 = vcmp.ge.f32.partialorder %v1732_v11, 0.0  ;;  %v1760_v55 = vmul.f32 %v7877_v6, %v1732_v11  ;;  %v2206_v31 = vsel %vm2182_vm6, %v2194_v61, %v2146_v47  ;;  %658 = sbr.rel (!%p656_p11) target bundleno = 45 (0x2d), region = 252  ;;  %v2275_v6 = vmul.u32 (%p656_p11), 2, %v7698_v15 }
 0x195   : >> { %vm2218_vm8 = vcmp.ge.s32.totalorder %v2206_v31, 46  ;;  %vm2277_vm0 = vcmp.eq.s32.totalorder (%p656_p11), %v2273_v58, %v2274_v37  ;;  %vm2279_vm14 = vcmp.eq.s32.totalorder (%p656_p11), %v2273_v58, %v2276_v22 }
 0x196   : >> { %v1772_v51 = vsel %vm1744_vm4, %v1732_v11, %v1760_v55  ;;  %vm2278_vm9 = vcmp.eq.s32.totalorder (%p656_p11), %v2273_v58, %v2275_v6  ;;  %v8215_v28 = vsel (%p656_p11), %vm2277_vm0, 1.0, %v7221_v1  ;;  %v8221_v36 = vsel (%p656_p11), %vm2279_vm14, 1.0, %v7221_v1 }
 0x197   : >> { %v2254_v35 = vsel %vm2218_vm8, -1e+30, %v1772_v51  ;;  %v8218_v46 = vsel (%p656_p11), %vm2278_vm9, 1.0, %v7221_v1 }
 0x198   : >> { %2267 = vst [vmem:[%s7925_s23 + $0x58] sm:$0xff] %v2254_v35 }
 0x199 LB: >> { %s2289_s29 = smul.u32 96, %s7206_s28  ;;  %vm2358_vm11 = vcmask 1045504   ;;  %vm2334_vm12 = vcmask 1046528   ;;  %vm2382_vm13 = vcmask 375808   ;;  %s7206_s28 = sphi %s8223_s28, %s2288_s28  }
 0x19a   : >> { %s2421_s22 = smul.u32 24, %s7206_s28  ;;  %s2288_s28 = sadd.s32 1, %s7206_s28  }
 0x19b   : >> { %s8229_s25 = scalar_lea.vmem [#allocation2], %s2289_s29  ;;  %p2285_p12 = scmp.ge.s32.totalorder %s2288_s28, 23  }
 0x19c   : >> { %s2422_s3 = scalar_lea.vmem [#allocation3], %s2421_s22  ;;  %s8269_s27 = smov (%p2285_p12), 0  }
 0x19f   : >> { %v2296_v1 = vld [vmem:[%s8229_s25 + $0x28] sm:$0xff]  ;;  %v6415_v62 = vld [vmem:[%s8229_s25 + $0x58] sm:$0xff]  ;;  %v2295_v18 = vld [vmem:[%s8229_s25 + $0x20] sm:$0xff] }
 0x1a0   : >> { %v6423_v25 = vld [vmem:[%s8229_s25 + $0x88] sm:$0xff]  ;;  %v2312_v7 = vmax.f32 %v2296_v1, %v6415_v62  ;;  %v6414_v24 = vld [vmem:[%s8229_s25 + $0x50] sm:$0xff]  ;;  %v6422_v39 = vld [vmem:[%s8229_s25 + $0x80] sm:$0xff] }
 0x1a1   : >> { %v2311_v20 = vmax.f32 %v2295_v18, %v6414_v24  ;;  %v2294_v32 = vld [vmem:[%s8229_s25 + $0x18] sm:$0xff]  ;;  %v6413_v12 = vld [vmem:[%s8229_s25 + $0x48] sm:$0xff]  ;;  %v2293_v29 = vld [vmem:[%s8229_s25 + $0x10] sm:$0xff] }
 0x1a2   : >> { %v6421_v27 = vld [vmem:[%s8229_s25 + $0x78] sm:$0xff]  ;;  %v2327_v50 = vmax.f32 %v2312_v7, %v6423_v25  ;;  %v2310_v9 = vmax.f32 %v2294_v32, %v6413_v12  ;;  %v6412_v13 = vld [vmem:[%s8229_s25 + $0x40] sm:$0xff]  ;;  %v6420_v26 = vld [vmem:[%s8229_s25 + $0x70] sm:$0xff] }
 0x1a3   : >> { %v2326_v4 = vmax.f32 %v2311_v20, %v6422_v39  ;;  %v2309_v0 = vmax.f32 %v2293_v29, %v6412_v13  ;;  %v2292_v10 = vld [vmem:[%s8229_s25 + $0x8] sm:$0xff]  ;;  %v6411_v38 = vld [vmem:[%s8229_s25 + $0x38] sm:$0xff]  ;;  %v2291_v41 = vld [vmem:[%s8229_s25] sm:$0xff] }
 0x1a4   : >> { %v6419_v3 = vld [vmem:[%s8229_s25 + $0x68] sm:$0xff]  ;;  %v2344_v19 = vrot.slane %v2327_v50, 1  ;;  %v2368_v54 = vrot.slane %v2327_v50, 2  ;;  %v2325_v63 = vmax.f32 %v2310_v9, %v6421_v27  ;;  %v2308_v34 = vmax.f32 %v2292_v10, %v6411_v38  ;;  %v6410_v30 = vld [vmem:[%s8229_s25 + $0x30] sm:$0xff]  ;;  %v6418_v11 = vld [vmem:[%s8229_s25 + $0x60] sm:$0xff] }
 0x1a5   : >> { %v2342_v45 = vrot.slane %v2326_v4, 1  ;;  %v2366_v49 = vrot.slane %v2326_v4, 2  ;;  %v2324_v53 = vmax.f32 %v2309_v0, %v6420_v26  ;;  %v2307_v52 = vmax.f32 %v2291_v41, %v6410_v30 }
 0x1a6   : >> { %v2357_v21 = vmax.f32 %v2327_v50, %v2344_v19  ;;  %v2340_v56 = vrot.slane %v2325_v63, 1  ;;  %v2364_v40 = vrot.slane %v2325_v63, 2  ;;  %v2323_v8 = vmax.f32 %v2308_v34, %v6419_v3 }
 0x1a7   : >> { %v2345_v57 = vsel %vm2334_vm12, %v2342_v45, %v2344_v19  ;;  %v2369_v44 = vsel %vm2358_vm11, %v2366_v49, %v2368_v54  ;;  %v2338_v17 = vrot.slane %v2324_v53, 1  ;;  %v2362_v23 = vrot.slane %v2324_v53, 2 }
 0x1a8   : >> { %v2381_v47 = vmax.f32 %v2357_v21, %v2368_v54  ;;  %v2356_v55 = vmax.f32 %v2326_v4, %v2345_v57  ;;  %v2343_v61 = vsel %vm2334_vm12, %v2340_v56, %v2342_v45  ;;  %v2367_v51 = vsel %vm2358_vm11, %v2364_v40, %v2366_v49 }
 0x1a9   : >> { %v2355_v31 = vmax.f32 %v2325_v63, %v2343_v61  ;;  %v2341_v35 = vsel %vm2334_vm12, %v2338_v17, %v2340_v56  ;;  %v2365_v58 = vsel %vm2358_vm11, %v2362_v23, %v2364_v40  ;;  %v2336_v37 = vrot.slane %v2323_v8, 1 }
 0x1aa   : >> { %6836 = vmatpush.msk.msra.mxu2 %vm2358_vm11, %v2381_v47  ;;  %v2380_v6 = vmax.f32 %v2356_v55, %v2369_v44  ;;  %6424 = vmatpush.msk.msra.mxu0 %vm2358_vm11, %v2381_v47  ;;  %v2354_v22 = vmax.f32 %v2324_v53, %v2341_v35  ;;  %v2360_v1 = vrot.slane %v2323_v8, 2  ;;  %v2322_v62 = vmax.f32 %v2307_v52, %v6418_v11 }
 0x1ab   : >> { %v2379_v25 = vmax.f32 %v2355_v31, %v2367_v51  ;;  %6835 = vmatpush.msk.msra.mxu1 %vm2358_vm11, %v2381_v47  ;;  %v2339_v7 = vsel %vm2334_vm12, %v2336_v37, %v2338_v17 }
 0x1ac   : >> { %6838 = vmatpush.msra.mxu2 %v2380_v6  ;;  %v2378_v18 = vmax.f32 %v2354_v22, %v2365_v58  ;;  %2406 = vmatpush.msra.mxu0 %v2380_v6  ;;  %v2353_v24 = vmax.f32 %v2323_v8, %v2339_v7  ;;  %v2363_v39 = vsel %vm2358_vm11, %v2360_v1, %v2362_v23  ;;  %v2335_v20 = vrot.slane %v2322_v62, 1 }
 0x1ad   : >> { %6837 = vmatpush.msra.mxu1 %v2380_v6  ;;  %v2359_v32 = vrot.slane %v2322_v62, 2 }
 0x1ae   : >> { %6840 = vmatpush.msra.mxu2 %v2379_v25  ;;  %v2377_v12 = vmax.f32 %v2353_v24, %v2363_v39  ;;  %2407 = vmatpush.msra.mxu0 %v2379_v25  ;;  %v2337_v27 = vsel %vm2334_vm12, %v2335_v20, %v2336_v37 }
 0x1af   : >> { %6839 = vmatpush.msra.mxu1 %v2379_v25  ;;  %v2352_v50 = vmax.f32 %v2322_v62, %v2337_v27  ;;  %v2361_v9 = vsel %vm2358_vm11, %v2359_v32, %v2360_v1 }
 0x1b0   : >> { %6842 = vmatpush.msra.mxu2 %v2378_v18  ;;  %2408 = vmatpush.msra.mxu0 %v2378_v18 }
 0x1b1   : >> { %v2376_v29 = vmax.f32 %v2352_v50, %v2361_v9  ;;  %6841 = vmatpush.msra.mxu1 %v2378_v18 }
 0x1b2   : >> { %6844 = vmatpush.msra.mxu2 %v2377_v12  ;;  %2409 = vmatpush.msra.mxu0 %v2377_v12 }
 0x1b3   : >> { %6843 = vmatpush.msra.mxu1 %v2377_v12 }
 0x1b4   : >> { %6846 = vmatpush.msra.mxu2 %v2376_v29  ;;  %2410 = vmatpush.msra.mxu0 %v2376_v29 }
 0x1b5   : >> { %6427 = vmatmul.msk.f32.vlgmr.msra.gmra.mxu2 %vm2382_vm13, %v8221_v36  ;;  %6845 = vmatpush.msra.mxu1 %v2376_v29 }
 0x1b6   : >> { %6425 = vmatmul.msk.f32.vlgmr.msra.gmra.mxu0 %vm2382_vm13, %v8215_v28  ;;  %6426 = vmatmul.msk.f32.vlgmr.msra.gmra.mxu1 %vm2382_vm13, %v8218_v46 }
 0x233   : >> { %v2412_v13 = vpop.f32.mrf.mxu0  ;;  %v2415_v26 = vpop.f32.mrf.mxu1 }
 0x234   : >> { %2423 = vst [vmem:[%s2422_s3] sm:$0xff] %v2412_v13 }
 0x235   : >> { %2424 = vst [vmem:[%s2422_s3 + $0x8] sm:$0xff] %v2415_v26  ;;  %2287 = sbr.rel (!%p2285_p12) target bundleno = 409 (0x199), region = 263 }
 0x238   : >> { %v2418_v4 = vpop.f32.mrf.mxu2 }
 0x239   : >> { %2425 = vst [vmem:[%s2422_s3 + $0x10] sm:$0xff] %v2418_v4 }
 0x23a LB: >> { %s11515_s1 = sld [smem:[#allocation27_spill]]  ;;  %s7210_s27 = sphi %s8269_s27, %s2431_s27  }
 0x23b   : >> { %s11519_s5 = sld [smem:[#allocation28_spill]] }
 0x23c   : >> { %s11524_s6 = sld [smem:[#allocation29_spill]] }
 0x240   : >> { %s11516_s29 = smov %s11515_s1  ;;  %v6452_v0 = vld [vmem:[%s11515_s1 + $0xf8] sm:$0xff]  ;;  %s8344_s1 = smul.u32 72, %s7210_s27 }
 0x241   : >> { %v6451_v10 = vld [vmem:[%s11516_s29 + $0xf0] sm:$0xff]  ;;  %6847 = vmatpush.msra.mxu1 %v6452_v0  ;;  %6848 = vmatpush.msra.mxu2 %v6452_v0  ;;  %v6450_v36 = vld [vmem:[%s11516_s29 + $0xe8] sm:$0xff]  ;;  %v6449_v38 = vld [vmem:[%s11516_s29 + $0xe0] sm:$0xff]  ;;  %s2431_s27 = sadd.s32 1, %s7210_s27  }
 0x242   : >> { %2487 = vmatpush.msra.mxu0 %v6452_v0  ;;  %v6502_v3 = vld [vmem:[%s11516_s29 + $0x1f8] sm:$0xff]  ;;  %v6501_v19 = vld [vmem:[%s11516_s29 + $0x1f0] sm:$0xff]  ;;  %v6500_v63 = vld [vmem:[%s11516_s29 + $0x1e8] sm:$0xff]  ;;  %s8365_s28 = scalar_lea.vmem [#allocation3], %s8344_s1  ;;  %s9087_s19 = scalar_lea.vmem [#allocation4], %s8344_s1 }
 0x243   : >> { %6849 = vmatpush.msra.mxu1 %v6451_v10  ;;  %6850 = vmatpush.msra.mxu2 %v6451_v10  ;;  %v6448_v54 = vld [vmem:[%s11516_s29 + $0xd8] sm:$0xff]  ;;  %v6447_v34 = vld [vmem:[%s11516_s29 + $0xd0] sm:$0xff]  ;;  %v6499_v41 = vld [vmem:[%s11516_s29 + $0x1e0] sm:$0xff]  ;;  %p2428_p13 = scmp.ge.s32.totalorder %s2431_s27, 7  }
 0x244   : >> { %2488 = vmatpush.msra.mxu0 %v6451_v10  ;;  %2684 = vmatpush.msra.mxu3 %v6502_v3  ;;  %v6446_v30 = vld [vmem:[%s11516_s29 + $0xc8] sm:$0xff]  ;;  %v6498_v45 = vld [vmem:[%s11516_s29 + $0x1d8] sm:$0xff]  ;;  %v6445_v49 = vld [vmem:[%s11516_s29 + $0xc0] sm:$0xff] }
 0x245   : >> { %6851 = vmatpush.msra.mxu1 %v6450_v36  ;;  %6852 = vmatpush.msra.mxu2 %v6450_v36  ;;  %v6497_v53 = vld [vmem:[%s11516_s29 + $0x1d0] sm:$0xff]  ;;  %v6444_v52 = vld [vmem:[%s11516_s29 + $0xb8] sm:$0xff]  ;;  %v6496_v21 = vld [vmem:[%s11516_s29 + $0x1c8] sm:$0xff] }
 0x246   : >> { %2489 = vmatpush.msra.mxu0 %v6450_v36  ;;  %2685 = vmatpush.msra.mxu3 %v6501_v19  ;;  %v6443_v56 = vld [vmem:[%s11516_s29 + $0xb0] sm:$0xff]  ;;  %v6495_v40 = vld [vmem:[%s11516_s29 + $0x1c0] sm:$0xff]  ;;  %v6442_v8 = vld [vmem:[%s11516_s29 + $0xa8] sm:$0xff] }
 0x247   : >> { %6853 = vmatpush.msra.mxu1 %v6449_v38  ;;  %6854 = vmatpush.msra.mxu2 %v6449_v38  ;;  %v6494_v57 = vld [vmem:[%s11516_s29 + $0x1b8] sm:$0xff]  ;;  %v6441_v44 = vld [vmem:[%s11516_s29 + $0xa0] sm:$0xff]  ;;  %v6493_v17 = vld [vmem:[%s11516_s29 + $0x1b0] sm:$0xff] }
 0x248   : >> { %2490 = vmatpush.msra.mxu0 %v6449_v38  ;;  %2686 = vmatpush.msra.mxu3 %v6500_v63  ;;  %v6440_v23 = vld [vmem:[%s11516_s29 + $0x98] sm:$0xff]  ;;  %v6492_v11 = vld [vmem:[%s11516_s29 + $0x1a8] sm:$0xff]  ;;  %v6439_v47 = vld [vmem:[%s11516_s29 + $0x90] sm:$0xff] }
 0x249   : >> { %6855 = vmatpush.msra.mxu1 %v6448_v54  ;;  %6856 = vmatpush.msra.mxu2 %v6448_v54  ;;  %v6491_v55 = vld [vmem:[%s11516_s29 + $0x1a0] sm:$0xff]  ;;  %v6438_v61 = vld [vmem:[%s11516_s29 + $0x88] sm:$0xff]  ;;  %v6490_v51 = vld [vmem:[%s11516_s29 + $0x198] sm:$0xff] }
 0x24a   : >> { %2491 = vmatpush.msra.mxu0 %v6448_v54  ;;  %2687 = vmatpush.msra.mxu3 %v6499_v41  ;;  %v6437_v31 = vld [vmem:[%s11516_s29 + $0x80] sm:$0xff]  ;;  %v6477_v58 = vld [vmem:[%s11516_s29 + $0x178] sm:$0xff]  ;;  %v6476_v6 = vld [vmem:[%s11516_s29 + $0x170] sm:$0xff] }
 0x24b   : >> { %6857 = vmatpush.msra.mxu1 %v6447_v34  ;;  %6858 = vmatpush.msra.mxu2 %v6447_v34  ;;  %v8368_v35 = vld [vmem:[%s8365_s28 + $0x21] sm:$0xff]  ;;  %v2458_v37 = vld [vmem:[%s11516_s29 + $0x78] sm:$0xff]  ;;  %v2457_v1 = vld [vmem:[%s11516_s29 + $0x70] sm:$0xff] }
 0x24c   : >> { %2492 = vmatpush.msra.mxu0 %v6447_v34  ;;  %2688 = vmatpush.msra.mxu3 %v6498_v45  ;;  %v6428_v22 = vld [vmem:[%s8365_s28 + $0x1] sm:$0xff]  ;;  %v6527_v62 = vld [vmem:[%s11516_s29 + $0x278] sm:$0xff]  ;;  %v6489_v7 = vld [vmem:[%s11516_s29 + $0x190] sm:$0xff] }
 0x24d   : >> { %6859 = vmatpush.msra.mxu1 %v6446_v30  ;;  %6860 = vmatpush.msra.mxu2 %v6446_v30  ;;  %v6475_v25 = vld [vmem:[%s11516_s29 + $0x168] sm:$0xff]  ;;  %v6526_v24 = vld [vmem:[%s11516_s29 + $0x270] sm:$0xff]  ;;  %v6474_v39 = vld [vmem:[%s11516_s29 + $0x160] sm:$0xff] }
 0x24e   : >> { %2493 = vmatpush.msra.mxu0 %v6446_v30  ;;  %2689 = vmatpush.msra.mxu3 %v6497_v53  ;;  %v2456_v18 = vld [vmem:[%s11516_s29 + $0x68] sm:$0xff]  ;;  %v2455_v32 = vld [vmem:[%s11516_s29 + $0x60] sm:$0xff]  ;;  %v6473_v50 = vld [vmem:[%s11516_s29 + $0x158] sm:$0xff] }
 0x24f   : >> { %6861 = vmatpush.msra.mxu1 %v6445_v49  ;;  %6862 = vmatpush.msra.mxu2 %v6445_v49  ;;  %v6488_v20 = vld [vmem:[%s11516_s29 + $0x188] sm:$0xff]  ;;  %v2454_v9 = vld [vmem:[%s11516_s29 + $0x58] sm:$0xff]  ;;  %v6524_v29 = vld [vmem:[%s11516_s29 + $0x260] sm:$0xff] }
 0x250   : >> { %2494 = vmatpush.msra.mxu0 %v6445_v49  ;;  %2690 = vmatpush.msra.mxu3 %v6496_v21  ;;  %v6525_v12 = vld [vmem:[%s11516_s29 + $0x268] sm:$0xff]  ;;  %v6472_v13 = vld [vmem:[%s11516_s29 + $0x150] sm:$0xff]  ;;  %v6523_v0 = vld [vmem:[%s11516_s29 + $0x258] sm:$0xff] }
 0x251   : >> { %6863 = vmatpush.msra.mxu1 %v6444_v52  ;;  %6864 = vmatpush.msra.mxu2 %v6444_v52  ;;  %v8412_v27 = vld [vmem:[%s8365_s28 + $0x29] sm:$0xff]  ;;  %v6487_v36 = vld [vmem:[%s11516_s29 + $0x180] sm:$0xff]  ;;  %v8450_v54 = vld [vmem:[%s8365_s28 + $0x18] sm:$0xff] }
 0x252   : >> { %2495 = vmatpush.msra.mxu0 %v6444_v52  ;;  %2691 = vmatpush.msra.mxu3 %v6495_v40  ;;  %v6429_v26 = vld [vmem:[%s8365_s28 + $0x9] sm:$0xff]  ;;  %v6470_v19 = vld [vmem:[%s11516_s29 + $0x140] sm:$0xff]  ;;  %v8459_v41 = vld [vmem:[%s8365_s28 + $0x31] sm:$0xff] }
 0x253   : >> { %6865 = vmatpush.msra.mxu1 %v6443_v56  ;;  %6866 = vmatpush.msra.mxu2 %v6443_v56  ;;  %v2453_v4 = vld [vmem:[%s11516_s29 + $0x50] sm:$0xff]  ;;  %v6471_v10 = vld [vmem:[%s11516_s29 + $0x148] sm:$0xff]  ;;  %v2451_v63 = vld [vmem:[%s11516_s29 + $0x40] sm:$0xff] }
 0x254   : >> { %2496 = vmatpush.msra.mxu0 %v6443_v56  ;;  %2692 = vmatpush.msra.mxu3 %v6494_v57  ;;  %v2452_v38 = vld [vmem:[%s11516_s29 + $0x48] sm:$0xff]  ;;  %v6522_v3 = vld [vmem:[%s11516_s29 + $0x250] sm:$0xff]  ;;  %v6469_v30 = vld [vmem:[%s11516_s29 + $0x138] sm:$0xff] }
 0x255   : >> { %6867 = vmatpush.msra.mxu1 %v6442_v8  ;;  %6868 = vmatpush.msra.mxu2 %v6442_v8  ;;  %v6521_v34 = vld [vmem:[%s11516_s29 + $0x248] sm:$0xff]  ;;  %v2450_v45 = vld [vmem:[%s11516_s29 + $0x38] sm:$0xff]  ;;  %v6468_v53 = vld [vmem:[%s11516_s29 + $0x130] sm:$0xff] }
 0x256   : >> { %2497 = vmatpush.msra.mxu0 %v6442_v8  ;;  %2693 = vmatpush.msra.mxu3 %v6493_v17  ;;  %v8468_v49 = vld [vmem:[%s8365_s28 + $0x41] sm:$0xff]  ;;  %v2449_v21 = vld [vmem:[%s11516_s29 + $0x30] sm:$0xff]  ;;  %v6519_v8 = vld [vmem:[%s11516_s29 + $0x238] sm:$0xff] }
 0x257   : >> { %6869 = vmatpush.msra.mxu1 %v6441_v44  ;;  %6870 = vmatpush.msra.mxu2 %v6441_v44  ;;  %v6520_v52 = vld [vmem:[%s11516_s29 + $0x240] sm:$0xff]  ;;  %v6430_v56 = vld [vmem:[%s8365_s28 + $0x11] sm:$0xff]  ;;  %v6467_v40 = vld [vmem:[%s11516_s29 + $0x128] sm:$0xff] }
 0x258   : >> { %2498 = vmatpush.msra.mxu0 %v6441_v44  ;;  %2694 = vmatpush.msra.mxu3 %v6492_v11  ;;  %v2448_v57 = vld [vmem:[%s11516_s29 + $0x28] sm:$0xff]  ;;  %v6602_v44 = vld [vmem:[%s11516_s29 + $0x3f8] sm:$0xff]  ;;  %v6466_v17 = vld [vmem:[%s11516_s29 + $0x120] sm:$0xff] }
 0x259   : >> { %6871 = vmatpush.msra.mxu1 %v6440_v23  ;;  %6872 = vmatpush.msra.mxu2 %v6440_v23  ;;  %v2447_v11 = vld [vmem:[%s11516_s29 + $0x20] sm:$0xff] }
 0x25a   : >> { %2499 = vmatpush.msra.mxu0 %v6440_v23  ;;  %2695 = vmatpush.msra.mxu3 %v6491_v55  ;;  %v6518_v23 = vld [vmem:[%s11516_s29 + $0x230] sm:$0xff]  ;;  %v8508_v55 = vld [vmem:[%s8365_s28 + $0x39] sm:$0xff] }
 0x25b   : >> { %6873 = vmatpush.msra.mxu1 %v6439_v47  ;;  %6874 = vmatpush.msra.mxu2 %v6439_v47 }
 0x25c   : >> { %2500 = vmatpush.msra.mxu0 %v6439_v47  ;;  %2696 = vmatpush.msra.mxu3 %v6490_v51  ;;  %v6601_v47 = vld [vmem:[%s11516_s29 + $0x3f0] sm:$0xff]  ;;  %v2446_v51 = vld [vmem:[%s11516_s29 + $0x18] sm:$0xff] }
 0x25d   : >> { %6875 = vmatpush.msra.mxu1 %v6438_v61  ;;  %6876 = vmatpush.msra.mxu2 %v6438_v61 }
 0x25e   : >> { %2501 = vmatpush.msra.mxu0 %v6438_v61  ;;  %2697 = vmatpush.msra.mxu3 %v6489_v7  ;;  %v6465_v61 = vld [vmem:[%s11516_s29 + $0x118] sm:$0xff] }
 0x25f   : >> { %6877 = vmatpush.msra.mxu1 %v6437_v31  ;;  %6878 = vmatpush.msra.mxu2 %v6437_v31  ;;  %v6515_v7 = vld [vmem:[%s11516_s29 + $0x218] sm:$0xff] }
 0x260   : >> { %2515 = vmatmul.f32.vlgmr.msra.gmra.mxu1 %v8368_v35  ;;  %2502 = vmatpush.msra.mxu0 %v6437_v31  ;;  %v6517_v31 = vld [vmem:[%s11516_s29 + $0x228] sm:$0xff] }
 0x261   : >> { %2603 = vmatpush.msrb.mxu2 %v6477_v58  ;;  %2531 = vmatpush.msrb.mxu1 %v2458_v37  ;;  %v6464_v58 = vld [vmem:[%s11516_s29 + $0x110] sm:$0xff]  ;;  %v8523_v37 = vld [vmem:[%s8365_s28 + $0x20] sm:$0xff] }
 0x262   : >> { %2503 = vmatmul.f32.vlgmr.msra.gmra.mxu0 %v6428_v22  ;;  %2698 = vmatpush.msra.mxu3 %v6488_v20  ;;  %v6516_v22 = vld [vmem:[%s11516_s29 + $0x220] sm:$0xff] }
 0x263   : >> { %2604 = vmatpush.msrb.mxu2 %v6476_v6  ;;  %2532 = vmatpush.msrb.mxu1 %v2457_v1  ;;  %v2445_v6 = vld [vmem:[%s11516_s29 + $0x10] sm:$0xff]  ;;  %v6463_v1 = vld [vmem:[%s11516_s29 + $0x108] sm:$0xff] }
 0x264   : >> { %2765 = vmatpush.msrb.mxu0 %v6527_v62  ;;  %2699 = vmatpush.msra.mxu3 %v6487_v36  ;;  %v6431_v62 = vld [vmem:[%s8365_s28 + $0x19] sm:$0xff]  ;;  %v6453_v20 = vld [vmem:[%s8365_s28 + $0x2] sm:$0xff] }
 0x265   : >> { %2605 = vmatpush.msrb.mxu2 %v6475_v25  ;;  %2533 = vmatpush.msrb.mxu1 %v2456_v18  ;;  %v2444_v25 = vld [vmem:[%s11516_s29 + $0x8] sm:$0xff]  ;;  %v6462_v18 = vld [vmem:[%s11516_s29 + $0x100] sm:$0xff] }
 0x266   : >> { %2766 = vmatpush.msrb.mxu0 %v6526_v24  ;;  %2700 = vmatmul.f32.vlgmr.msra.gmra.mxu3 %v8450_v54  ;;  %v6600_v24 = vld [vmem:[%s11516_s29 + $0x3e8] sm:$0xff]  ;;  %v6512_v36 = vld [vmem:[%s11516_s29 + $0x200] sm:$0xff] }
 0x267   : >> { %2606 = vmatpush.msrb.mxu2 %v6474_v39  ;;  %2534 = vmatpush.msrb.mxu1 %v2455_v32  ;;  %v2443_v39 = vld [vmem:[%s11516_s29] sm:$0xff]  ;;  %v6577_v32 = vld [vmem:[%s11516_s29 + $0x378] sm:$0xff] }
 0x268   : >> { %2767 = vmatpush.msrb.mxu0 %v6525_v12  ;;  %2518 = vmatmul.f32.gmra.mxu1 %v8412_v27  ;;  %v2434_v12 = vld [vmem:[%s8365_s28] sm:$0xff] }
 0x269   : >> { %2607 = vmatpush.msrb.mxu2 %v6473_v50  ;;  %2535 = vmatpush.msrb.mxu1 %v2454_v9  ;;  %v6552_v50 = vld [vmem:[%s11516_s29 + $0x2f8] sm:$0xff]  ;;  %v6514_v9 = vld [vmem:[%s11516_s29 + $0x210] sm:$0xff] }
 0x26a   : >> { %2768 = vmatpush.msrb.mxu0 %v6524_v29  ;;  %2527 = vmatmul.f32.vlgmr.msra.gmra.mxu2 %v8468_v49  ;;  %v6576_v29 = vld [vmem:[%s11516_s29 + $0x370] sm:$0xff] }
 0x26b   : >> { %2608 = vmatpush.msrb.mxu2 %v6472_v13  ;;  %2506 = vmatmul.f32.gmra.mxu0 %v6429_v26  ;;  %v6599_v13 = vld [vmem:[%s11516_s29 + $0x3e0] sm:$0xff]  ;;  %v6513_v26 = vld [vmem:[%s11516_s29 + $0x208] sm:$0xff] }
 0x26c   : >> { %2536 = vmatpush.msrb.mxu1 %v2453_v4  ;;  %2769 = vmatpush.msrb.mxu0 %v6523_v0  ;;  %v6551_v4 = vld [vmem:[%s11516_s29 + $0x2f0] sm:$0xff]  ;;  %v6575_v0 = vld [vmem:[%s11516_s29 + $0x368] sm:$0xff] }
 0x26d   : >> { %2609 = vmatpush.msrb.mxu2 %v6471_v10  ;;  %3008 = vmatpush.msrb.mxu3 %v6602_v44  ;;  %v8579_v10 = vld [vmem:[%s8365_s28 + $0x28] sm:$0xff] }
 0x26e   : >> { %2537 = vmatpush.msrb.mxu1 %v2452_v38  ;;  %2770 = vmatpush.msrb.mxu0 %v6522_v3  ;;  %v6550_v38 = vld [vmem:[%s11516_s29 + $0x2e8] sm:$0xff]  ;;  %v6574_v3 = vld [vmem:[%s11516_s29 + $0x360] sm:$0xff] }
 0x26f   : >> { %2610 = vmatpush.msrb.mxu2 %v6470_v19  ;;  %3009 = vmatpush.msrb.mxu3 %v6601_v47  ;;  %v6454_v19 = vld [vmem:[%s8365_s28 + $0xa] sm:$0xff] }
 0x270   : >> { %2538 = vmatpush.msrb.mxu1 %v2451_v63  ;;  %2771 = vmatpush.msrb.mxu0 %v6521_v34  ;;  %v6598_v63 = vld [vmem:[%s11516_s29 + $0x3d8] sm:$0xff]  ;;  %v2435_v34 = vld [vmem:[%s8365_s28 + $0x8] sm:$0xff] }
 0x271   : >> { %2521 = vmatmul.f32.gmra.mxu1 %v8459_v41  ;;  %2611 = vmatpush.msrb.mxu2 %v6469_v30  ;;  %v6573_v30 = vld [vmem:[%s11516_s29 + $0x358] sm:$0xff]  ;;  %v6596_v44 = vld [vmem:[%s11516_s29 + $0x3c8] sm:$0xff] }
 0x272   : >> { %2539 = vmatpush.msrb.mxu1 %v2450_v45  ;;  %2772 = vmatpush.msrb.mxu0 %v6520_v52  ;;  %v6549_v45 = vld [vmem:[%s11516_s29 + $0x2e0] sm:$0xff]  ;;  %v6597_v52 = vld [vmem:[%s11516_s29 + $0x3d0] sm:$0xff]  ;;  %v8643_v47 = vld [vmem:[%s11516_s29 + $0x468] sm:$0xff] }
 0x273   : >> { %2612 = vmatpush.msrb.mxu2 %v6468_v53  ;;  %2509 = vmatmul.f32.gmra.mxu0 %v6430_v56  ;;  %v8605_v53 = vld [vmem:[%s11516_s29 + $0x478] sm:$0xff] }
 0x274   : >> { %2540 = vmatpush.msrb.mxu1 %v2449_v21  ;;  %2773 = vmatpush.msrb.mxu0 %v6519_v8  ;;  %v6572_v21 = vld [vmem:[%s11516_s29 + $0x350] sm:$0xff]  ;;  %v6548_v56 = vld [vmem:[%s11516_s29 + $0x2d8] sm:$0xff] }
 0x275   : >> { %2613 = vmatpush.msrb.mxu2 %v6467_v40  ;;  %2703 = vmatmul.f32.gmra.mxu3 %v8523_v37  ;;  %v8619_v40 = vld [vmem:[%s11516_s29 + $0x470] sm:$0xff] }
 0x276   : >> { %2541 = vmatpush.msrb.mxu1 %v2448_v57  ;;  %2774 = vmatpush.msrb.mxu0 %v6518_v23  ;;  %v8623_v8 = vld [vmem:[%s8365_s28 + $0x30] sm:$0xff]  ;;  %v6571_v57 = vld [vmem:[%s11516_s29 + $0x348] sm:$0xff]  ;;  %v6570_v23 = vld [vmem:[%s11516_s29 + $0x340] sm:$0xff] }
 0x277   : >> { %2614 = vmatpush.msrb.mxu2 %v6466_v17  ;;  %3010 = vmatpush.msrb.mxu3 %v6600_v24  ;;  %v6547_v17 = vld [vmem:[%s11516_s29 + $0x2d0] sm:$0xff]  ;;  %v6567_v24 = vld [vmem:[%s11516_s29 + $0x328] sm:$0xff] }
 0x278   : >> { %2542 = vmatpush.msrb.mxu1 %v2447_v11  ;;  %2775 = vmatpush.msrb.mxu0 %v6517_v31  ;;  %v6455_v11 = vld [vmem:[%s8365_s28 + $0x12] sm:$0xff]  ;;  %v6546_v31 = vld [vmem:[%s11516_s29 + $0x2c8] sm:$0xff] }
 0x279   : >> { %2524 = vmatmul.f32.gmra.mxu1 %v8508_v55  ;;  %2615 = vmatpush.msrb.mxu2 %v6465_v61  ;;  %v2436_v61 = vld [vmem:[%s8365_s28 + $0x10] sm:$0xff] }
 0x27a   : >> { %2543 = vmatpush.msrb.mxu1 %v2446_v51  ;;  %2776 = vmatpush.msrb.mxu0 %v6516_v22  ;;  %v6595_v51 = vld [vmem:[%s11516_s29 + $0x3c0] sm:$0xff] }
 0x27b   : >> { %2616 = vmatpush.msrb.mxu2 %v6464_v58  ;;  %2512 = vmatmul.f32.gmra.mxu0 %v6431_v62  ;;  %v8656_v58 = vld [vmem:[%s11516_s29 + $0x460] sm:$0xff] }
 0x27c   : >> { %2544 = vmatpush.msrb.mxu1 %v2445_v6  ;;  %2777 = vmatpush.msrb.mxu0 %v6515_v7  ;;  %v6594_v6 = vld [vmem:[%s11516_s29 + $0x3b8] sm:$0xff]  ;;  %v6545_v22 = vld [vmem:[%s11516_s29 + $0x2c0] sm:$0xff]  ;;  %v6593_v7 = vld [vmem:[%s11516_s29 + $0x3b0] sm:$0xff] }
 0x27d   : >> { %2617 = vmatpush.msrb.mxu2 %v6463_v1  ;;  %3011 = vmatpush.msrb.mxu3 %v6599_v13  ;;  %v8671_v1 = vld [vmem:[%s11516_s29 + $0x458] sm:$0xff] }
 0x27e   : >> { %2545 = vmatpush.msrb.mxu1 %v2444_v25  ;;  %2778 = vmatpush.msrb.mxu0 %v6514_v9  ;;  %v6568_v25 = vld [vmem:[%s11516_s29 + $0x330] sm:$0xff]  ;;  %v8713_v9 = vld [vmem:[%s11516_s29 + $0x448] sm:$0xff]  ;;  %v6590_v13 = vld [vmem:[%s11516_s29 + $0x398] sm:$0xff] }
 0x27f   : >> { %2618 = vmatpush.msrb.mxu2 %v6462_v18  ;;  %2706 = vmatmul.f32.gmra.mxu3 %v8579_v10  ;;  %v6544_v18 = vld [vmem:[%s11516_s29 + $0x2b8] sm:$0xff] }
 0x280   : >> { %2546 = vmatpush.msrb.mxu1 %v2443_v39  ;;  %2619 = vmatmul.f32.vlgmr.msrb.gmra.mxu2 %v6453_v20  ;;  %v8691_v39 = vld [vmem:[%s8365_s28 + $0x1a] sm:$0xff]  ;;  %v6592_v20 = vld [vmem:[%s11516_s29 + $0x3a8] sm:$0xff] }
 0x281   : >> { %2927 = vmatpush.msra.mxu2 %v6577_v32  ;;  %2547 = vmatmul.f32.vlgmr.msrb.gmra.mxu1 %v2434_v12  ;;  %v8700_v32 = vld [vmem:[%s11516_s29 + $0x450] sm:$0xff] }
 0x282   : >> { %2846 = vmatpush.msra.mxu1 %v6552_v50  ;;  %2779 = vmatpush.msrb.mxu0 %v6513_v26  ;;  %v6543_v12 = vld [vmem:[%s11516_s29 + $0x2b0] sm:$0xff]  ;;  %v6591_v50 = vld [vmem:[%s11516_s29 + $0x3a0] sm:$0xff] }
 0x283   : >> { %2928 = vmatpush.msra.mxu2 %v6576_v29  ;;  %3012 = vmatpush.msrb.mxu3 %v6598_v63  ;;  %v6542_v29 = vld [vmem:[%s11516_s29 + $0x2a8] sm:$0xff]  ;;  %v8727_v26 = vld [vmem:[%s8365_s28 + $0x40] sm:$0xff]  ;;  %v6540_v63 = vld [vmem:[%s11516_s29 + $0x298] sm:$0xff] }
 0x284   : >> { %2847 = vmatpush.msra.mxu1 %v6551_v4  ;;  %2780 = vmatpush.msrb.mxu0 %v6512_v36  ;;  %v8732_v4 = vld [vmem:[%s11516_s29 + $0x440] sm:$0xff]  ;;  %v6589_v36 = vld [vmem:[%s11516_s29 + $0x390] sm:$0xff] }
 0x285   : >> { %2929 = vmatpush.msra.mxu2 %v6575_v0  ;;  %2781 = vmatmul.f32.vlgmr.msrb.gmra.mxu0 %v6431_v62  ;;  %v8674_v62 = vld [vmem:[%s8365_s28 + $0x38] sm:$0xff] }
 0x286   : >> { %2848 = vmatpush.msra.mxu1 %v6550_v38  ;;  %3089 = vmatpush.msra.mxu0 %v8605_v53  ;;  %v6565_v0 = vld [vmem:[%s11516_s29 + $0x318] sm:$0xff]  ;;  %v8745_v38 = vld [vmem:[%s8365_s28 + $0x22] sm:$0xff] }
 0x287   : >> { %2930 = vmatpush.msra.mxu2 %v6574_v3  ;;  %3013 = vmatpush.msrb.mxu3 %v6597_v52  ;;  %v8752_v3 = vld [vmem:[%s11516_s29 + $0x438] sm:$0xff]  ;;  %v6539_v52 = vld [vmem:[%s11516_s29 + $0x290] sm:$0xff] }
 0x288   : >> { %2622 = vmatmul.f32.gmra.mxu2 %v6454_v19  ;;  %2849 = vmatpush.msra.mxu1 %v6549_v45  ;;  %v6564_v19 = vld [vmem:[%s11516_s29 + $0x310] sm:$0xff]  ;;  %v6563_v45 = vld [vmem:[%s11516_s29 + $0x308] sm:$0xff] }
 0x289   : >> { %2550 = vmatmul.f32.gmra.mxu1 %v2435_v34  ;;  %2931 = vmatpush.msra.mxu2 %v6573_v30  ;;  %v6588_v34 = vld [vmem:[%s11516_s29 + $0x388] sm:$0xff]  ;;  %v6618_v30 = vld [vmem:[%s11516_s29 + $0x430] sm:$0xff] }
 0x28a   : >> { %2850 = vmatpush.msra.mxu1 %v6548_v56  ;;  %3090 = vmatpush.msra.mxu0 %v8619_v40  ;;  %v8780_v56 = vld [vmem:[%s8365_s28 + $0x48] sm:$0xff] }
 0x28b   : >> { %2932 = vmatpush.msra.mxu2 %v6572_v21  ;;  %2709 = vmatmul.f32.gmra.mxu3 %v8623_v8  ;;  %v6587_v21 = vld [vmem:[%s11516_s29 + $0x380] sm:$0xff] }
 0x28c   : >> { %3014 = vmatpush.msrb.mxu3 %v6596_v44  ;;  %2851 = vmatpush.msra.mxu1 %v6547_v17  ;;  %v6562_v44 = vld [vmem:[%s11516_s29 + $0x300] sm:$0xff]  ;;  %v8792_v17 = vld [vmem:[%s8365_s28 + $0x2a] sm:$0xff] }
 0x28d   : >> { %2933 = vmatpush.msra.mxu2 %v6571_v57  ;;  %2784 = vmatmul.f32.gmra.mxu0 %v8368_v35  ;;  %v6569_v35 = vld [vmem:[%s11516_s29 + $0x338] sm:$0xff]  ;;  %v6617_v57 = vld [vmem:[%s11516_s29 + $0x428] sm:$0xff] }
 0x28e   : >> { %3091 = vmatpush.msra.mxu0 %v8643_v47  ;;  %3015 = vmatpush.msrb.mxu3 %v6595_v51  ;;  %v6614_v51 = vld [vmem:[%s11516_s29 + $0x410] sm:$0xff] }
 0x28f   : >> { %2934 = vmatpush.msra.mxu2 %v6570_v23  ;;  %2852 = vmatpush.msra.mxu1 %v6546_v31  ;;  %v6616_v23 = vld [vmem:[%s11516_s29 + $0x420] sm:$0xff]  ;;  %v6613_v31 = vld [vmem:[%s11516_s29 + $0x408] sm:$0xff] }
 0x290   : >> { %2625 = vmatmul.f32.gmra.mxu2 %v6455_v11  ;;  %3092 = vmatpush.msra.mxu0 %v8656_v58  ;;  %v6537_v11 = vld [vmem:[%s11516_s29 + $0x280] sm:$0xff] }
 0x291   : >> { %2553 = vmatmul.f32.gmra.mxu1 %v2436_v61  ;;  %3016 = vmatpush.msrb.mxu3 %v6594_v6  ;;  %v6615_v61 = vld [vmem:[%s11516_s29 + $0x418] sm:$0xff]  ;;  %v6509_v6 = vld [vmem:[%s8365_s28 + $0x49] sm:$0xff] }
 0x292   : >> { %2935 = vmatpush.msra.mxu2 %v6569_v35  ;;  %2853 = vmatpush.msra.mxu1 %v6545_v22  ;;  %v6510_v35 = vld [vmem:[%s8365_s28 + $0x51] sm:$0xff]  ;;  %v6461_v22 = vld [vmem:[%s8365_s28 + $0x42] sm:$0xff] }
 0x293   : >> { %3093 = vmatpush.msra.mxu0 %v8671_v1  ;;  %2712 = vmatmul.f32.gmra.mxu3 %v8674_v62 }
 0x294   : >> { %2936 = vmatpush.msra.mxu2 %v6568_v25  ;;  %3017 = vmatpush.msrb.mxu3 %v6593_v7  ;;  %v6584_v25 = vld [vmem:[%s8365_s28 + $0x61] sm:$0xff]  ;;  %v6607_v7 = vld [vmem:[%s8365_s28 + $0x52] sm:$0xff] }
 0x295   : >> { %2854 = vmatpush.msra.mxu1 %v6544_v18  ;;  %2787 = vmatmul.f32.gmra.mxu0 %v8412_v27  ;;  %v6566_v27 = vld [vmem:[%s11516_s29 + $0x320] sm:$0xff] }
 0x296   : >> { %2937 = vmatpush.msra.mxu2 %v6567_v24  ;;  %3018 = vmatpush.msrb.mxu3 %v6592_v20  ;;  %v6608_v20 = vld [vmem:[%s8365_s28 + $0x5a] sm:$0xff] }
 0x297   : >> { %3094 = vmatpush.msra.mxu0 %v8700_v32  ;;  %2855 = vmatpush.msra.mxu1 %v6543_v12  ;;  %v6559_v12 = vld [vmem:[%s8365_s28 + $0x60] sm:$0xff] }
 0x298   : >> { %2628 = vmatmul.f32.gmra.mxu2 %v8691_v39  ;;  %3019 = vmatpush.msrb.mxu3 %v6591_v50 }
 0x299   : >> { %2556 = vmatmul.f32.gmra.mxu1 %v8450_v54  ;;  %3095 = vmatpush.msra.mxu0 %v8713_v9  ;;  %v6541_v54 = vld [vmem:[%s11516_s29 + $0x2a0] sm:$0xff] }
 0x29a   : >> { %2938 = vmatpush.msra.mxu2 %v6566_v27  ;;  %2856 = vmatpush.msra.mxu1 %v6542_v29  ;;  %v6586_v29 = vld [vmem:[%s8365_s28 + $0x71] sm:$0xff] }
 0x29b   : >> { %3020 = vmatpush.msrb.mxu3 %v6590_v13  ;;  %3096 = vmatpush.msra.mxu0 %v8732_v4  ;;  %v6609_v13 = vld [vmem:[%s8365_s28 + $0x62] sm:$0xff] }
 0x29c   : >> { %2715 = vmatmul.f32.gmra.mxu3 %v8727_v26  ;;  %2857 = vmatpush.msra.mxu1 %v6541_v54 }
 0x29d   : >> { %2939 = vmatpush.msra.mxu2 %v6565_v0  ;;  %2790 = vmatmul.f32.gmra.mxu0 %v8459_v41 }
 0x29e   : >> { %3021 = vmatpush.msrb.mxu3 %v6589_v36  ;;  %3097 = vmatpush.msra.mxu0 %v8752_v3  ;;  %v6611_v36 = vld [vmem:[%s8365_s28 + $0x72] sm:$0xff] }
 0x29f   : >> { %2940 = vmatpush.msra.mxu2 %v6564_v19  ;;  %2858 = vmatpush.msra.mxu1 %v6540_v63  ;;  %v6610_v63 = vld [vmem:[%s8365_s28 + $0x6a] sm:$0xff] }
 0x2a0   : >> { %2631 = vmatmul.f32.gmra.mxu2 %v8745_v38  ;;  %3022 = vmatpush.msrb.mxu3 %v6588_v34  ;;  %v6561_v34 = vld [vmem:[%s8365_s28 + $0x70] sm:$0xff] }
 0x2a1   : >> { %2559 = vmatmul.f32.gmra.mxu1 %v8523_v37  ;;  %3098 = vmatpush.msra.mxu0 %v6618_v30  ;;  %v6538_v37 = vld [vmem:[%s11516_s29 + $0x288] sm:$0xff] }
 0x2a2   : >> { %2941 = vmatpush.msra.mxu2 %v6563_v45  ;;  %2859 = vmatpush.msra.mxu1 %v6539_v52 }
 0x2a3   : >> { %3023 = vmatpush.msrb.mxu3 %v6587_v21  ;;  %3099 = vmatpush.msra.mxu0 %v6617_v57 }
 0x2a4   : >> { %2718 = vmatmul.f32.gmra.mxu3 %v8780_v56  ;;  %2860 = vmatpush.msra.mxu1 %v6538_v37 }
 0x2a5   : >> { %2942 = vmatpush.msra.mxu2 %v6562_v44  ;;  %2793 = vmatmul.f32.gmra.mxu0 %v8508_v55 }
 0x2a6   : >> { %6879 = vmatpush.msra.mxu3 %v8605_v53  ;;  %3100 = vmatpush.msra.mxu0 %v6616_v23  ;;  %v6485_v53 = vld [vmem:[%s8365_s28 + $0x50] sm:$0xff] }
 0x2a7   : >> { %2861 = vmatpush.msra.mxu1 %v6537_v11 }
 0x2a8   : >> { %2634 = vmatmul.f32.gmra.mxu2 %v8792_v17  ;;  %6880 = vmatpush.msra.mxu3 %v8619_v40  ;;  %v6612_v40 = vld [vmem:[%s11516_s29 + $0x400] sm:$0xff] }
 0x2a9   : >> { %2562 = vmatmul.f32.gmra.mxu1 %v8579_v10  ;;  %3101 = vmatpush.msra.mxu0 %v6615_v61  ;;  %v6459_v10 = vld [vmem:[%s8365_s28 + $0x32] sm:$0xff] }
 0x2aa   : >> { %6881 = vmatpush.msra.mxu3 %v8643_v47  ;;  %v6486_v47 = vld [vmem:[%s8365_s28 + $0x58] sm:$0xff] }
 0x2ab   : >> { %3102 = vmatpush.msra.mxu0 %v6614_v51 }
 0x2ac   : >> { %2721 = vmatmul.f32.gmra.mxu3 %v6485_v53 }
 0x2ad   : >> { %3103 = vmatpush.msra.mxu0 %v6613_v31  ;;  %6882 = vmatpush.msra.mxu3 %v8656_v58  ;;  %v6460_v58 = vld [vmem:[%s8365_s28 + $0x3a] sm:$0xff] }
 0x2ae   : >> { %2796 = vmatmul.f32.gmra.mxu0 %v8468_v49 }
 0x2af   : >> { %6883 = vmatpush.msra.mxu3 %v8671_v1  ;;  %3104 = vmatpush.msra.mxu0 %v6612_v40  ;;  %v6511_v1 = vld [vmem:[%s8365_s28 + $0x59] sm:$0xff] }
 0x2b0   : >> { %2637 = vmatmul.f32.gmra.mxu2 %v6459_v10 }
 0x2b1   : >> { %2565 = vmatmul.f32.gmra.mxu1 %v8623_v8  ;;  %6884 = vmatpush.msra.mxu3 %v8700_v32 }
 0x2b3   : >> { %6885 = vmatpush.msra.mxu3 %v8713_v9 }
 0x2b4   : >> { %2724 = vmatmul.f32.gmra.mxu3 %v6486_v47 }
 0x2b5   : >> { %6886 = vmatpush.msra.mxu3 %v8732_v4 }
 0x2b6   : >> { %2799 = vmatmul.f32.gmra.mxu0 %v6509_v6 }
 0x2b7   : >> { %6887 = vmatpush.msra.mxu3 %v8752_v3 }
 0x2b8   : >> { %2640 = vmatmul.f32.gmra.mxu2 %v6460_v58 }
 0x2b9   : >> { %2568 = vmatmul.f32.gmra.mxu1 %v8674_v62  ;;  %6888 = vmatpush.msra.mxu3 %v6618_v30 }
 0x2bb   : >> { %6889 = vmatpush.msra.mxu3 %v6617_v57 }
 0x2bc   : >> { %3024 = vmatmul.f32.vlgmr.msrb.gmra.mxu3 %v8459_v41 }
 0x2bd   : >> { %6890 = vmatpush.msra.mxu3 %v6616_v23 }
 0x2be   : >> { %2802 = vmatmul.f32.gmra.mxu0 %v6510_v35 }
 0x2bf   : >> { %6891 = vmatpush.msra.mxu3 %v6615_v61 }
 0x2c0   : >> { %2643 = vmatmul.f32.gmra.mxu2 %v6461_v22 }
 0x2c1   : >> { %2571 = vmatmul.f32.gmra.mxu1 %v8727_v26  ;;  %6892 = vmatpush.msra.mxu3 %v6614_v51 }
 0x2c3   : >> { %6893 = vmatpush.msra.mxu3 %v6613_v31 }
 0x2c4   : >> { %3027 = vmatmul.f32.gmra.mxu3 %v8508_v55  ;;  %v6606_v55 = vld [vmem:[%s8365_s28 + $0x4a] sm:$0xff] }
 0x2c5   : >> { %6894 = vmatpush.msra.mxu3 %v6612_v40  ;;  %v8874_v40 = vstv %s8344_s1  ;;  %s9269_s1 = smov (%p2428_p13), 0  }
 0x2c6   : >> { %2805 = vmatmul.f32.gmra.mxu0 %v6511_v1 }
 0x2c8   : >> { %2943 = vmatmul.f32.vlgmr.msra.gmra.mxu2 %v8623_v8 }
 0x2c9   : >> { %2862 = vmatmul.f32.vlgmr.msra.gmra.mxu1 %v8691_v39  ;;  %v6585_v39 = vld [vmem:[%s8365_s28 + $0x69] sm:$0xff] }
 0x2cc   : >> { %3030 = vmatmul.f32.gmra.mxu3 %v8468_v49 }
 0x2ce   : >> { %3105 = vmatmul.f32.vlgmr.msra.gmra.mxu0 %v6459_v10 }
 0x2d0   : >> { %2946 = vmatmul.f32.gmra.mxu2 %v8674_v62 }
 0x2d1   : >> { %2865 = vmatmul.f32.gmra.mxu1 %v8745_v38 }
 0x2d4   : >> { %3033 = vmatmul.f32.gmra.mxu3 %v6509_v6 }
 0x2d6   : >> { %3108 = vmatmul.f32.gmra.mxu0 %v6460_v58 }
 0x2d8   : >> { %2949 = vmatmul.f32.gmra.mxu2 %v8727_v26  ;;  %v6560_v26 = vld [vmem:[%s8365_s28 + $0x68] sm:$0xff] }
 0x2d9   : >> { %2868 = vmatmul.f32.gmra.mxu1 %v8792_v17 }
 0x2dc   : >> { %3036 = vmatmul.f32.gmra.mxu3 %v6510_v35 }
 0x2dd   : >> { %v8846_v41 = vpop.f32.mrf.mxu1 }
 0x2de   : >> { %3111 = vmatmul.f32.gmra.mxu0 %v6461_v22 }
 0x2df   : >> { %v2504_v49 = vpop.f32.mrf.mxu0 }
 0x2e0   : >> { %2952 = vmatmul.f32.gmra.mxu2 %v8780_v56 }
 0x2e1   : >> { %2871 = vmatmul.f32.gmra.mxu1 %v6459_v10 }
 0x2e4   : >> { %3039 = vmatmul.f32.gmra.mxu3 %v6511_v1 }
 0x2e5   : >> { %v8850_v8 = vpop.f32.mrf.mxu1 }
 0x2e6   : >> { %3114 = vmatmul.f32.gmra.mxu0 %v6606_v55 }
 0x2e8   : >> { %2955 = vmatmul.f32.gmra.mxu2 %v6485_v53  ;;  %v2507_v62 = vpop.f32.mrf.mxu0 }
 0x2e9   : >> { %2874 = vmatmul.f32.gmra.mxu1 %v6460_v58  ;;  %v2701_v32 = vpop.f32.mrf.mxu3 }
 0x2ec   : >> { %3042 = vmatmul.f32.gmra.mxu3 %v6584_v25 }
 0x2ed   : >> { %v8861_v9 = vpop.f32.mrf.mxu2 }
 0x2ee   : >> { %v8854_v18 = vpop.f32.mrf.mxu1  ;;  %3117 = vmatmul.f32.gmra.mxu0 %v6607_v7 }
 0x2f0   : >> { %2958 = vmatmul.f32.gmra.mxu2 %v6486_v47  ;;  %v2510_v24 = vpop.f32.mrf.mxu0  ;;  %v8878_v47 = vadd.s32 %v8874_v40, %v7669_v16 }
 0x2f1   : >> { %2877 = vmatmul.f32.gmra.mxu1 %v6461_v22 }
 0x2f2   : >> { %v3203_v22 = vsub.s32 0, %v8878_v47  ;;  %vm3202_vm1 = vcmp.lt.s32.totalorder %v8878_v47, 0 }
 0x2f4   : >> { %3045 = vmatmul.f32.gmra.mxu3 %v6585_v39 }
 0x2f6   : >> { %v8859_v50 = vpop.f32.mrf.mxu1  ;;  %3120 = vmatmul.f32.gmra.mxu0 %v6608_v20 }
 0x2f8   : >> { %2961 = vmatmul.f32.gmra.mxu2 %v6559_v12  ;;  %v2513_v27 = vpop.f32.mrf.mxu0  ;;  %v2704_v54 = vpop.f32.mrf.mxu3 }
 0x2f9   : >> { %2880 = vmatmul.f32.gmra.mxu1 %v6606_v55  ;;  %v8887_v55 = vsel %vm3202_vm1, %v3203_v22, %v8878_v47 }
 0x2fa   : >> { %v3206_v39 = vshrl.u32 %v8887_v55, 16 }
 0x2fc   : >> { %3048 = vmatmul.f32.gmra.mxu3 %v6586_v29 }
 0x2fe   : >> { %v2548_v4 = vpop.f32.mrf.mxu1  ;;  %3123 = vmatmul.f32.gmra.mxu0 %v6609_v13  ;;  %v3210_v13 = vmul.u32 43691, %v3206_v39 }
 0x2ff   : >> { %v2549_v0 = vadd.f32 %v2548_v4, %v2504_v49 }
 0x300   : >> { %2964 = vmatmul.f32.gmra.mxu2 %v6560_v26 }
 0x301   : >> { %2883 = vmatmul.f32.gmra.mxu1 %v6607_v7 }
 0x302   : >> { %v2782_v19 = vpop.f32.mrf.mxu0  ;;  %v2707_v56 = vpop.f32.mrf.mxu3 }
 0x303   : >> { %v2620_v38 = vpop.f32.mrf.mxu2 }
 0x304   : >> { %v2647_v3 = vadd.f32 %v2620_v38, %v2549_v0  ;;  %3129 = vmatmul.f32.vlgmr.msra.gmra.mxu3 %v6611_v36  ;;  %v3211_v38 = vmul.u32 43690, %v3206_v39 }
 0x306   : >> { %v2551_v30 = vpop.f32.mrf.mxu1  ;;  %v2728_v45 = vadd.f32 %v2701_v32, %v2647_v3  ;;  %3126 = vmatmul.f32.gmra.mxu0 %v6610_v63  ;;  %v8893_v32 = vadd.s32 %v8874_v40, %v7698_v15  ;;  %v3214_v3 = vshll.u32 %v3210_v13, 16  ;;  %v7223_v63 = vmov 0  }
 0x307   : >> { %v2552_v52 = vadd.f32 %v2551_v30, %v2507_v62  ;;  %v3205_v62 = vand.u32 65535, %v8887_v55 }
 0x308   : >> { %v8869_v21 = vadd.f32 %v2782_v19, %v2728_v45  ;;  %2967 = vmatmul.f32.gmra.mxu2 %v6561_v34  ;;  %vm3231_vm10 = vcmp.lt.s32.totalorder %v8893_v32, 0 }
 0x309   : >> { %2886 = vmatmul.f32.gmra.mxu1 %v6608_v20  ;;  %v3209_v20 = vmul.u32 43690, %v3205_v62  ;;  %v3208_v29 = vmul.u32 43691, %v3205_v62 }
 0x30a   : >> { %v2785_v44 = vpop.f32.mrf.mxu0 }
 0x30b   : >> { %v2623_v57 = vpop.f32.mrf.mxu2  ;;  %v3212_v26 = vshll.u32 %v3209_v20, 16 }
 0x30c   : >> { %v2648_v37 = vadd.f32 %v2623_v57, %v2552_v52 }
 0x30d   : >> { %vm3216_vm2 = vc.u32 %v3208_v29, %v3212_v26  ;;  %v3218_v19 = vadd.s32 %v3212_v26, %v3208_v29 }
 0x30e   : >> { %v2554_v17 = vpop.f32.mrf.mxu1  ;;  %v2729_v23 = vadd.f32 %v2704_v54, %v2648_v37  ;;  %v2710_v51 = vpop.f32.mrf.mxu3  ;;  %v3232_v54 = vsub.s32 0, %v8893_v32  ;;  %v3217_v34 = vsel %vm3216_vm2, 1, %v7223_v63  ;;  %v3213_v37 = vshrl.u32 %v3209_v20, 16 }
 0x30f   : >> { %v2555_v11 = vadd.f32 %v2554_v17, %v2510_v24  ;;  %v3219_v45 = vadd.s32 %v3217_v34, %v3211_v38  ;;  %vm3220_vm15 = vc.u32 %v3218_v19, %v3214_v3 }
 0x310   : >> { %v8871_v61 = vadd.f32 %v2785_v44, %v2729_v23  ;;  %v8904_v30 = vsel %vm3231_vm10, %v3232_v54, %v8893_v32  ;;  %v3221_v44 = vsel %vm3220_vm15, 1, %v7223_v63 }
 0x311   : >> { %v3234_v52 = vand.u32 65535, %v8904_v30  ;;  %v3235_v17 = vshrl.u32 %v8904_v30, 16  ;;  %v3223_v23 = vadd.s32 %v3221_v44, %v3219_v45 }
 0x312   : >> { %v2788_v10 = vpop.f32.mrf.mxu0 }
 0x313   : >> { %v2626_v53 = vpop.f32.mrf.mxu2  ;;  %v3224_v22 = vadd.s32 %v3223_v23, %v3213_v37  ;;  %v3240_v39 = vmul.u32 43690, %v3235_v17 }
 0x314   : >> { %v2649_v31 = vadd.f32 %v2626_v53, %v2555_v11  ;;  %v3238_v11 = vmul.u32 43690, %v3234_v52 }
 0x316   : >> { %v2557_v6 = vpop.f32.mrf.mxu1  ;;  %v2730_v58 = vadd.f32 %v2707_v56, %v2649_v31  ;;  %v2713_v49 = vpop.f32.mrf.mxu3  ;;  %v3241_v62 = vshll.u32 %v3238_v11, 16  ;;  %v3242_v3 = vshrl.u32 %v3238_v11, 16 }
 0x317   : >> { %v2558_v35 = vadd.f32 %v2557_v6, %v2513_v27  ;;  %v3237_v6 = vmul.u32 43691, %v3234_v52 }
 0x318   : >> { %v8881_v1 = vadd.f32 %v2788_v10, %v2730_v58  ;;  %v3215_v10 = vshrl.u32 %v3210_v13, 16  ;;  %v3239_v58 = vmul.u32 43691, %v3235_v17 }
 0x319   : >> { %vm3245_vm4 = vc.u32 %v3237_v6, %v3241_v62 }
 0x31a   : >> { %v2791_v24 = vpop.f32.mrf.mxu0  ;;  %v3243_v20 = vshll.u32 %v3239_v58, 16  ;;  %v3244_v44 = vshrl.u32 %v3239_v58, 16 }
 0x31b   : >> { %v2629_v25 = vpop.f32.mrf.mxu2 }
 0x31c   : >> { %v2650_v7 = vadd.f32 %v2629_v25, %v2558_v35 }
 0x31e   : >> { %v2560_v12 = vpop.f32.mrf.mxu1  ;;  %v2731_v27 = vadd.f32 %v2710_v51, %v2650_v7  ;;  %v8911_v51 = vadd.s32 %v8874_v40, %v7726_v60 }
 0x31f   : >> { %v2561_v4 = vadd.f32 %v2560_v12, %v8846_v41  ;;  %v2716_v36 = vpop.f32.mrf.mxu3  ;;  %v3225_v12 = vadd.s32 %v3224_v22, %v3215_v10 }
 0x320   : >> { %v8897_v0 = vadd.f32 %v2791_v24, %v2731_v27  ;;  %v3261_v25 = vsub.s32 0, %v8911_v51  ;;  %vm3260_vm3 = vcmp.lt.s32.totalorder %v8911_v51, 0  ;;  %v3247_v27 = vadd.s32 %v3241_v62, %v3237_v6 }
 0x321   : >> { %v3226_v26 = vshrl.u32 %v3225_v12, 4 }
 0x322   : >> { %v2794_v57 = vpop.f32.mrf.mxu0  ;;  %vm3249_vm5 = vc.u32 %v3247_v27, %v3243_v20 }
 0x323   : >> { %v2632_v41 = vpop.f32.mrf.mxu2  ;;  %v3250_v19 = vsel %vm3249_vm5, 1, %v7223_v63 }
 0x324   : >> { %v2651_v56 = vadd.f32 %v2632_v41, %v2561_v4  ;;  %v3227_v41 = vmul.u32 24, %v3226_v26 }
 0x326   : >> { %v2563_v53 = vpop.f32.mrf.mxu1  ;;  %v2732_v31 = vadd.f32 %v2713_v49, %v2651_v56  ;;  %v8921_v49 = vsel %vm3260_vm3, %v3261_v25, %v8911_v51  ;;  %v8929_v56 = vadd.s32 %v8874_v40, %v7749_v5  ;;  %v3228_v62 = vsub.s32 %v8887_v55, %v3227_v41 }
 0x327   : >> { %v2564_v35 = vadd.f32 %v2563_v53, %v8850_v8  ;;  %v2719_v24 = vpop.f32.mrf.mxu3  ;;  %v3246_v8 = vsel %vm3245_vm4, 1, %v7223_v63  ;;  %v3263_v29 = vand.u32 65535, %v8921_v49  ;;  %v3264_v34 = vshrl.u32 %v8921_v49, 16 }
 0x328   : >> { %v8915_v7 = vadd.f32 %v2794_v57, %v2732_v31  ;;  %v3248_v4 = vadd.s32 %v3246_v8, %v3240_v39  ;;  %vm3289_vm6 = vcmp.lt.s32.totalorder %v8929_v56, 0 }
 0x329   : >> { %v3267_v52 = vmul.u32 43690, %v3263_v29  ;;  %v3266_v17 = vmul.u32 43691, %v3263_v29  ;;  %v3268_v23 = vmul.u32 43691, %v3264_v34  ;;  %v3229_v29 = vsub.s32 0, %v3228_v62 }
 0x32a   : >> { %v3252_v45 = vadd.s32 %v3250_v19, %v3248_v4 }
 0x32b   : >> { %v2635_v13 = vpop.f32.mrf.mxu2  ;;  %v2797_v38 = vpop.f32.mrf.mxu0  ;;  %v3270_v11 = vshll.u32 %v3267_v52, 16  ;;  %v3272_v22 = vshll.u32 %v3268_v23, 16 }
 0x32c   : >> { %v2652_v54 = vadd.f32 %v2635_v13, %v2564_v35  ;;  %v3253_v31 = vadd.s32 %v3252_v45, %v3242_v3  ;;  %v3269_v35 = vmul.u32 43690, %v3264_v34  ;;  %v3271_v13 = vshrl.u32 %v3267_v52, 16 }
 0x32d   : >> { %vm3274_vm7 = vc.u32 %v3266_v17, %v3270_v11  ;;  %v3276_v39 = vadd.s32 %v3270_v11, %v3266_v17  ;;  %v3273_v3 = vshrl.u32 %v3268_v23, 16 }
 0x32e   : >> { %v2566_v57 = vpop.f32.mrf.mxu1  ;;  %v2733_v37 = vadd.f32 %v2716_v36, %v2652_v54  ;;  %v3254_v25 = vadd.s32 %v3253_v31, %v3244_v44  ;;  %v3275_v20 = vsel %vm3274_vm7, 1, %v7223_v63  ;;  %v3290_v36 = vsub.s32 0, %v8929_v56 }
 0x32f   : >> { %v2567_v53 = vadd.f32 %v2566_v57, %v8854_v18  ;;  %v2722_v6 = vpop.f32.mrf.mxu3  ;;  %v3277_v12 = vadd.s32 %v3275_v20, %v3269_v35  ;;  %vm3278_vm8 = vc.u32 %v3276_v39, %v3272_v22  ;;  %v8951_v44 = vadd.s32 %v8874_v40, %v7763_v33 }
 0x330   : >> { %v8932_v10 = vadd.f32 %v2797_v38, %v2733_v37  ;;  %v3255_v18 = vshrl.u32 %v3254_v25, 4  ;;  %v3279_v26 = vsel %vm3278_vm8, 1, %v7223_v63  ;;  %v8942_v55 = vsel %vm3289_vm6, %v3290_v36, %v8929_v56 }
 0x331   : >> { %v3281_v19 = vadd.s32 %v3279_v26, %v3277_v12  ;;  %v3292_v41 = vand.u32 65535, %v8942_v55  ;;  %v3293_v37 = vshrl.u32 %v8942_v55, 16  ;;  %v3319_v20 = vsub.s32 0, %v8951_v44 }
 0x332   : >> { %v3256_v38 = vmul.u32 24, %v3255_v18  ;;  %vm3318_vm14 = vcmp.lt.s32.totalorder %v8951_v44, 0 }
 0x333   : >> { %v2638_v58 = vpop.f32.mrf.mxu2  ;;  %v2800_v8 = vpop.f32.mrf.mxu0  ;;  %v3282_v52 = vadd.s32 %v3281_v19, %v3271_v13  ;;  %v3295_v17 = vmul.u32 43691, %v3292_v41  ;;  %v3296_v23 = vmul.u32 43690, %v3292_v41  ;;  %v3297_v31 = vmul.u32 43691, %v3293_v37 }
 0x334   : >> { %v2653_v27 = vadd.f32 %v2638_v58, %v2567_v53  ;;  %v3298_v39 = vmul.u32 43690, %v3293_v37 }
 0x335   : >> { %v3283_v53 = vadd.s32 %v3282_v52, %v3273_v3  ;;  %v3299_v35 = vshll.u32 %v3296_v23, 16  ;;  %v3301_v58 = vshll.u32 %v3297_v31, 16  ;;  %v3302_v41 = vshrl.u32 %v3297_v31, 16 }
 0x336   : >> { %v2569_v4 = vpop.f32.mrf.mxu1  ;;  %v2734_v54 = vadd.f32 %v2719_v24, %v2653_v27  ;;  %v8955_v24 = vsel %vm3202_vm1, %v3229_v29, %v3228_v62 }
 0x337   : >> { %v2570_v34 = vadd.f32 %v2569_v4, %v8859_v50  ;;  %v2725_v57 = vpop.f32.mrf.mxu3  ;;  %v3257_v50 = vsub.s32 %v8904_v30, %v3256_v38  ;;  %vm3463_vm0 = vcmp.ne.s32.totalorder %v8955_v24, 0  ;;  %v3284_v36 = vshrl.u32 %v3283_v53, 4 }
 0x338   : >> { %v8946_v45 = vadd.f32 %v2800_v8, %v2734_v54  ;;  %vm3303_vm9 = vc.u32 %v3295_v17, %v3299_v35  ;;  %vm3472_vm13 = vcmp.lt.s32.totalorder %v8955_v24, 0  ;;  %v8965_v27 = vadd.s32 24, %v8955_v24 }
 0x339   : >> { %v3258_v30 = vsub.s32 0, %v3257_v50  ;;  %v3304_v18 = vsel %vm3303_vm9, 1, %v7223_v63  ;;  %v3285_v8 = vmul.u32 24, %v3284_v36  ;;  %v3305_v29 = vadd.s32 %v3299_v35, %v3295_v17  ;;  %vm8984_vm2 = vmand %vm3472_vm13, %vm3463_vm0 }
 0x33a   : >> { %v3306_v4 = vadd.s32 %v3304_v18, %v3298_v39  ;;  %v8976_v54 = vadd.s32 %v8874_v40, %v7789_v2  ;;  %v3300_v38 = vshrl.u32 %v3296_v23, 16  ;;  %v3499_v32 = vsel %vm8984_vm2, %v8965_v27, %v8955_v24 }
 0x33b   : >> { %v2641_v11 = vpop.f32.mrf.mxu2  ;;  %v2803_v25 = vpop.f32.mrf.mxu0  ;;  %vm3307_vm1 = vc.u32 %v3305_v29, %v3301_v58  ;;  %v3286_v23 = vsub.s32 %v8921_v49, %v3285_v8  ;;  %vm9029_vm8 = vcmp.ge.s32.totalorder %v3499_v32, 21 }
 0x33c   : >> { %v2654_v22 = vadd.f32 %v2641_v11, %v2570_v34  ;;  %v8990_v34 = vsel %vm3231_vm10, %v3258_v30, %v3257_v50  ;;  %v3308_v52 = vsel %vm3307_vm1, 1, %v7223_v63  ;;  %v3348_v37 = vsub.s32 0, %v8976_v54 }
 0x33d   : >> { %v3310_v53 = vadd.s32 %v3308_v52, %v3306_v4  ;;  %vm3347_vm15 = vcmp.lt.s32.totalorder %v8976_v54, 0  ;;  %vm3464_vm10 = vcmp.ne.s32.totalorder %v8990_v34, 0  ;;  %vm3473_vm4 = vcmp.lt.s32.totalorder %v8990_v34, 0 }
 0x33e   : >> { %v2572_v47 = vpop.f32.mrf.mxu1  ;;  %v2735_v62 = vadd.f32 %v2722_v6, %v2654_v22  ;;  %v8972_v6 = vsel %vm3318_vm14, %v3319_v20, %v8951_v44  ;;  %v9004_v58 = vsel %vm3347_vm15, %v3348_v37, %v8976_v54  ;;  %vm9037_vm0 = vmand %vm3473_vm4, %vm3464_vm10 }
 0x33f   : >> { %v2573_v12 = vadd.f32 %v2572_v47, %v8861_v9  ;;  %v3025_v26 = vpop.f32.mrf.mxu3  ;;  %v3321_v9 = vand.u32 65535, %v8972_v6  ;;  %v3322_v3 = vshrl.u32 %v8972_v6, 16  ;;  %v3311_v50 = vadd.s32 %v3310_v53, %v3300_v38 }
 0x340   : >> { %v8967_v13 = vadd.f32 %v2803_v25, %v2735_v62  ;;  %v3287_v47 = vsub.s32 0, %v3286_v23  ;;  %v3350_v4 = vand.u32 65535, %v9004_v58 }
 0x341   : >> { %v3325_v11 = vmul.u32 43690, %v3321_v9  ;;  %v3324_v25 = vmul.u32 43691, %v3321_v9  ;;  %v3326_v39 = vmul.u32 43691, %v3322_v3  ;;  %v3327_v49 = vmul.u32 43690, %v3322_v3 }
 0x342   : >> { %v3312_v62 = vadd.s32 %v3311_v50, %v3302_v41  ;;  %v3351_v9 = vshrl.u32 %v9004_v58, 16  ;;  %v9017_v3 = vadd.s32 %v8874_v40, %v7856_v48  ;;  %v3353_v37 = vmul.u32 43691, %v3350_v4 }
 0x343   : >> { %v2644_v17 = vpop.f32.mrf.mxu2  ;;  %v2806_v22 = vpop.f32.mrf.mxu0  ;;  %v3328_v31 = vshll.u32 %v3325_v11, 16  ;;  %v3330_v30 = vshll.u32 %v3326_v39, 16 }
 0x344   : >> { %v2655_v35 = vadd.f32 %v2644_v17, %v2573_v12  ;;  %v3329_v12 = vshrl.u32 %v3325_v11, 16  ;;  %v3313_v8 = vshrl.u32 %v3312_v62, 4  ;;  %v3354_v17 = vmul.u32 43690, %v3350_v4  ;;  %v9027_v62 = vld [vmem:[%s11519_s5] ss:$0 sm:$0xff] }
 0x345   : >> { %vm3332_vm5 = vc.u32 %v3324_v25, %v3328_v31  ;;  %v3331_v11 = vshrl.u32 %v3326_v39, 16  ;;  %vm3376_vm13 = vcmp.lt.s32.totalorder %v9017_v3, 0 }
 0x346   : >> { %v2863_v20 = vpop.f32.mrf.mxu1  ;;  %v2736_v36 = vadd.f32 %v2725_v57, %v2655_v35  ;;  %v3334_v57 = vadd.s32 %v3328_v31, %v3324_v25  ;;  %v3333_v29 = vsel %vm3332_vm5, 1, %v7223_v63  ;;  %v3314_v41 = vmul.u32 24, %v3313_v8  ;;  %v9050_v8 = vld [vmem:[%s11524_s6] ss:$0 sm:$0xff] }
 0x347   : >> { %v9009_v24 = vpop.f32.mrf.mxu3  ;;  %v2890_v27 = vadd.f32 %v2863_v20, %v8869_v21  ;;  %v3335_v38 = vadd.s32 %v3333_v29, %v3327_v49  ;;  %v3491_v25 = vadd.s32 24, %v8990_v34  ;;  %v3356_v31 = vmul.u32 43690, %v3351_v9 }
 0x348   : >> { %v9007_v18 = vadd.f32 %v2806_v22, %v2736_v36  ;;  %vm3336_vm7 = vc.u32 %v3334_v57, %v3330_v30  ;;  %v9020_v22 = vmul.u32 43691, %v3351_v9  ;;  %v3315_v50 = vsub.s32 %v8942_v55, %v3314_v41 }
 0x349   : >> { %v3337_v52 = vsel %vm3336_vm7, 1, %v7223_v63  ;;  %v3357_v20 = vshll.u32 %v3354_v17, 16  ;;  %v9044_v57 = vsel %vm3260_vm3, %v3287_v47, %v3286_v23  ;;  %v3500_v51 = vsel %vm9037_vm0, %v3491_v25, %v8990_v34 }
 0x34a   : >> { %v3339_v35 = vadd.s32 %v3337_v52, %v3335_v38  ;;  %v3377_v38 = vsub.s32 0, %v9017_v3  ;;  %v3316_v23 = vsub.s32 0, %v3315_v50  ;;  %vm3465_vm1 = vcmp.ne.s32.totalorder %v9044_v57, 0 }
 0x34b   : >> { %v2944_v19 = vpop.f32.mrf.mxu2  ;;  %v3106_v53 = vpop.f32.mrf.mxu0  ;;  %vm3361_vm9 = vc.u32 %v3353_v37, %v3357_v20  ;;  %v3363_v32 = vadd.s32 %v3357_v20, %v3353_v37  ;;  %v9064_v41 = vadd.s32 %v8874_v40, %v7914_v59  ;;  %vm3474_vm10 = vcmp.lt.s32.totalorder %v9044_v57, 0 }
 0x34c   : >> { %v2971_v21 = vadd.f32 %v2944_v19, %v2890_v27  ;;  %v3340_v55 = vadd.s32 %v3339_v35, %v3329_v12  ;;  %v3362_v12 = vsel %vm3361_vm9, 1, %v7223_v63  ;;  %v9070_v34 = vsel %vm3376_vm13, %v3377_v38, %v9017_v3  ;;  %vm9106_vm7 = vmand %vm3474_vm10, %vm3465_vm1 }
 0x34d   : >> { %v3364_v47 = vadd.s32 %v3362_v12, %v3356_v31  ;;  %v9076_v25 = vsel %vm3289_vm6, %v3316_v23, %v3315_v50  ;;  %v3379_v20 = vand.u32 65535, %v9070_v34  ;;  %vm3405_vm6 = vcmp.lt.s32.totalorder %v9064_v41, 0 }
 0x34e   : >> { %v2866_v36 = vpop.f32.mrf.mxu1  ;;  %v3052_v49 = vadd.f32 %v3025_v26, %v2971_v21  ;;  %v3359_v26 = vshll.u32 %v9020_v22, 16  ;;  %v3341_v4 = vadd.s32 %v3340_v55, %v3331_v11  ;;  %v3358_v21 = vshrl.u32 %v3354_v17, 16 }
 0x34f   : >> { %v9052_v29 = vpop.f32.mrf.mxu3  ;;  %v2891_v9 = vadd.f32 %v2866_v36, %v8871_v61  ;;  %v3360_v17 = vshrl.u32 %v9020_v22, 16  ;;  %v3380_v55 = vshrl.u32 %v9070_v34, 16  ;;  %vm9090_vm4 = vcmp.ge.s32.totalorder %v3500_v51, 21 }
 0x350   : >> { %v3133_v27 = vadd.f32 %v3106_v53, %v3052_v49  ;;  %vm3365_vm3 = vc.u32 %v3363_v32, %v3359_v26  ;;  %v3342_v37 = vshrl.u32 %v3341_v4, 4  ;;  %v3406_v26 = vsub.s32 0, %v9064_v41 }
 0x351   : >> { %v3366_v53 = vsel %vm3365_vm3, 1, %v7223_v63  ;;  %v3383_v4 = vmul.u32 43690, %v3379_v20  ;;  %v9096_v12 = vmul.u32 43691, %v3380_v55  ;;  %v3492_v30 = vadd.s32 24, %v9044_v57 }
 0x352   : >> { %v3146_v19 = vadd.f32 %v9027_v62, %v3133_v27  ;;  %v3368_v31 = vadd.s32 %v3366_v53, %v3364_v47  ;;  %v3343_v27 = vmul.u32 24, %v3342_v37  ;;  %vm3466_vm5 = vcmp.ne.s32.totalorder %v9076_v25, 0 }
 0x353   : >> { %v2947_v52 = vpop.f32.mrf.mxu2  ;;  %v3109_v35 = vpop.f32.mrf.mxu0  ;;  %v3382_v23 = vmul.u32 43691, %v3379_v20  ;;  %v3385_v53 = vmul.u32 43690, %v3380_v55  ;;  %v3493_v20 = vadd.s32 24, %v9076_v25 }
 0x354   : >> { %vm3155_vm2 = vcmp.ge.f32.partialorder %v3146_v19, 0.0  ;;  %v3168_v61 = vmul.f32 %v9050_v8, %v3146_v19  ;;  %v2972_v11 = vadd.f32 %v2947_v52, %v2891_v9  ;;  %v3369_v56 = vadd.s32 %v3368_v31, %v3358_v21 }
 0x355   : >> { %v9113_v52 = vsel %vm3405_vm6, %v3406_v26, %v9064_v41  ;;  %v3501_v31 = vsel %vm9106_vm7, %v3492_v30, %v9044_v57 }
 0x356   : >> { %v3177_v36 = vsel %vm3155_vm2, %v3146_v19, %v3168_v61  ;;  %v2869_v49 = vpop.f32.mrf.mxu1  ;;  %v3053_v39 = vadd.f32 %v9009_v24, %v2972_v11  ;;  %v3370_v38 = vadd.s32 %v3369_v56, %v3360_v17  ;;  %v3386_v19 = vshll.u32 %v3383_v4, 16 }
 0x357   : >> { %v3535_v32 = vsel %vm9029_vm8, -1e+30, %v3177_v36  ;;  %v9094_v24 = vpop.f32.mrf.mxu3  ;;  %v2892_v47 = vadd.f32 %v2869_v49, %v8881_v1  ;;  %vm3475_vm8 = vcmp.lt.s32.totalorder %v9076_v25, 0  ;;  %v3344_v1 = vsub.s32 %v8972_v6, %v3343_v27 }
 0x358   : >> { %3545 = vst [vmem:[%s9087_s19] sm:$0xff] %v3535_v32  ;;  %v3134_v22 = vadd.f32 %v3109_v35, %v3053_v39  ;;  %v3371_v21 = vshrl.u32 %v3370_v38, 4  ;;  %v3388_v17 = vshll.u32 %v9096_v12, 16  ;;  %vm3390_vm9 = vc.u32 %v3382_v23, %v3386_v19  ;;  %vm9129_vm3 = vmand %vm3475_vm8, %vm3466_vm5 }
 0x359   : >> { %v3408_v36 = vand.u32 65535, %v9113_v52  ;;  %v3391_v26 = vsel %vm3390_vm9, 1, %v7223_v63  ;;  %v3392_v57 = vadd.s32 %v3386_v19, %v3382_v23  ;;  %v3345_v27 = vsub.s32 0, %v3344_v1 }
 0x35a   : >> { %v3147_v9 = vadd.f32 %v9027_v62, %v3134_v22  ;;  %v3372_v56 = vmul.u32 24, %v3371_v21  ;;  %vm9137_vm1 = vcmp.ge.s32.totalorder %v3501_v31, 21  ;;  %v3393_v38 = vadd.s32 %v3391_v26, %v3385_v53 }
 0x35b   : >> { %v2950_v37 = vpop.f32.mrf.mxu2  ;;  %v3112_v35 = vpop.f32.mrf.mxu0  ;;  %vm3394_vm2 = vc.u32 %v3392_v57, %v3388_v17  ;;  %v3387_v23 = vshrl.u32 %v3383_v4, 16  ;;  %v3412_v21 = vmul.u32 43690, %v3408_v36  ;;  %v9152_v53 = vsel %vm3318_vm14, %v3345_v27, %v3344_v1 }
 0x35c   : >> { %vm3156_vm0 = vcmp.ge.f32.partialorder %v3147_v9, 0.0  ;;  %v3169_v61 = vmul.f32 %v9050_v8, %v3147_v9  ;;  %v2973_v11 = vadd.f32 %v2950_v37, %v2892_v47  ;;  %v3502_v47 = vsel %vm9129_vm3, %v3493_v20, %v9076_v25 }
 0x35d   : >> { %v3395_v50 = vsel %vm3394_vm2, 1, %v7223_v63  ;;  %v3389_v25 = vshrl.u32 %v9096_v12, 16  ;;  %v3411_v31 = vmul.u32 43691, %v3408_v36  ;;  %v3415_v1 = vshll.u32 %v3412_v21, 16 }
 0x35e   : >> { %v3178_v6 = vsel %vm3156_vm0, %v3147_v9, %v3169_v61  ;;  %v2872_v49 = vpop.f32.mrf.mxu1  ;;  %v3054_v39 = vadd.f32 %v9052_v29, %v2973_v11  ;;  %v3409_v9 = vshrl.u32 %v9113_v52, 16  ;;  %v3397_v37 = vadd.s32 %v3395_v50, %v3393_v38 }
 0x35f   : >> { %v3536_v32 = vsel %vm9090_vm4, -1e+30, %v3178_v6  ;;  %v9141_v30 = vpop.f32.mrf.mxu3  ;;  %v2893_v51 = vadd.f32 %v2872_v49, %v8897_v0  ;;  %v3373_v11 = vsub.s32 %v9004_v58, %v3372_v56  ;;  %vm9159_vm4 = vcmp.ge.s32.totalorder %v3502_v47, 21 }
 0x360   : >> { %3546 = vst [vmem:[%s9087_s19 + $0x8] sm:$0xff] %v3536_v32  ;;  %v3135_v22 = vadd.f32 %v3112_v35, %v3054_v39  ;;  %v9156_v4 = vmul.u32 43691, %v3409_v9  ;;  %v3398_v44 = vadd.s32 %v3397_v37, %v3387_v23  ;;  %v3414_v12 = vmul.u32 43690, %v3409_v9 }
 0x361   : >> { %v9166_v39 = vadd.s32 %v8874_v40, %v8006_v42  ;;  %vm3467_vm14 = vcmp.ne.s32.totalorder %v9152_v53, 0  ;;  %vm3476_vm5 = vcmp.lt.s32.totalorder %v9152_v53, 0  ;;  %vm3419_vm7 = vc.u32 %v3411_v31, %v3415_v1 }
 0x362   : >> { %v3148_v19 = vadd.f32 %v9027_v62, %v3135_v22  ;;  %v3399_v36 = vadd.s32 %v3398_v44, %v3389_v25  ;;  %v3417_v26 = vshll.u32 %v9156_v4, 16  ;;  %v3420_v56 = vsel %vm3419_vm7, 1, %v7223_v63  ;;  %vm9187_vm3 = vmand %vm3476_vm5, %vm3467_vm14 }
 0x363   : >> { %v2953_v61 = vpop.f32.mrf.mxu2  ;;  %v3115_v17 = vpop.f32.mrf.mxu0  ;;  %v3421_v22 = vadd.s32 %v3415_v1, %v3411_v31  ;;  %v3422_v38 = vadd.s32 %v3420_v56, %v3414_v12  ;;  %vm3434_vm8 = vcmp.lt.s32.totalorder %v9166_v39, 0  ;;  %v3435_v47 = vsub.s32 0, %v9166_v39 }
 0x364   : >> { %vm3157_vm10 = vcmp.ge.f32.partialorder %v3148_v19, 0.0  ;;  %v3170_v35 = vmul.f32 %v9050_v8, %v3148_v19  ;;  %v2974_v0 = vadd.f32 %v2953_v61, %v2893_v51  ;;  %v3400_v40 = vshrl.u32 %v3399_v36, 4 }
 0x365   : >> { %v3494_v50 = vadd.s32 24, %v9152_v53  ;;  %v3416_v51 = vshrl.u32 %v3412_v21, 16  ;;  %vm3423_vm0 = vc.u32 %v3421_v22, %v3417_v26 }
 0x366   : >> { %v3179_v6 = vsel %vm3157_vm10, %v3148_v19, %v3170_v35  ;;  %v2875_v49 = vpop.f32.mrf.mxu1  ;;  %v3055_v58 = vadd.f32 %v9094_v24, %v2974_v0  ;;  %v3374_v24 = vsub.s32 0, %v3373_v11  ;;  %v3401_v9 = vmul.u32 24, %v3400_v40 }
 0x367   : >> { %v3537_v55 = vsel %vm9137_vm1, -1e+30, %v3179_v6  ;;  %v9173_v32 = vpop.f32.mrf.mxu3  ;;  %v2894_v27 = vadd.f32 %v2875_v49, %v8915_v7  ;;  %v3424_v25 = vsel %vm3423_vm0, 1, %v7223_v63  ;;  %v3418_v35 = vshrl.u32 %v9156_v4, 16 }
 0x368   : >> { %3547 = vst [vmem:[%s9087_s19 + $0x10] sm:$0xff] %v3537_v55  ;;  %v3136_v57 = vadd.f32 %v3115_v17, %v3055_v58  ;;  %v3375_v21 = vsel %vm3347_vm15, %v3374_v24, %v3373_v11  ;;  %v3426_v0 = vadd.s32 %v3424_v25, %v3422_v38  ;;  %v9198_v17 = vsel %vm3434_vm8, %v3435_v47, %v9166_v39 }
 0x369   : >> { %v3437_v6 = vand.u32 65535, %v9198_v17  ;;  %v3438_v49 = vshrl.u32 %v9198_v17, 16  ;;  %v3503_v11 = vsel %vm9187_vm3, %v3494_v50, %v9152_v53  ;;  %v3402_v4 = vsub.s32 %v9070_v34, %v3401_v9 }
 0x36a   : >> { %v3149_v29 = vadd.f32 %v9027_v62, %v3136_v57  ;;  %v3427_v58 = vadd.s32 %v3426_v0, %v3416_v51  ;;  %vm3468_vm15 = vcmp.ne.s32.totalorder %v3375_v21, 0  ;;  %vm3477_vm1 = vcmp.lt.s32.totalorder %v3375_v21, 0 }
 0x36b   : >> { %v2956_v23 = vpop.f32.mrf.mxu2  ;;  %v3118_v37 = vpop.f32.mrf.mxu0  ;;  %v3441_v36 = vmul.u32 43690, %v3437_v6  ;;  %v3442_v26 = vmul.u32 43691, %v3438_v49  ;;  %v3440_v57 = vmul.u32 43691, %v3437_v6  ;;  %vm9212_vm2 = vcmp.ge.s32.totalorder %v3503_v11, 21 }
 0x36c   : >> { %vm3158_vm9 = vcmp.ge.f32.partialorder %v3149_v29, 0.0  ;;  %v3171_v7 = vmul.f32 %v9050_v8, %v3149_v29  ;;  %v2975_v19 = vadd.f32 %v2956_v23, %v2894_v27  ;;  %v3495_v53 = vadd.s32 24, %v3375_v21 }
 0x36d   : >> { %v3403_v40 = vsub.s32 0, %v3402_v4  ;;  %v3443_v22 = vmul.u32 43690, %v3438_v49  ;;  %v3446_v50 = vshll.u32 %v3442_v26, 16  ;;  %v3447_v3 = vshrl.u32 %v3442_v26, 16 }
 0x36e   : >> { %v3180_v31 = vsel %vm3158_vm9, %v3149_v29, %v3171_v7  ;;  %v2878_v44 = vpop.f32.mrf.mxu1  ;;  %v3056_v1 = vadd.f32 %v9141_v30, %v2975_v19  ;;  %v3428_v30 = vadd.s32 %v3427_v58, %v3418_v35  ;;  %v3444_v29 = vshll.u32 %v3441_v36, 16 }
 0x36f   : >> { %v3538_v54 = vsel %vm9159_vm4, -1e+30, %v3180_v31  ;;  %v3043_v55 = vpop.f32.mrf.mxu3  ;;  %v2895_v24 = vadd.f32 %v2878_v44, %v8932_v10  ;;  %vm9219_vm4 = vmand %vm3477_vm1, %vm3468_vm15  ;;  %v3404_v44 = vsel %vm3376_vm13, %v3403_v40, %v3402_v4 }
 0x370   : >> { %3548 = vst [vmem:[%s9087_s19 + $0x18] sm:$0xff] %v3538_v54  ;;  %v3137_v12 = vadd.f32 %v3118_v37, %v3056_v1  ;;  %v3429_v56 = vshrl.u32 %v3428_v30, 4  ;;  %vm3448_vm14 = vc.u32 %v3440_v57, %v3444_v29  ;;  %v3450_v61 = vadd.s32 %v3444_v29, %v3440_v57 }
 0x371   : >> { %v3449_v37 = vsel %vm3448_vm14, 1, %v7223_v63  ;;  %v3504_v35 = vsel %vm9219_vm4, %v3495_v53, %v3375_v21  ;;  %vm3469_vm0 = vcmp.ne.s32.totalorder %v3404_v44, 0  ;;  %vm3478_vm13 = vcmp.lt.s32.totalorder %v3404_v44, 0 }
 0x372   : >> { %v3150_v20 = vadd.f32 %v9027_v62, %v3137_v12  ;;  %v3430_v9 = vmul.u32 24, %v3429_v56  ;;  %v3451_v0 = vadd.s32 %v3449_v37, %v3443_v22  ;;  %vm3452_vm5 = vc.u32 %v3450_v61, %v3446_v50  ;;  %vm9241_vm3 = vmand %vm3478_vm13, %vm3469_vm0 }
 0x373   : >> { %v2959_v34 = vpop.f32.mrf.mxu2  ;;  %v3121_v23 = vpop.f32.mrf.mxu0  ;;  %v3453_v49 = vsel %vm3452_vm5, 1, %v7223_v63  ;;  %vm9236_vm7 = vcmp.ge.s32.totalorder %v3504_v35, 21  ;;  %v3496_v30 = vadd.s32 24, %v3404_v44 }
 0x374   : >> { %vm3159_vm10 = vcmp.ge.f32.partialorder %v3150_v20, 0.0  ;;  %v3172_v38 = vmul.f32 %v9050_v8, %v3150_v20  ;;  %v2976_v47 = vadd.f32 %v2959_v34, %v2895_v24  ;;  %v3431_v1 = vsub.s32 %v9113_v52, %v3430_v9 }
 0x375   : >> { %v3455_v58 = vadd.s32 %v3453_v49, %v3451_v0  ;;  %v3505_v56 = vsel %vm9241_vm3, %v3496_v30, %v3404_v44 }
 0x376   : >> { %v3181_v51 = vsel %vm3159_vm10, %v3150_v20, %v3172_v38  ;;  %v2881_v7 = vpop.f32.mrf.mxu1  ;;  %v3057_v19 = vadd.f32 %v9173_v32, %v2976_v47  ;;  %v3445_v32 = vshrl.u32 %v3441_v36, 16  ;;  %v3432_v63 = vsub.s32 0, %v3431_v1 }
 0x377   : >> { %v3539_v25 = vsel %vm9212_vm2, -1e+30, %v3181_v51  ;;  %v3046_v6 = vpop.f32.mrf.mxu3  ;;  %v2896_v54 = vadd.f32 %v2881_v7, %v8946_v45  ;;  %vm3514_vm10 = vcmp.ge.s32.totalorder %v3505_v56, 21 }
 0x378   : >> { %3549 = vst [vmem:[%s9087_s19 + $0x20] sm:$0xff] %v3539_v25  ;;  %v3138_v31 = vadd.f32 %v3121_v23, %v3057_v19  ;;  %v3456_v45 = vadd.s32 %v3455_v58, %v3445_v32  ;;  %v3433_v40 = vsel %vm3405_vm6, %v3432_v63, %v3431_v1 }
 0x379   : >> { %vm3470_vm15 = vcmp.ne.s32.totalorder %v3433_v40, 0  ;;  %vm3479_vm1 = vcmp.lt.s32.totalorder %v3433_v40, 0  ;;  %v3497_v9 = vadd.s32 24, %v3433_v40 }
 0x37a   : >> { %v3151_v11 = vadd.f32 %v9027_v62, %v3138_v31  ;;  %v3457_v34 = vadd.s32 %v3456_v45, %v3447_v3  ;;  %vm3488_vm6 = vmand %vm3479_vm1, %vm3470_vm15 }
 0x37b   : >> { %v2962_v12 = vpop.f32.mrf.mxu2  ;;  %v3124_v36 = vpop.f32.mrf.mxu0  ;;  %v3506_v35 = vsel %vm3488_vm6, %v3497_v9, %v3433_v40 }
 0x37c   : >> { %vm3160_vm9 = vcmp.ge.f32.partialorder %v3151_v11, 0.0  ;;  %v3173_v52 = vmul.f32 %v9050_v8, %v3151_v11  ;;  %v2977_v4 = vadd.f32 %v2962_v12, %v2896_v54  ;;  %v3458_v22 = vshrl.u32 %v3457_v34, 4 }
 0x37e   : >> { %v3182_v57 = vsel %vm3160_vm9, %v3151_v11, %v3173_v52  ;;  %v2884_v24 = vpop.f32.mrf.mxu1  ;;  %v3058_v20 = vadd.f32 %v3043_v55, %v2977_v4  ;;  %v3459_v23 = vmul.u32 24, %v3458_v22 }
 0x37f   : >> { %v3540_v53 = vsel %vm9236_vm7, -1e+30, %v3182_v57  ;;  %v2897_v29 = vadd.f32 %v2884_v24, %v8967_v13  ;;  %v3049_v47 = vpop.f32.mrf.mxu3  ;;  %vm3515_vm7 = vcmp.ge.s32.totalorder %v3506_v35, 21 }
 0x380   : >> { %3550 = vst [vmem:[%s9087_s19 + $0x28] sm:$0xff] %v3540_v53  ;;  %v3139_v26 = vadd.f32 %v3124_v36, %v3058_v20  ;;  %v3460_v51 = vsub.s32 %v9198_v17, %v3459_v23 }
 0x382   : >> { %v3152_v55 = vadd.f32 %v9027_v62, %v3139_v26  ;;  %v3461_v61 = vsub.s32 0, %v3460_v51 }
 0x383   : >> { %v2965_v38 = vpop.f32.mrf.mxu2  ;;  %v3127_v50 = vpop.f32.mrf.mxu0 }
 0x384   : >> { %vm3161_vm2 = vcmp.ge.f32.partialorder %v3152_v55, 0.0  ;;  %v3174_v10 = vmul.f32 %v9050_v8, %v3152_v55  ;;  %v2978_v41 = vadd.f32 %v2965_v38, %v2897_v29  ;;  %v3462_v0 = vsel %vm3434_vm8, %v3461_v61, %v3460_v51 }
 0x385   : >> { %vm3471_vm4 = vcmp.ne.s32.totalorder %v3462_v0, 0  ;;  %vm3480_vm14 = vcmp.lt.s32.totalorder %v3462_v0, 0  ;;  %v3498_v49 = vadd.s32 24, %v3462_v0 }
 0x386   : >> { %v3183_v7 = vsel %vm3161_vm2, %v3152_v55, %v3174_v10  ;;  %v3059_v19 = vadd.f32 %v3046_v6, %v2978_v41  ;;  %v2887_v37 = vpop.f32.mrf.mxu1  ;;  %vm3489_vm0 = vmand %vm3480_vm14, %vm3471_vm4 }
 0x387   : >> { %v3541_v13 = vsel %vm3514_vm10, -1e+30, %v3183_v7  ;;  %v2898_v31 = vadd.f32 %v2887_v37, %v9007_v18  ;;  %v3130_v32 = vpop.f32.mrf.mxu3  ;;  %v3507_v18 = vsel %vm3489_vm0, %v3498_v49, %v3462_v0 }
 0x388   : >> { %3551 = vst [vmem:[%s9087_s19 + $0x30] sm:$0xff] %v3541_v13  ;;  %v3140_v25 = vadd.f32 %v3127_v50, %v3059_v19  ;;  %vm3516_vm13 = vcmp.ge.s32.totalorder %v3507_v18, 21 }
 0x38a   : >> { %v3153_v44 = vadd.f32 %v9027_v62, %v3140_v25 }
 0x38b   : >> { %v2968_v1 = vpop.f32.mrf.mxu2 }
 0x38c   : >> { %vm3162_vm5 = vcmp.ge.f32.partialorder %v3153_v44, 0.0  ;;  %v3175_v17 = vmul.f32 %v9050_v8, %v3153_v44  ;;  %v2979_v6 = vadd.f32 %v2968_v1, %v2898_v31 }
 0x38e   : >> { %v3184_v54 = vsel %vm3162_vm5, %v3153_v44, %v3175_v17  ;;  %v3060_v11 = vadd.f32 %v3049_v47, %v2979_v6 }
 0x38f   : >> { %v3542_v39 = vsel %vm3515_vm7, -1e+30, %v3184_v54 }
 0x390   : >> { %3552 = vst [vmem:[%s9087_s19 + $0x38] sm:$0xff] %v3542_v39  ;;  %v3141_v58 = vadd.f32 %v3130_v32, %v3060_v11 }
 0x392   : >> { %v3154_v21 = vadd.f32 %v9027_v62, %v3141_v58 }
 0x394   : >> { %vm3163_vm8 = vcmp.ge.f32.partialorder %v3154_v21, 0.0  ;;  %v3176_v12 = vmul.f32 %v9050_v8, %v3154_v21  ;;  %2430 = sbr.rel (!%p2428_p13) target bundleno = 570 (0x23a), region = 274 }
 0x396   : >> { %v3185_v3 = vsel %vm3163_vm8, %v3154_v21, %v3176_v12 }
 0x397   : >> { %v3543_v52 = vsel %vm3516_vm13, -1e+30, %v3185_v3 }
 0x398   : >> { %3553 = vst [vmem:[%s9087_s19 + $0x40] sm:$0xff] %v3543_v52 }
 0x399 LB: >> { %s3560_s20 = smul.u32 48, %s7214_s1  ;;  %vm3611_vm9 = vcmask 179200   ;;  %s7214_s1 = sphi %s9269_s1, %s3559_s1  }
 0x39a   : >> { %s3644_s27 = smul.u32 10, %s7214_s1  ;;  %s3559_s1 = sadd.s32 1, %s7214_s1  }
 0x39b   : >> { %s3561_s22 = scalar_lea.vmem [#allocation4], %s3560_s20  ;;  %p3556_p0 = scmp.ge.s32.totalorder %s3559_s1, 10  }
 0x39c   : >> { %s3645_s24 = scalar_lea.vmem [#allocation5], %s3644_s27  ;;  %v6656_v35 = vld [vmem:[%s11427_s7 + $0xf8] sm:$0xff] (%p3556_p0)  ;;  %v6655_v0 = vld [vmem:[%s11427_s7 + $0xf0] sm:$0xff] (%p3556_p0)  ;;  %v6654_v31 = vld [vmem:[%s11427_s7 + $0xe8] sm:$0xff] (%p3556_p0)  ;;  %s10103_s25 = smov (%p3556_p0), 0  }
 0x39d   : > { %6899 = vmatpush.msra.mxu2 (%p3556_p0), %v6656_v35  ;;  %v6688_v44 = vld [vmem:[%s11427_s7 + $0x1f8] sm:$0xff] (%p3556_p0)  ;;  %v6687_v1 = vld [vmem:[%s11427_s7 + $0x1f0] sm:$0xff] (%p3556_p0)  ;;  %v6686_v6 = vld [vmem:[%s11427_s7 + $0x1e8] sm:$0xff] (%p3556_p0) }
 0x39e   : > { %v6652_v17 = vld [vmem:[%s11427_s7 + $0xd8] sm:$0xff] (%p3556_p0)  ;;  %3906 = vmatpush.msra.mxu3 (%p3556_p0), %v6688_v44  ;;  %v6651_v32 = vld [vmem:[%s11427_s7 + $0xd0] sm:$0xff] (%p3556_p0)  ;;  %v6685_v49 = vld [vmem:[%s11427_s7 + $0x1e0] sm:$0xff] (%p3556_p0) }
 0x39f   : >> { %v3564_v62 = vld [vmem:[%s3561_s22 + $0x10] sm:$0xff]  ;;  %v6632_v8 = vld [vmem:[%s3561_s22 + $0x28] sm:$0xff]  ;;  %v6637_v4 = vld [vmem:[%s3561_s22 + $0x40] sm:$0xff]  ;;  %6901 = vmatpush.msra.mxu2 (%p3556_p0), %v6655_v0 }
 0x3a0   : >> { %v3574_v36 = vmax.f32 %v3564_v62, %v6632_v8  ;;  %v3563_v63 = vld [vmem:[%s3561_s22 + $0x8] sm:$0xff]  ;;  %v6631_v30 = vld [vmem:[%s3561_s22 + $0x20] sm:$0xff]  ;;  %v6636_v45 = vld [vmem:[%s3561_s22 + $0x38] sm:$0xff]  ;;  %3907 = vmatpush.msra.mxu3 (%p3556_p0), %v6687_v1 }
 0x3a1   : >> { %v3573_v57 = vmax.f32 %v3563_v63, %v6631_v30  ;;  %v3562_v24 = vld [vmem:[%s3561_s22] sm:$0xff]  ;;  %v6630_v20 = vld [vmem:[%s3561_s22 + $0x18] sm:$0xff]  ;;  %v6635_v27 = vld [vmem:[%s3561_s22 + $0x30] sm:$0xff]  ;;  %6903 = vmatpush.msra.mxu2 (%p3556_p0), %v6654_v31 }
 0x3a2   : >> { %v3583_v53 = vmax.f32 %v3574_v36, %v6637_v4  ;;  %v3572_v34 = vmax.f32 %v3562_v24, %v6630_v20  ;;  %v6650_v54 = vld [vmem:[%s11427_s7 + $0xc8] sm:$0xff] (%p3556_p0)  ;;  %3908 = vmatpush.msra.mxu3 (%p3556_p0), %v6686_v6  ;;  %v6684_v11 = vld [vmem:[%s11427_s7 + $0x1d8] sm:$0xff] (%p3556_p0)  ;;  %v6649_v39 = vld [vmem:[%s11427_s7 + $0xc0] sm:$0xff] (%p3556_p0) }
 0x3a3   : >> { %v3582_v26 = vmax.f32 %v3573_v57, %v6636_v45  ;;  %v6683_v58 = vld [vmem:[%s11427_s7 + $0x1d0] sm:$0xff] (%p3556_p0)  ;;  %v6648_v18 = vld [vmem:[%s11427_s7 + $0xb8] sm:$0xff] (%p3556_p0)  ;;  %v6682_v21 = vld [vmem:[%s11427_s7 + $0x1c8] sm:$0xff] (%p3556_p0) }
 0x3a4   : >> { %v3591_v40 = vrot.slane %v3583_v53, 1  ;;  %v3603_v56 = vrot.slane %v3583_v53, 2  ;;  %v3581_v22 = vmax.f32 %v3572_v34, %v6635_v27  ;;  %3909 = vmatpush.msra.mxu3 (%p3556_p0), %v6685_v49  ;;  %v6647_v12 = vld [vmem:[%s11427_s7 + $0xb0] sm:$0xff] (%p3556_p0)  ;;  %v6681_v3 = vld [vmem:[%s11427_s7 + $0x1c0] sm:$0xff] (%p3556_p0)  ;;  %v6646_v52 = vld [vmem:[%s11427_s7 + $0xa8] sm:$0xff] (%p3556_p0) }
 0x3a5   : >> { %v3589_v29 = vrot.slane %v3582_v26, 1  ;;  %v3601_v55 = vrot.slane %v3582_v26, 2  ;;  %v6680_v62 = vld [vmem:[%s11427_s7 + $0x1b8] sm:$0xff] (%p3556_p0)  ;;  %v6645_v8 = vld [vmem:[%s11427_s7 + $0xa0] sm:$0xff] (%p3556_p0)  ;;  %v6679_v4 = vld [vmem:[%s11427_s7 + $0x1b0] sm:$0xff] (%p3556_p0) }
 0x3a6   : >> { %v3598_v38 = vmax.f32 %v3583_v53, %v3591_v40  ;;  %v3588_v47 = vrot.slane %v3581_v22, 1  ;;  %v3600_v23 = vrot.slane %v3581_v22, 2  ;;  %3910 = vmatpush.msra.mxu3 (%p3556_p0), %v6684_v11  ;;  %v6644_v36 = vld [vmem:[%s11427_s7 + $0x98] sm:$0xff] (%p3556_p0)  ;;  %v6678_v63 = vld [vmem:[%s11427_s7 + $0x1a8] sm:$0xff] (%p3556_p0)  ;;  %v6643_v30 = vld [vmem:[%s11427_s7 + $0x90] sm:$0xff] (%p3556_p0) }
 0x3a7   : >> { %v3592_v10 = vsel %vm2334_vm12, %v3589_v29, %v3591_v40  ;;  %v3604_v41 = vsel %vm2358_vm11, %v3601_v55, %v3603_v56  ;;  %v6677_v45 = vld [vmem:[%s11427_s7 + $0x1a0] sm:$0xff] (%p3556_p0)  ;;  %v6642_v57 = vld [vmem:[%s11427_s7 + $0x88] sm:$0xff] (%p3556_p0)  ;;  %v6676_v24 = vld [vmem:[%s11427_s7 + $0x198] sm:$0xff] (%p3556_p0) }
 0x3a8   : >> { %v3610_v50 = vmax.f32 %v3598_v38, %v3603_v56  ;;  %v3597_v9 = vmax.f32 %v3582_v26, %v3592_v10  ;;  %v3590_v51 = vsel %vm2334_vm12, %v3588_v47, %v3589_v29  ;;  %v3602_v7 = vsel %vm2358_vm11, %v3600_v23, %v3601_v55  ;;  %3911 = vmatpush.msra.mxu3 (%p3556_p0), %v6683_v58  ;;  %v6641_v20 = vld [vmem:[%s11427_s7 + $0x80] sm:$0xff] (%p3556_p0)  ;;  %v6672_v53 = vld [vmem:[%s11427_s7 + $0x178] sm:$0xff] (%p3556_p0)  ;;  %v6671_v26 = vld [vmem:[%s11427_s7 + $0x170] sm:$0xff] (%p3556_p0) }
 0x3a9   : >> { %v3596_v19 = vmax.f32 %v3581_v22, %v3590_v51  ;;  %v3673_v34 = vld [vmem:[%s11427_s7 + $0x78] sm:$0xff] (%p3556_p0)  ;;  %v3672_v56 = vld [vmem:[%s11427_s7 + $0x70] sm:$0xff] (%p3556_p0)  ;;  %v6670_v29 = vld [vmem:[%s11427_s7 + $0x168] sm:$0xff] (%p3556_p0) }
 0x3aa   : >> { %6638 = vmatpush.msk.msra.mxu0 %vm2358_vm11, %v3610_v50  ;;  %6895 = vmatpush.msk.msra.mxu1 %vm2358_vm11, %v3610_v50  ;;  %v3609_v13 = vmax.f32 %v3597_v9, %v3604_v41  ;;  %v6704_v22 = vld [vmem:[%s11427_s7 + $0x278] sm:$0xff] (%p3556_p0)  ;;  %v6675_v55 = vld [vmem:[%s11427_s7 + $0x190] sm:$0xff] (%p3556_p0)  ;;  %v3671_v38 = vld [vmem:[%s11427_s7 + $0x68] sm:$0xff] (%p3556_p0) }
 0x3ab   : >> { %v3608_v37 = vmax.f32 %v3596_v19, %v3602_v7  ;;  %3912 = vmatpush.msra.mxu3 (%p3556_p0), %v6682_v21  ;;  %v6703_v47 = vld [vmem:[%s11427_s7 + $0x270] sm:$0xff] (%p3556_p0)  ;;  %v6669_v23 = vld [vmem:[%s11427_s7 + $0x160] sm:$0xff] (%p3556_p0)  ;;  %v6674_v10 = vld [vmem:[%s11427_s7 + $0x188] sm:$0xff] (%p3556_p0) }
 0x3ac   : >> { %3635 = vmatpush.msra.mxu0 %v3609_v13  ;;  %6896 = vmatpush.msra.mxu1 %v3609_v13  ;;  %v3670_v41 = vld [vmem:[%s11427_s7 + $0x60] sm:$0xff] (%p3556_p0)  ;;  %v6702_v50 = vld [vmem:[%s11427_s7 + $0x268] sm:$0xff] (%p3556_p0)  ;;  %v6668_v51 = vld [vmem:[%s11427_s7 + $0x158] sm:$0xff] (%p3556_p0) }
 0x3ad   : > { %3913 = vmatpush.msra.mxu3 (%p3556_p0), %v6681_v3  ;;  %v3669_v7 = vld [vmem:[%s11427_s7 + $0x58] sm:$0xff] (%p3556_p0)  ;;  %v6667_v13 = vld [vmem:[%s11427_s7 + $0x150] sm:$0xff] (%p3556_p0)  ;;  %v6665_v44 = vld [vmem:[%s11427_s7 + $0x140] sm:$0xff] (%p3556_p0) }
 0x3ae   : >> { %3636 = vmatpush.msra.mxu0 %v3608_v37  ;;  %6897 = vmatpush.msra.mxu1 %v3608_v37  ;;  %v6701_v37 = vld [vmem:[%s11427_s7 + $0x260] sm:$0xff] (%p3556_p0)  ;;  %v6699_v1 = vld [vmem:[%s11427_s7 + $0x250] sm:$0xff] (%p3556_p0)  ;;  %v6664_v49 = vld [vmem:[%s11427_s7 + $0x138] sm:$0xff] (%p3556_p0) }
 0x3af   : >> { %6639 = vmatmul.msk.f32.vlgmr.msra.gmra.mxu0 %vm3611_vm9, %v8215_v28  ;;  %6640 = vmatmul.msk.f32.vlgmr.msra.gmra.mxu1 %vm3611_vm9, %v8218_v46  ;;  %v6653_v46 = vld [vmem:[%s11427_s7 + $0xe0] sm:$0xff] (%p3556_p0)  ;;  %v6698_v11 = vld [vmem:[%s11427_s7 + $0x248] sm:$0xff] (%p3556_p0)  ;;  %v6752_v58 = vld [vmem:[%s11427_s7 + $0x3f8] sm:$0xff] (%p3556_p0) }
 0x3b0   : > { %6898 = vmatpush.msra.mxu1 (%p3556_p0), %v6656_v35  ;;  %3701 = vmatpush.msra.mxu0 (%p3556_p0), %v6656_v35  ;;  %v6666_v35 = vld [vmem:[%s11427_s7 + $0x148] sm:$0xff] (%p3556_p0)  ;;  %v6697_v3 = vld [vmem:[%s11427_s7 + $0x240] sm:$0xff] (%p3556_p0) }
 0x3b1   : > { %6905 = vmatpush.msra.mxu2 (%p3556_p0), %v6653_v46  ;;  %3914 = vmatpush.msra.mxu3 (%p3556_p0), %v6680_v62 }
 0x3b2   : > { %6900 = vmatpush.msra.mxu1 (%p3556_p0), %v6655_v0  ;;  %3702 = vmatpush.msra.mxu0 (%p3556_p0), %v6655_v0  ;;  %v6700_v0 = vld [vmem:[%s11427_s7 + $0x258] sm:$0xff] (%p3556_p0) }
 0x3b3   : > { %6907 = vmatpush.msra.mxu2 (%p3556_p0), %v6652_v17  ;;  %3915 = vmatpush.msra.mxu3 (%p3556_p0), %v6679_v4  ;;  %v6696_v4 = vld [vmem:[%s11427_s7 + $0x238] sm:$0xff] (%p3556_p0) }
 0x3b4   : > { %6902 = vmatpush.msra.mxu1 (%p3556_p0), %v6654_v31  ;;  %3703 = vmatpush.msra.mxu0 (%p3556_p0), %v6654_v31  ;;  %v3667_v31 = vld [vmem:[%s11427_s7 + $0x48] sm:$0xff] (%p3556_p0) }
 0x3b5   : > { %6909 = vmatpush.msra.mxu2 (%p3556_p0), %v6651_v32  ;;  %3916 = vmatpush.msra.mxu3 (%p3556_p0), %v6678_v63  ;;  %v6751_v63 = vld [vmem:[%s11427_s7 + $0x3f0] sm:$0xff] (%p3556_p0) }
 0x3b6   : > { %6904 = vmatpush.msra.mxu1 (%p3556_p0), %v6653_v46  ;;  %3704 = vmatpush.msra.mxu0 (%p3556_p0), %v6653_v46  ;;  %v6673_v46 = vld [vmem:[%s11427_s7 + $0x180] sm:$0xff] (%p3556_p0) }
 0x3b7   : > { %6911 = vmatpush.msra.mxu2 (%p3556_p0), %v6650_v54  ;;  %3917 = vmatpush.msra.mxu3 (%p3556_p0), %v6677_v45  ;;  %v6660_v45 = vld [vmem:[%s11427_s7 + $0x118] sm:$0xff] (%p3556_p0) }
 0x3b8   : > { %6906 = vmatpush.msra.mxu1 (%p3556_p0), %v6652_v17  ;;  %3705 = vmatpush.msra.mxu0 (%p3556_p0), %v6652_v17  ;;  %v3666_v17 = vld [vmem:[%s11427_s7 + $0x40] sm:$0xff] (%p3556_p0) }
 0x3b9   : > { %6913 = vmatpush.msra.mxu2 (%p3556_p0), %v6649_v39  ;;  %3918 = vmatpush.msra.mxu3 (%p3556_p0), %v6676_v24  ;;  %v6695_v24 = vld [vmem:[%s11427_s7 + $0x230] sm:$0xff] (%p3556_p0) }
 0x3ba   : > { %6908 = vmatpush.msra.mxu1 (%p3556_p0), %v6651_v32  ;;  %3706 = vmatpush.msra.mxu0 (%p3556_p0), %v6651_v32 }
 0x3bb   : > { %6915 = vmatpush.msra.mxu2 (%p3556_p0), %v6648_v18  ;;  %3919 = vmatpush.msra.mxu3 (%p3556_p0), %v6675_v55 }
 0x3bc   : > { %6910 = vmatpush.msra.mxu1 (%p3556_p0), %v6650_v54  ;;  %3707 = vmatpush.msra.mxu0 (%p3556_p0), %v6650_v54  ;;  %v3665_v54 = vld [vmem:[%s11427_s7 + $0x38] sm:$0xff] (%p3556_p0) }
 0x3bd   : > { %6917 = vmatpush.msra.mxu2 (%p3556_p0), %v6647_v12  ;;  %3920 = vmatpush.msra.mxu3 (%p3556_p0), %v6674_v10 }
 0x3be   : > { %6912 = vmatpush.msra.mxu1 (%p3556_p0), %v6649_v39  ;;  %3708 = vmatpush.msra.mxu0 (%p3556_p0), %v6649_v39  ;;  %v6663_v39 = vld [vmem:[%s11427_s7 + $0x130] sm:$0xff] (%p3556_p0) }
 0x3bf   : > { %6919 = vmatpush.msra.mxu2 (%p3556_p0), %v6646_v52  ;;  %3921 = vmatpush.msra.mxu3 (%p3556_p0), %v6673_v46 }
 0x3c0   : > { %6914 = vmatpush.msra.mxu1 (%p3556_p0), %v6648_v18  ;;  %3709 = vmatpush.msra.mxu0 (%p3556_p0), %v6648_v18  ;;  %v3664_v18 = vld [vmem:[%s11427_s7 + $0x30] sm:$0xff] (%p3556_p0) }
 0x3c1   : > { %6921 = vmatpush.msra.mxu2 (%p3556_p0), %v6645_v8  ;;  %4242 = vmatpush.msrb.mxu3 (%p3556_p0), %v6752_v58  ;;  %v6746_v58 = vld [vmem:[%s11427_s7 + $0x3c8] sm:$0xff] (%p3556_p0) }
 0x3c2   : > { %6916 = vmatpush.msra.mxu1 (%p3556_p0), %v6647_v12  ;;  %3710 = vmatpush.msra.mxu0 (%p3556_p0), %v6647_v12  ;;  %v6662_v12 = vld [vmem:[%s11427_s7 + $0x128] sm:$0xff] (%p3556_p0) }
 0x3c3   : > { %6923 = vmatpush.msra.mxu2 (%p3556_p0), %v6644_v36  ;;  %4243 = vmatpush.msrb.mxu3 (%p3556_p0), %v6751_v63  ;;  %v6744_v63 = vld [vmem:[%s11427_s7 + $0x3b8] sm:$0xff] (%p3556_p0) }
 0x3c4   : > { %6918 = vmatpush.msra.mxu1 (%p3556_p0), %v6646_v52  ;;  %3711 = vmatpush.msra.mxu0 (%p3556_p0), %v6646_v52  ;;  %v3663_v52 = vld [vmem:[%s11427_s7 + $0x28] sm:$0xff] (%p3556_p0) }
 0x3c5   : > { %6925 = vmatpush.msra.mxu2 (%p3556_p0), %v6643_v30 }
 0x3c6   : > { %6920 = vmatpush.msra.mxu1 (%p3556_p0), %v6645_v8  ;;  %3712 = vmatpush.msra.mxu0 (%p3556_p0), %v6645_v8  ;;  %v6661_v8 = vld [vmem:[%s11427_s7 + $0x120] sm:$0xff] (%p3556_p0) }
 0x3c7   : > { %6927 = vmatpush.msra.mxu2 (%p3556_p0), %v6642_v57 }
 0x3c8   : > { %6922 = vmatpush.msra.mxu1 (%p3556_p0), %v6644_v36  ;;  %3713 = vmatpush.msra.mxu0 (%p3556_p0), %v6644_v36  ;;  %v3662_v36 = vld [vmem:[%s11427_s7 + $0x20] sm:$0xff] (%p3556_p0) }
 0x3c9   : > { %6929 = vmatpush.msra.mxu2 (%p3556_p0), %v6641_v20 }
 0x3ca   : > { %6924 = vmatpush.msra.mxu1 (%p3556_p0), %v6643_v30  ;;  %3714 = vmatpush.msra.mxu0 (%p3556_p0), %v6643_v30 }
 0x3cb   : > { %3822 = vmatpush.msrb.mxu2 (%p3556_p0), %v6672_v53  ;;  %v3660_v53 = vld [vmem:[%s11427_s7 + $0x10] sm:$0xff] (%p3556_p0) }
 0x3cc   : > { %6926 = vmatpush.msra.mxu1 (%p3556_p0), %v6642_v57  ;;  %3715 = vmatpush.msra.mxu0 (%p3556_p0), %v6642_v57  ;;  %v3661_v57 = vld [vmem:[%s11427_s7 + $0x18] sm:$0xff] (%p3556_p0) }
 0x3cd   : > { %3823 = vmatpush.msrb.mxu2 (%p3556_p0), %v6671_v26  ;;  %v6658_v26 = vld [vmem:[%s11427_s7 + $0x108] sm:$0xff] (%p3556_p0) }
 0x3ce   : > { %6928 = vmatpush.msra.mxu1 (%p3556_p0), %v6641_v20  ;;  %3716 = vmatpush.msra.mxu0 (%p3556_p0), %v6641_v20  ;;  %v6659_v20 = vld [vmem:[%s11427_s7 + $0x110] sm:$0xff] (%p3556_p0) }
 0x3cf   : > { %3824 = vmatpush.msrb.mxu2 (%p3556_p0), %v6670_v29  ;;  %v6657_v29 = vld [vmem:[%s11427_s7 + $0x100] sm:$0xff] (%p3556_p0) }
 0x3d0   : > { %3748 = vmatpush.msrb.mxu1 (%p3556_p0), %v3673_v34  ;;  %3990 = vmatpush.msrb.mxu0 (%p3556_p0), %v6704_v22  ;;  %v6694_v34 = vld [vmem:[%s11427_s7 + $0x228] sm:$0xff] (%p3556_p0)  ;;  %v6693_v22 = vld [vmem:[%s11427_s7 + $0x220] sm:$0xff] (%p3556_p0) }
 0x3d1   : > { %3825 = vmatpush.msrb.mxu2 (%p3556_p0), %v6669_v23  ;;  %v6736_v23 = vld [vmem:[%s11427_s7 + $0x378] sm:$0xff] (%p3556_p0) }
 0x3d2   : > { %3749 = vmatpush.msrb.mxu1 (%p3556_p0), %v3672_v56  ;;  %3991 = vmatpush.msrb.mxu0 (%p3556_p0), %v6703_v47  ;;  %v3659_v56 = vld [vmem:[%s11427_s7 + $0x8] sm:$0xff] (%p3556_p0) }
 0x3d3   : > { %3826 = vmatpush.msrb.mxu2 (%p3556_p0), %v6668_v51  ;;  %v6749_v51 = vld [vmem:[%s11427_s7 + $0x3e0] sm:$0xff] (%p3556_p0) }
 0x3d4   : > { %3750 = vmatpush.msrb.mxu1 (%p3556_p0), %v3671_v38  ;;  %3992 = vmatpush.msrb.mxu0 (%p3556_p0), %v6702_v50  ;;  %v3658_v38 = vld [vmem:[%s11427_s7] sm:$0xff] (%p3556_p0)  ;;  %v6720_v50 = vld [vmem:[%s11427_s7 + $0x2f8] sm:$0xff] (%p3556_p0) }
 0x3d5   : > { %3827 = vmatpush.msrb.mxu2 (%p3556_p0), %v6667_v13  ;;  %v6734_v13 = vld [vmem:[%s11427_s7 + $0x368] sm:$0xff] (%p3556_p0) }
 0x3d6   : > { %3751 = vmatpush.msrb.mxu1 (%p3556_p0), %v3670_v41  ;;  %3993 = vmatpush.msrb.mxu0 (%p3556_p0), %v6701_v37  ;;  %v6692_v41 = vld [vmem:[%s11427_s7 + $0x218] sm:$0xff] (%p3556_p0) }
 0x3d7   : > { %3828 = vmatpush.msrb.mxu2 (%p3556_p0), %v6666_v35  ;;  %v6733_v35 = vld [vmem:[%s11427_s7 + $0x360] sm:$0xff] (%p3556_p0) }
 0x3d8   : > { %3752 = vmatpush.msrb.mxu1 (%p3556_p0), %v3669_v7  ;;  %3994 = vmatpush.msrb.mxu0 (%p3556_p0), %v6700_v0  ;;  %v6691_v7 = vld [vmem:[%s11427_s7 + $0x210] sm:$0xff] (%p3556_p0)  ;;  %v6748_v0 = vld [vmem:[%s11427_s7 + $0x3d8] sm:$0xff] (%p3556_p0) }
 0x3d9   : > { %3829 = vmatpush.msrb.mxu2 (%p3556_p0), %v6665_v44 }
 0x3da   : > { %3995 = vmatpush.msrb.mxu0 (%p3556_p0), %v6699_v1  ;;  %v9575_v1 = vld [vmem:[%s11427_s7 + $0x478] sm:$0xff] (%p3556_p0) }
 0x3db   : > { %3830 = vmatpush.msrb.mxu2 (%p3556_p0), %v6664_v49  ;;  %v6747_v49 = vld [vmem:[%s11427_s7 + $0x3d0] sm:$0xff] (%p3556_p0) }
 0x3dc   : > { %3996 = vmatpush.msrb.mxu0 (%p3556_p0), %v6698_v11 }
 0x3dd   : > { %3831 = vmatpush.msrb.mxu2 (%p3556_p0), %v6663_v39  ;;  %v6731_v39 = vld [vmem:[%s11427_s7 + $0x350] sm:$0xff] (%p3556_p0) }
 0x3de   : > { %3997 = vmatpush.msrb.mxu0 (%p3556_p0), %v6697_v3  ;;  %v6745_v3 = vld [vmem:[%s11427_s7 + $0x3c0] sm:$0xff] (%p3556_p0) }
 0x3df   : > { %3832 = vmatpush.msrb.mxu2 (%p3556_p0), %v6662_v12  ;;  %v6730_v12 = vld [vmem:[%s11427_s7 + $0x348] sm:$0xff] (%p3556_p0) }
 0x3e0   : > { %3998 = vmatpush.msrb.mxu0 (%p3556_p0), %v6696_v4  ;;  %v6714_v4 = vld [vmem:[%s11427_s7 + $0x2c8] sm:$0xff] (%p3556_p0) }
 0x3e1   : > { %3833 = vmatpush.msrb.mxu2 (%p3556_p0), %v6661_v8  ;;  %v9624_v8 = vld [vmem:[%s11427_s7 + $0x460] sm:$0xff] (%p3556_p0) }
 0x3e2   : > { %3999 = vmatpush.msrb.mxu0 (%p3556_p0), %v6695_v24  ;;  %v6728_v24 = vld [vmem:[%s11427_s7 + $0x338] sm:$0xff] (%p3556_p0) }
 0x3e3   : > { %3834 = vmatpush.msrb.mxu2 (%p3556_p0), %v6660_v45  ;;  %v6713_v45 = vld [vmem:[%s11427_s7 + $0x2c0] sm:$0xff] (%p3556_p0) }
 0x3e4   : > { %4000 = vmatpush.msrb.mxu0 (%p3556_p0), %v6694_v34  ;;  %v6727_v34 = vld [vmem:[%s11427_s7 + $0x330] sm:$0xff] (%p3556_p0) }
 0x3e5   : > { %3835 = vmatpush.msrb.mxu2 (%p3556_p0), %v6659_v20  ;;  %v6743_v20 = vld [vmem:[%s11427_s7 + $0x3b0] sm:$0xff] (%p3556_p0) }
 0x3e6   : > { %4001 = vmatpush.msrb.mxu0 (%p3556_p0), %v6693_v22  ;;  %v9673_v22 = vld [vmem:[%s11427_s7 + $0x448] sm:$0xff] (%p3556_p0) }
 0x3e7   : > { %3836 = vmatpush.msrb.mxu2 (%p3556_p0), %v6658_v26  ;;  %v6742_v26 = vld [vmem:[%s11427_s7 + $0x3a8] sm:$0xff] (%p3556_p0) }
 0x3e8   : > { %4002 = vmatpush.msrb.mxu0 (%p3556_p0), %v6692_v41  ;;  %v6725_v41 = vld [vmem:[%s11427_s7 + $0x320] sm:$0xff] (%p3556_p0) }
 0x3e9   : > { %3837 = vmatpush.msrb.mxu2 (%p3556_p0), %v6657_v29  ;;  %v6711_v29 = vld [vmem:[%s11427_s7 + $0x2b0] sm:$0xff] (%p3556_p0) }
 0x3ea   : > { %4003 = vmatpush.msrb.mxu0 (%p3556_p0), %v6691_v7  ;;  %v6724_v7 = vld [vmem:[%s11427_s7 + $0x318] sm:$0xff] (%p3556_p0) }
 0x42a   : > { %3558 = sbr.rel (!%p3556_p0) target bundleno = 921 (0x399), region = 285 }
 0x42c   : >> { %v3638_v61 = vpop.f32.mrf.mxu0  ;;  %v3641_v25 = vpop.f32.mrf.mxu1 }
 0x42d   : >> { %3646 = vst [vmem:[%s3645_s24] sm:$0xff] %v3638_v61  ;;  %v3668_v61 = vld [vmem:[%s11427_s7 + $0x50] sm:$0xff] (%p3556_p0) }
 0x42e   : >> { %3647 = vst [vmem:[%s3645_s24 + $0x8] sm:$0x3] %v3641_v25  ;;  %3753 = vmatpush.msrb.mxu1 (%p3556_p0), %v3668_v61  ;;  %v6690_v61 = vld [vmem:[%s11427_s7 + $0x208] sm:$0xff] (%p3556_p0) }
 0x42f   : > { %4004 = vmatpush.msrb.mxu0 %v6690_v61  ;;  %v9722_v61 = vld [vmem:[%s11427_s7 + $0x430] sm:$0xff] }
 0x430   : > { %3754 = vmatpush.msrb.mxu1 %v3667_v31  ;;  %v6689_v31 = vld [vmem:[%s11427_s7 + $0x200] sm:$0xff] }
 0x431   : > { %4005 = vmatpush.msrb.mxu0 %v6689_v31 }
 0x432   : > { %3755 = vmatpush.msrb.mxu1 %v3666_v17  ;;  %v6717_v17 = vld [vmem:[%s11427_s7 + $0x2e0] sm:$0xff] }
 0x434   : > { %3756 = vmatpush.msrb.mxu1 %v3665_v54  ;;  %v9590_v54 = vld [vmem:[%s11427_s7 + $0x470] sm:$0xff] }
 0x435   : > { %v3678_v27 = vld [vmem:[#allocation5 + $0x21] sm:$0xff]  ;;  %v3679_v9 = vld [vmem:[#allocation5 + $0x29] sm:$0xff]  ;;  %v3680_v32 = vld [vmem:[#allocation5 + $0x31] sm:$0xff] }
 0x436   : > { %v3674_v40 = vld [vmem:[#allocation5 + $0x1] sm:$0xff]  ;;  %3729 = vmatmul.f32.vlgmr.msra.gmra.mxu1 %v3678_v27  ;;  %v3675_v25 = vld [vmem:[#allocation5 + $0x9] sm:$0xff]  ;;  %v3676_v62 = vld [vmem:[#allocation5 + $0x11] sm:$0xff] }
 0x437   : > { %3717 = vmatmul.f32.vlgmr.msra.gmra.mxu0 %v3674_v40  ;;  %v3682_v19 = vld [vmem:[#allocation5 + $0x41] sm:$0xff]  ;;  %v9449_v6 = vld [vmem:[#allocation5 + $0xa] sm:$0xff]  ;;  %3757 = vmatpush.msrb.mxu1 %v3664_v18  ;;  %v3681_v30 = vld [vmem:[#allocation5 + $0x39] sm:$0xff] }
 0x438   : > { %3741 = vmatmul.f32.vlgmr.msra.gmra.mxu2 %v3682_v19  ;;  %3922 = vmatmul.f32.vlgmr.msra.gmra.mxu3 %v9449_v6  ;;  %v3683_v21 = vld [vmem:[#allocation5 + $0x49] sm:$0xff]  ;;  %v9503_v27 = vld [vmem:[#allocation5 + $0x12] sm:$0xff]  ;;  %v3648_v10 = vld [vmem:[#allocation5] sm:$0xff] }
 0x439   : > { %3758 = vmatpush.msrb.mxu1 %v3663_v52  ;;  %v6750_v40 = vld [vmem:[%s11427_s7 + $0x3e8] sm:$0xff]  ;;  %v3677_v55 = vld [vmem:[#allocation5 + $0x19] sm:$0xff]  ;;  %4158 = vmatpush.msra.mxu2 %v6736_v23  ;;  %v6719_v19 = vld [vmem:[%s11427_s7 + $0x2f0] sm:$0xff] }
 0x43a   : > { %v3795_v47 = vld [vmem:[#allocation5 + $0x2] sm:$0xff]  ;;  %4244 = vmatpush.msrb.mxu3 %v6750_v40  ;;  %v9554_v37 = vld [vmem:[#allocation5 + $0x1a] sm:$0xff]  ;;  %v3963_v44 = vld [vmem:[#allocation5 + $0xb] sm:$0xff]  ;;  %4326 = vmatpush.msra.mxu0 %v9575_v1 }
 0x43b   : > { %3759 = vmatpush.msrb.mxu1 %v3662_v36  ;;  %v3649_v46 = vld [vmem:[#allocation5 + $0x8] sm:$0xff]  ;;  %v3650_v52 = vld [vmem:[#allocation5 + $0x10] sm:$0xff]  ;;  %v6729_v36 = vld [vmem:[%s11427_s7 + $0x340] sm:$0xff] }
 0x43c   : > { %4245 = vmatpush.msrb.mxu3 %v6749_v51  ;;  %v9596_v11 = vld [vmem:[#allocation5 + $0x22] sm:$0xff]  ;;  %4327 = vmatpush.msra.mxu0 %v9590_v54  ;;  %v3651_v40 = vld [vmem:[#allocation5 + $0x18] sm:$0xff] }
 0x43d   : > { %3760 = vmatpush.msrb.mxu1 %v3661_v57  ;;  %v9607_v18 = vld [vmem:[%s11427_s7 + $0x468] sm:$0xff]  ;;  %v6709_v51 = vld [vmem:[%s11427_s7 + $0x2a0] sm:$0xff] }
 0x43e   : > { %3732 = vmatmul.f32.gmra.mxu1 %v3679_v9  ;;  %v6735_v9 = vld [vmem:[%s11427_s7 + $0x370] sm:$0xff]  ;;  %4246 = vmatpush.msrb.mxu3 %v6748_v0  ;;  %v6710_v23 = vld [vmem:[%s11427_s7 + $0x2a8] sm:$0xff]  ;;  %v3885_v31 = vld [vmem:[#allocation5 + $0x3a] sm:$0xff] }
 0x43f   : > { %3720 = vmatmul.f32.gmra.mxu0 %v3675_v25  ;;  %3761 = vmatpush.msrb.mxu1 %v3660_v53  ;;  %v6718_v25 = vld [vmem:[%s11427_s7 + $0x2e8] sm:$0xff]  ;;  %v6712_v53 = vld [vmem:[%s11427_s7 + $0x2b8] sm:$0xff] }
 0x440   : > { %3744 = vmatmul.f32.gmra.mxu2 %v3683_v21  ;;  %3925 = vmatmul.f32.gmra.mxu3 %v9503_v27  ;;  %v6715_v21 = vld [vmem:[%s11427_s7 + $0x2d0] sm:$0xff]  ;;  %v6738_v0 = vld [vmem:[%s11427_s7 + $0x388] sm:$0xff] }
 0x441   : > { %3762 = vmatpush.msrb.mxu1 %v3659_v56  ;;  %4159 = vmatpush.msra.mxu2 %v6735_v9  ;;  %v9644_v57 = vld [vmem:[#allocation5 + $0x2a] sm:$0xff]  ;;  %v3965_v56 = vld [vmem:[#allocation5 + $0x1b] sm:$0xff] }
 0x442   : > { %4247 = vmatpush.msrb.mxu3 %v6747_v49  ;;  %4328 = vmatpush.msra.mxu0 %v9607_v18  ;;  %v9705_v9 = vld [vmem:[%s11427_s7 + $0x438] sm:$0xff]  ;;  %v3653_v49 = vld [vmem:[#allocation5 + $0x28] sm:$0xff] }
 0x443   : > { %3763 = vmatpush.msrb.mxu1 %v3658_v38  ;;  %4160 = vmatpush.msra.mxu2 %v6734_v13  ;;  %v6741_v38 = vld [vmem:[%s11427_s7 + $0x3a0] sm:$0xff] }
 0x444   : > { %4248 = vmatpush.msrb.mxu3 %v6746_v58  ;;  %4329 = vmatpush.msra.mxu0 %v9624_v8  ;;  %v3652_v13 = vld [vmem:[#allocation5 + $0x20] sm:$0xff] }
 0x445   : > { %4074 = vmatpush.msra.mxu1 %v6720_v50  ;;  %4161 = vmatpush.msra.mxu2 %v6733_v35  ;;  %v6740_v50 = vld [vmem:[%s11427_s7 + $0x398] sm:$0xff]  ;;  %v6723_v35 = vld [vmem:[%s11427_s7 + $0x310] sm:$0xff]  ;;  %v3886_v58 = vld [vmem:[#allocation5 + $0x42] sm:$0xff] }
 0x446   : > { %3735 = vmatmul.f32.gmra.mxu1 %v3680_v32  ;;  %v6732_v32 = vld [vmem:[%s11427_s7 + $0x358] sm:$0xff]  ;;  %4249 = vmatpush.msrb.mxu3 %v6745_v3  ;;  %v3654_v3 = vld [vmem:[#allocation5 + $0x30] sm:$0xff] }
 0x447   : > { %3723 = vmatmul.f32.gmra.mxu0 %v3676_v62  ;;  %4075 = vmatpush.msra.mxu1 %v6719_v19  ;;  %v3964_v62 = vld [vmem:[#allocation5 + $0x13] sm:$0xff] }
 0x448   : > { %3838 = vmatmul.f32.vlgmr.msrb.gmra.mxu2 %v3795_v47  ;;  %3928 = vmatmul.f32.gmra.mxu3 %v9554_v37  ;;  %v9688_v47 = vld [vmem:[%s11427_s7 + $0x440] sm:$0xff]  ;;  %v6739_v19 = vld [vmem:[%s11427_s7 + $0x390] sm:$0xff] }
 0x449   : > { %4076 = vmatpush.msra.mxu1 %v6718_v25  ;;  %4162 = vmatpush.msra.mxu2 %v6732_v32  ;;  %v6708_v25 = vld [vmem:[%s11427_s7 + $0x298] sm:$0xff]  ;;  %v6737_v32 = vld [vmem:[%s11427_s7 + $0x380] sm:$0xff] }
 0x44a   : > { %4250 = vmatpush.msrb.mxu3 %v6744_v63  ;;  %v3888_v63 = vld [vmem:[#allocation5 + $0x52] sm:$0xff] }
 0x44b   : > { %4077 = vmatpush.msra.mxu1 %v6717_v17  ;;  %4163 = vmatpush.msra.mxu2 %v6731_v39  ;;  %v6722_v17 = vld [vmem:[%s11427_s7 + $0x308] sm:$0xff] }
 0x44c   : > { %4251 = vmatpush.msrb.mxu3 %v6743_v20  ;;  %v6706_v39 = vld [vmem:[%s11427_s7 + $0x288] sm:$0xff] }
 0x44d   : > { %4164 = vmatpush.msra.mxu2 %v6730_v12  ;;  %v6705_v12 = vld [vmem:[%s11427_s7 + $0x280] sm:$0xff]  ;;  %v3971_v20 = vld [vmem:[#allocation5 + $0x4b] sm:$0xff] }
 0x44e   : > { %3738 = vmatmul.f32.gmra.mxu1 %v3681_v30  ;;  %v9639_v30 = vld [vmem:[%s11427_s7 + $0x458] sm:$0xff]  ;;  %4252 = vmatpush.msrb.mxu3 %v6742_v26 }
 0x44f   : > { %3726 = vmatmul.f32.gmra.mxu0 %v3677_v55  ;;  %4165 = vmatpush.msra.mxu2 %v6729_v36  ;;  %v6726_v55 = vld [vmem:[%s11427_s7 + $0x328] sm:$0xff]  ;;  %v6753_v36 = vld [vmem:[%s11427_s7 + $0x400] sm:$0xff]  ;;  %v3972_v26 = vld [vmem:[#allocation5 + $0x53] sm:$0xff] }
 0x450   : > { %3841 = vmatmul.f32.gmra.mxu2 %v9449_v6  ;;  %v6716_v6 = vld [vmem:[%s11427_s7 + $0x2d8] sm:$0xff]  ;;  %3931 = vmatmul.f32.gmra.mxu3 %v9596_v11 }
 0x451   : > { %4078 = vmatpush.msra.mxu1 %v6716_v6  ;;  %4330 = vmatpush.msra.mxu0 %v9639_v30  ;;  %v3967_v6 = vld [vmem:[#allocation5 + $0x2b] sm:$0xff] }
 0x452   : > { %4166 = vmatpush.msra.mxu2 %v6728_v24  ;;  %4253 = vmatpush.msrb.mxu3 %v6741_v38  ;;  %v3657_v24 = vld [vmem:[#allocation5 + $0x48] sm:$0xff] }
 0x453   : > { %4079 = vmatpush.msra.mxu1 %v6715_v21  ;;  %v6721_v21 = vld [vmem:[%s11427_s7 + $0x300] sm:$0xff] }
 0x454   : > { %4167 = vmatpush.msra.mxu2 %v6727_v34  ;;  %4254 = vmatpush.msrb.mxu3 %v6740_v50  ;;  %v4047_v34 = vld [vmem:[#allocation5 + $0xc] sm:$0xff] }
 0x455   : > { %4080 = vmatpush.msra.mxu1 %v6714_v4  ;;  %v3887_v4 = vld [vmem:[#allocation5 + $0x4a] sm:$0xff] }
 0x456   : > { %3764 = vmatmul.f32.vlgmr.msrb.gmra.mxu1 %v3648_v10  ;;  %v9693_v10 = vld [vmem:[#allocation5 + $0x32] sm:$0xff]  ;;  %4168 = vmatpush.msra.mxu2 %v6726_v55  ;;  %v4133_v55 = vld [vmem:[#allocation5 + $0x24] sm:$0xff] }
 0x457   : > { %4006 = vmatmul.f32.vlgmr.msrb.gmra.mxu0 %v3963_v44  ;;  %4081 = vmatpush.msra.mxu1 %v6713_v45  ;;  %v6707_v44 = vld [vmem:[%s11427_s7 + $0x290] sm:$0xff]  ;;  %v3970_v45 = vld [vmem:[#allocation5 + $0x43] sm:$0xff] }
 0x458   : > { %3844 = vmatmul.f32.gmra.mxu2 %v9503_v27  ;;  %v9656_v27 = vld [vmem:[%s11427_s7 + $0x450] sm:$0xff]  ;;  %3934 = vmatmul.f32.gmra.mxu3 %v9644_v57 }
 0x459   : > { %4331 = vmatpush.msra.mxu0 %v9656_v27  ;;  %4082 = vmatpush.msra.mxu1 %v6712_v53  ;;  %v4131_v53 = vld [vmem:[#allocation5 + $0x14] sm:$0xff] }
 0x45a   : > { %4169 = vmatpush.msra.mxu2 %v6725_v41  ;;  %4255 = vmatpush.msrb.mxu3 %v6739_v19  ;;  %v4134_v41 = vld [vmem:[#allocation5 + $0x2c] sm:$0xff]  ;;  %v4135_v19 = vld [vmem:[#allocation5 + $0x34] sm:$0xff] }
 0x45b   : > { %4332 = vmatpush.msra.mxu0 %v9673_v22  ;;  %4083 = vmatpush.msra.mxu1 %v6711_v29  ;;  %v4218_v29 = vld [vmem:[#allocation5 + $0x2d] sm:$0xff] }
 0x45c   : > { %4170 = vmatpush.msra.mxu2 %v6724_v7  ;;  %4256 = vmatpush.msrb.mxu3 %v6738_v0  ;;  %v4220_v7 = vld [vmem:[#allocation5 + $0x3d] sm:$0xff] }
 0x45d   : > { %4333 = vmatpush.msra.mxu0 %v9688_v47  ;;  %4084 = vmatpush.msra.mxu1 %v6710_v23 }
 0x45e   : > { %3767 = vmatmul.f32.gmra.mxu1 %v3649_v46  ;;  %v6758_v46 = vld [vmem:[%s11427_s7 + $0x428] sm:$0xff]  ;;  %4171 = vmatpush.msra.mxu2 %v6723_v35 }
 0x45f   : > { %4009 = vmatmul.f32.gmra.mxu0 %v3964_v62  ;;  %4085 = vmatpush.msra.mxu1 %v6709_v51  ;;  %v6755_v62 = vld [vmem:[%s11427_s7 + $0x410] sm:$0xff] }
 0x460   : > { %3847 = vmatmul.f32.gmra.mxu2 %v9554_v37  ;;  %3937 = vmatmul.f32.gmra.mxu3 %v9693_v10  ;;  %v3966_v37 = vld [vmem:[#allocation5 + $0x23] sm:$0xff] }
 0x461   : > { %4334 = vmatpush.msra.mxu0 %v9705_v9  ;;  %4086 = vmatpush.msra.mxu1 %v6708_v25  ;;  %v4221_v25 = vld [vmem:[#allocation5 + $0x45] sm:$0xff] }
 0x462   : > { %4172 = vmatpush.msra.mxu2 %v6722_v17  ;;  %4257 = vmatpush.msrb.mxu3 %v6737_v32  ;;  %v4222_v32 = vld [vmem:[#allocation5 + $0x4d] sm:$0xff] }
 0x463   : > { %4335 = vmatpush.msra.mxu0 %v9722_v61  ;;  %4087 = vmatpush.msra.mxu1 %v6707_v44  ;;  %v4303_v44 = vld [vmem:[#allocation5 + $0x36] sm:$0xff] }
 0x464   : > { %6930 = vmatpush.msra.mxu3 %v9575_v1  ;;  %v6756_v1 = vld [vmem:[%s11427_s7 + $0x418] sm:$0xff]  ;;  %4173 = vmatpush.msra.mxu2 %v6721_v21 }
 0x465   : > { %4336 = vmatpush.msra.mxu0 %v6758_v46  ;;  %4088 = vmatpush.msra.mxu1 %v6706_v39  ;;  %v4304_v39 = vld [vmem:[#allocation5 + $0x3e] sm:$0xff] }
 0x466   : > { %3770 = vmatmul.f32.gmra.mxu1 %v3650_v52  ;;  %6931 = vmatpush.msra.mxu3 %v9590_v54  ;;  %v3968_v52 = vld [vmem:[#allocation5 + $0x33] sm:$0xff]  ;;  %v6754_v54 = vld [vmem:[%s11427_s7 + $0x408] sm:$0xff] }
 0x467   : > { %4012 = vmatmul.f32.gmra.mxu0 %v3965_v56  ;;  %4089 = vmatpush.msra.mxu1 %v6705_v12  ;;  %v4132_v56 = vld [vmem:[#allocation5 + $0x1c] sm:$0xff] }
 0x468   : > { %3850 = vmatmul.f32.gmra.mxu2 %v9596_v11  ;;  %3940 = vmatmul.f32.gmra.mxu3 %v3885_v31  ;;  %v6757_v11 = vld [vmem:[%s11427_s7 + $0x420] sm:$0xff] }
 0x469   : > { %4337 = vmatpush.msra.mxu0 %v6757_v11  ;;  %6932 = vmatpush.msra.mxu3 %v9607_v18  ;;  %v3655_v18 = vld [vmem:[#allocation5 + $0x38] sm:$0xff] }
 0x46b   : > { %4338 = vmatpush.msra.mxu0 %v6756_v1  ;;  %6933 = vmatpush.msra.mxu3 %v9624_v8  ;;  %v3969_v8 = vld [vmem:[#allocation5 + $0x3b] sm:$0xff] }
 0x46d   : > { %4339 = vmatpush.msra.mxu0 %v6755_v62  ;;  %6934 = vmatpush.msra.mxu3 %v9639_v30  ;;  %v3656_v30 = vld [vmem:[#allocation5 + $0x40] sm:$0xff] }
 0x46e   : > { %3773 = vmatmul.f32.gmra.mxu1 %v3651_v40  ;;  %v4217_v40 = vld [vmem:[#allocation5 + $0x25] sm:$0xff] }
 0x46f   : > { %4015 = vmatmul.f32.gmra.mxu0 %v3966_v37  ;;  %6935 = vmatpush.msra.mxu3 %v9656_v27  ;;  %v4216_v27 = vld [vmem:[#allocation5 + $0x1d] sm:$0xff]  ;;  %v4302_v37 = vld [vmem:[#allocation5 + $0x2e] sm:$0xff] }
 0x470   : > { %3853 = vmatmul.f32.gmra.mxu2 %v9644_v57  ;;  %3943 = vmatmul.f32.gmra.mxu3 %v3886_v58  ;;  %v4215_v57 = vld [vmem:[#allocation5 + $0x15] sm:$0xff] }
 0x471   : > { %4340 = vmatpush.msra.mxu0 %v6754_v54  ;;  %6936 = vmatpush.msra.mxu3 %v9673_v22  ;;  %v4299_v22 = vld [vmem:[#allocation5 + $0x16] sm:$0xff] }
 0x473   : > { %6937 = vmatpush.msra.mxu3 %v9688_v47  ;;  %4341 = vmatpush.msra.mxu0 %v6753_v36  ;;  %v4300_v47 = vld [vmem:[#allocation5 + $0x1e] sm:$0xff] }
 0x475   : > { %6938 = vmatpush.msra.mxu3 %v9705_v9  ;;  %v4301_v9 = vld [vmem:[#allocation5 + $0x26] sm:$0xff] }
 0x476   : > { %3776 = vmatmul.f32.gmra.mxu1 %v3652_v13 }
 0x477   : > { %4018 = vmatmul.f32.gmra.mxu0 %v3967_v6  ;;  %6939 = vmatpush.msra.mxu3 %v9722_v61  ;;  %v4137_v6 = vld [vmem:[#allocation5 + $0x44] sm:$0xff] }
 0x478   : > { %3856 = vmatmul.f32.gmra.mxu2 %v9693_v10  ;;  %3946 = vmatmul.f32.gmra.mxu3 %v3887_v4  ;;  %v4219_v10 = vld [vmem:[#allocation5 + $0x35] sm:$0xff] }
 0x479   : > { %6940 = vmatpush.msra.mxu3 %v6758_v46 }
 0x47b   : > { %6941 = vmatpush.msra.mxu3 %v6757_v11 }
 0x47d   : > { %6942 = vmatpush.msra.mxu3 %v6756_v1  ;;  %v4223_v1 = vld [vmem:[#allocation5 + $0x55] sm:$0xff] }
 0x47e   : > { %3779 = vmatmul.f32.gmra.mxu1 %v3653_v49 }
 0x47f   : > { %4021 = vmatmul.f32.gmra.mxu0 %v3968_v52  ;;  %6943 = vmatpush.msra.mxu3 %v6755_v62  ;;  %v4138_v52 = vld [vmem:[#allocation5 + $0x4c] sm:$0xff] }
 0x480   : > { %3859 = vmatmul.f32.gmra.mxu2 %v3885_v31  ;;  %3949 = vmatmul.f32.gmra.mxu3 %v3888_v63  ;;  %v4136_v31 = vld [vmem:[#allocation5 + $0x3c] sm:$0xff] }
 0x481   : > { %6944 = vmatpush.msra.mxu3 %v6754_v54 }
 0x483   : > { %6945 = vmatpush.msra.mxu3 %v6753_v36 }
 0x486   : > { %3782 = vmatmul.f32.gmra.mxu1 %v3654_v3 }
 0x487   : > { %4024 = vmatmul.f32.gmra.mxu0 %v3969_v8 }
 0x488   : > { %3862 = vmatmul.f32.gmra.mxu2 %v3886_v58  ;;  %4258 = vmatmul.f32.vlgmr.msrb.gmra.mxu3 %v4215_v57 }
 0x48e   : > { %3785 = vmatmul.f32.gmra.mxu1 %v3655_v18  ;;  %v4305_v18 = vld [vmem:[#allocation5 + $0x46] sm:$0xff] }
 0x48f   : > { %4027 = vmatmul.f32.gmra.mxu0 %v3970_v45 }
 0x490   : > { %3865 = vmatmul.f32.gmra.mxu2 %v3887_v4  ;;  %4261 = vmatmul.f32.gmra.mxu3 %v4216_v27 }
 0x496   : > { %3788 = vmatmul.f32.gmra.mxu1 %v3656_v30  ;;  %v4224_v30 = vld [vmem:[#allocation5 + $0x5d] sm:$0xff] }
 0x497   : > { %4030 = vmatmul.f32.gmra.mxu0 %v3971_v20 }
 0x498   : > { %4174 = vmatmul.f32.vlgmr.msra.gmra.mxu2 %v4131_v53  ;;  %4264 = vmatmul.f32.gmra.mxu3 %v4217_v40 }
 0x49e   : > { %3791 = vmatmul.f32.gmra.mxu1 %v3657_v24  ;;  %v4139_v24 = vld [vmem:[#allocation5 + $0x54] sm:$0xff] }
 0x49f   : > { %4033 = vmatmul.f32.gmra.mxu0 %v3972_v26 }
 0x4a0   : > { %4177 = vmatmul.f32.gmra.mxu2 %v4132_v56  ;;  %4267 = vmatmul.f32.gmra.mxu3 %v4218_v29 }
 0x4a6   : > { %4090 = vmatmul.f32.vlgmr.msra.gmra.mxu1 %v4047_v34  ;;  %v4306_v34 = vld [vmem:[#allocation5 + $0x4e] sm:$0xff] }
 0x4a7   : > { %4342 = vmatmul.f32.vlgmr.msra.gmra.mxu0 %v4299_v22  ;;  %v4308_v22 = vld [vmem:[#allocation5 + $0x5e] sm:$0xff] }
 0x4a8   : > { %4180 = vmatmul.f32.gmra.mxu2 %v4133_v55  ;;  %4270 = vmatmul.f32.gmra.mxu3 %v4219_v10 }
 0x4ae   : > { %4093 = vmatmul.f32.gmra.mxu1 %v4131_v53 }
 0x4af   : > { %4345 = vmatmul.f32.gmra.mxu0 %v4300_v47  ;;  %v4140_v47 = vld [vmem:[#allocation5 + $0x5c] sm:$0xff] }
 0x4b0   : > { %4183 = vmatmul.f32.gmra.mxu2 %v4134_v41  ;;  %4273 = vmatmul.f32.gmra.mxu3 %v4220_v7 }
 0x4b3   : > { %v9783_v38 = vpop.f32.mrf.mxu1 }
 0x4b4   : > { %v3718_v23 = vpop.f32.mrf.mxu0 }
 0x4b6   : > { %4096 = vmatmul.f32.gmra.mxu1 %v4132_v56 }
 0x4b7   : > { %4348 = vmatmul.f32.gmra.mxu0 %v4301_v9  ;;  %v4307_v9 = vld [vmem:[#allocation5 + $0x56] sm:$0xff] }
 0x4b8   : > { %4186 = vmatmul.f32.gmra.mxu2 %v4135_v19  ;;  %4276 = vmatmul.f32.gmra.mxu3 %v4221_v25 }
 0x4bb   : > { %v9785_v50 = vpop.f32.mrf.mxu1  ;;  %v9789_v61 = vpop.f32.mrf.mxu2 }
 0x4bc   : > { %v3721_v51 = vpop.f32.mrf.mxu0  ;;  %v3923_v0 = vpop.f32.mrf.mxu3 }
 0x4be   : > { %4099 = vmatmul.f32.gmra.mxu1 %v4133_v55 }
 0x4bf   : > { %4351 = vmatmul.f32.gmra.mxu0 %v4302_v37 }
 0x4c0   : > { %4189 = vmatmul.f32.gmra.mxu2 %v4136_v31  ;;  %4279 = vmatmul.f32.gmra.mxu3 %v4222_v32 }
 0x4c3   : > { %v9787_v13 = vpop.f32.mrf.mxu1  ;;  %v9793_v17 = vpop.f32.mrf.mxu2 }
 0x4c4   : > { %v3724_v35 = vpop.f32.mrf.mxu0  ;;  %v3926_v58 = vpop.f32.mrf.mxu3 }
 0x4c6   : > { %4102 = vmatmul.f32.gmra.mxu1 %v4134_v41 }
 0x4c7   : > { %4354 = vmatmul.f32.gmra.mxu0 %v4303_v44 }
 0x4c8   : > { %4192 = vmatmul.f32.gmra.mxu2 %v4137_v6  ;;  %4282 = vmatmul.f32.gmra.mxu3 %v4223_v1 }
 0x4cb   : > { %v9791_v46 = vpop.f32.mrf.mxu1  ;;  %v3839_v12 = vpop.f32.mrf.mxu2 }
 0x4cc   : > { %v3727_v49 = vpop.f32.mrf.mxu0  ;;  %v3929_v63 = vpop.f32.mrf.mxu3 }
 0x4ce   : > { %4105 = vmatmul.f32.gmra.mxu1 %v4135_v19 }
 0x4cf   : > { %4357 = vmatmul.f32.gmra.mxu0 %v4304_v39 }
 0x4d0   : > { %4195 = vmatmul.f32.gmra.mxu2 %v4138_v52  ;;  %4285 = vmatmul.f32.gmra.mxu3 %v4224_v30 }
 0x4d3   : > { %v3765_v11 = vpop.f32.mrf.mxu1  ;;  %v3842_v45 = vpop.f32.mrf.mxu2 }
 0x4d4   : > { %v3766_v21 = vadd.f32 %v3765_v11, %v3718_v23  ;;  %v4007_v54 = vpop.f32.mrf.mxu0  ;;  %v3932_v56 = vpop.f32.mrf.mxu3 }
 0x4d6   : > { %4108 = vmatmul.f32.gmra.mxu1 %v4136_v31  ;;  %v3869_v3 = vadd.f32 %v3839_v12, %v3766_v21 }
 0x4d7   : > { %4360 = vmatmul.f32.gmra.mxu0 %v4305_v18 }
 0x4d8   : > { %v3953_v4 = vadd.f32 %v3923_v0, %v3869_v3  ;;  %4198 = vmatmul.f32.gmra.mxu2 %v4139_v24  ;;  %4369 = vmatmul.f32.vlgmr.msra.gmra.mxu3 %v4308_v22  ;;  %v4442_v3 = vshrl.u32 %v7669_v16, 16  ;;  %v4471_v22 = vshrl.u32 %v7698_v15, 16 }
 0x4da   : > { %v9795_v36 = vadd.f32 %v4007_v54, %v3953_v4 }
 0x4db   : > { %v3768_v62 = vpop.f32.mrf.mxu1  ;;  %v3845_v29 = vpop.f32.mrf.mxu2 }
 0x4dc   : > { %v3769_v8 = vadd.f32 %v3768_v62, %v3721_v51  ;;  %v4010_v53 = vpop.f32.mrf.mxu0  ;;  %v3935_v19 = vpop.f32.mrf.mxu3 }
 0x4de   : > { %4111 = vmatmul.f32.gmra.mxu1 %v4137_v6  ;;  %v3870_v57 = vadd.f32 %v3842_v45, %v3769_v8 }
 0x4df   : > { %4363 = vmatmul.f32.gmra.mxu0 %v4306_v34 }
 0x4e0   : > { %v3954_v27 = vadd.f32 %v3926_v58, %v3870_v57  ;;  %4201 = vmatmul.f32.gmra.mxu2 %v4140_v47  ;;  %v7224_v57 = vmov 0  }
 0x4e2   : > { %v9797_v40 = vadd.f32 %v4010_v53, %v3954_v27 }
 0x4e3   : > { %v3771_v20 = vpop.f32.mrf.mxu1  ;;  %v3848_v37 = vpop.f32.mrf.mxu2 }
 0x4e4   : > { %v3772_v26 = vadd.f32 %v3771_v20, %v3724_v35  ;;  %v4013_v41 = vpop.f32.mrf.mxu0  ;;  %v3938_v6 = vpop.f32.mrf.mxu3 }
 0x4e6   : > { %4114 = vmatmul.f32.gmra.mxu1 %v4138_v52  ;;  %v3871_v55 = vadd.f32 %v3845_v29, %v3772_v26 }
 0x4e7   : > { %4366 = vmatmul.f32.gmra.mxu0 %v4307_v9 }
 0x4e8   : > { %v3955_v10 = vadd.f32 %v3929_v63, %v3871_v55  ;;  %v4447_v63 = vmul.u32 52428, %v4442_v3 }
 0x4ea   : > { %v9799_v7 = vadd.f32 %v4013_v41, %v3955_v10  ;;  %v9816_v41 = vmul.u32 52429, %v4471_v22 }
 0x4eb   : > { %v3774_v23 = vpop.f32.mrf.mxu1  ;;  %v3851_v11 = vpop.f32.mrf.mxu2 }
 0x4ec   : > { %v3775_v51 = vadd.f32 %v3774_v23, %v3727_v49  ;;  %v4016_v31 = vpop.f32.mrf.mxu0  ;;  %v4441_v49 = vand.u32 65535, %v7669_v16  ;;  %v3941_v4 = vpop.f32.mrf.mxu3 }
 0x4ee   : > { %4117 = vmatmul.f32.gmra.mxu1 %v4139_v24  ;;  %v3872_v25 = vadd.f32 %v3848_v37, %v3775_v51  ;;  %v4445_v52 = vmul.u32 52428, %v4441_v49  ;;  %v4444_v54 = vmul.u32 52429, %v4441_v49 }
 0x4f0   : > { %v3956_v0 = vadd.f32 %v3932_v56, %v3872_v25  ;;  %v4448_v18 = vshll.u32 %v4445_v52, 16  ;;  %v4479_v25 = vshll.u32 %v9816_v41, 16 }
 0x4f2   : > { %v9802_v32 = vadd.f32 %v4016_v31, %v3956_v0  ;;  %vm4452_vm11 = vc.u32 %v4444_v54, %v4448_v18  ;;  %v4454_v20 = vadd.s32 %v4448_v18, %v4444_v54  ;;  %v4476_v0 = vmul.u32 52428, %v4471_v22 }
 0x4f3   : > { %v3777_v35 = vpop.f32.mrf.mxu1  ;;  %v3854_v8 = vpop.f32.mrf.mxu2  ;;  %v4453_v24 = vsel %vm4452_vm11, 1, %v7224_v57  ;;  %v4499_v31 = vand.u32 65535, %v7726_v60  ;;  %v4528_v22 = vand.u32 65535, %v7749_v5 }
 0x4f4   : > { %v3778_v44 = vadd.f32 %v3777_v35, %v9783_v38  ;;  %v4019_v1 = vpop.f32.mrf.mxu0  ;;  %v4446_v38 = vmul.u32 52429, %v4442_v3  ;;  %v4455_v56 = vadd.s32 %v4453_v24, %v4447_v63  ;;  %v3944_v55 = vpop.f32.mrf.mxu3 }
 0x4f5   : > { %v4502_v18 = vmul.u32 52429, %v4499_v31 }
 0x4f6   : > { %v3873_v39 = vadd.f32 %v3851_v11, %v3778_v44  ;;  %v4450_v30 = vshll.u32 %v4446_v38, 16 }
 0x4f8   : > { %v3957_v21 = vadd.f32 %v3935_v19, %v3873_v39  ;;  %vm4456_vm3 = vc.u32 %v4454_v20, %v4450_v30  ;;  %v4449_v19 = vshrl.u32 %v4445_v52, 16  ;;  %v4451_v39 = vshrl.u32 %v4446_v38, 16 }
 0x4f9   : > { %v4457_v47 = vsel %vm4456_vm3, 1, %v7224_v57  ;;  %v4503_v52 = vmul.u32 52428, %v4499_v31  ;;  %v4532_v31 = vmul.u32 52428, %v4528_v22 }
 0x4fa   : > { %v9807_v62 = vadd.f32 %v4019_v1, %v3957_v21  ;;  %v4459_v37 = vadd.s32 %v4457_v47, %v4455_v56  ;;  %v4500_v1 = vshrl.u32 %v7726_v60, 16 }
 0x4fb   : > { %v3780_v58 = vpop.f32.mrf.mxu1  ;;  %v3857_v51 = vpop.f32.mrf.mxu2 }
 0x4fc   : > { %v3781_v12 = vadd.f32 %v3780_v58, %v9785_v50  ;;  %v4470_v50 = vand.u32 65535, %v7698_v15  ;;  %v4022_v34 = vpop.f32.mrf.mxu0  ;;  %v4460_v21 = vadd.s32 %v4459_v37, %v4449_v19  ;;  %v3947_v3 = vpop.f32.mrf.mxu3  ;;  %v4505_v24 = vmul.u32 52428, %v4500_v1 }
 0x4fe   : > { %v3874_v45 = vadd.f32 %v3854_v8, %v3781_v12  ;;  %v4474_v23 = vmul.u32 52428, %v4470_v50  ;;  %v4473_v10 = vmul.u32 52429, %v4470_v50  ;;  %v4504_v8 = vmul.u32 52429, %v4500_v1 }
 0x4ff   : > { %v4461_v38 = vadd.s32 %v4460_v21, %v4451_v39 }
 0x500   : > { %v3958_v53 = vadd.f32 %v3938_v6, %v3874_v45  ;;  %v4477_v9 = vshll.u32 %v4474_v23, 16  ;;  %v4508_v20 = vshll.u32 %v4504_v8, 16  ;;  %v4509_v21 = vshrl.u32 %v4504_v8, 16 }
 0x501   : > { %v4462_v47 = vshrl.u32 %v4461_v38, 3 }
 0x502   : > { %v9813_v29 = vadd.f32 %v4022_v34, %v3958_v53  ;;  %vm4481_vm15 = vc.u32 %v4473_v10, %v4477_v9 }
 0x503   : > { %v3783_v27 = vpop.f32.mrf.mxu1  ;;  %v4482_v49 = vsel %vm4481_vm15, 1, %v7224_v57  ;;  %v3860_v30 = vpop.f32.mrf.mxu2 }
 0x504   : > { %v3784_v26 = vadd.f32 %v3783_v27, %v9787_v13  ;;  %v4483_v13 = vadd.s32 %v4477_v9, %v4473_v10  ;;  %v4025_v11 = vpop.f32.mrf.mxu0  ;;  %v4484_v54 = vadd.s32 %v4482_v49, %v4476_v0  ;;  %v4480_v10 = vshrl.u32 %v9816_v41, 16 }
 0x505   : > { %v4531_v0 = vmul.u32 52429, %v4528_v22  ;;  %v4535_v49 = vshll.u32 %v4532_v31, 16 }
 0x506   : > { %v3875_v35 = vadd.f32 %v3857_v51, %v3784_v26  ;;  %vm4485_vm1 = vc.u32 %v4483_v13, %v4479_v25  ;;  %v3950_v51 = vpop.f32.mrf.mxu3 }
 0x507   : > { %v4486_v63 = vsel %vm4485_vm1, 1, %v7224_v57  ;;  %vm4539_vm6 = vc.u32 %v4531_v0, %v4535_v49 }
 0x508   : > { %v3959_v6 = vadd.f32 %v3941_v4, %v3875_v35  ;;  %v4506_v4 = vshll.u32 %v4503_v52, 16  ;;  %v4488_v50 = vadd.s32 %v4486_v63, %v4484_v54  ;;  %v4507_v35 = vshrl.u32 %v4503_v52, 16 }
 0x509   : > { %v4541_v63 = vadd.s32 %v4535_v49, %v4531_v0 }
 0x50a   : > { %v9823_v12 = vadd.f32 %v4025_v11, %v3959_v6  ;;  %vm4510_vm2 = vc.u32 %v4502_v18, %v4506_v4  ;;  %v4512_v27 = vadd.s32 %v4506_v4, %v4502_v18  ;;  %v4463_v11 = vmul.u32 10, %v4462_v47 }
 0x50b   : > { %v3786_v44 = vpop.f32.mrf.mxu1  ;;  %v4511_v56 = vsel %vm4510_vm2, 1, %v7224_v57  ;;  %v3863_v6 = vpop.f32.mrf.mxu2  ;;  %v4557_v4 = vand.u32 65535, %v7763_v33 }
 0x50c   : > { %v3787_v58 = vadd.f32 %v3786_v44, %v9791_v46  ;;  %v4478_v46 = vshrl.u32 %v4474_v23, 16  ;;  %v4028_v26 = vpop.f32.mrf.mxu0  ;;  %v4513_v19 = vadd.s32 %v4511_v56, %v4505_v24  ;;  %vm4514_vm10 = vc.u32 %v4512_v27, %v4508_v20 }
 0x50d   : > { %v4529_v23 = vshrl.u32 %v7749_v5, 16  ;;  %v4464_v24 = vsub.s32 %v7669_v16, %v4463_v11  ;;  %v4560_v22 = vmul.u32 52429, %v4557_v4 }
 0x50e   : > { %v3876_v45 = vadd.f32 %v3860_v30, %v3787_v58  ;;  %v4489_v25 = vadd.s32 %v4488_v50, %v4478_v46  ;;  %v4540_v30 = vsel %vm4539_vm6, 1, %v7224_v57  ;;  %v4558_v50 = vshrl.u32 %v7763_v33, 16 }
 0x50f   : > { %v9834_v44 = vmul.u32 52429, %v4529_v23  ;;  %v4534_v39 = vmul.u32 52428, %v4529_v23  ;;  %vm4728_vm14 = vcmp.ne.s32.totalorder %v4464_v24, 0  ;;  %vm4738_vm5 = vcmp.lt.s32.totalorder %v4464_v24, 0 }
 0x510   : > { %v3960_v34 = vadd.f32 %v3944_v55, %v3876_v45  ;;  %v4515_v55 = vsel %vm4514_vm10, 1, %v7224_v57  ;;  %v4490_v58 = vadd.s32 %v4489_v25, %v4480_v10  ;;  %v4259_v45 = vpop.f32.mrf.mxu3  ;;  %v4562_v47 = vmul.u32 52429, %v4558_v50  ;;  %vm9853_vm0 = vmand %vm4738_vm5, %vm4728_vm14 }
 0x511   : > { %v4517_v13 = vadd.s32 %v4515_v55, %v4513_v19  ;;  %v4537_v54 = vshll.u32 %v9834_v44, 16  ;;  %v4542_v20 = vadd.s32 %v4540_v30, %v4534_v39  ;;  %v4758_v0 = vadd.s32 10, %v4464_v24 }
 0x512   : > { %v9829_v9 = vadd.f32 %v4028_v26, %v3960_v34  ;;  %v4491_v46 = vshrl.u32 %v4490_v58, 3  ;;  %v4536_v26 = vshrl.u32 %v4532_v31, 16  ;;  %v4567_v30 = vshrl.u32 %v4562_v47, 16 }
 0x513   : > { %v3789_v53 = vpop.f32.mrf.mxu1  ;;  %v4518_v1 = vadd.s32 %v4517_v13, %v4507_v35  ;;  %vm4543_vm4 = vc.u32 %v4541_v63, %v4537_v54  ;;  %v3866_v34 = vpop.f32.mrf.mxu2  ;;  %v4566_v13 = vshll.u32 %v4562_v47, 16  ;;  %v4768_v63 = vsel %vm9853_vm0, %v4758_v0, %v4464_v24  ;;  %v9877_v24 = vld [vmem:[%s11428_s8] ss:$0 sm:$0xff] }
 0x514   : > { %v3790_v37 = vadd.f32 %v3789_v53, %v9789_v61  ;;  %v4031_v52 = vpop.f32.mrf.mxu0  ;;  %v4544_v27 = vsel %vm4543_vm4, 1, %v7224_v57  ;;  %v4561_v53 = vmul.u32 52428, %v4557_v4  ;;  %v4492_v16 = vmul.u32 10, %v4491_v46 }
 0x515   : > { %v4519_v8 = vadd.s32 %v4518_v1, %v4509_v21  ;;  %v4546_v56 = vadd.s32 %v4544_v27, %v4542_v20  ;;  %vm9879_vm13 = vcmp.ge.s32.totalorder %v4768_v63, 8  ;;  %v4616_v39 = vshrl.u32 %v7856_v48, 16 }
 0x516   : > { %v3877_v41 = vadd.f32 %v3863_v6, %v3790_v37  ;;  %v4564_v19 = vshll.u32 %v4561_v53, 16  ;;  %v4563_v37 = vmul.u32 52428, %v4558_v50  ;;  %v4538_v6 = vshrl.u32 %v9834_v44, 16 }
 0x517   : > { %v4520_v23 = vshrl.u32 %v4519_v8, 3  ;;  %v4547_v31 = vadd.s32 %v4546_v56, %v4536_v26  ;;  %v9860_v21 = vsub.s32 %v7698_v15, %v4492_v16  ;;  %v4565_v54 = vshrl.u32 %v4561_v53, 16 }
 0x518   : > { %v3961_v18 = vadd.f32 %v3947_v3, %v3877_v41  ;;  %vm4568_vm7 = vc.u32 %v4560_v22, %v4564_v19  ;;  %v9849_v11 = vpop.f32.mrf.mxu3  ;;  %v4570_v49 = vadd.s32 %v4564_v19, %v4560_v22 }
 0x519   : > { %v4521_v44 = vmul.u32 10, %v4520_v23  ;;  %v4548_v4 = vadd.s32 %v4547_v31, %v4538_v6  ;;  %vm4729_vm9 = vcmp.ne.s32.totalorder %v9860_v21, 0  ;;  %vm4739_vm11 = vcmp.lt.s32.totalorder %v9860_v21, 0 }
 0x51a   : > { %v9839_v38 = vadd.f32 %v4031_v52, %v3961_v18  ;;  %vm4572_vm8 = vc.u32 %v4570_v49, %v4566_v13  ;;  %v4759_v16 = vadd.s32 10, %v9860_v21  ;;  %vm9913_vm6 = vmand %vm4739_vm11, %vm4729_vm9 }
 0x51b   : > { %v3792_v61 = vpop.f32.mrf.mxu1  ;;  %v4175_v52 = vpop.f32.mrf.mxu2  ;;  %v4573_v20 = vsel %vm4572_vm8, 1, %v7224_v57  ;;  %v9871_v50 = vsub.s32 %v7726_v60, %v4521_v44  ;;  %v4549_v60 = vshrl.u32 %v4548_v4, 3 }
 0x51c   : > { %v3793_v3 = vadd.f32 %v3792_v61, %v9793_v17  ;;  %v4034_v55 = vpop.f32.mrf.mxu0  ;;  %v4586_v17 = vand.u32 65535, %v7789_v2  ;;  %v4587_v61 = vshrl.u32 %v7789_v2, 16 }
 0x51d   : > { %vm4730_vm15 = vcmp.ne.s32.totalorder %v9871_v50, 0  ;;  %vm4740_vm1 = vcmp.lt.s32.totalorder %v9871_v50, 0  ;;  %v4760_v13 = vadd.s32 10, %v9871_v50  ;;  %v4550_v6 = vmul.u32 10, %v4549_v60 }
 0x51e   : > { %v3878_v10 = vadd.f32 %v3866_v34, %v3793_v3  ;;  %v9863_v18 = vmul.u32 52428, %v4586_v17  ;;  %v4589_v15 = vmul.u32 52429, %v4586_v17  ;;  %v9868_v8 = vmul.u32 52429, %v4587_v61  ;;  %vm9921_vm4 = vmand %vm4740_vm1, %vm4730_vm15 }
 0x51f   : > { %v4770_v60 = vsel %vm9921_vm4, %v4760_v13, %v9871_v50 }
 0x520   : > { %v3962_v35 = vadd.f32 %v3950_v51, %v3878_v10  ;;  %v4569_v51 = vsel %vm4568_vm7, 1, %v7224_v57  ;;  %v4593_v3 = vshll.u32 %v9863_v18, 16  ;;  %v4595_v22 = vshll.u32 %v9868_v8, 16  ;;  %v9890_v10 = vld [vmem:[%s11429_s9] ss:$0 sm:$0xff]  ;;  %v9892_v19 = vpop.f32.mrf.mxu3 }
 0x521   : > { %v4571_v1 = vadd.s32 %v4569_v51, %v4563_v37  ;;  %v4592_v37 = vmul.u32 52428, %v4587_v61  ;;  %v4594_v26 = vshrl.u32 %v9863_v18, 16 }
 0x522   : > { %v9847_v41 = vadd.f32 %v4034_v55, %v3962_v35  ;;  %vm4597_vm3 = vc.u32 %v4589_v15, %v4593_v3 }
 0x523   : > { %v4091_v25 = vpop.f32.mrf.mxu1  ;;  %v4575_v46 = vadd.s32 %v4573_v20, %v4571_v1  ;;  %v4598_v17 = vsel %vm4597_vm3, 1, %v7224_v57  ;;  %v4178_v0 = vpop.f32.mrf.mxu2 }
 0x524   : > { %v4121_v58 = vadd.f32 %v4091_v25, %v9795_v36  ;;  %v4343_v34 = vpop.f32.mrf.mxu0  ;;  %v4599_v25 = vadd.s32 %v4593_v3, %v4589_v15  ;;  %v9935_v3 = vsub.s32 %v7749_v5, %v4550_v6  ;;  %v4645_v6 = vshrl.u32 %v7914_v59, 16 }
 0x525   : > { %v4576_v56 = vadd.s32 %v4575_v46, %v4565_v54  ;;  %v4600_v54 = vadd.s32 %v4598_v17, %v4592_v37  ;;  %v4596_v17 = vshrl.u32 %v9868_v8, 16 }
 0x526   : > { %v4205_v36 = vadd.f32 %v4175_v52, %v4121_v58  ;;  %vm9901_vm2 = vc.u32 %v4599_v25, %v4595_v22  ;;  %v9925_v52 = vmul.u32 52429, %v4616_v39  ;;  %vm4731_vm7 = vcmp.ne.s32.totalorder %v9935_v3, 0 }
 0x527   : > { %v4577_v23 = vadd.s32 %v4576_v56, %v4567_v30  ;;  %v4602_v46 = vsel %vm9901_vm2, 1, %v7224_v57  ;;  %vm4741_vm9 = vcmp.lt.s32.totalorder %v9935_v3, 0 }
 0x528   : > { %v4289_v53 = vadd.f32 %v4259_v45, %v4205_v36  ;;  %v4615_v45 = vand.u32 65535, %v7856_v48  ;;  %v9941_v56 = vpop.f32.mrf.mxu3  ;;  %v4604_v5 = vadd.s32 %v4602_v46, %v4600_v54  ;;  %vm9989_vm1 = vmand %vm4741_vm9, %vm4731_vm7 }
 0x529   : > { %v4578_v44 = vshrl.u32 %v4577_v23, 3 }
 0x52a   : > { %v4373_v47 = vadd.f32 %v4343_v34, %v4289_v53  ;;  %v9906_v51 = vmul.u32 52428, %v4615_v45  ;;  %v4618_v61 = vmul.u32 52429, %v4615_v45  ;;  %v4624_v53 = vshll.u32 %v9925_v52, 16 }
 0x52b   : > { %v4094_v27 = vpop.f32.mrf.mxu1  ;;  %v4579_v22 = vmul.u32 10, %v4578_v44  ;;  %v4181_v25 = vpop.f32.mrf.mxu2 }
 0x52c   : > { %v4122_v35 = vadd.f32 %v4094_v27, %v9797_v40  ;;  %v4387_v55 = vadd.f32 %v9877_v24, %v4373_v47  ;;  %v4622_v63 = vshll.u32 %v9906_v51, 16  ;;  %v4346_v36 = vpop.f32.mrf.mxu0  ;;  %v4621_v27 = vmul.u32 52428, %v4616_v39 }
 0x52d   : > { %v9963_v13 = vsub.s32 %v7763_v33, %v4579_v22  ;;  %v4623_v33 = vshrl.u32 %v9906_v51, 16 }
 0x52e   : > { %vm4397_vm10 = vcmp.ge.f32.partialorder %v4387_v55, 0.0  ;;  %v4411_v49 = vmul.f32 %v9890_v10, %v4387_v55  ;;  %v4206_v40 = vadd.f32 %v4178_v0, %v4122_v35  ;;  %vm4626_vm14 = vc.u32 %v4618_v61, %v4622_v63 }
 0x52f   : > { %v4628_v45 = vadd.s32 %v4622_v63, %v4618_v61  ;;  %v4627_v37 = vsel %vm4626_vm14, 1, %v7224_v57  ;;  %v4605_v0 = vadd.s32 %v4604_v5, %v4594_v26  ;;  %v4761_v63 = vadd.s32 10, %v9935_v3 }
 0x530   : > { %v4421_v4 = vsel %vm4397_vm10, %v4387_v55, %v4411_v49  ;;  %v4290_v20 = vadd.f32 %v9849_v11, %v4206_v40  ;;  %v4769_v11 = vsel %vm9913_vm6, %v4759_v16, %v9860_v21  ;;  %v4644_v21 = vand.u32 65535, %v7914_v59  ;;  %v9974_v61 = vpop.f32.mrf.mxu3 }
 0x531   : > { %v4808_v15 = vsel %vm9879_vm13, -1e+30, %v4421_v4  ;;  %vm9951_vm5 = vcmp.ge.s32.totalorder %v4769_v11, 8  ;;  %v4629_v18 = vadd.s32 %v4627_v37, %v4621_v27  ;;  %vm4630_vm0 = vc.u32 %v4628_v45, %v4624_v53 }
 0x532   : > { %4818 = vst [vmem:[#allocation6] sm:$0xff] %v4808_v15  ;;  %v4374_v34 = vadd.f32 %v4346_v36, %v4290_v20  ;;  %vm9957_vm13 = vcmp.ge.s32.totalorder %v4770_v60, 8  ;;  %v4631_v55 = vsel %vm4630_vm0, 1, %v7224_v57  ;;  %v4647_v58 = vmul.u32 52429, %v4644_v21 }
 0x533   : > { %v4097_v30 = vpop.f32.mrf.mxu1  ;;  %v9968_v44 = vmul.u32 52428, %v4644_v21  ;;  %v4633_v54 = vadd.s32 %v4631_v55, %v4629_v18  ;;  %v9977_v4 = vmul.u32 52429, %v4645_v6  ;;  %vm4732_vm11 = vcmp.ne.s32.totalorder %v9963_v13, 0  ;;  %v4184_v15 = vpop.f32.mrf.mxu2 }
 0x534   : > { %v4123_v47 = vadd.f32 %v4097_v30, %v9799_v7  ;;  %v4388_v23 = vadd.f32 %v9877_v24, %v4374_v34  ;;  %v4349_v40 = vpop.f32.mrf.mxu0  ;;  %vm4742_vm3 = vcmp.lt.s32.totalorder %v9963_v13, 0  ;;  %v4625_v30 = vshrl.u32 %v9925_v52, 16 }
 0x535   : > { %v4650_v20 = vmul.u32 52428, %v4645_v6  ;;  %v4606_v46 = vadd.s32 %v4605_v0, %v4596_v17  ;;  %v4634_v53 = vadd.s32 %v4633_v54, %v4623_v33  ;;  %v4653_v34 = vshll.u32 %v9977_v4, 16  ;;  %vm10009_vm10 = vmand %vm4742_vm3, %vm4732_vm11 }
 0x536   : > { %vm4398_vm8 = vcmp.ge.f32.partialorder %v4388_v23, 0.0  ;;  %v4412_v50 = vmul.f32 %v9890_v10, %v4388_v23  ;;  %v4207_v35 = vadd.f32 %v4181_v25, %v4123_v47  ;;  %v4673_v52 = vand.u32 65535, %v8006_v42 }
 0x537   : > { %v4771_v21 = vsel %vm9989_vm1, %v4761_v63, %v9935_v3  ;;  %v4762_v16 = vadd.s32 10, %v9963_v13  ;;  %v4652_v6 = vshrl.u32 %v9968_v44, 16  ;;  %v4654_v63 = vshrl.u32 %v9977_v4, 16 }
 0x538   : > { %v4422_v31 = vsel %vm4398_vm8, %v4388_v23, %v4412_v50  ;;  %v4291_v49 = vadd.f32 %v9892_v19, %v4207_v35  ;;  %v4651_v19 = vshll.u32 %v9968_v44, 16  ;;  %v4607_v50 = vshrl.u32 %v4606_v46, 3  ;;  %v10013_v55 = vpop.f32.mrf.mxu3 }
 0x539   : > { %v4809_v1 = vsel %vm9951_vm5, -1e+30, %v4422_v31  ;;  %v10016_v17 = vmul.u32 52428, %v4673_v52  ;;  %vm10020_vm4 = vcmp.ge.s32.totalorder %v4771_v21, 8  ;;  %v4703_v4 = vshrl.u32 %v8009_v43, 16 }
 0x53a   : > { %4819 = vst [vmem:[#allocation6 + $0x8] sm:$0xff] %v4809_v1  ;;  %v4375_v8 = vadd.f32 %v4349_v40, %v4291_v49  ;;  %vm4655_vm15 = vc.u32 %v4647_v58, %v4651_v19  ;;  %v4657_v22 = vadd.s32 %v4651_v19, %v4647_v58  ;;  %v4772_v58 = vsel %vm10009_vm10, %v4762_v16, %v9963_v13 }
 0x53b   : > { %v4100_v39 = vpop.f32.mrf.mxu1  ;;  %v4656_v26 = vsel %vm4655_vm15, 1, %v7224_v57  ;;  %v4680_v1 = vshll.u32 %v10016_v17, 16  ;;  %v4187_v33 = vpop.f32.mrf.mxu2  ;;  %v4608_v54 = vmul.u32 10, %v4607_v50  ;;  %vm10041_vm7 = vcmp.ge.s32.totalorder %v4772_v58, 8 }
 0x53c   : > { %v4124_v51 = vadd.f32 %v4100_v39, %v9802_v32  ;;  %v4389_v36 = vadd.f32 %v9877_v24, %v4375_v8  ;;  %v4674_v32 = vshrl.u32 %v8006_v42, 16  ;;  %v4658_v5 = vadd.s32 %v4656_v26, %v4650_v20  ;;  %v4352_v37 = vpop.f32.mrf.mxu0 }
 0x53d   : > { %vm4659_vm6 = vc.u32 %v4657_v22, %v4653_v34  ;;  %v4676_v39 = vmul.u32 52429, %v4673_v52  ;;  %v4609_v52 = vsub.s32 %v7789_v2, %v4608_v54 }
 0x53e   : > { %vm4399_vm2 = vcmp.ge.f32.partialorder %v4389_v36, 0.0  ;;  %v4413_v11 = vmul.f32 %v9890_v10, %v4389_v36  ;;  %v4208_v60 = vadd.f32 %v4184_v15, %v4124_v51  ;;  %v4660_v3 = vsel %vm4659_vm6, 1, %v7224_v57 }
 0x53f   : > { %v10018_v7 = vmul.u32 52429, %v4674_v32  ;;  %v4662_v31 = vadd.s32 %v4660_v3, %v4658_v5  ;;  %v4679_v19 = vmul.u32 52428, %v4674_v32  ;;  %vm4684_vm5 = vc.u32 %v4676_v39, %v4680_v1 }
 0x540   : > { %v4423_v45 = vsel %vm4399_vm2, %v4389_v36, %v4413_v11  ;;  %v4292_v23 = vadd.f32 %v9941_v56, %v4208_v60  ;;  %v4635_v56 = vadd.s32 %v4634_v53, %v4625_v30  ;;  %v4686_v51 = vadd.s32 %v4680_v1, %v4676_v39  ;;  %v4277_v26 = vpop.f32.mrf.mxu3 }
 0x541   : > { %v4810_v25 = vsel %vm9957_vm13, -1e+30, %v4423_v45  ;;  %v4663_v20 = vadd.s32 %v4662_v31, %v4652_v6  ;;  %v4702_v36 = vand.u32 65535, %v8009_v43  ;;  %v4685_v53 = vsel %vm4684_vm5, 1, %v7224_v57 }
 0x542   : > { %4820 = vst [vmem:[#allocation6 + $0x10] sm:$0xff] %v4810_v25  ;;  %v4376_v35 = vadd.f32 %v4352_v37, %v4292_v23  ;;  %v4636_v8 = vshrl.u32 %v4635_v56, 3  ;;  %v4687_v32 = vadd.s32 %v4685_v53, %v4679_v19  ;;  %vm4733_vm8 = vcmp.ne.s32.totalorder %v4609_v52, 0 }
 0x543   : > { %v4103_v47 = vpop.f32.mrf.mxu1  ;;  %v4705_v45 = vmul.u32 52429, %v4702_v36  ;;  %v4664_v37 = vadd.s32 %v4663_v20, %v4654_v63  ;;  %v4190_v16 = vpop.f32.mrf.mxu2  ;;  %vm4743_vm13 = vcmp.lt.s32.totalorder %v4609_v52, 0  ;;  %v4681_v25 = vshrl.u32 %v10016_v17, 16 }
 0x544   : > { %v4125_v49 = vadd.f32 %v4103_v47, %v9807_v62  ;;  %v4390_v40 = vadd.f32 %v9877_v24, %v4376_v35  ;;  %v4682_v62 = vshll.u32 %v10018_v7, 16  ;;  %v4355_v27 = vpop.f32.mrf.mxu0  ;;  %v4637_v22 = vmul.u32 10, %v4636_v8  ;;  %vm10060_vm3 = vmand %vm4743_vm13, %vm4733_vm8 }
 0x545   : > { %v10048_v47 = vmul.u32 52429, %v4703_v4  ;;  %v4708_v35 = vmul.u32 52428, %v4703_v4  ;;  %v4763_v3 = vadd.s32 10, %v4609_v52  ;;  %v4683_v1 = vshrl.u32 %v10018_v7, 16 }
 0x546   : > { %vm4400_vm14 = vcmp.ge.f32.partialorder %v4390_v40, 0.0  ;;  %v4414_v44 = vmul.f32 %v9890_v10, %v4390_v40  ;;  %v4209_v30 = vadd.f32 %v4187_v33, %v4125_v49  ;;  %vm4688_vm0 = vc.u32 %v4686_v51, %v4682_v62 }
 0x547   : > { %v4689_v5 = vsel %vm4688_vm0, 1, %v7224_v57  ;;  %v4638_v0 = vsub.s32 %v7856_v48, %v4637_v22  ;;  %v4773_v19 = vsel %vm10060_vm3, %v4763_v3, %v4609_v52  ;;  %v4712_v60 = vshrl.u32 %v10048_v47, 16 }
 0x548   : > { %v4424_v13 = vsel %vm4400_vm14, %v4390_v40, %v4414_v44  ;;  %v4293_v15 = vadd.f32 %v9974_v61, %v4209_v30  ;;  %v10045_v61 = vmul.u32 52428, %v4702_v36  ;;  %v4691_v18 = vadd.s32 %v4689_v5, %v4687_v32 }
 0x549   : > { %v4811_v34 = vsel %vm10020_vm4, -1e+30, %v4424_v13  ;;  %v4665_v40 = vshrl.u32 %v4664_v37, 3  ;;  %vm4734_vm15 = vcmp.ne.s32.totalorder %v4638_v0, 0  ;;  %vm4744_vm2 = vcmp.lt.s32.totalorder %v4638_v0, 0 }
 0x54a   : > { %4821 = vst [vmem:[#allocation6 + $0x18] sm:$0xff] %v4811_v34  ;;  %v4377_v11 = vadd.f32 %v4355_v27, %v4293_v15  ;;  %v4709_v21 = vshll.u32 %v10045_v61, 16  ;;  %v4692_v33 = vadd.s32 %v4691_v18, %v4681_v25  ;;  %v4710_v36 = vshrl.u32 %v10045_v61, 16  ;;  %vm10076_vm4 = vmand %vm4744_vm2, %vm4734_vm15 }
 0x54b   : > { %v4106_v46 = vpop.f32.mrf.mxu1  ;;  %v4666_v62 = vmul.u32 10, %v4665_v40  ;;  %v4193_v51 = vpop.f32.mrf.mxu2  ;;  %vm4783_vm6 = vcmp.ge.s32.totalorder %v4773_v19, 8  ;;  %v4764_v27 = vadd.s32 10, %v4638_v0 }
 0x54c   : > { %v4126_v23 = vadd.f32 %v4106_v46, %v9813_v29  ;;  %v4391_v2 = vadd.f32 %v9877_v24, %v4377_v11  ;;  %v4711_v29 = vshll.u32 %v10048_v47, 16  ;;  %vm4713_vm11 = vc.u32 %v4705_v45, %v4709_v21  ;;  %v4358_v49 = vpop.f32.mrf.mxu0 }
 0x54d   : > { %v4714_v58 = vsel %vm4713_vm11, 1, %v7224_v57  ;;  %v4715_v54 = vadd.s32 %v4709_v21, %v4705_v45  ;;  %v4693_v7 = vadd.s32 %v4692_v33, %v4683_v1  ;;  %v4774_v5 = vsel %vm10076_vm4, %v4764_v27, %v4638_v0 }
 0x54e   : > { %vm4401_vm9 = vcmp.ge.f32.partialorder %v4391_v2, 0.0  ;;  %v4415_v50 = vmul.f32 %v9890_v10, %v4391_v2  ;;  %v4210_v56 = vadd.f32 %v4190_v16, %v4126_v23  ;;  %v4716_v63 = vadd.s32 %v4714_v58, %v4708_v35 }
 0x54f   : > { %vm4717_vm1 = vc.u32 %v4715_v54, %v4711_v29  ;;  %v4694_v11 = vshrl.u32 %v4693_v7, 3  ;;  %vm4784_vm0 = vcmp.ge.s32.totalorder %v4774_v5, 8 }
 0x550   : > { %v4425_v6 = vsel %vm4401_vm9, %v4391_v2, %v4415_v50  ;;  %v4294_v39 = vadd.f32 %v10013_v55, %v4210_v56  ;;  %v4280_v55 = vpop.f32.mrf.mxu3  ;;  %v4718_v20 = vsel %vm4717_vm1, 1, %v7224_v57  ;;  %v4667_v57 = vsub.s32 %v7914_v59, %v4666_v62 }
 0x551   : > { %v4812_v48 = vsel %vm10041_vm7, -1e+30, %v4425_v6  ;;  %v4720_v13 = vadd.s32 %v4718_v20, %v4716_v63  ;;  %v4695_v37 = vmul.u32 10, %v4694_v11 }
 0x552   : > { %4822 = vst [vmem:[#allocation6 + $0x20] sm:$0xff] %v4812_v48  ;;  %v4378_v8 = vadd.f32 %v4358_v49, %v4294_v39  ;;  %vm4735_vm14 = vcmp.ne.s32.totalorder %v4667_v57, 0  ;;  %vm4745_vm5 = vcmp.lt.s32.totalorder %v4667_v57, 0  ;;  %v4765_v16 = vadd.s32 10, %v4667_v57 }
 0x553   : > { %v4109_v31 = vpop.f32.mrf.mxu1  ;;  %v4721_v61 = vadd.s32 %v4720_v13, %v4710_v36  ;;  %v4196_v2 = vpop.f32.mrf.mxu2  ;;  %vm10087_vm8 = vmand %vm4745_vm5, %vm4735_vm14  ;;  %v4696_v3 = vsub.s32 %v8006_v42, %v4695_v37 }
 0x554   : > { %v4127_v44 = vadd.f32 %v4109_v31, %v9823_v12  ;;  %v4392_v30 = vadd.f32 %v9877_v24, %v4378_v8  ;;  %v4361_v34 = vpop.f32.mrf.mxu0  ;;  %v4775_v6 = vsel %vm10087_vm8, %v4765_v16, %v4667_v57 }
 0x555   : > { %v4722_v59 = vadd.s32 %v4721_v61, %v4712_v60  ;;  %vm4736_vm13 = vcmp.ne.s32.totalorder %v4696_v3, 0  ;;  %vm4746_vm9 = vcmp.lt.s32.totalorder %v4696_v3, 0  ;;  %vm4785_vm3 = vcmp.ge.s32.totalorder %v4775_v6, 8 }
 0x556   : > { %vm4402_vm10 = vcmp.ge.f32.partialorder %v4392_v30, 0.0  ;;  %v4416_v46 = vmul.f32 %v9890_v10, %v4392_v30  ;;  %v4211_v15 = vadd.f32 %v4193_v51, %v4127_v44  ;;  %v4766_v48 = vadd.s32 10, %v4696_v3  ;;  %vm4756_vm15 = vmand %vm4746_vm9, %vm4736_vm13 }
 0x557   : > { %v4723_v0 = vshrl.u32 %v4722_v59, 3 }
 0x558   : > { %v4426_v53 = vsel %vm4402_vm10, %v4392_v30, %v4416_v46  ;;  %v4295_v12 = vadd.f32 %v4277_v26, %v4211_v15  ;;  %v4283_v45 = vpop.f32.mrf.mxu3  ;;  %v4776_v19 = vsel %vm4756_vm15, %v4766_v48, %v4696_v3 }
 0x559   : > { %v4813_v32 = vsel %vm4783_vm6, -1e+30, %v4426_v53  ;;  %v4724_v40 = vmul.u32 10, %v4723_v0  ;;  %vm4786_vm6 = vcmp.ge.s32.totalorder %v4776_v19, 8 }
 0x55a   : > { %4823 = vst [vmem:[#allocation6 + $0x28] sm:$0xff] %v4813_v32  ;;  %v4379_v22 = vadd.f32 %v4361_v34, %v4295_v12 }
 0x55b   : > { %v4112_v4 = vpop.f32.mrf.mxu1  ;;  %v4199_v49 = vpop.f32.mrf.mxu2 }
 0x55c   : > { %v4128_v26 = vadd.f32 %v4112_v4, %v9829_v9  ;;  %v4393_v23 = vadd.f32 %v9877_v24, %v4379_v22  ;;  %v4364_v56 = vpop.f32.mrf.mxu0 }
 0x55e   : > { %vm4403_vm7 = vcmp.ge.f32.partialorder %v4393_v23, 0.0  ;;  %v4417_v21 = vmul.f32 %v9890_v10, %v4393_v23  ;;  %v4212_v47 = vadd.f32 %v4196_v2, %v4128_v26 }
 0x560   : > { %v4427_v25 = vsel %vm4403_vm7, %v4393_v23, %v4417_v21  ;;  %v4296_v50 = vadd.f32 %v4280_v55, %v4212_v47  ;;  %v4286_v17 = vpop.f32.mrf.mxu3 }
 0x561   : > { %v4814_v9 = vsel %vm4784_vm0, -1e+30, %v4427_v25 }
 0x562   : > { %4824 = vst [vmem:[#allocation6 + $0x30] sm:$0xff] %v4814_v9  ;;  %v4380_v29 = vadd.f32 %v4364_v56, %v4296_v50 }
 0x563   : > { %v4115_v18 = vpop.f32.mrf.mxu1  ;;  %v4202_v62 = vpop.f32.mrf.mxu2 }
 0x564   : > { %v4129_v31 = vadd.f32 %v4115_v18, %v9839_v38  ;;  %v4394_v39 = vadd.f32 %v9877_v24, %v4380_v29  ;;  %v4367_v54 = vpop.f32.mrf.mxu0  ;;  %v4725_v38 = vsub.s32 %v8009_v43, %v4724_v40 }
 0x566   : > { %vm4404_vm11 = vcmp.ge.f32.partialorder %v4394_v39, 0.0  ;;  %v4418_v58 = vmul.f32 %v9890_v10, %v4394_v39  ;;  %v4213_v42 = vadd.f32 %v4199_v49, %v4129_v31  ;;  %vm4737_vm1 = vcmp.ne.s32.totalorder %v4725_v38, 0 }
 0x567   : > { %vm4747_vm2 = vcmp.lt.s32.totalorder %v4725_v38, 0  ;;  %v4767_v36 = vadd.s32 10, %v4725_v38 }
 0x568   : > { %v4428_v1 = vsel %vm4404_vm11, %v4394_v39, %v4418_v58  ;;  %v4297_v33 = vadd.f32 %v4283_v45, %v4213_v42  ;;  %v4370_v7 = vpop.f32.mrf.mxu3  ;;  %vm4757_vm4 = vmand %vm4747_vm2, %vm4737_vm1 }
 0x569   : > { %v4815_v8 = vsel %vm4785_vm3, -1e+30, %v4428_v1  ;;  %v4777_v27 = vsel %vm4757_vm4, %v4767_v36, %v4725_v38 }
 0x56a   : > { %4825 = vst [vmem:[#allocation6 + $0x38] sm:$0xff] %v4815_v8  ;;  %v4381_v63 = vadd.f32 %v4367_v54, %v4297_v33  ;;  %vm4787_vm5 = vcmp.ge.s32.totalorder %v4777_v27, 8 }
 0x56b   : > { %v4118_v55 = vpop.f32.mrf.mxu1 }
 0x56c   : > { %v4130_v44 = vadd.f32 %v4118_v55, %v9847_v41  ;;  %v4395_v30 = vadd.f32 %v9877_v24, %v4381_v63 }
 0x56e   : > { %vm4405_vm10 = vcmp.ge.f32.partialorder %v4395_v30, 0.0  ;;  %v4419_v20 = vmul.f32 %v9890_v10, %v4395_v30  ;;  %v4214_v51 = vadd.f32 %v4202_v62, %v4130_v44 }
 0x570   : > { %v4429_v13 = vsel %vm4405_vm10, %v4395_v30, %v4419_v20  ;;  %v4298_v46 = vadd.f32 %v4286_v17, %v4214_v51 }
 0x571   : > { %v4816_v43 = vsel %vm4786_vm6, -1e+30, %v4429_v13 }
 0x572   : > { %4826 = vst [vmem:[#allocation6 + $0x40] sm:$0xff] %v4816_v43  ;;  %v4382_v15 = vadd.f32 %v4370_v7, %v4298_v46 }
 0x574   : > { %v4396_v41 = vadd.f32 %v9877_v24, %v4382_v15 }
 0x576   : > { %vm4406_vm14 = vcmp.ge.f32.partialorder %v4396_v41, 0.0  ;;  %v4420_v53 = vmul.f32 %v9890_v10, %v4396_v41 }
 0x578   : > { %v4430_v4 = vsel %vm4406_vm14, %v4396_v41, %v4420_v53 }
 0x579   : > { %v4817_v12 = vsel %vm4787_vm5, -1e+30, %v4430_v4 }
 0x57a   : > { %4827 = vst [vmem:[#allocation6 + $0x48] sm:$0xff] %v4817_v12 }
 0x57b LB: >> { %s4834_s19 = smul.u32 20, %s7218_s25  ;;  %vm4860_vm7 = vcmask 1040384   ;;  %vm4856_vm0 = vcmask 72704   ;;  %s6775_s20 = sshll.u32 %s7218_s25, 2  ;;  %s7218_s25 = sphi %s10103_s25, %s4833_s25  }
 0x57c   : >> { %s4885_s22 = scalar_lea.vmem [#allocation7], %s6775_s20  ;;  %s4833_s25 = sadd.s32 1, %s7218_s25  }
 0x57d   : >> { %s4835_s1 = scalar_lea.vmem [#allocation6], %s4834_s19  ;;  %p4830_p1 = scmp.ge.s32.totalorder %s4833_s25, 4  }
 0x57e   : > { %v6807_v26 = vld [vmem:[%s11430_s10 + $0x178] sm:$0xff] (%p4830_p1)  ;;  %v6806_v23 = vld [vmem:[%s11430_s10 + $0x170] sm:$0xff] (%p4830_p1)  ;;  %v6805_v59 = vld [vmem:[%s11430_s10 + $0x168] sm:$0xff] (%p4830_p1)  ;;  %vm5099_vm8 = vcmask (%p4830_p1), 1046534   ;;  %vm5093_vm9 = vcmask (%p4830_p1), 1042434   ;;  %vm5095_vm11 = vcmask (%p4830_p1), 1041408   ;;  %s5931_s0 = scalar_lea.hbm (%p4830_p1), %s11438_s18, %s7353_s2 }
 0x57f   : > { %v6823_v2 = vld [vmem:[%s11430_s10 + $0x1f8] sm:$0xff] (%p4830_p1)  ;;  %4989 = vmatpush.msra.mxu2 (%p4830_p1), %v6807_v26  ;;  %v6822_v21 = vld [vmem:[%s11430_s10 + $0x1f0] sm:$0xff] (%p4830_p1)  ;;  %v6821_v25 = vld [vmem:[%s11430_s10 + $0x1e8] sm:$0xff] (%p4830_p1)  ;;  %vm5097_vm3 = vcmask (%p4830_p1), 1044484   ;;  %vm5101_vm15 = vcmask (%p4830_p1), 1045508   ;;  %vm5109_vm1 = vcmp.lt.s32.totalorder (%p4830_p1), %v1773_v14, 128 }
 0x580   : > { %5033 = vmatpush.msra.mxu3 (%p4830_p1), %v6823_v2  ;;  %v6791_v37 = vld [vmem:[%s11430_s10 + $0xf8] sm:$0xff] (%p4830_p1)  ;;  %v6790_v47 = vld [vmem:[%s11430_s10 + $0xf0] sm:$0xff] (%p4830_p1)  ;;  %v6789_v18 = vld [vmem:[%s11430_s10 + $0xe8] sm:$0xff] (%p4830_p1)  ;;  %vm5103_vm2 = vcmask (%p4830_p1), 1043456   ;;  %vm5877_vm4 = vcmask (%p4830_p1), 8192   ;;  %s7225_s20 = smov (%p4830_p1), 126  }
 0x581   : >> { %v4837_v34 = vld [vmem:[%s4835_s1 + $0x8] sm:$0x3]  ;;  %v6772_v52 = vld [vmem:[%s4835_s1 + $0x12] sm:$0x3]  ;;  %v4836_v57 = vld [vmem:[%s4835_s1] sm:$0xff]  ;;  %4990 = vmatpush.msra.mxu2 (%p4830_p1), %v6806_v23  ;;  %vm5907_vm14 = vcmask (%p4830_p1), 24576  }
 0x582   : >> { %v4845_v32 = vmax.f32 %v4837_v34, %v6772_v52  ;;  %v6771_v24 = vld [vmem:[%s4835_s1 + $0xa] sm:$0xff]  ;;  %5034 = vmatpush.msra.mxu3 (%p4830_p1), %v6822_v21  ;;  %v6804_v50 = vld [vmem:[%s11430_s10 + $0x160] sm:$0xff] (%p4830_p1)  ;;  %v6803_v0 = vld [vmem:[%s11430_s10 + $0x158] sm:$0xff] (%p4830_p1)  ;;  %s11573_s27 = scalar_lea.vmem (%p4830_p1), [#allocation9], %s7383_s30  ;;  %vm5912_vm5 = vcmask (%p4830_p1), 73728   ;;  %s11574_s24 = scalar_lea.vmem (%p4830_p1), [#allocation13], %s7383_s30 }
 0x583   : >> { %v4844_v11 = vmax.f32 %v4836_v57, %v6771_v24  ;;  %v4903_v16 = vld [vmem:[%s11430_s10 + $0x70] sm:$0xff] (%p4830_p1)  ;;  %v4902_v56 = vld [vmem:[%s11430_s10 + $0x68] sm:$0xff] (%p4830_p1)  ;;  %v6820_v35 = vld [vmem:[%s11430_s10 + $0x1e0] sm:$0xff] (%p4830_p1)  ;;  %4991 = vmatpush.msra.mxu2 (%p4830_p1), %v6805_v59  ;;  %s11575_s28 = smov (%p4830_p1), %s11573_s27  ;;  %s5935_s23 = sshll.u32 (%p4830_p1), %s5931_s0, 4  ;;  %s5936_s23 = int_to_ptr.hbm [resolvable:$true] %s5935_s23 }
 0x584   : >> { %v4850_v60 = vrot.slane %v4845_v32, 1  ;;  %5035 = vmatpush.msra.mxu3 (%p4830_p1), %v6821_v25  ;;  %v6788_v9 = vld [vmem:[%s11430_s10 + $0xe0] sm:$0xff] (%p4830_p1)  ;;  %v6819_v29 = vld [vmem:[%s11430_s10 + $0x1d8] sm:$0xff] (%p4830_p1)  ;;  %v6802_v39 = vld [vmem:[%s11430_s10 + $0x150] sm:$0xff] (%p4830_p1)  ;;  %s5933_s26 = sshll.u32 (%p4830_p1), %s11575_s28, 4  ;;  %s5915_s25 = scalar_lea.sflag (%p4830_p1), [#allocation10], %s7383_s30  ;;  %s5934_s26 = int_to_ptr.vmem [resolvable:$true] %s5933_s26 }
 0x585   : >> { %v4849_v10 = vrot.slane %v4844_v11, 1  ;;  %v4901_v3 = vld [vmem:[%s11430_s10 + $0x60] sm:$0xff] (%p4830_p1)  ;;  %4992 = vmatpush.msra.mxu2 (%p4830_p1), %v6804_v50  ;;  %v6787_v6 = vld [vmem:[%s11430_s10 + $0xd8] sm:$0xff] (%p4830_p1)  ;;  %v6818_v49 = vld [vmem:[%s11430_s10 + $0x1d0] sm:$0xff] (%p4830_p1)  ;;  %s7070_s19 = sshra.s32 (%p4830_p1), %s5936_s23, 4  ;;  %s7071_s19 = int_to_ptr.hbm [resolvable:$true] %s7070_s19 }
 0x586   : >> { %v4855_v61 = vmax.f32 %v4845_v32, %v4850_v60  ;;  %5036 = vmatpush.msra.mxu3 (%p4830_p1), %v6820_v35  ;;  %v4900_v31 = vld [vmem:[%s11430_s10 + $0x58] sm:$0xff] (%p4830_p1)  ;;  %v6786_v17 = vld [vmem:[%s11430_s10 + $0xd0] sm:$0xff] (%p4830_p1)  ;;  %v6801_v58 = vld [vmem:[%s11430_s10 + $0x148] sm:$0xff] (%p4830_p1)  ;;  %s7072_s1 = scalar_lea.hbm (%p4830_p1), %s7071_s19, 1  ;;  %p7077_p7 = scmp.lt.s32.totalorder (%p4830_p1), %s7071_s19, %s11438_s18 }
 0x587   : >> { %v4851_v22 = vsel %vm2334_vm12, %v4849_v10, %v4850_v60  ;;  %4993 = vmatpush.msra.mxu2 (%p4830_p1), %v6803_v0  ;;  %v4899_v40 = vld [vmem:[%s11430_s10 + $0x50] sm:$0xff] (%p4830_p1)  ;;  %v6817_v42 = vld [vmem:[%s11430_s10 + $0x1c8] sm:$0xff] (%p4830_p1)  ;;  %v6800_v33 = vld [vmem:[%s11430_s10 + $0x140] sm:$0xff] (%p4830_p1)  ;;  %p7073_p2 = scmp.ne.s32.totalorder (%p4830_p1), %s7071_s19, %s7072_s1 }
 0x588   : >> { %6773 = vmatpush.msk.msra.mxu0 %vm4860_vm7, %v4855_v61  ;;  %v4854_v5 = vmax.f32 %v4844_v11, %v4851_v22  ;;  %5037 = vmatpush.msra.mxu3 (%p4830_p1), %v6819_v29  ;;  %v6785_v48 = vld [vmem:[%s11430_s10 + $0xc8] sm:$0xff] (%p4830_p1)  ;;  %v6816_v54 = vld [vmem:[%s11430_s10 + $0x1c0] sm:$0xff] (%p4830_p1)  ;;  %v6799_v38 = vld [vmem:[%s11430_s10 + $0x138] sm:$0xff] (%p4830_p1) }
 0x589   : > { %4994 = vmatpush.msra.mxu2 (%p4830_p1), %v6802_v39  ;;  %v4898_v1 = vld [vmem:[%s11430_s10 + $0x48] sm:$0xff] (%p4830_p1)  ;;  %v6784_v8 = vld [vmem:[%s11430_s10 + $0xc0] sm:$0xff] (%p4830_p1)  ;;  %v6815_v63 = vld [vmem:[%s11430_s10 + $0x1b8] sm:$0xff] (%p4830_p1)  ;;  %p7074_p3 = pnand (%p4830_p1), %p7073_p2, %p7372_p5 }
 0x58a   : >> { %4879 = vmatpush.msra.mxu0 %v4854_v5  ;;  %5038 = vmatpush.msra.mxu3 (%p4830_p1), %v6818_v49  ;;  %v4897_v55 = vld [vmem:[%s11430_s10 + $0x40] sm:$0xff] (%p4830_p1)  ;;  %v6783_v19 = vld [vmem:[%s11430_s10 + $0xb8] sm:$0xff] (%p4830_p1)  ;;  %v6798_v30 = vld [vmem:[%s11430_s10 + $0x130] sm:$0xff] (%p4830_p1) }
 0x58b   : >> { %6774 = vmatmul.msk.f32.vlgmr.msra.gmra.mxu0 %vm4856_vm0, %v8215_v28  ;;  %v4904_v28 = vld [vmem:[%s11430_s10 + $0x78] sm:$0xff] (%p4830_p1)  ;;  %4995 = vmatpush.msra.mxu2 (%p4830_p1), %v6801_v58  ;;  %v6814_v62 = vld [vmem:[%s11430_s10 + $0x1b0] sm:$0xff] (%p4830_p1)  ;;  %v6797_v7 = vld [vmem:[%s11430_s10 + $0x128] sm:$0xff] (%p4830_p1)  ;;  %p7075_p4 = pneg (%p4830_p1), %p7074_p3 }
 0x58c   : > { %4924 = vmatpush.msra.mxu0 (%p4830_p1), %v6791_v37  ;;  %4947 = vmatpush.msra.mxu1 (%p4830_p1), %v4904_v28  ;;  %v4896_v44 = vld [vmem:[%s11430_s10 + $0x38] sm:$0xff] (%p4830_p1)  ;;  %v6782_v20 = vld [vmem:[%s11430_s10 + $0xb0] sm:$0xff] (%p4830_p1)  ;;  %v6813_v36 = vld [vmem:[%s11430_s10 + $0x1a8] sm:$0xff] (%p4830_p1) }
 0x58d   : > { %5039 = vmatpush.msra.mxu3 (%p4830_p1), %v6817_v42  ;;  %4996 = vmatpush.msra.mxu2 (%p4830_p1), %v6800_v33  ;;  %v4895_v51 = vld [vmem:[%s11430_s10 + $0x30] sm:$0xff] (%p4830_p1)  ;;  %v6781_v13 = vld [vmem:[%s11430_s10 + $0xa8] sm:$0xff] (%p4830_p1)  ;;  %v6796_v43 = vld [vmem:[%s11430_s10 + $0x120] sm:$0xff] (%p4830_p1) }
 0x58e   : > { %4925 = vmatpush.msra.mxu0 (%p4830_p1), %v6790_v47  ;;  %4948 = vmatpush.msra.mxu1 (%p4830_p1), %v4903_v16  ;;  %v4894_v46 = vld [vmem:[%s11430_s10 + $0x28] sm:$0xff] (%p4830_p1)  ;;  %v6812_v15 = vld [vmem:[%s11430_s10 + $0x1a0] sm:$0xff] (%p4830_p1)  ;;  %v6795_v53 = vld [vmem:[%s11430_s10 + $0x118] sm:$0xff] (%p4830_p1) }
 0x58f   : > { %5040 = vmatpush.msra.mxu3 (%p4830_p1), %v6816_v54  ;;  %4997 = vmatpush.msra.mxu2 (%p4830_p1), %v6799_v38  ;;  %v6780_v27 = vld [vmem:[%s11430_s10 + $0xa0] sm:$0xff] (%p4830_p1)  ;;  %v6811_v4 = vld [vmem:[%s11430_s10 + $0x198] sm:$0xff] (%p4830_p1)  ;;  %v6794_v52 = vld [vmem:[%s11430_s10 + $0x110] sm:$0xff] (%p4830_p1) }
 0x590   : > { %4926 = vmatpush.msra.mxu0 (%p4830_p1), %v6789_v18  ;;  %4949 = vmatpush.msra.mxu1 (%p4830_p1), %v4902_v56  ;;  %v4893_v41 = vld [vmem:[%s11430_s10 + $0x20] sm:$0xff] (%p4830_p1)  ;;  %v6779_v12 = vld [vmem:[%s11430_s10 + $0x98] sm:$0xff] (%p4830_p1)  ;;  %v6810_v57 = vld [vmem:[%s11430_s10 + $0x190] sm:$0xff] (%p4830_p1) }
 0x591   : > { %5041 = vmatpush.msra.mxu3 (%p4830_p1), %v6815_v63  ;;  %4998 = vmatpush.msra.mxu2 (%p4830_p1), %v6798_v30  ;;  %v4892_v34 = vld [vmem:[%s11430_s10 + $0x18] sm:$0xff] (%p4830_p1)  ;;  %v6778_v32 = vld [vmem:[%s11430_s10 + $0x90] sm:$0xff] (%p4830_p1)  ;;  %v6793_v11 = vld [vmem:[%s11430_s10 + $0x108] sm:$0xff] (%p4830_p1) }
 0x592   : > { %4927 = vmatpush.msra.mxu0 (%p4830_p1), %v6788_v9  ;;  %4950 = vmatpush.msra.mxu1 (%p4830_p1), %v4901_v3  ;;  %v4891_v24 = vld [vmem:[%s11430_s10 + $0x10] sm:$0xff] (%p4830_p1)  ;;  %v6809_v60 = vld [vmem:[%s11430_s10 + $0x188] sm:$0xff] (%p4830_p1)  ;;  %v6792_v22 = vld [vmem:[%s11430_s10 + $0x100] sm:$0xff] (%p4830_p1) }
 0x593   : > { %5042 = vmatpush.msra.mxu3 (%p4830_p1), %v6814_v62  ;;  %4999 = vmatpush.msra.mxu2 (%p4830_p1), %v6797_v7  ;;  %v6777_v10 = vld [vmem:[%s11430_s10 + $0x88] sm:$0xff] (%p4830_p1)  ;;  %v6808_v5 = vld [vmem:[%s11430_s10 + $0x180] sm:$0xff] (%p4830_p1)  ;;  %v5144_v59 = vld [vmem:[%s11433_s13 + $0xf0] sm:$0xff] (%p4830_p1) }
 0x594   : > { %4928 = vmatpush.msra.mxu0 (%p4830_p1), %v6787_v6  ;;  %4951 = vmatpush.msra.mxu1 (%p4830_p1), %v4900_v31  ;;  %v4890_v61 = vld [vmem:[%s11430_s10 + $0x8] sm:$0xff] (%p4830_p1)  ;;  %v6776_v23 = vld [vmem:[%s11430_s10 + $0x80] sm:$0xff] (%p4830_p1)  ;;  %v5176_v21 = vld [vmem:[%s11433_s13 + $0x1f0] sm:$0xff] (%p4830_p1) }
 0x595   : > { %5043 = vmatpush.msra.mxu3 (%p4830_p1), %v6813_v36  ;;  %5000 = vmatpush.msra.mxu2 (%p4830_p1), %v6796_v43  ;;  %v4889_v2 = vld [vmem:[%s11430_s10] sm:$0xff] (%p4830_p1)  ;;  %v5208_v47 = vld [vmem:[%s11433_s13 + $0x2f0] sm:$0xff] (%p4830_p1) }
 0x596   : > { %4929 = vmatpush.msra.mxu0 (%p4830_p1), %v6786_v17  ;;  %4952 = vmatpush.msra.mxu1 (%p4830_p1), %v4899_v40  ;;  %v5240_v16 = vld [vmem:[%s11433_s13 + $0x3f0] sm:$0xff] (%p4830_p1)  ;;  %v5142_v25 = vld [vmem:[%s11433_s13 + $0xe0] sm:$0xff] (%p4830_p1) }
 0x597   : > { %5044 = vmatpush.msra.mxu3 (%p4830_p1), %v6812_v15  ;;  %5001 = vmatpush.msra.mxu2 (%p4830_p1), %v6795_v53  ;;  %v5174_v18 = vld [vmem:[%s11433_s13 + $0x1e0] sm:$0xff] (%p4830_p1)  ;;  %v5140_v35 = vld [vmem:[%s11433_s13 + $0xd0] sm:$0xff] (%p4830_p1) }
 0x598   : > { %4930 = vmatpush.msra.mxu0 (%p4830_p1), %v6785_v48  ;;  %4953 = vmatpush.msra.mxu1 (%p4830_p1), %v4898_v1  ;;  %v5206_v50 = vld [vmem:[%s11433_s13 + $0x2e0] sm:$0xff] (%p4830_p1)  ;;  %v5172_v9 = vld [vmem:[%s11433_s13 + $0x1d0] sm:$0xff] (%p4830_p1) }
 0x599   : > { %5045 = vmatpush.msra.mxu3 (%p4830_p1), %v6811_v4  ;;  %5002 = vmatpush.msra.mxu2 (%p4830_p1), %v6794_v52  ;;  %v5238_v56 = vld [vmem:[%s11433_s13 + $0x3e0] sm:$0xff] (%p4830_p1)  ;;  %v5204_v29 = vld [vmem:[%s11433_s13 + $0x2d0] sm:$0xff] (%p4830_p1) }
 0x59a   : > { %4931 = vmatpush.msra.mxu0 (%p4830_p1), %v6784_v8  ;;  %4954 = vmatpush.msra.mxu1 (%p4830_p1), %v4897_v55  ;;  %v5236_v6 = vld [vmem:[%s11433_s13 + $0x3d0] sm:$0xff] (%p4830_p1)  ;;  %v5138_v49 = vld [vmem:[%s11433_s13 + $0xc0] sm:$0xff] (%p4830_p1) }
 0x59b   : > { %5046 = vmatpush.msra.mxu3 (%p4830_p1), %v6810_v57  ;;  %5003 = vmatpush.msra.mxu2 (%p4830_p1), %v6793_v11  ;;  %v5170_v17 = vld [vmem:[%s11433_s13 + $0x1c0] sm:$0xff] (%p4830_p1)  ;;  %v5136_v42 = vld [vmem:[%s11433_s13 + $0xb0] sm:$0xff] (%p4830_p1) }
 0x59c   : > { %4932 = vmatpush.msra.mxu0 (%p4830_p1), %v6783_v19  ;;  %4955 = vmatpush.msra.mxu1 (%p4830_p1), %v4896_v44  ;;  %v5202_v40 = vld [vmem:[%s11433_s13 + $0x2c0] sm:$0xff] (%p4830_p1)  ;;  %v5168_v48 = vld [vmem:[%s11433_s13 + $0x1b0] sm:$0xff] (%p4830_p1) }
 0x59d   : > { %5047 = vmatpush.msra.mxu3 (%p4830_p1), %v6809_v60  ;;  %5004 = vmatpush.msra.mxu2 (%p4830_p1), %v6792_v22  ;;  %v5234_v58 = vld [vmem:[%s11433_s13 + $0x3c0] sm:$0xff] (%p4830_p1)  ;;  %v5200_v1 = vld [vmem:[%s11433_s13 + $0x2b0] sm:$0xff] (%p4830_p1) }
 0x59e   : > { %4933 = vmatpush.msra.mxu0 (%p4830_p1), %v6782_v20  ;;  %4956 = vmatpush.msra.mxu1 (%p4830_p1), %v4895_v51  ;;  %v5232_v33 = vld [vmem:[%s11433_s13 + $0x3b0] sm:$0xff] (%p4830_p1)  ;;  %v5134_v54 = vld [vmem:[%s11433_s13 + $0xa0] sm:$0xff] (%p4830_p1) }
 0x59f   : > { %5048 = vmatpush.msra.mxu3 (%p4830_p1), %v6808_v5  ;;  %5468 = vmatpush.msrb.mxu2 (%p4830_p1), %v5208_v47  ;;  %v5166_v8 = vld [vmem:[%s11433_s13 + $0x1a0] sm:$0xff] (%p4830_p1)  ;;  %v5132_v63 = vld [vmem:[%s11433_s13 + $0x90] sm:$0xff] (%p4830_p1) }
 0x5a0   : > { %4934 = vmatpush.msra.mxu0 (%p4830_p1), %v6781_v13  ;;  %4957 = vmatpush.msra.mxu1 (%p4830_p1), %v4894_v46  ;;  %v5198_v55 = vld [vmem:[%s11433_s13 + $0x2a0] sm:$0xff] (%p4830_p1)  ;;  %v5164_v19 = vld [vmem:[%s11433_s13 + $0x190] sm:$0xff] (%p4830_p1) }
 0x5a1   : > { %5488 = vmatpush.msrb.mxu3 (%p4830_p1), %v5240_v16  ;;  %5469 = vmatpush.msrb.mxu2 (%p4830_p1), %v5206_v50  ;;  %v5230_v38 = vld [vmem:[%s11433_s13 + $0x3a0] sm:$0xff] (%p4830_p1)  ;;  %v5196_v44 = vld [vmem:[%s11433_s13 + $0x290] sm:$0xff] (%p4830_p1) }
 0x5a2   : > { %4935 = vmatpush.msra.mxu0 (%p4830_p1), %v6780_v27  ;;  %4958 = vmatpush.msra.mxu1 (%p4830_p1), %v4893_v41  ;;  %v5228_v30 = vld [vmem:[%s11433_s13 + $0x390] sm:$0xff] (%p4830_p1)  ;;  %v5130_v62 = vld [vmem:[%s11433_s13 + $0x80] sm:$0xff] (%p4830_p1) }
 0x5a3   : > { %5489 = vmatpush.msrb.mxu3 (%p4830_p1), %v5238_v56  ;;  %5470 = vmatpush.msrb.mxu2 (%p4830_p1), %v5204_v29  ;;  %v5162_v20 = vld [vmem:[%s11433_s13 + $0x180] sm:$0xff] (%p4830_p1)  ;;  %v5128_v36 = vld [vmem:[%s11433_s13 + $0x70] sm:$0xff] (%p4830_p1) }
 0x5a4   : > { %4936 = vmatpush.msra.mxu0 (%p4830_p1), %v6779_v12  ;;  %4959 = vmatpush.msra.mxu1 (%p4830_p1), %v4892_v34  ;;  %v5194_v51 = vld [vmem:[%s11433_s13 + $0x280] sm:$0xff] (%p4830_p1)  ;;  %v5160_v13 = vld [vmem:[%s11433_s13 + $0x170] sm:$0xff] (%p4830_p1) }
 0x5a5   : > { %5490 = vmatpush.msrb.mxu3 (%p4830_p1), %v5236_v6  ;;  %5471 = vmatpush.msrb.mxu2 (%p4830_p1), %v5202_v40  ;;  %v5226_v7 = vld [vmem:[%s11433_s13 + $0x380] sm:$0xff] (%p4830_p1)  ;;  %v5192_v46 = vld [vmem:[%s11433_s13 + $0x270] sm:$0xff] (%p4830_p1) }
 0x5a6   : > { %4937 = vmatpush.msra.mxu0 (%p4830_p1), %v6778_v32  ;;  %4960 = vmatpush.msra.mxu1 (%p4830_p1), %v4891_v24  ;;  %v5224_v43 = vld [vmem:[%s11433_s13 + $0x370] sm:$0xff] (%p4830_p1)  ;;  %v5126_v15 = vld [vmem:[%s11433_s13 + $0x60] sm:$0xff] (%p4830_p1) }
 0x5a7   : > { %5491 = vmatpush.msrb.mxu3 (%p4830_p1), %v5234_v58  ;;  %5472 = vmatpush.msrb.mxu2 (%p4830_p1), %v5200_v1  ;;  %v5158_v27 = vld [vmem:[%s11433_s13 + $0x160] sm:$0xff] (%p4830_p1)  ;;  %v5124_v4 = vld [vmem:[%s11433_s13 + $0x50] sm:$0xff] (%p4830_p1) }
 0x5a8   : > { %4938 = vmatpush.msra.mxu0 (%p4830_p1), %v6777_v10  ;;  %4961 = vmatpush.msra.mxu1 (%p4830_p1), %v4890_v61  ;;  %v5190_v41 = vld [vmem:[%s11433_s13 + $0x260] sm:$0xff] (%p4830_p1)  ;;  %v5156_v12 = vld [vmem:[%s11433_s13 + $0x150] sm:$0xff] (%p4830_p1) }
 0x5a9   : > { %5492 = vmatpush.msrb.mxu3 (%p4830_p1), %v5232_v33  ;;  %5473 = vmatpush.msrb.mxu2 (%p4830_p1), %v5198_v55  ;;  %v5222_v53 = vld [vmem:[%s11433_s13 + $0x360] sm:$0xff] (%p4830_p1)  ;;  %v5188_v34 = vld [vmem:[%s11433_s13 + $0x250] sm:$0xff] (%p4830_p1) }
 0x5aa   : > { %4939 = vmatpush.msra.mxu0 (%p4830_p1), %v6776_v23  ;;  %4962 = vmatpush.msra.mxu1 (%p4830_p1), %v4889_v2  ;;  %v5220_v52 = vld [vmem:[%s11433_s13 + $0x350] sm:$0xff] (%p4830_p1)  ;;  %v5122_v57 = vld [vmem:[%s11433_s13 + $0x40] sm:$0xff] (%p4830_p1) }
 0x5ab   : > { %5493 = vmatpush.msrb.mxu3 (%p4830_p1), %v5230_v38  ;;  %5474 = vmatpush.msrb.mxu2 (%p4830_p1), %v5196_v44  ;;  %v5154_v32 = vld [vmem:[%s11433_s13 + $0x140] sm:$0xff] (%p4830_p1)  ;;  %v5120_v60 = vld [vmem:[%s11433_s13 + $0x30] sm:$0xff] (%p4830_p1) }
 0x5ac   : > { %5428 = vmatpush.msrb.mxu0 (%p4830_p1), %v5144_v59  ;;  %5448 = vmatpush.msrb.mxu1 (%p4830_p1), %v5176_v21  ;;  %v5186_v24 = vld [vmem:[%s11433_s13 + $0x240] sm:$0xff] (%p4830_p1)  ;;  %v5152_v10 = vld [vmem:[%s11433_s13 + $0x130] sm:$0xff] (%p4830_p1) }
 0x5ad   : > { %5494 = vmatpush.msrb.mxu3 (%p4830_p1), %v5228_v30  ;;  %5475 = vmatpush.msrb.mxu2 (%p4830_p1), %v5194_v51  ;;  %v5218_v11 = vld [vmem:[%s11433_s13 + $0x340] sm:$0xff] (%p4830_p1)  ;;  %v5184_v61 = vld [vmem:[%s11433_s13 + $0x230] sm:$0xff] (%p4830_p1) }
 0x5ae   : > { %5429 = vmatpush.msrb.mxu0 (%p4830_p1), %v5142_v25  ;;  %5449 = vmatpush.msrb.mxu1 (%p4830_p1), %v5174_v18  ;;  %v5216_v22 = vld [vmem:[%s11433_s13 + $0x330] sm:$0xff] (%p4830_p1)  ;;  %v5118_v5 = vld [vmem:[%s11433_s13 + $0x20] sm:$0xff] (%p4830_p1) }
 0x5af   : > { %5495 = vmatpush.msrb.mxu3 (%p4830_p1), %v5226_v7  ;;  %5476 = vmatpush.msrb.mxu2 (%p4830_p1), %v5192_v46  ;;  %v5214_v23 = vld [vmem:[%s11433_s13 + $0x320] sm:$0xff] (%p4830_p1)  ;;  %v5116_v2 = vld [vmem:[%s11433_s13 + $0x10] sm:$0xff] (%p4830_p1) }
 0x5b0   : > { %5430 = vmatpush.msrb.mxu0 (%p4830_p1), %v5140_v35  ;;  %5450 = vmatpush.msrb.mxu1 (%p4830_p1), %v5172_v9  ;;  %v5212_v59 = vld [vmem:[%s11433_s13 + $0x310] sm:$0xff] (%p4830_p1)  ;;  %v5114_v21 = vld [vmem:[%s11433_s13] sm:$0xff] (%p4830_p1) }
 0x5b1   : > { %5496 = vmatpush.msrb.mxu3 (%p4830_p1), %v5224_v43  ;;  %5477 = vmatpush.msrb.mxu2 (%p4830_p1), %v5190_v41  ;;  %v5146_v47 = vld [vmem:[%s11433_s13 + $0x100] sm:$0xff] (%p4830_p1)  ;;  %v5272_v18 = vld [vmem:[%s11433_s13 + $0x4f0] sm:$0xff] (%p4830_p1) }
 0x5b2   : > { %5431 = vmatpush.msrb.mxu0 (%p4830_p1), %v5138_v49  ;;  %5451 = vmatpush.msrb.mxu1 (%p4830_p1), %v5170_v17  ;;  %v5178_v16 = vld [vmem:[%s11433_s13 + $0x200] sm:$0xff] (%p4830_p1)  ;;  %v5304_v50 = vld [vmem:[%s11433_s13 + $0x5f0] sm:$0xff] (%p4830_p1) }
 0x5b3   : > { %5497 = vmatpush.msrb.mxu3 (%p4830_p1), %v5222_v53  ;;  %5478 = vmatpush.msrb.mxu2 (%p4830_p1), %v5188_v34  ;;  %v5210_v25 = vld [vmem:[%s11433_s13 + $0x300] sm:$0xff] (%p4830_p1)  ;;  %v5336_v56 = vld [vmem:[%s11433_s13 + $0x6f0] sm:$0xff] (%p4830_p1) }
 0x5b4   : > { %5432 = vmatpush.msrb.mxu0 (%p4830_p1), %v5136_v42  ;;  %5452 = vmatpush.msrb.mxu1 (%p4830_p1), %v5168_v48  ;;  %v5368_v35 = vld [vmem:[%s11433_s13 + $0x7f0] sm:$0xff] (%p4830_p1)  ;;  %v5270_v9 = vld [vmem:[%s11433_s13 + $0x4e0] sm:$0xff] (%p4830_p1) }
 0x5b5   : > { %5498 = vmatpush.msrb.mxu3 (%p4830_p1), %v5220_v52  ;;  %5479 = vmatpush.msrb.mxu2 (%p4830_p1), %v5186_v24  ;;  %v5366_v29 = vld [vmem:[%s11433_s13 + $0x7e0] sm:$0xff] (%p4830_p1)  ;;  %v5268_v6 = vld [vmem:[%s11433_s13 + $0x4d0] sm:$0xff] (%p4830_p1) }
 0x5b6   : > { %5433 = vmatpush.msrb.mxu0 (%p4830_p1), %v5134_v54  ;;  %5453 = vmatpush.msrb.mxu1 (%p4830_p1), %v5166_v8  ;;  %v5364_v49 = vld [vmem:[%s11433_s13 + $0x7d0] sm:$0xff] (%p4830_p1)  ;;  %v5266_v17 = vld [vmem:[%s11433_s13 + $0x4c0] sm:$0xff] (%p4830_p1) }
 0x5b7   : > { %5499 = vmatpush.msrb.mxu3 (%p4830_p1), %v5218_v11  ;;  %5480 = vmatpush.msrb.mxu2 (%p4830_p1), %v5184_v61  ;;  %v5298_v40 = vld [vmem:[%s11433_s13 + $0x5c0] sm:$0xff] (%p4830_p1)  ;;  %v5264_v48 = vld [vmem:[%s11433_s13 + $0x4b0] sm:$0xff] (%p4830_p1) }
 0x5b8   : > { %5434 = vmatpush.msrb.mxu0 (%p4830_p1), %v5132_v63  ;;  %5454 = vmatpush.msrb.mxu1 (%p4830_p1), %v5164_v19  ;;  %v5330_v58 = vld [vmem:[%s11433_s13 + $0x6c0] sm:$0xff] (%p4830_p1)  ;;  %v5296_v1 = vld [vmem:[%s11433_s13 + $0x5b0] sm:$0xff] (%p4830_p1) }
 0x5b9   : > { %5500 = vmatpush.msrb.mxu3 (%p4830_p1), %v5216_v22  ;;  %v5362_v42 = vld [vmem:[%s11433_s13 + $0x7c0] sm:$0xff] (%p4830_p1)  ;;  %v5328_v33 = vld [vmem:[%s11433_s13 + $0x6b0] sm:$0xff] (%p4830_p1) }
 0x5ba   : > { %5435 = vmatpush.msrb.mxu0 (%p4830_p1), %v5130_v62  ;;  %5455 = vmatpush.msrb.mxu1 (%p4830_p1), %v5162_v20  ;;  %v5360_v54 = vld [vmem:[%s11433_s13 + $0x7b0] sm:$0xff] (%p4830_p1)  ;;  %v5262_v8 = vld [vmem:[%s11433_s13 + $0x4a0] sm:$0xff] (%p4830_p1) }
 0x5bb   : > { %5501 = vmatpush.msrb.mxu3 (%p4830_p1), %v5214_v23  ;;  %v5294_v55 = vld [vmem:[%s11433_s13 + $0x5a0] sm:$0xff] (%p4830_p1)  ;;  %v5260_v19 = vld [vmem:[%s11433_s13 + $0x490] sm:$0xff] (%p4830_p1) }
 0x5bc   : > { %5436 = vmatpush.msrb.mxu0 (%p4830_p1), %v5128_v36  ;;  %5456 = vmatpush.msrb.mxu1 (%p4830_p1), %v5160_v13  ;;  %v5326_v38 = vld [vmem:[%s11433_s13 + $0x6a0] sm:$0xff] (%p4830_p1)  ;;  %v5292_v44 = vld [vmem:[%s11433_s13 + $0x590] sm:$0xff] (%p4830_p1) }
 0x5bd   : > { %5502 = vmatpush.msrb.mxu3 (%p4830_p1), %v5212_v59  ;;  %v5358_v63 = vld [vmem:[%s11433_s13 + $0x7a0] sm:$0xff] (%p4830_p1)  ;;  %v5324_v30 = vld [vmem:[%s11433_s13 + $0x690] sm:$0xff] (%p4830_p1) }
 0x5be   : > { %5437 = vmatpush.msrb.mxu0 (%p4830_p1), %v5126_v15  ;;  %5457 = vmatpush.msrb.mxu1 (%p4830_p1), %v5158_v27  ;;  %v5356_v62 = vld [vmem:[%s11433_s13 + $0x790] sm:$0xff] (%p4830_p1)  ;;  %v5258_v20 = vld [vmem:[%s11433_s13 + $0x480] sm:$0xff] (%p4830_p1) }
 0x5bf   : > { %5503 = vmatpush.msrb.mxu3 (%p4830_p1), %v5210_v25  ;;  %v5290_v51 = vld [vmem:[%s11433_s13 + $0x580] sm:$0xff] (%p4830_p1)  ;;  %v5256_v13 = vld [vmem:[%s11433_s13 + $0x470] sm:$0xff] (%p4830_p1) }
 0x5c0   : > { %5438 = vmatpush.msrb.mxu0 (%p4830_p1), %v5124_v4  ;;  %5458 = vmatpush.msrb.mxu1 (%p4830_p1), %v5156_v12  ;;  %v5322_v7 = vld [vmem:[%s11433_s13 + $0x680] sm:$0xff] (%p4830_p1)  ;;  %v5288_v46 = vld [vmem:[%s11433_s13 + $0x570] sm:$0xff] (%p4830_p1) }
 0x5c1   : > { %v5354_v36 = vld [vmem:[%s11433_s13 + $0x780] sm:$0xff] (%p4830_p1)  ;;  %v5320_v43 = vld [vmem:[%s11433_s13 + $0x670] sm:$0xff] (%p4830_p1) }
 0x5c2   : > { %5439 = vmatpush.msrb.mxu0 (%p4830_p1), %v5122_v57  ;;  %5459 = vmatpush.msrb.mxu1 (%p4830_p1), %v5154_v32  ;;  %v5352_v15 = vld [vmem:[%s11433_s13 + $0x770] sm:$0xff] (%p4830_p1)  ;;  %v5254_v27 = vld [vmem:[%s11433_s13 + $0x460] sm:$0xff] (%p4830_p1) }
 0x5c3   : > { %v5286_v41 = vld [vmem:[%s11433_s13 + $0x560] sm:$0xff] (%p4830_p1)  ;;  %v5252_v12 = vld [vmem:[%s11433_s13 + $0x450] sm:$0xff] (%p4830_p1) }
 0x5c4   : > { %5440 = vmatpush.msrb.mxu0 (%p4830_p1), %v5120_v60  ;;  %5460 = vmatpush.msrb.mxu1 (%p4830_p1), %v5152_v10  ;;  %v5318_v53 = vld [vmem:[%s11433_s13 + $0x660] sm:$0xff] (%p4830_p1)  ;;  %v5284_v34 = vld [vmem:[%s11433_s13 + $0x550] sm:$0xff] (%p4830_p1) }
 0x5c5   : > { %v5350_v4 = vld [vmem:[%s11433_s13 + $0x760] sm:$0xff] (%p4830_p1)  ;;  %v5316_v52 = vld [vmem:[%s11433_s13 + $0x650] sm:$0xff] (%p4830_p1) }
 0x5c6   : > { %5441 = vmatpush.msrb.mxu0 (%p4830_p1), %v5118_v5  ;;  %v5348_v57 = vld [vmem:[%s11433_s13 + $0x750] sm:$0xff] (%p4830_p1)  ;;  %v5250_v32 = vld [vmem:[%s11433_s13 + $0x440] sm:$0xff] (%p4830_p1) }
 0x5c7   : > { %v5282_v24 = vld [vmem:[%s11433_s13 + $0x540] sm:$0xff] (%p4830_p1)  ;;  %v5248_v10 = vld [vmem:[%s11433_s13 + $0x430] sm:$0xff] (%p4830_p1) }
 0x5c8   : > { %5442 = vmatpush.msrb.mxu0 (%p4830_p1), %v5116_v2  ;;  %v5314_v11 = vld [vmem:[%s11433_s13 + $0x640] sm:$0xff] (%p4830_p1)  ;;  %v5280_v61 = vld [vmem:[%s11433_s13 + $0x530] sm:$0xff] (%p4830_p1) }
 0x5c9   : > { %v5346_v60 = vld [vmem:[%s11433_s13 + $0x740] sm:$0xff] (%p4830_p1)  ;;  %v5312_v22 = vld [vmem:[%s11433_s13 + $0x630] sm:$0xff] (%p4830_p1) }
 0x5ca   : > { %5443 = vmatpush.msrb.mxu0 (%p4830_p1), %v5114_v21  ;;  %v5344_v5 = vld [vmem:[%s11433_s13 + $0x730] sm:$0xff] (%p4830_p1)  ;;  %v5310_v23 = vld [vmem:[%s11433_s13 + $0x620] sm:$0xff] (%p4830_p1) }
 0x5cb   : > { %v5342_v2 = vld [vmem:[%s11433_s13 + $0x720] sm:$0xff] (%p4830_p1)  ;;  %v5308_v59 = vld [vmem:[%s11433_s13 + $0x610] sm:$0xff] (%p4830_p1) }
 0x5cc   : > { %v5340_v21 = vld [vmem:[%s11433_s13 + $0x710] sm:$0xff] (%p4830_p1)  ;;  %v5306_v25 = vld [vmem:[%s11433_s13 + $0x600] sm:$0xff] (%p4830_p1) }
 0x605   : > { %4832 = sbr.rel (!%p4830_p1) target bundleno = 1403 (0x57b), region = 296 }
 0x608   : >> { %v4881_v45 = vpop.f32.mrf.mxu0 }
 0x609   : >> { %4886 = vst [vmem:[%s4885_s22] sm:$0xf] %v4881_v45  ;;  %s7226_s22 = smov (%p4830_p1), 122  }
 0x610   : > { %v4970_v45 = vld [vmem:[#allocation7 + $0x4] sm:$0xff]  ;;  %v4971_v3 = vld [vmem:[#allocation7 + $0xc] sm:$0xf] }
 0x611   : > { %v5014_v26 = vld [vmem:[#allocation7 + $0x5] sm:$0xff]  ;;  %5005 = vmatmul.f32.vlgmr.msra.gmra.mxu2 %v4970_v45  ;;  %v5015_v0 = vld [vmem:[#allocation7 + $0xd] sm:$0xf] }
 0x612   : > { %v4905_v37 = vld [vmem:[#allocation7 + $0x1] sm:$0xff]  ;;  %5049 = vmatmul.f32.vlgmr.msra.gmra.mxu3 %v5014_v26  ;;  %v4906_v31 = vld [vmem:[#allocation7 + $0x9] sm:$0xf] }
 0x613   : > { %v4887_v28 = vld [vmem:[#allocation7] sm:$0xff]  ;;  %4940 = vmatmul.f32.vlgmr.msra.gmra.mxu0 %v4905_v37  ;;  %v4888_v39 = vld [vmem:[#allocation7 + $0x8] sm:$0xf]  ;;  %v5148_v37 = vld [vmem:[%s11433_s13 + $0x110] sm:$0xff]  ;;  %5568 = vmatpush.msra.mxu3 %v5368_v35 }
 0x614   : > { %4963 = vmatmul.f32.vlgmr.msra.gmra.mxu1 %v4887_v28  ;;  %v5150_v45 = vld [vmem:[%s11433_s13 + $0x120] sm:$0xff]  ;;  %v5180_v28 = vld [vmem:[%s11433_s13 + $0x210] sm:$0xff]  ;;  %5508 = vmatpush.msra.mxu0 %v5272_v18 }
 0x615   : > { %v5182_v26 = vld [vmem:[%s11433_s13 + $0x220] sm:$0xff]  ;;  %5461 = vmatpush.msrb.mxu1 %v5150_v45  ;;  %5569 = vmatpush.msra.mxu3 %v5366_v29 }
 0x616   : > { %5481 = vmatpush.msrb.mxu2 %v5182_v26  ;;  %5509 = vmatpush.msra.mxu0 %v5270_v9  ;;  %v5246_v45 = vld [vmem:[%s11433_s13 + $0x420] sm:$0xff] }
 0x617   : > { %5462 = vmatpush.msrb.mxu1 %v5148_v37  ;;  %5570 = vmatpush.msra.mxu3 %v5364_v49  ;;  %v5278_v26 = vld [vmem:[%s11433_s13 + $0x520] sm:$0xff]  ;;  %v5244_v37 = vld [vmem:[%s11433_s13 + $0x410] sm:$0xff] }
 0x618   : > { %5482 = vmatpush.msrb.mxu2 %v5180_v28  ;;  %5510 = vmatpush.msra.mxu0 %v5268_v6  ;;  %v5276_v28 = vld [vmem:[%s11433_s13 + $0x510] sm:$0xff]  ;;  %v5338_v18 = vld [vmem:[%s11433_s13 + $0x700] sm:$0xff] }
 0x619   : > { %5008 = vmatmul.f32.gmra.mxu2 %v4971_v3  ;;  %5463 = vmatpush.msrb.mxu1 %v5146_v47  ;;  %v5302_v3 = vld [vmem:[%s11433_s13 + $0x5e0] sm:$0xff] }
 0x61a   : > { %5052 = vmatmul.f32.gmra.mxu3 %v5015_v0  ;;  %5483 = vmatpush.msrb.mxu2 %v5178_v16  ;;  %v5334_v0 = vld [vmem:[%s11433_s13 + $0x6e0] sm:$0xff] }
 0x61b   : > { %4943 = vmatmul.f32.gmra.mxu0 %v4906_v31  ;;  %5528 = vmatpush.msra.mxu1 %v5304_v50  ;;  %v5300_v31 = vld [vmem:[%s11433_s13 + $0x5d0] sm:$0xff]  ;;  %v5242_v47 = vld [vmem:[%s11433_s13 + $0x400] sm:$0xff] }
 0x61c   : > { %4966 = vmatmul.f32.gmra.mxu1 %v4888_v39  ;;  %5548 = vmatpush.msra.mxu2 %v5336_v56  ;;  %v5332_v39 = vld [vmem:[%s11433_s13 + $0x6d0] sm:$0xff]  ;;  %v5274_v16 = vld [vmem:[%s11433_s13 + $0x500] sm:$0xff] }
 0x61d   : > { %5529 = vmatpush.msra.mxu1 %v5302_v3  ;;  %5511 = vmatpush.msra.mxu0 %v5266_v17  ;;  %v7049_v29 = vld [vmem:[%s11431_s11] ss:$0 sm:$0xff] }
 0x61e   : > { %5549 = vmatpush.msra.mxu2 %v5334_v0  ;;  %5571 = vmatpush.msra.mxu3 %v5362_v42  ;;  %v7050_v17 = vld [vmem:[%s11432_s12] ss:$0 sm:$0xff] }
 0x61f   : > { %5530 = vmatpush.msra.mxu1 %v5300_v31  ;;  %5512 = vmatpush.msra.mxu0 %v5264_v48 }
 0x620   : > { %5550 = vmatpush.msra.mxu2 %v5332_v39  ;;  %5572 = vmatpush.msra.mxu3 %v5360_v54 }
 0x621   : > { %5531 = vmatpush.msra.mxu1 %v5298_v40  ;;  %5513 = vmatpush.msra.mxu0 %v5262_v8 }
 0x622   : > { %5551 = vmatpush.msra.mxu2 %v5330_v58  ;;  %5573 = vmatpush.msra.mxu3 %v5358_v63 }
 0x623   : > { %5532 = vmatpush.msra.mxu1 %v5296_v1  ;;  %5514 = vmatpush.msra.mxu0 %v5260_v19 }
 0x624   : > { %5552 = vmatpush.msra.mxu2 %v5328_v33  ;;  %5574 = vmatpush.msra.mxu3 %v5356_v62 }
 0x625   : > { %5533 = vmatpush.msra.mxu1 %v5294_v55  ;;  %5515 = vmatpush.msra.mxu0 %v5258_v20 }
 0x626   : > { %5553 = vmatpush.msra.mxu2 %v5326_v38  ;;  %5575 = vmatpush.msra.mxu3 %v5354_v36 }
 0x627   : > { %5534 = vmatpush.msra.mxu1 %v5292_v44  ;;  %5516 = vmatpush.msra.mxu0 %v5256_v13 }
 0x628   : > { %5554 = vmatpush.msra.mxu2 %v5324_v30  ;;  %5576 = vmatpush.msra.mxu3 %v5352_v15 }
 0x629   : > { %5535 = vmatpush.msra.mxu1 %v5290_v51  ;;  %5517 = vmatpush.msra.mxu0 %v5254_v27 }
 0x62a   : > { %5555 = vmatpush.msra.mxu2 %v5322_v7  ;;  %5577 = vmatpush.msra.mxu3 %v5350_v4 }
 0x62b   : > { %5536 = vmatpush.msra.mxu1 %v5288_v46  ;;  %5518 = vmatpush.msra.mxu0 %v5252_v12 }
 0x62c   : > { %5556 = vmatpush.msra.mxu2 %v5320_v43  ;;  %5578 = vmatpush.msra.mxu3 %v5348_v57  ;;  %v5177_v57 = vld [vmem:[%s11433_s13 + $0x1f8] sm:$0xff] }
 0x62d   : > { %5537 = vmatpush.msra.mxu1 %v5286_v41  ;;  %5519 = vmatpush.msra.mxu0 %v5250_v32  ;;  %v5209_v32 = vld [vmem:[%s11433_s13 + $0x2f8] sm:$0xff] }
 0x62e   : > { %5557 = vmatpush.msra.mxu2 %v5318_v53  ;;  %5579 = vmatpush.msra.mxu3 %v5346_v60  ;;  %v5175_v60 = vld [vmem:[%s11433_s13 + $0x1e8] sm:$0xff] }
 0x62f   : > { %5538 = vmatpush.msra.mxu1 %v5284_v34  ;;  %5520 = vmatpush.msra.mxu0 %v5248_v10  ;;  %v5400_v34 = vld [vmem:[%s11433_s13 + $0x8f0] sm:$0xff]  ;;  %v5207_v10 = vld [vmem:[%s11433_s13 + $0x2e8] sm:$0xff] }
 0x630   : > { %5558 = vmatpush.msra.mxu2 %v5316_v52  ;;  %5580 = vmatpush.msra.mxu3 %v5344_v5  ;;  %v5145_v52 = vld [vmem:[%s11433_s13 + $0xf8] sm:$0xff] }
 0x631   : > { %5539 = vmatpush.msra.mxu1 %v5282_v24  ;;  %5521 = vmatpush.msra.mxu0 %v5246_v45  ;;  %v5398_v24 = vld [vmem:[%s11433_s13 + $0x8e0] sm:$0xff]  ;;  %v5173_v5 = vld [vmem:[%s11433_s13 + $0x1d8] sm:$0xff] }
 0x632   : > { %5559 = vmatpush.msra.mxu2 %v5314_v11  ;;  %5581 = vmatpush.msra.mxu3 %v5342_v2  ;;  %v5143_v11 = vld [vmem:[%s11433_s13 + $0xe8] sm:$0xff]  ;;  %v5205_v45 = vld [vmem:[%s11433_s13 + $0x2d8] sm:$0xff] }
 0x633   : > { %5540 = vmatpush.msra.mxu1 %v5280_v61  ;;  %5522 = vmatpush.msra.mxu0 %v5244_v37  ;;  %v5396_v61 = vld [vmem:[%s11433_s13 + $0x8d0] sm:$0xff]  ;;  %v5171_v2 = vld [vmem:[%s11433_s13 + $0x1c8] sm:$0xff] }
 0x634   : > { %5560 = vmatpush.msra.mxu2 %v5312_v22  ;;  %5582 = vmatpush.msra.mxu3 %v5340_v21  ;;  %v5141_v22 = vld [vmem:[%s11433_s13 + $0xd8] sm:$0xff]  ;;  %v5203_v37 = vld [vmem:[%s11433_s13 + $0x2c8] sm:$0xff] }
 0x635   : > { %5541 = vmatpush.msra.mxu1 %v5278_v26  ;;  %5523 = vmatpush.msra.mxu0 %v5242_v47  ;;  %v5394_v26 = vld [vmem:[%s11433_s13 + $0x8c0] sm:$0xff] }
 0x636   : > { %5561 = vmatpush.msra.mxu2 %v5310_v23  ;;  %5583 = vmatpush.msra.mxu3 %v5338_v18  ;;  %v5139_v23 = vld [vmem:[%s11433_s13 + $0xc8] sm:$0xff]  ;;  %v5169_v18 = vld [vmem:[%s11433_s13 + $0x1b8] sm:$0xff] }
 0x637   : > { %5542 = vmatpush.msra.mxu1 %v5276_v28 }
 0x638   : > { %5562 = vmatpush.msra.mxu2 %v5308_v59 }
 0x639   : > { %5543 = vmatpush.msra.mxu1 %v5274_v16  ;;  %v5392_v16 = vld [vmem:[%s11433_s13 + $0x8b0] sm:$0xff] }
 0x63a   : > { %5563 = vmatpush.msra.mxu2 %v5306_v25  ;;  %v5137_v25 = vld [vmem:[%s11433_s13 + $0xb8] sm:$0xff] }
 0x690   : > { %v4941_v50 = vpop.f32.mrf.mxu0 }
 0x691   : > { %v4964_v56 = vpop.f32.mrf.mxu1 }
 0x692   : > { %v4965_v35 = vadd.f32 %v4964_v56, %v4941_v50  ;;  %v5201_v50 = vld [vmem:[%s11433_s13 + $0x2b8] sm:$0xff]  ;;  %v5390_v56 = vld [vmem:[%s11433_s13 + $0x8a0] sm:$0xff] }
 0x694   : > { %v5006_v9 = vpop.f32.mrf.mxu2 }
 0x695   : > { %v5050_v3 = vpop.f32.mrf.mxu3  ;;  %v5012_v0 = vadd.f32 %v5006_v9, %v4965_v35  ;;  %v5135_v35 = vld [vmem:[%s11433_s13 + $0xa8] sm:$0xff] }
 0x696   : > { %v5167_v9 = vld [vmem:[%s11433_s13 + $0x1a8] sm:$0xff] }
 0x697   : > { %v5056_v6 = vadd.f32 %v5050_v3, %v5012_v0  ;;  %v5199_v3 = vld [vmem:[%s11433_s13 + $0x2a8] sm:$0xff]  ;;  %v5388_v0 = vld [vmem:[%s11433_s13 + $0x890] sm:$0xff] }
 0x698   : > { %v4944_v31 = vpop.f32.mrf.mxu0 }
 0x699   : > { %v4967_v39 = vpop.f32.mrf.mxu1  ;;  %v5062_v49 = vadd.f32 %v7049_v29, %v5056_v6  ;;  %v5165_v6 = vld [vmem:[%s11433_s13 + $0x198] sm:$0xff] }
 0x69a   : > { %v4968_v40 = vadd.f32 %v4967_v39, %v4944_v31  ;;  %v5197_v31 = vld [vmem:[%s11433_s13 + $0x298] sm:$0xff]  ;;  %v5386_v39 = vld [vmem:[%s11433_s13 + $0x880] sm:$0xff] }
 0x69b   : > { %v5070_v48 = vmul.f32 %v7050_v17, %v5062_v49  ;;  %vm5064_vm12 = vcmp.ge.f32.partialorder %v5062_v49, 0.0 }
 0x69c   : > { %v5009_v58 = vpop.f32.mrf.mxu2 }
 0x69d   : > { %v5053_v42 = vpop.f32.mrf.mxu3  ;;  %v5013_v1 = vadd.f32 %v5009_v58, %v4968_v40  ;;  %v5072_v54 = vsel %vm5064_vm12, %v5062_v49, %v5070_v48  ;;  %v5131_v49 = vld [vmem:[%s11433_s13 + $0x88] sm:$0xff]  ;;  %v5384_v58 = vld [vmem:[%s11433_s13 + $0x870] sm:$0xff]  ;;  %v5161_v48 = vld [vmem:[%s11433_s13 + $0x178] sm:$0xff] }
 0x69e   : > { %v6824_v38 = vrot.slane %v5072_v54, 11  ;;  %v6828_v63 = vrot.slane %v5072_v54, 4  ;;  %v6829_v19 = vrot.slane %v5072_v54, 7  ;;  %v6825_v44 = vrot.slane %v5072_v54, 6  ;;  %v5195_v40 = vld [vmem:[%s11433_s13 + $0x288] sm:$0xff] }
 0x69f   : > { %v5057_v33 = vadd.f32 %v5053_v42, %v5013_v1  ;;  %v6826_v62 = vrot.slane %v5072_v54, 9  ;;  %v5129_v42 = vld [vmem:[%s11433_s13 + $0x78] sm:$0xff] }
 0x6a0   : > { %v5092_v36 = vsel %vm4860_vm7, %v5072_v54, %v6824_v38  ;;  %v5100_v43 = vsel %vm5099_vm8, %v6828_v63, %v6829_v19  ;;  %v5193_v1 = vld [vmem:[%s11433_s13 + $0x278] sm:$0xff]  ;;  %v5127_v54 = vld [vmem:[%s11433_s13 + $0x68] sm:$0xff]  ;;  %v5380_v38 = vld [vmem:[%s11433_s13 + $0x850] sm:$0xff] }
 0x6a1   : > { %v5063_v8 = vadd.f32 %v7049_v29, %v5057_v33  ;;  %v5133_v29 = vld [vmem:[%s11433_s13 + $0x98] sm:$0xff]  ;;  %v5382_v33 = vld [vmem:[%s11433_s13 + $0x860] sm:$0xff] }
 0x6a2   : > { %v5125_v63 = vld [vmem:[%s11433_s13 + $0x58] sm:$0xff] }
 0x6a3   : > { %vm5065_vm13 = vcmp.ge.f32.partialorder %v5063_v8, 0.0  ;;  %v5071_v55 = vmul.f32 %v7050_v17, %v5063_v8  ;;  %v5163_v17 = vld [vmem:[%s11433_s13 + $0x188] sm:$0xff]  ;;  %v5157_v19 = vld [vmem:[%s11433_s13 + $0x158] sm:$0xff] }
 0x6a5   : > { %v5073_v30 = vsel %vm5065_vm13, %v5063_v8, %v5071_v55  ;;  %v5159_v8 = vld [vmem:[%s11433_s13 + $0x168] sm:$0xff] }
 0x6a6   : > { %v5082_v20 = vrot.slane %v5073_v30, 2  ;;  %v5085_v51 = vrot.slane %v5073_v30, 6  ;;  %v6827_v7 = vrot.slane %v5073_v30, 4  ;;  %v5191_v55 = vld [vmem:[%s11433_s13 + $0x268] sm:$0xff]  ;;  %v5378_v30 = vld [vmem:[%s11433_s13 + $0x840] sm:$0xff] }
 0x6a8   : > { %v5094_v13 = vsel %vm5093_vm9, %v5085_v51, %v6825_v44  ;;  %v5098_v46 = vsel %vm5097_vm3, %v6826_v62, %v6827_v7  ;;  %5111 = vst.msk [vmem:[#allocation8 + $0x8] sm:$0x1] %vm5109_vm1, %v5082_v20  ;;  %v5189_v44 = vld [vmem:[%s11433_s13 + $0x258] sm:$0xff]  ;;  %v5123_v62 = vld [vmem:[%s11433_s13 + $0x48] sm:$0xff]  ;;  %v5376_v7 = vld [vmem:[%s11433_s13 + $0x830] sm:$0xff] }
 0x6a9   : > { %v5096_v15 = vsel %vm5095_vm11, %v5092_v36, %v5094_v13  ;;  %v5102_v27 = vsel %vm5101_vm15, %v5098_v46, %v5100_v43  ;;  %v5155_v20 = vld [vmem:[%s11433_s13 + $0x148] sm:$0xff]  ;;  %v5121_v36 = vld [vmem:[%s11433_s13 + $0x38] sm:$0xff]  ;;  %v5374_v43 = vld [vmem:[%s11433_s13 + $0x820] sm:$0xff] }
 0x6aa   : > { %v10698_v41 = vsel %vm5103_vm2, %v5096_v15, %v5102_v27  ;;  %v5187_v51 = vld [vmem:[%s11433_s13 + $0x248] sm:$0xff]  ;;  %v5153_v13 = vld [vmem:[%s11433_s13 + $0x138] sm:$0xff] }
 0x6ab   : > { %v5405_v14 = vperm.slane %v10698_v41, 0  ;;  %v5406_v53 = vperm.slane %v10698_v41, 1  ;;  %v5407_v4 = vperm.slane %v10698_v41, 2  ;;  %v5408_v12 = vperm.slane %v10698_v41, 3  ;;  %v5185_v46 = vld [vmem:[%s11433_s13 + $0x238] sm:$0xff]  ;;  %v5119_v15 = vld [vmem:[%s11433_s13 + $0x28] sm:$0xff] }
 0x6ac   : > { %v5409_v28 = vperm.slane %v10698_v41, 4  ;;  %v5410_v59 = vperm.slane %v10698_v41, 5  ;;  %v5411_v21 = vperm.slane %v10698_v41, 6  ;;  %v5412_v47 = vperm.slane %v10698_v41, 7  ;;  %v5151_v27 = vld [vmem:[%s11433_s13 + $0x128] sm:$0xff]  ;;  %v5834_v41 = vld [vmem:[%s11436_s16 + $0xf0] sm:$0xff] }
 0x6ad   : > { %5444 = vmatmul.f32.vlgmr.msrb.gmra.mxu0 %v5405_v14  ;;  %5464 = vmatmul.f32.vlgmr.msrb.gmra.mxu1 %v5406_v53 }
 0x6ae   : > { %5484 = vmatmul.f32.vlgmr.msrb.gmra.mxu2 %v5407_v4  ;;  %5504 = vmatmul.f32.vlgmr.msrb.gmra.mxu3 %v5408_v12 }
 0x6af   : > { %5588 = vmatpush.msrb.mxu0 %v5400_v34  ;;  %5608 = vmatpush.msrb.mxu1 %v5145_v52  ;;  %v5183_v34 = vld [vmem:[%s11433_s13 + $0x228] sm:$0xff]  ;;  %v5372_v52 = vld [vmem:[%s11433_s13 + $0x810] sm:$0xff] }
 0x6b0   : > { %5628 = vmatpush.msrb.mxu2 %v5177_v57  ;;  %5648 = vmatpush.msrb.mxu3 %v5209_v32  ;;  %v5117_v57 = vld [vmem:[%s11433_s13 + $0x18] sm:$0xff] }
 0x6b1   : > { %5589 = vmatpush.msrb.mxu0 %v5398_v24  ;;  %5609 = vmatpush.msrb.mxu1 %v5143_v11  ;;  %v5149_v32 = vld [vmem:[%s11433_s13 + $0x118] sm:$0xff]  ;;  %v5370_v11 = vld [vmem:[%s11433_s13 + $0x800] sm:$0xff] }
 0x6b2   : > { %5629 = vmatpush.msrb.mxu2 %v5175_v60  ;;  %5649 = vmatpush.msrb.mxu3 %v5207_v10  ;;  %v5181_v24 = vld [vmem:[%s11433_s13 + $0x218] sm:$0xff]  ;;  %v5115_v60 = vld [vmem:[%s11433_s13 + $0x8] sm:$0xff] }
 0x6b3   : > { %5590 = vmatpush.msrb.mxu0 %v5396_v61  ;;  %5610 = vmatpush.msrb.mxu1 %v5141_v22  ;;  %v5147_v10 = vld [vmem:[%s11433_s13 + $0x108] sm:$0xff]  ;;  %v10916_v22 = vld [vmem:[#allocation8 + $0x8] ss:$0 sm:$0xff] }
 0x6b4   : > { %5630 = vmatpush.msrb.mxu2 %v5173_v5  ;;  %5650 = vmatpush.msrb.mxu3 %v5205_v45  ;;  %v5179_v61 = vld [vmem:[%s11433_s13 + $0x208] sm:$0xff]  ;;  %v5241_v5 = vld [vmem:[%s11433_s13 + $0x3f8] sm:$0xff] }
 0x6b5   : > { %5591 = vmatpush.msrb.mxu0 %v5394_v26  ;;  %5611 = vmatpush.msrb.mxu1 %v5139_v23  ;;  %v5273_v45 = vld [vmem:[%s11433_s13 + $0x4f8] sm:$0xff] }
 0x6b6   : > { %5631 = vmatpush.msrb.mxu2 %v5171_v2  ;;  %5651 = vmatpush.msrb.mxu3 %v5203_v37  ;;  %v5305_v26 = vld [vmem:[%s11433_s13 + $0x5f8] sm:$0xff]  ;;  %v5239_v2 = vld [vmem:[%s11433_s13 + $0x3e8] sm:$0xff] }
 0x6b7   : > { %5524 = vmatmul.f32.vlgmr.msra.gmra.mxu0 %v5409_v28  ;;  %5544 = vmatmul.f32.vlgmr.msra.gmra.mxu1 %v5410_v59  ;;  %v5337_v23 = vld [vmem:[%s11433_s13 + $0x6f8] sm:$0xff]  ;;  %v5303_v37 = vld [vmem:[%s11433_s13 + $0x5e8] sm:$0xff] }
 0x6b8   : > { %5564 = vmatmul.f32.vlgmr.msra.gmra.mxu2 %v5411_v21  ;;  %5584 = vmatmul.f32.vlgmr.msra.gmra.mxu3 %v5412_v47 }
 0x6b9   : > { %5592 = vmatpush.msrb.mxu0 %v5392_v16  ;;  %5612 = vmatpush.msrb.mxu1 %v5137_v25  ;;  %v5269_v16 = vld [vmem:[%s11433_s13 + $0x4d8] sm:$0xff] }
 0x6ba   : > { %5632 = vmatpush.msrb.mxu2 %v5169_v18  ;;  %5652 = vmatpush.msrb.mxu3 %v5201_v50  ;;  %v5301_v25 = vld [vmem:[%s11433_s13 + $0x5d8] sm:$0xff]  ;;  %v5235_v50 = vld [vmem:[%s11433_s13 + $0x3c8] sm:$0xff] }
 0x6bb   : > { %5593 = vmatpush.msrb.mxu0 %v5390_v56  ;;  %5613 = vmatpush.msrb.mxu1 %v5135_v35  ;;  %v5333_v18 = vld [vmem:[%s11433_s13 + $0x6d8] sm:$0xff]  ;;  %v5267_v56 = vld [vmem:[%s11433_s13 + $0x4c8] sm:$0xff] }
 0x6bc   : > { %5633 = vmatpush.msrb.mxu2 %v5167_v9  ;;  %5653 = vmatpush.msrb.mxu3 %v5199_v3  ;;  %v5299_v35 = vld [vmem:[%s11433_s13 + $0x5c8] sm:$0xff]  ;;  %v5233_v3 = vld [vmem:[%s11433_s13 + $0x3b8] sm:$0xff] }
 0x6bd   : > { %5594 = vmatpush.msrb.mxu0 %v5388_v0  ;;  %5614 = vmatpush.msrb.mxu1 %v5133_v29  ;;  %v5331_v9 = vld [vmem:[%s11433_s13 + $0x6c8] sm:$0xff]  ;;  %v5265_v0 = vld [vmem:[%s11433_s13 + $0x4b8] sm:$0xff] }
 0x6be   : > { %5634 = vmatpush.msrb.mxu2 %v5165_v6  ;;  %5654 = vmatpush.msrb.mxu3 %v5197_v31  ;;  %v5297_v29 = vld [vmem:[%s11433_s13 + $0x5b8] sm:$0xff]  ;;  %v5231_v31 = vld [vmem:[%s11433_s13 + $0x3a8] sm:$0xff] }
 0x6bf   : > { %5595 = vmatpush.msrb.mxu0 %v5386_v39  ;;  %5615 = vmatpush.msrb.mxu1 %v5131_v49  ;;  %v5329_v6 = vld [vmem:[%s11433_s13 + $0x6b8] sm:$0xff]  ;;  %v5263_v39 = vld [vmem:[%s11433_s13 + $0x4a8] sm:$0xff] }
 0x6c0   : > { %5635 = vmatpush.msrb.mxu2 %v5163_v17  ;;  %5655 = vmatpush.msrb.mxu3 %v5195_v40  ;;  %v5295_v49 = vld [vmem:[%s11433_s13 + $0x5a8] sm:$0xff]  ;;  %v5229_v40 = vld [vmem:[%s11433_s13 + $0x398] sm:$0xff] }
 0x6c1   : > { %5596 = vmatpush.msrb.mxu0 %v5384_v58  ;;  %5616 = vmatpush.msrb.mxu1 %v5129_v42  ;;  %v5327_v17 = vld [vmem:[%s11433_s13 + $0x6a8] sm:$0xff]  ;;  %v5261_v58 = vld [vmem:[%s11433_s13 + $0x498] sm:$0xff] }
 0x6c2   : > { %5636 = vmatpush.msrb.mxu2 %v5161_v48  ;;  %5656 = vmatpush.msrb.mxu3 %v5193_v1  ;;  %v5293_v42 = vld [vmem:[%s11433_s13 + $0x598] sm:$0xff]  ;;  %v5227_v1 = vld [vmem:[%s11433_s13 + $0x388] sm:$0xff] }
 0x6c3   : > { %5597 = vmatpush.msrb.mxu0 %v5382_v33  ;;  %5617 = vmatpush.msrb.mxu1 %v5127_v54  ;;  %v5325_v48 = vld [vmem:[%s11433_s13 + $0x698] sm:$0xff]  ;;  %v5259_v33 = vld [vmem:[%s11433_s13 + $0x488] sm:$0xff] }
 0x6c4   : > { %5637 = vmatpush.msrb.mxu2 %v5159_v8  ;;  %5657 = vmatpush.msrb.mxu3 %v5191_v55  ;;  %v5291_v54 = vld [vmem:[%s11433_s13 + $0x588] sm:$0xff]  ;;  %v5225_v55 = vld [vmem:[%s11433_s13 + $0x378] sm:$0xff] }
 0x6c5   : > { %5598 = vmatpush.msrb.mxu0 %v5380_v38  ;;  %5618 = vmatpush.msrb.mxu1 %v5125_v63  ;;  %v5323_v8 = vld [vmem:[%s11433_s13 + $0x688] sm:$0xff]  ;;  %v5257_v38 = vld [vmem:[%s11433_s13 + $0x478] sm:$0xff] }
 0x6c6   : > { %5638 = vmatpush.msrb.mxu2 %v5157_v19  ;;  %5658 = vmatpush.msrb.mxu3 %v5189_v44  ;;  %v5289_v63 = vld [vmem:[%s11433_s13 + $0x578] sm:$0xff]  ;;  %v5223_v44 = vld [vmem:[%s11433_s13 + $0x368] sm:$0xff] }
 0x6c7   : > { %5599 = vmatpush.msrb.mxu0 %v5378_v30  ;;  %5619 = vmatpush.msrb.mxu1 %v5123_v62  ;;  %v5321_v19 = vld [vmem:[%s11433_s13 + $0x678] sm:$0xff]  ;;  %v5255_v30 = vld [vmem:[%s11433_s13 + $0x468] sm:$0xff] }
 0x6c8   : > { %5639 = vmatpush.msrb.mxu2 %v5155_v20  ;;  %5659 = vmatpush.msrb.mxu3 %v5187_v51  ;;  %v5287_v62 = vld [vmem:[%s11433_s13 + $0x568] sm:$0xff]  ;;  %v5221_v51 = vld [vmem:[%s11433_s13 + $0x358] sm:$0xff] }
 0x6c9   : > { %5600 = vmatpush.msrb.mxu0 %v5376_v7  ;;  %5620 = vmatpush.msrb.mxu1 %v5121_v36  ;;  %v5319_v20 = vld [vmem:[%s11433_s13 + $0x668] sm:$0xff]  ;;  %v5253_v7 = vld [vmem:[%s11433_s13 + $0x458] sm:$0xff] }
 0x6ca   : > { %5640 = vmatpush.msrb.mxu2 %v5153_v13  ;;  %5660 = vmatpush.msrb.mxu3 %v5185_v46  ;;  %v5285_v36 = vld [vmem:[%s11433_s13 + $0x558] sm:$0xff]  ;;  %v5219_v46 = vld [vmem:[%s11433_s13 + $0x348] sm:$0xff] }
 0x6cb   : > { %5601 = vmatpush.msrb.mxu0 %v5374_v43  ;;  %5621 = vmatpush.msrb.mxu1 %v5119_v15  ;;  %v5317_v13 = vld [vmem:[%s11433_s13 + $0x658] sm:$0xff]  ;;  %v5251_v43 = vld [vmem:[%s11433_s13 + $0x448] sm:$0xff] }
 0x6cc   : > { %5641 = vmatpush.msrb.mxu2 %v5151_v27  ;;  %5661 = vmatpush.msrb.mxu3 %v5183_v34  ;;  %v5283_v15 = vld [vmem:[%s11433_s13 + $0x548] sm:$0xff]  ;;  %v5217_v34 = vld [vmem:[%s11433_s13 + $0x338] sm:$0xff] }
 0x6cd   : > { %5602 = vmatpush.msrb.mxu0 %v5372_v52  ;;  %5622 = vmatpush.msrb.mxu1 %v5117_v57  ;;  %v5315_v27 = vld [vmem:[%s11433_s13 + $0x648] sm:$0xff]  ;;  %v5249_v52 = vld [vmem:[%s11433_s13 + $0x438] sm:$0xff] }
 0x6ce   : > { %5642 = vmatpush.msrb.mxu2 %v5149_v32  ;;  %5662 = vmatpush.msrb.mxu3 %v5181_v24  ;;  %v5281_v57 = vld [vmem:[%s11433_s13 + $0x538] sm:$0xff]  ;;  %v5215_v24 = vld [vmem:[%s11433_s13 + $0x328] sm:$0xff] }
 0x6cf   : > { %5603 = vmatpush.msrb.mxu0 %v5370_v11  ;;  %5623 = vmatpush.msrb.mxu1 %v5115_v60  ;;  %v5313_v32 = vld [vmem:[%s11433_s13 + $0x638] sm:$0xff]  ;;  %v5247_v11 = vld [vmem:[%s11433_s13 + $0x428] sm:$0xff] }
 0x6d0   : > { %5643 = vmatpush.msrb.mxu2 %v5147_v10  ;;  %5663 = vmatpush.msrb.mxu3 %v5179_v61  ;;  %v5279_v60 = vld [vmem:[%s11433_s13 + $0x528] sm:$0xff]  ;;  %v5213_v61 = vld [vmem:[%s11433_s13 + $0x318] sm:$0xff] }
 0x6d1   : > { %5604 = vmatmul.f32.vlgmr.msrb.gmra.mxu0 %v10916_v22  ;;  %5624 = vmatmul.f32.vlgmr.msrb.gmra.mxu1 %v5405_v14  ;;  %v5271_v14 = vld [vmem:[%s11433_s13 + $0x4e8] sm:$0xff] }
 0x6d2   : > { %5644 = vmatmul.f32.vlgmr.msrb.gmra.mxu2 %v5406_v53  ;;  %5664 = vmatmul.f32.vlgmr.msrb.gmra.mxu3 %v5407_v4  ;;  %v5335_v53 = vld [vmem:[%s11433_s13 + $0x6e8] sm:$0xff]  ;;  %v5237_v4 = vld [vmem:[%s11433_s13 + $0x3d8] sm:$0xff] }
 0x6d3   : > { %5668 = vmatpush.msra.mxu0 %v5241_v5  ;;  %5688 = vmatpush.msra.mxu1 %v5273_v45  ;;  %v5311_v10 = vld [vmem:[%s11433_s13 + $0x628] sm:$0xff]  ;;  %v5245_v5 = vld [vmem:[%s11433_s13 + $0x418] sm:$0xff] }
 0x6d4   : > { %5708 = vmatpush.msra.mxu2 %v5305_v26  ;;  %5728 = vmatpush.msra.mxu3 %v5337_v23  ;;  %v5277_v45 = vld [vmem:[%s11433_s13 + $0x518] sm:$0xff]  ;;  %v5211_v23 = vld [vmem:[%s11433_s13 + $0x308] sm:$0xff] }
 0x6d5   : > { %5669 = vmatpush.msra.mxu0 %v5239_v2  ;;  %5689 = vmatpush.msra.mxu1 %v5271_v14  ;;  %v5309_v26 = vld [vmem:[%s11433_s13 + $0x618] sm:$0xff]  ;;  %v5243_v2 = vld [vmem:[%s11433_s13 + $0x408] sm:$0xff] }
 0x6d6   : > { %5709 = vmatpush.msra.mxu2 %v5303_v37  ;;  %5729 = vmatpush.msra.mxu3 %v5335_v53  ;;  %v5275_v14 = vld [vmem:[%s11433_s13 + $0x508] sm:$0xff]  ;;  %v5369_v53 = vld [vmem:[%s11433_s13 + $0x7f8] sm:$0xff] }
 0x6d7   : > { %5670 = vmatpush.msra.mxu0 %v5237_v4  ;;  %5690 = vmatpush.msra.mxu1 %v5269_v16  ;;  %v5307_v37 = vld [vmem:[%s11433_s13 + $0x608] sm:$0xff]  ;;  %v5401_v4 = vld [vmem:[%s11433_s13 + $0x8f8] sm:$0xff] }
 0x6d8   : > { %5710 = vmatpush.msra.mxu2 %v5301_v25  ;;  %5730 = vmatpush.msra.mxu3 %v5333_v18  ;;  %v5367_v16 = vld [vmem:[%s11433_s13 + $0x7e8] sm:$0xff]  ;;  %v5361_v18 = vld [vmem:[%s11433_s13 + $0x7b8] sm:$0xff] }
 0x6d9   : > { %5671 = vmatpush.msra.mxu0 %v5235_v50  ;;  %5691 = vmatpush.msra.mxu1 %v5267_v56  ;;  %v5399_v25 = vld [vmem:[%s11433_s13 + $0x8e8] sm:$0xff]  ;;  %v5393_v50 = vld [vmem:[%s11433_s13 + $0x8b8] sm:$0xff] }
 0x6da   : > { %5711 = vmatpush.msra.mxu2 %v5299_v35  ;;  %5731 = vmatpush.msra.mxu3 %v5331_v9  ;;  %v5359_v56 = vld [vmem:[%s11433_s13 + $0x7a8] sm:$0xff]  ;;  %v5357_v9 = vld [vmem:[%s11433_s13 + $0x798] sm:$0xff] }
 0x6db   : > { %5672 = vmatpush.msra.mxu0 %v5233_v3  ;;  %5692 = vmatpush.msra.mxu1 %v5265_v0  ;;  %v5391_v35 = vld [vmem:[%s11433_s13 + $0x8a8] sm:$0xff]  ;;  %v5389_v3 = vld [vmem:[%s11433_s13 + $0x898] sm:$0xff] }
 0x6dc   : > { %5712 = vmatpush.msra.mxu2 %v5297_v29  ;;  %5732 = vmatpush.msra.mxu3 %v5329_v6  ;;  %v5355_v0 = vld [vmem:[%s11433_s13 + $0x788] sm:$0xff]  ;;  %v5353_v6 = vld [vmem:[%s11433_s13 + $0x778] sm:$0xff] }
 0x6dd   : > { %5673 = vmatpush.msra.mxu0 %v5231_v31  ;;  %5693 = vmatpush.msra.mxu1 %v5263_v39  ;;  %v5387_v29 = vld [vmem:[%s11433_s13 + $0x888] sm:$0xff]  ;;  %v5385_v31 = vld [vmem:[%s11433_s13 + $0x878] sm:$0xff] }
 0x6de   : > { %5713 = vmatpush.msra.mxu2 %v5295_v49  ;;  %5733 = vmatpush.msra.mxu3 %v5327_v17  ;;  %v5351_v39 = vld [vmem:[%s11433_s13 + $0x768] sm:$0xff]  ;;  %v5349_v17 = vld [vmem:[%s11433_s13 + $0x758] sm:$0xff] }
 0x6df   : > { %5674 = vmatpush.msra.mxu0 %v5229_v40  ;;  %5694 = vmatpush.msra.mxu1 %v5261_v58  ;;  %v5383_v49 = vld [vmem:[%s11433_s13 + $0x868] sm:$0xff]  ;;  %v5381_v40 = vld [vmem:[%s11433_s13 + $0x858] sm:$0xff] }
 0x6e0   : > { %5714 = vmatpush.msra.mxu2 %v5293_v42  ;;  %5734 = vmatpush.msra.mxu3 %v5325_v48  ;;  %v5347_v58 = vld [vmem:[%s11433_s13 + $0x748] sm:$0xff]  ;;  %v5345_v48 = vld [vmem:[%s11433_s13 + $0x738] sm:$0xff] }
 0x6e1   : > { %5675 = vmatpush.msra.mxu0 %v5227_v1  ;;  %5695 = vmatpush.msra.mxu1 %v5259_v33  ;;  %v5379_v42 = vld [vmem:[%s11433_s13 + $0x848] sm:$0xff]  ;;  %v5377_v1 = vld [vmem:[%s11433_s13 + $0x838] sm:$0xff] }
 0x6e2   : > { %5715 = vmatpush.msra.mxu2 %v5291_v54  ;;  %5735 = vmatpush.msra.mxu3 %v5323_v8  ;;  %v5343_v33 = vld [vmem:[%s11433_s13 + $0x728] sm:$0xff]  ;;  %v5341_v8 = vld [vmem:[%s11433_s13 + $0x718] sm:$0xff] }
 0x6e3   : > { %5676 = vmatpush.msra.mxu0 %v5225_v55  ;;  %5696 = vmatpush.msra.mxu1 %v5257_v38  ;;  %v5375_v54 = vld [vmem:[%s11433_s13 + $0x828] sm:$0xff]  ;;  %v5373_v55 = vld [vmem:[%s11433_s13 + $0x818] sm:$0xff] }
 0x6e4   : > { %5716 = vmatpush.msra.mxu2 %v5289_v63  ;;  %5736 = vmatpush.msra.mxu3 %v5321_v19  ;;  %v5339_v38 = vld [vmem:[%s11433_s13 + $0x708] sm:$0xff]  ;;  %v5819_v19 = vld [vmem:[%s11436_s16 + $0x78] sm:$0xff] }
 0x6e5   : > { %5677 = vmatpush.msra.mxu0 %v5223_v44  ;;  %5697 = vmatpush.msra.mxu1 %v5255_v30  ;;  %v5371_v63 = vld [vmem:[%s11433_s13 + $0x808] sm:$0xff]  ;;  %v5835_v44 = vld [vmem:[%s11436_s16 + $0xf8] sm:$0xff]  ;;  %v5818_v30 = vld [vmem:[%s11436_s16 + $0x70] sm:$0xff] }
 0x6e6   : > { %5717 = vmatpush.msra.mxu2 %v5287_v62  ;;  %5737 = vmatpush.msra.mxu3 %v5319_v20  ;;  %v5816_v62 = vld [vmem:[%s11436_s16 + $0x60] sm:$0xff] }
 0x6e7   : > { %5678 = vmatpush.msra.mxu0 %v5221_v51  ;;  %5698 = vmatpush.msra.mxu1 %v5253_v7  ;;  %v5832_v20 = vld [vmem:[%s11436_s16 + $0xe0] sm:$0xff]  ;;  %v5815_v51 = vld [vmem:[%s11436_s16 + $0x58] sm:$0xff] }
 0x6e8   : > { %5718 = vmatpush.msra.mxu2 %v5285_v36  ;;  %5738 = vmatpush.msra.mxu3 %v5317_v13  ;;  %v5831_v7 = vld [vmem:[%s11436_s16 + $0xd8] sm:$0xff]  ;;  %v5814_v36 = vld [vmem:[%s11436_s16 + $0x50] sm:$0xff] }
 0x6e9   : > { %5679 = vmatpush.msra.mxu0 %v5219_v46  ;;  %5699 = vmatpush.msra.mxu1 %v5251_v43  ;;  %v5830_v13 = vld [vmem:[%s11436_s16 + $0xd0] sm:$0xff]  ;;  %v5813_v46 = vld [vmem:[%s11436_s16 + $0x48] sm:$0xff] }
 0x6ea   : > { %5719 = vmatpush.msra.mxu2 %v5283_v15  ;;  %5739 = vmatpush.msra.mxu3 %v5315_v27  ;;  %v5829_v43 = vld [vmem:[%s11436_s16 + $0xc8] sm:$0xff]  ;;  %v5812_v15 = vld [vmem:[%s11436_s16 + $0x40] sm:$0xff] }
 0x6eb   : > { %5680 = vmatpush.msra.mxu0 %v5217_v34  ;;  %5700 = vmatpush.msra.mxu1 %v5249_v52  ;;  %v5828_v27 = vld [vmem:[%s11436_s16 + $0xc0] sm:$0xff]  ;;  %v5811_v34 = vld [vmem:[%s11436_s16 + $0x38] sm:$0xff] }
 0x6ec   : > { %5720 = vmatpush.msra.mxu2 %v5281_v57  ;;  %5740 = vmatpush.msra.mxu3 %v5313_v32  ;;  %v5827_v52 = vld [vmem:[%s11436_s16 + $0xb8] sm:$0xff] }
 0x6ed   : > { %5681 = vmatpush.msra.mxu0 %v5215_v24  ;;  %5701 = vmatpush.msra.mxu1 %v5247_v11 }
 0x6ee   : > { %5721 = vmatpush.msra.mxu2 %v5279_v60  ;;  %5741 = vmatpush.msra.mxu3 %v5311_v10  ;;  %v5810_v60 = vld [vmem:[%s11436_s16 + $0x30] sm:$0xff] }
 0x6ef   : > { %5682 = vmatpush.msra.mxu0 %v5213_v61  ;;  %5702 = vmatpush.msra.mxu1 %v5245_v5  ;;  %v5826_v10 = vld [vmem:[%s11436_s16 + $0xb0] sm:$0xff]  ;;  %v5809_v61 = vld [vmem:[%s11436_s16 + $0x28] sm:$0xff] }
 0x6f0   : > { %5722 = vmatpush.msra.mxu2 %v5277_v45  ;;  %5742 = vmatpush.msra.mxu3 %v5309_v26  ;;  %v5825_v5 = vld [vmem:[%s11436_s16 + $0xa8] sm:$0xff]  ;;  %v5402_v45 = vld [vmem:[%s11434_s14] sm:$0x3] }
 0x6f1   : > { %5683 = vmatpush.msra.mxu0 %v5211_v23  ;;  %5703 = vmatpush.msra.mxu1 %v5243_v2  ;;  %v5808_v2 = vld [vmem:[%s11436_s16 + $0x20] sm:$0xff] }
 0x6f2   : > { %5723 = vmatpush.msra.mxu2 %v5275_v14  ;;  %5743 = vmatpush.msra.mxu3 %v5307_v37  ;;  %v5824_v14 = vld [vmem:[%s11436_s16 + $0xa0] sm:$0xff] }
 0x6f3   : > { %5684 = vmatmul.f32.vlgmr.msra.gmra.mxu0 %v5408_v12  ;;  %5704 = vmatmul.f32.vlgmr.msra.gmra.mxu1 %v5409_v28  ;;  %v5365_v12 = vld [vmem:[%s11433_s13 + $0x7d8] sm:$0xff] }
 0x6f4   : > { %5724 = vmatmul.f32.vlgmr.msra.gmra.mxu2 %v5410_v59  ;;  %5744 = vmatmul.f32.vlgmr.msra.gmra.mxu3 %v5411_v21  ;;  %v5397_v28 = vld [vmem:[%s11433_s13 + $0x8d8] sm:$0xff]  ;;  %v5363_v59 = vld [vmem:[%s11433_s13 + $0x7c8] sm:$0xff] }
 0x6f5   : > { %5748 = vmatpush.msrb.mxu0 %v5369_v53  ;;  %5768 = vmatpush.msrb.mxu1 %v5401_v4  ;;  %v5395_v21 = vld [vmem:[%s11433_s13 + $0x8c8] sm:$0xff]  ;;  %v5424_v53 = vperm.slane %v5402_v45, 0  ;;  %v5807_v4 = vld [vmem:[%s11436_s16 + $0x18] sm:$0xff] }
 0x6f6   : > { %5837 = vmatpush.msrb.mxu2 %v5819_v19  ;;  %5857 = vmatpush.msrb.mxu3 %v5835_v44 }
 0x6f7   : > { %5749 = vmatpush.msrb.mxu0 %v5367_v16  ;;  %5769 = vmatpush.msrb.mxu1 %v5399_v25  ;;  %v5823_v16 = vld [vmem:[%s11436_s16 + $0x98] sm:$0xff]  ;;  %v5806_v25 = vld [vmem:[%s11436_s16 + $0x10] sm:$0xff] }
 0x6f8   : > { %5838 = vmatpush.msrb.mxu2 %v5818_v30  ;;  %5858 = vmatpush.msrb.mxu3 %v5834_v41 }
 0x6f9   : > { %5750 = vmatpush.msrb.mxu0 %v5365_v12  ;;  %5770 = vmatpush.msrb.mxu1 %v5397_v28  ;;  %v5822_v12 = vld [vmem:[%s11436_s16 + $0x90] sm:$0xff]  ;;  %v5805_v28 = vld [vmem:[%s11436_s16 + $0x8] sm:$0xff] }
 0x6fb   : > { %5751 = vmatpush.msrb.mxu0 %v5363_v59  ;;  %5771 = vmatpush.msrb.mxu1 %v5395_v21  ;;  %v5821_v59 = vld [vmem:[%s11436_s16 + $0x88] sm:$0xff] }
 0x6fd   : > { %5752 = vmatpush.msrb.mxu0 %v5361_v18  ;;  %5772 = vmatpush.msrb.mxu1 %v5393_v50  ;;  %v5425_v50 = vperm.slane %v5402_v45, 1 }
 0x6ff   : > { %5753 = vmatpush.msrb.mxu0 %v5359_v56  ;;  %5773 = vmatpush.msrb.mxu1 %v5391_v35  ;;  %v5804_v56 = vld [vmem:[%s11436_s16] sm:$0xff] }
 0x700   : > { %v5820_v35 = vld [vmem:[%s11436_s16 + $0x80] sm:$0xff] }
 0x701   : > { %5754 = vmatpush.msrb.mxu0 %v5357_v9  ;;  %5774 = vmatpush.msrb.mxu1 %v5389_v3 }
 0x703   : > { %5755 = vmatpush.msrb.mxu0 %v5355_v0  ;;  %5775 = vmatpush.msrb.mxu1 %v5387_v29 }
 0x705   : > { %5756 = vmatpush.msrb.mxu0 %v5353_v6  ;;  %5776 = vmatpush.msrb.mxu1 %v5385_v31 }
 0x707   : > { %5757 = vmatpush.msrb.mxu0 %v5351_v39  ;;  %5777 = vmatpush.msrb.mxu1 %v5383_v49 }
 0x709   : > { %5758 = vmatpush.msrb.mxu0 %v5349_v17  ;;  %5778 = vmatpush.msrb.mxu1 %v5381_v40 }
 0x70b   : > { %5759 = vmatpush.msrb.mxu0 %v5347_v58  ;;  %5779 = vmatpush.msrb.mxu1 %v5379_v42 }
 0x70d   : > { %5760 = vmatpush.msrb.mxu0 %v5345_v48  ;;  %5780 = vmatpush.msrb.mxu1 %v5377_v1 }
 0x70f   : > { %5761 = vmatpush.msrb.mxu0 %v5343_v33  ;;  %5781 = vmatpush.msrb.mxu1 %v5375_v54 }
 0x711   : > { %5762 = vmatpush.msrb.mxu0 %v5341_v8  ;;  %5782 = vmatpush.msrb.mxu1 %v5373_v55 }
 0x713   : > { %5763 = vmatpush.msrb.mxu0 %v5339_v38  ;;  %5783 = vmatpush.msrb.mxu1 %v5371_v63 }
 0x714   : > { %5764 = vmatmul.f32.vlgmr.msrb.gmra.mxu0 %v5412_v47  ;;  %5784 = vmatmul.f32.vlgmr.msrb.gmra.mxu1 %v10916_v22  ;;  %v5817_v47 = vld [vmem:[%s11436_s16 + $0x68] sm:$0xff] }
 0x715   : > { %v5833_v22 = vld [vmem:[%s11436_s16 + $0xe8] sm:$0xff]  ;;  %5839 = vmatpush.msrb.mxu2 %v5817_v47 }
 0x716   : > { %5859 = vmatpush.msrb.mxu3 %v5833_v22 }
 0x717   : > { %5840 = vmatpush.msrb.mxu2 %v5816_v62 }
 0x718   : > { %5860 = vmatpush.msrb.mxu3 %v5832_v20  ;;  %v5790_v20 = vld [vmem:[%s11435_s15] sm:$0x3] }
 0x719   : > { %5841 = vmatpush.msrb.mxu2 %v5815_v51 }
 0x71a   : > { %5861 = vmatpush.msrb.mxu3 %v5831_v7 }
 0x71b   : > { %5842 = vmatpush.msrb.mxu2 %v5814_v36 }
 0x71c   : > { %5862 = vmatpush.msrb.mxu3 %v5830_v13 }
 0x71d   : > { %5843 = vmatpush.msrb.mxu2 %v5813_v46 }
 0x71e   : > { %5863 = vmatpush.msrb.mxu3 %v5829_v43 }
 0x71f   : > { %5844 = vmatpush.msrb.mxu2 %v5812_v15 }
 0x720   : > { %5864 = vmatpush.msrb.mxu3 %v5828_v27  ;;  %v5836_v27 = vld [vmem:[%s11437_s17] sm:$0x1] }
 0x721   : > { %5845 = vmatpush.msrb.mxu2 %v5811_v34 }
 0x722   : > { %5865 = vmatpush.msrb.mxu3 %v5827_v52 }
 0x723   : > { %5846 = vmatpush.msrb.mxu2 %v5810_v60 }
 0x724   : > { %5866 = vmatpush.msrb.mxu3 %v5826_v10 }
 0x725   : > { %5847 = vmatpush.msrb.mxu2 %v5809_v61 }
 0x726   : > { %5867 = vmatpush.msrb.mxu3 %v5825_v5 }
 0x727   : > { %5848 = vmatpush.msrb.mxu2 %v5808_v2 }
 0x728   : > { %5868 = vmatpush.msrb.mxu3 %v5824_v14 }
 0x729   : > { %5849 = vmatpush.msrb.mxu2 %v5807_v4 }
 0x72a   : > { %v5445_v57 = vpop.f32.mrf.mxu0  ;;  %v5465_v32 = vpop.f32.mrf.mxu1  ;;  %5869 = vmatpush.msrb.mxu3 %v5823_v16 }
 0x72b   : > { %5850 = vmatpush.msrb.mxu2 %v5806_v25  ;;  %v5446_v21 = vadd.f32 %v5445_v57, %v5424_v53 }
 0x72c   : > { %5870 = vmatpush.msrb.mxu3 %v5822_v12 }
 0x72d   : > { %5851 = vmatpush.msrb.mxu2 %v5805_v28  ;;  %v5466_v29 = vadd.f32 %v5465_v32, %v5446_v21 }
 0x72e   : > { %5871 = vmatpush.msrb.mxu3 %v5821_v59 }
 0x72f   : > { %5852 = vmatpush.msrb.mxu2 %v5804_v56 }
 0x730   : > { %5872 = vmatpush.msrb.mxu3 %v5820_v35 }
 0x731   : > { %v5485_v24 = vpop.f32.mrf.mxu2  ;;  %v5505_v11 = vpop.f32.mrf.mxu3 }
 0x732   : > { %v5486_v31 = vadd.f32 %v5485_v24, %v5466_v29 }
 0x734   : > { %v5525_v26 = vpop.f32.mrf.mxu0  ;;  %v5545_v23 = vpop.f32.mrf.mxu1  ;;  %v5506_v40 = vadd.f32 %v5505_v11, %v5486_v31 }
 0x736   : > { %v5526_v48 = vadd.f32 %v5525_v26, %v5506_v40 }
 0x738   : > { %v5546_v8 = vadd.f32 %v5545_v23, %v5526_v48 }
 0x73b   : > { %v5565_v37 = vpop.f32.mrf.mxu2  ;;  %v5585_v18 = vpop.f32.mrf.mxu3 }
 0x73c   : > { %v5566_v63 = vadd.f32 %v5565_v37, %v5546_v8 }
 0x73e   : > { %v5586_v47 = vadd.f32 %v5585_v18, %v5566_v63 }
 0x74e   : > { %v5605_v9 = vpop.f32.mrf.mxu0  ;;  %v5625_v3 = vpop.f32.mrf.mxu1 }
 0x74f   : > { %v5626_v6 = vadd.f32 %v5625_v3, %v5425_v50  ;;  %v5606_v62 = vadd.f32 %v5605_v9, %v5586_v47 }
 0x751   : > { %vm5788_vm10 = vcmp.ge.f32.partialorder %v5606_v62, 0.0 }
 0x755   : > { %v5645_v0 = vpop.f32.mrf.mxu2  ;;  %v5665_v49 = vpop.f32.mrf.mxu3 }
 0x756   : > { %v5646_v39 = vadd.f32 %v5645_v0, %v5626_v6 }
 0x758   : > { %v5666_v58 = vadd.f32 %v5665_v49, %v5646_v39 }
 0x770   : > { %v5685_v17 = vpop.f32.mrf.mxu0  ;;  %v5705_v1 = vpop.f32.mrf.mxu1 }
 0x771   : > { %v5686_v42 = vadd.f32 %v5685_v17, %v5666_v58 }
 0x773   : > { %v5706_v54 = vadd.f32 %v5705_v1, %v5686_v42 }
 0x777   : > { %v5725_v33 = vpop.f32.mrf.mxu2  ;;  %v5745_v38 = vpop.f32.mrf.mxu3 }
 0x778   : > { %v5726_v55 = vadd.f32 %v5725_v33, %v5706_v54 }
 0x77a   : > { %v5746_v19 = vadd.f32 %v5745_v38, %v5726_v55 }
 0x791   : > { %v5765_v44 = vpop.f32.mrf.mxu0  ;;  %v5785_v41 = vpop.f32.mrf.mxu1 }
 0x792   : > { %v5766_v30 = vadd.f32 %v5765_v44, %v5746_v19 }
 0x794   : > { %v5786_v22 = vadd.f32 %v5785_v41, %v5766_v30 }
 0x796   : > { %v5793_v51 = vrot.slane %v5786_v22, 7  ;;  %vm5789_vm6 = vcmp.ge.f32.partialorder %v5786_v22, 0.0 }
 0x798   : > { %v5794_v7 = vsel %vm4860_vm7, %v5606_v62, %v5793_v51 }
 0x799   : > { %v5796_v36 = vmul.f32 %v5794_v7, %v5790_v20 }
 0x79b   : > { %v5798_v13 = vperm.slane %v5796_v36, 0  ;;  %v5799_v46 = vperm.slane %v5796_v36, 1 }
 0x79d   : > { %v5802_v43 = vsel %vm5788_vm10, %v5606_v62, %v5798_v13  ;;  %v5803_v15 = vsel %vm5789_vm6, %v5786_v22, %v5799_v46 }
 0x79e   : > { %5853 = vmatmul.f32.vlgmr.msrb.gmra.mxu2 %v5802_v43  ;;  %5873 = vmatmul.f32.vlgmr.msrb.gmra.mxu3 %v5803_v15 }
 0x821   : > { %v5854_v34 = vpop.f32.mrf.mxu2  ;;  %v5874_v57 = vpop.f32.mrf.mxu3 }
 0x822   : > { %v5855_v52 = vadd.f32 %v5854_v34, %v5836_v27 }
 0x824   : > { %v5875_v32 = vadd.f32 %v5874_v57, %v5855_v52 }
 0x826   : > { %5904 = vrot.lane.b32.xlu1 %v5875_v32, %s7225_s20  ;;  %v5878_v24 = vsel %vm5877_vm4, %v5875_v32, -inf }
 0x827   : > { %5879 = vmax.xlane.f32.xlu0 %v5878_v24 }
 0x82e   : > { %5909 = vrot.lane.b32.xlu1 %v5875_v32, %s7226_s22 }
 0x898   : > { %v5905_v11 = vpop.permute.xlu1 %5904 }
 0x899   : > { %5908 = vst.msk [vmem:[%s11573_s27] sm:$0x1] %vm5907_vm14, %v5905_v11  ;;  %s7076_s27 = scalar_lea.hbm %s11438_s18, 2 }
 0x89a   : > { %v5880_v60 = vpop.xlane.xlu0 %5879  ;;  %p7078_p8 = scmp.lt.s32.totalorder %s7076_s27, %s7072_s1 }
 0x89b   : > { %v5881_v10 = vsub.f32 %v5875_v32, %v5880_v60 }
 0x89c   : > { %p7079_p9 = por %p7078_p8, %p7077_p7 }
 0x89d   : > { %v5882_v61 = vmul.f32 1.442695, %v5881_v10 }
 0x89e   : > { %p7080_p10 = pnand %p7079_p9, %p7075_p4 }
 0x89f   : > { %7052 = vpow2.f32 %v5882_v61 }
 0x8a0   : > { %v5910_v5 = vpop.permute.xlu1 %5909 }
 0x8a1   : > { %5913 = vst.msk [vmem:[%s11574_s24] sm:$0x1] %vm5912_vm5, %v5910_v5 }
 0x8a5   : > { %v7053_v45 = vpop.eup %7052 }
 0x8a6   : > { %v5884_v26 = vsel %vm5877_vm4, %v7053_v45, 0.0 }
 0x8a7   : > { %5885 = vadd.xlane.f32.xlu0 %v5884_v26 }
 0x8a8   : > { %7083 = shalt.err (!%p7080_p10)
}
 0x8a9   : > { %6947 = dma.vmem_to_hbm [thread:$0]  (%p7372_p5), %s5934_s26, 16, %s5936_s23, %s5915_s25  }
 0x8aa   : > { %s11576_s28 = sld [smem:[#allocation30_spill]]  ;;  %s5918_s26 = sand.u32 1, %s7353_s2  }
 0x8ab   : > { %s11577_s22 = sld [smem:[#allocation31_spill]]  ;;  %s11579_s23 = scalar_lea.vmem [#allocation11], %s7383_s30 }
 0x8ac   : > { %s5946_s25 = sshll.u32 %s11579_s23, 4  ;;  %s11580_s5 = scalar_lea.vmem [#allocation13], %s7383_s30  ;;  %s5947_s25 = int_to_ptr.vmem [resolvable:$true] %s5946_s25 }
 0x8ad   : > { %s11366_s6 = sshll.u32 %s11580_s5, 4  ;;  %s5919_s0 = scalar_lea.sflag [#allocation12], %s5918_s26  ;;  %s5960_s6 = int_to_ptr.vmem [resolvable:$true] %s11366_s6 }
 0x8b0   : > { %s5944_s19 = scalar_lea.hbm %s11576_s28, %s7353_s2 }
 0x8b1   : > { %s11578_s27 = smov %s11577_s22  ;;  %s5957_s24 = scalar_lea.hbm %s11577_s22, %s7353_s2 }
 0x8b2   : > { %s5948_s21 = sshll.u32 %s5944_s19, 4  ;;  %s11368_s3 = sshll.u32 %s5957_s24, 4  ;;  %s5949_s21 = int_to_ptr.hbm [resolvable:$true] %s5948_s21  ;;  %s5962_s3 = int_to_ptr.hbm [resolvable:$true] %s11368_s3 }
 0x8b3   : > { %s11581_s2 = smov %s11579_s23  ;;  %s7098_s19 = sshra.s32 %s5949_s21, 4  ;;  %s7099_s19 = int_to_ptr.hbm [resolvable:$true] %s7098_s19 }
 0x8b4   : > { %s7100_s1 = scalar_lea.hbm %s7099_s19, 1  ;;  %s7104_s22 = scalar_lea.hbm %s11576_s28, 2 }
 0x8b5   : > { %p7101_p11 = scmp.ne.s32.totalorder %s7099_s19, %s7100_s1  ;;  %p7105_p0 = scmp.lt.s32.totalorder %s7099_s19, %s11576_s28 }
 0x8b6   : > { %p7106_p1 = scmp.lt.s32.totalorder %s7104_s22, %s7100_s1 }
 0x8b7   : > { %p7102_p12 = pnand %p7101_p11, %p7372_p5 }
 0x8b8   : > { %p7107_p2 = por %p7106_p1, %p7105_p0 }
 0x8b9   : > { %p7103_p13 = pneg %p7102_p12 }
 0x8bb   : > { %p7108_p3 = pnand %p7107_p2, %p7103_p13 }
 0x91a   : > { %v5886_v23 = vpop.xlane.xlu0 %5885 }
 0x91b   : > { %7054 = vrcp.f32 %v5886_v23  ;;  %v5898_v53 = vand.u32 2147483648, %v5886_v23  ;;  %v5896_v16 = vand.u32 2147483647, %v5886_v23  ;;  %vm5892_vm0 = vweird.f32 %v5886_v23 }
 0x91d   : > { %v5899_v12 = vor.u32 1.1754944e-38, %v5898_v53  ;;  %vm5897_vm8 = vcmp.eq.f32.partialorder %v5896_v16, 8.507059e+37 }
 0x921   : > { %v7055_v2 = vpop.eup %7054 }
 0x922   : > { %v5888_v14 = vmul.f32 %v7055_v2, %v5886_v23  ;;  %vm5893_vm7 = vweird.f32 %v7055_v2 }
 0x923   : > { %vm5894_vm12 = vmor %vm5892_vm0, %vm5893_vm7 }
 0x924   : > { %v5889_v37 = vsub.f32 1.0, %v5888_v14 }
 0x926   : > { %v5890_v4 = vmul.f32 %v7055_v2, %v5889_v37 }
 0x928   : > { %v5891_v25 = vadd.f32 %v7055_v2, %v5890_v4 }
 0x92a   : > { %v5895_v28 = vsel %vm5894_vm12, %v7055_v2, %v5891_v25 }
 0x92b   : > { %v5900_v59 = vsel %vm5897_vm8, %v5899_v12, %v5895_v28 }
 0x92c   : > { %v5901_v21 = vmul.f32 %v7053_v45, %v5900_v59 }
 0x92e   : > { %5902 = vst.msk [vmem:[%s11581_s2] sm:$0x1] %vm5877_vm4, %v5901_v21 }
 0x92f   : > { %7111 = shalt.err (!%p7108_p3)
}
 0x930   : > { %6948 = dma.vmem_to_hbm [thread:$0]  (%p7372_p5), %s5947_s25, 16, %s5949_s21, %s5919_s0  }
 0x931   : > { %s7126_s30 = sshra.s32 %s5962_s3, 4  ;;  %s7132_s19 = scalar_lea.hbm %s11578_s27, 2  ;;  %s7127_s30 = int_to_ptr.hbm [resolvable:$true] %s7126_s30 }
 0x932   : > { %s7128_s26 = scalar_lea.hbm %s7127_s30, 1  ;;  %p7133_p9 = scmp.lt.s32.totalorder %s7127_s30, %s11578_s27 }
 0x933   : > { %p7129_p4 = scmp.ne.s32.totalorder %s7127_s30, %s7128_s26  ;;  %p7134_p10 = scmp.lt.s32.totalorder %s7132_s19, %s7128_s26 }
 0x935   : > { %p7130_p7 = pnand %p7129_p4, %p7372_p5  ;;  %p7135_p11 = por %p7134_p10, %p7133_p9 }
 0x937   : > { %p7131_p8 = pneg %p7130_p7 }
 0x939   : > { %p7136_p12 = pnand %p7135_p11, %p7131_p8 }
 0x93b   : > { %7139 = shalt.err (!%p7136_p12)
}
 0x93c   : > { %6949 = dma.vmem_to_hbm [thread:$0]  (%p7372_p5), %s5960_s6, 16, %s5962_s3, %s5919_s0  }
 0x93d PF: > { %s11582_s25 = sld [smem:[#allocation19_spill]] }
 0x93e   : > { %s11583_s21 = sld [smem:[#allocation16_spill]] }
 0x943   : > { %p6963_p13 = scmp.ge.s32.totalorder %s11582_s25, 2 }
 0x944   : > { %s5973_s24 = sand.u32 1, %s11583_s21  }
 0x945   : > { %p6954_p0 = pnand %p6963_p13, %p7376_p6  ;;  %s5974_s23 = scalar_lea.sflag [#allocation10], %s5973_s24 }
 0x947   : > { %p6955_p1 = pneg %p6954_p0 }
 0x949   : > { %7177 = dma.done.wait (%p6955_p1), %s5974_s23, 16  }
 0x94a   : > { %7179 = vsyncadd (%p6955_p1), %s5974_s23, 4294967280  ;;  %s11585_s30 = sadd.s32 4294967294, %s11582_s25  }
 0x94b   : > { %s5982_s4 = sand.u32 1, %s11585_s30  }
 0x94c   : > { %s5983_s26 = scalar_lea.sflag [#allocation12], %s5982_s4 }
 0x94d   : > { %7181 = dma.done.wait (%p6955_p1), %s5983_s26, 32  }
 0x94e   : > { %7183 = vsyncadd (%p6955_p1), %s5983_s26, 4294967264  ;;  %s11586_s24 = sld [smem:[#allocation20_spill]] }
 0x94f   : > { %s11587_s1 = sld [smem:[#allocation17_spill]] }
 0x950   : > { %s11588_s22 = sld [smem:[#allocation18_spill]] }
 0x951   : > { %s11589_s23 = sld [smem:[#allocation21_spill]] }
 0x954   : > { %p34_p5 = scmp.ge.s32.totalorder %s11586_s24, 4  }
 0x956   :  { %36 = sbr.rel (!%p34_p5) target bundleno = 15 (0xf), region = 307 }
 0x95b   :  { %5997 = vsyncpa [#allocation10], 1 }
 0x95c   :  { %5999 = vsyncpa [#allocation10 + $0x1], 1 }
 0x95d   :  { %6000 = vsyncpa [#allocation12], 1 }
 0x95e   :  { %6002 = vsyncpa [#allocation12 + $0x1], 1 }

</bundles_post_ra>
